<compile_context>
chip_gen: v6e
topology: v6e:2x2x1
jax: 0.10.0
libtpu: 0.0.40
codegen_flags: <defaults>
</compile_context>

<pallas_src>
import functools

import jax
import jax.numpy as jnp
from jax.experimental import pallas as pl
from jax.experimental.pallas import tpu as pltpu

EPS = 1e-5
LANE = 128


def _round_up(x, m):
    return (x + m - 1) // m * m


def _cparams():
    # 1-D grids everywhere; mark them parallel so v7x megacore shards them.
    return pltpu.CompilerParams(
        dimension_semantics=("parallel",),
        vmem_limit_bytes=32 * 1024 * 1024,
    )


# ------------------------------ Pallas kernels -------------------------------

def _conv1_kernel(x_ref, w1_ref, y1_ref, p1_ref):
    x = x_ref[...]
    y1 = jnp.dot(x, w1_ref[...], preferred_element_type=jnp.float32)
    y1_ref[...] = y1.astype(y1_ref.dtype)
    p1_ref[0, 0:1, :] = jnp.sum(y1, axis=0, keepdims=True)
    p1_ref[0, 1:2, :] = jnp.sum(y1 * y1, axis=0, keepdims=True)


def _conv1_down_kernel(x_ref, w1_ref, wd_ref, y1_ref, yd_ref, p1_ref, pd_ref):
    # conv1 and the downsample 1x1 conv share the same A operand: load the xf
    # tile once, run two MXU matmuls, emit raw outputs + per-tile BN partials.
    # (Any zero-padded M rows contribute 0 to the partial sums, so statistics
    # stay exact when divided by the real row count.)
    x = x_ref[...]
    y1 = jnp.dot(x, w1_ref[...], preferred_element_type=jnp.float32)
    yd = jnp.dot(x, wd_ref[...], preferred_element_type=jnp.float32)
    y1_ref[...] = y1.astype(y1_ref.dtype)
    yd_ref[...] = yd.astype(yd_ref.dtype)
    p1_ref[0, 0:1, :] = jnp.sum(y1, axis=0, keepdims=True)
    p1_ref[0, 1:2, :] = jnp.sum(y1 * y1, axis=0, keepdims=True)
    pd_ref[0, 0:1, :] = jnp.sum(yd, axis=0, keepdims=True)
    pd_ref[0, 1:2, :] = jnp.sum(yd * yd, axis=0, keepdims=True)


def _conv2_kernel(y1_ref, s1_ref, b1_ref, w2_ref, y2_ref, p2_ref, apad_ref, *, h, w):
    # 3x3 conv (stride 1, pad 1) as a 9-tap shifted matmul; bn1 + relu of the
    # *raw* conv1 output is applied in this consumer's prologue.
    pp = y1_ref.shape[-1]
    s1 = s1_ref[...].reshape(1, 1, pp)
    b1 = b1_ref[...].reshape(1, 1, pp)
    a1 = jnp.maximum(y1_ref[0].astype(jnp.float32) * s1 + b1, 0.0)      # (h, w, pp)

    # Zero halo == the conv's zero spatial padding (re-zeroed every step so the
    # kernel stays correct when the grid is split across TensorCores).
    apad_ref[...] = jnp.zeros_like(apad_ref)
    apad_ref[1:h + 1, 1:w + 1, :] = a1.astype(apad_ref.dtype)

    acc = jnp.zeros((h * w, pp), jnp.float32)
    for t in range(9):                                                   # unrolled taps
        ky, kx = t // 3, t % 3
        slab = apad_ref[ky:ky + h, kx:kx + w, :].reshape(h * w, pp)
        acc = acc + jnp.dot(slab, w2_ref[t], preferred_element_type=jnp.float32)

    y2_ref[0] = acc.astype(y2_ref.dtype)
    p2_ref[0, 0:1, :] = jnp.sum(acc, axis=0, keepdims=True)
    p2_ref[0, 1:2, :] = jnp.sum(acc * acc, axis=0, keepdims=True)


def _conv3_kernel(y2_ref, s2_ref, b2_ref, w3_ref, y3_ref, p3_ref,
                  *, tm, m_real, mask_rows):
    # bn2 + relu fused into the prologue, then the 1x1 conv3 matmul.
    a2 = jnp.maximum(
        y2_ref[...].astype(jnp.float32) * s2_ref[...] + b2_ref[...], 0.0)
    y3 = jnp.dot(a2.astype(jnp.bfloat16), w3_ref[...],
                 preferred_element_type=jnp.float32)
    y3_ref[...] = y3.astype(y3_ref.dtype)
    if mask_rows:
        # Padded M rows carry relu(bias2) garbage -> exclude from bn3 stats.
        row = pl.program_id(0) * tm + jax.lax.broadcasted_iota(jnp.int32, (tm, 1), 0)
        y3 = jnp.where(row < m_real, y3, 0.0)
    p3_ref[0, 0:1, :] = jnp.sum(y3, axis=0, keepdims=True)
    p3_ref[0, 1:2, :] = jnp.sum(y3 * y3, axis=0, keepdims=True)


def _epilogue_kernel(y3_ref, r_ref, s3_ref, b3_ref, sd_ref, bd_ref, o_ref):
    # Fused epilogue: bn3 + (downsample-bn or identity) + residual add + relu.
    y = y3_ref[...].astype(jnp.float32) * s3_ref[...] + b3_ref[...]
    r = r_ref[...].astype(jnp.float32) * sd_ref[...] + bd_ref[...]
    o_ref[...] = jnp.maximum(y + r, 0.0)


# ------------------------------ JAX-side glue --------------------------------

def _pad2(w, rows, cols):
    return jnp.pad(w, ((0, rows - w.shape[0]), (0, cols - w.shape[1]))).astype(jnp.bfloat16)


def _fold_bn_stats(partials, gamma, beta, count, c_pad):
    # partials: (G, 2, Cpad) per-tile [sum, sum_sq] in f32.  Training-mode BN:
    # batch mean, biased variance.  E[x^2]-E[x]^2 is safe here because the
    # accumulators are f32 and |mean| is small relative to std; clamp >= 0.
    s = jnp.sum(partials[:, 0, :], axis=0)
    sq = jnp.sum(partials[:, 1, :], axis=0)
    mean = s / count
    var = jnp.maximum(sq / count - mean * mean, 0.0)
    g = jnp.pad(gamma.astype(jnp.float32), (0, c_pad - gamma.shape[0]))
    b = jnp.pad(beta.astype(jnp.float32), (0, c_pad - beta.shape[0]))
    scale = g * jax.lax.rsqrt(var + EPS)
    bias = b - mean * scale
    return scale.reshape(1, -1), bias.reshape(1, -1)


def clone_bottleneck_forward(x_nchw, p):
    n, cin, h, w = x_nchw.shape
    planes = p["w1"].shape[0]
    cout = p["w3"].shape[0]
    has_down = "wd" in p
    if not has_down:
        assert cin == cout, "identity residual requires cin == expansion * planes"

    m = n * h * w
    cp, pp, cop = (_round_up(c, LANE) for c in (cin, planes, cout))
    if m >= 1024:
        tm = 512
    elif m >= 512:
        tm = 256
    else:
        tm = _round_up(m, 8)
    mp = _round_up(m, tm)
    g = mp // tm
    f32, bf16 = jnp.float32, jnp.bfloat16

    # NHWC, flatten spatial, zero-pad rows/channels, cast matmul operands to bf16.
    xf = jnp.transpose(x_nchw, (0, 2, 3, 1)).reshape(m, cin)
    xf = jnp.pad(xf, ((0, mp - m), (0, cp - cin))).astype(bf16)

    w1 = _pad2(p["w1"][:, :, 0, 0].T, cp, pp)                      # (Cp, Pp)
    w3 = _pad2(p["w3"][:, :, 0, 0].T, pp, cop)                     # (Pp, Cop)
    w2 = jnp.transpose(p["w2"], (2, 3, 1, 0)).reshape(9, planes, planes)
    w2 = jnp.pad(w2, ((0, 0), (0, pp - planes), (0, pp - planes))).astype(bf16)

    row_in = pl.BlockSpec((tm, cp), lambda i: (i, 0))

    # ---- kernel A: conv1 (+ fused downsample 1x1), raw outputs + BN partials
    if has_down:
        wd = _pad2(p["wd"][:, :, 0, 0].T, cp, cop)
        y1, yd, p1, pd = pl.pallas_call(
            _conv1_down_kernel,
            grid=(g,),
            in_specs=[row_in,
                      pl.BlockSpec((cp, pp), lambda i: (0, 0)),
                      pl.BlockSpec((cp, cop), lambda i: (0, 0))],
            out_specs=[pl.BlockSpec((tm, pp), lambda i: (i, 0)),
                       pl.BlockSpec((tm, cop), lambda i: (i, 0)),
                       pl.BlockSpec((1, 2, pp), lambda i: (i, 0, 0)),
                       pl.BlockSpec((1, 2, cop), lambda i: (i, 0, 0))],
            out_shape=[jax.ShapeDtypeStruct((mp, pp), bf16),
                       jax.ShapeDtypeStruct((mp, cop), bf16),
                       jax.ShapeDtypeStruct((g, 2, pp), f32),
                       jax.ShapeDtypeStruct((g, 2, cop), f32)],
            compiler_params=_cparams(),
            cost_estimate=pl.CostEstimate(
                flops=2 * mp * cp * (pp + cop), transcendentals=0,
                bytes_accessed=2 * (mp * cp + cp * (pp + cop) + mp * (pp + cop))),
        )(xf, w1, wd)
        sd, bd = _fold_bn_stats(pd, p["gd"], p["bd"], m, cop)
        res = yd
    else:
        y1, p1 = pl.pallas_call(
            _conv1_kernel,
            grid=(g,),
            in_specs=[row_in,
                      pl.BlockSpec((cp, pp), lambda i: (0, 0))],
            out_specs=[pl.BlockSpec((tm, pp), lambda i: (i, 0)),
                       pl.BlockSpec((1, 2, pp), lambda i: (i, 0, 0))],
            out_shape=[jax.ShapeDtypeStruct((mp, pp), bf16),
                       jax.ShapeDtypeStruct((g, 2, pp), f32)],
            compiler_params=_cparams(),
            cost_estimate=pl.CostEstimate(
                flops=2 * mp * cp * pp, transcendentals=0,
                bytes_accessed=2 * (mp * cp + cp * pp + mp * pp)),
        )(xf, w1)
        sd = jnp.ones((1, cop), f32)     # identity residual: scale 1, bias 0
        bd = jnp.zeros((1, cop), f32)
        res = xf
    s1, b1 = _fold_bn_stats(p1, p["g1"], p["b1"], m, pp)

    # ---- kernel B: 3x3 conv as 9-tap shifted matmul; bn1+relu in the prologue
    y1img = y1[:m].reshape(n, h, w, pp)
    y2, p2 = pl.pallas_call(
        functools.partial(_conv2_kernel, h=h, w=w),
        grid=(n,),
        in_specs=[pl.BlockSpec((1, h, w, pp), lambda i: (i, 0, 0, 0)),
                  pl.BlockSpec((1, pp), lambda i: (0, 0)),
                  pl.BlockSpec((1, pp), lambda i: (0, 0)),
                  pl.BlockSpec((9, pp, pp), lambda i: (0, 0, 0))],
        out_specs=[pl.BlockSpec((1, h * w, pp), lambda i: (i, 0, 0)),
                   pl.BlockSpec((1, 2, pp), lambda i: (i, 0, 0))],
        out_shape=[jax.ShapeDtypeStruct((n, h * w, pp), bf16),
                   jax.ShapeDtypeStruct((n, 2, pp), f32)],
        scratch_shapes=[pltpu.VMEM((h + 2, w + 2, pp), bf16)],
        compiler_params=_cparams(),
        cost_estimate=pl.CostEstimate(
            flops=2 * 9 * m * pp * pp, transcendentals=0,
            bytes_accessed=2 * (2 * m * pp + 9 * pp * pp)),
    )(y1img, s1, b1, w2)
    s2, b2 = _fold_bn_stats(p2, p["g2"], p["b2"], m, pp)
    # TODO(synk): for very large spatial sizes, additionally tile H with a halo
    # instead of one image per grid step.

    # ---- kernel C: conv3; bn2+relu in the prologue; bn3 partial stats out
    y2f = jnp.pad(y2.reshape(m, pp), ((0, mp - m), (0, 0)))
    y3, p3 = pl.pallas_call(
        functools.partial(_conv3_kernel, tm=tm, m_real=m, mask_rows=(mp > m)),
        grid=(g,),
        in_specs=[pl.BlockSpec((tm, pp), lambda i: (i, 0)),
                  pl.BlockSpec((1, pp), lambda i: (0, 0)),
                  pl.BlockSpec((1, pp), lambda i: (0, 0)),
                  pl.BlockSpec((pp, cop), lambda i: (0, 0))],
        out_specs=[pl.BlockSpec((tm, cop), lambda i: (i, 0)),
                   pl.BlockSpec((1, 2, cop), lambda i: (i, 0, 0))],
        out_shape=[jax.ShapeDtypeStruct((mp, cop), bf16),
                   jax.ShapeDtypeStruct((g, 2, cop), f32)],
        compiler_params=_cparams(),
        cost_estimate=pl.CostEstimate(
            flops=2 * mp * pp * cop, transcendentals=0,
            bytes_accessed=2 * (mp * pp + pp * cop + mp * cop)),
    )(y2f, s2, b2, w3)
    s3, b3 = _fold_bn_stats(p3, p["g3"], p["b3"], m, cop)

    # ---- kernel D: fused epilogue  relu(bn3(y3) + bn_d(res))
    out = pl.pallas_call(
        _epilogue_kernel,
        grid=(g,),
        in_specs=[pl.BlockSpec((tm, cop), lambda i: (i, 0)),
                  pl.BlockSpec((tm, cop), lambda i: (i, 0)),
                  pl.BlockSpec((1, cop), lambda i: (0, 0)),
                  pl.BlockSpec((1, cop), lambda i: (0, 0)),
                  pl.BlockSpec((1, cop), lambda i: (0, 0)),
                  pl.BlockSpec((1, cop), lambda i: (0, 0))],
        out_specs=pl.BlockSpec((tm, cop), lambda i: (i, 0)),
        out_shape=jax.ShapeDtypeStruct((mp, cop), f32),
        compiler_params=_cparams(),
        cost_estimate=pl.CostEstimate(
            flops=4 * mp * cop, transcendentals=0,
            bytes_accessed=2 * mp * cop * 2 + 4 * mp * cop),
    )(y3, res, s3, b3, sd, bd)

    out = out[:m, :cout].reshape(n, h, w, cout)
    return jnp.transpose(out, (0, 3, 1, 2))


# --------------------------- deterministic params ----------------------------

def init_params(key, cin, planes, expansion=4, with_downsample=True):
    cout = planes * expansion
    ks = jax.random.split(key, 12)

    def conv_w(k, co, ci, kh, kw):
        fan_in = ci * kh * kw
        return jax.random.normal(k, (co, ci, kh, kw), jnp.float32) / jnp.sqrt(fan_in)

    def bn_gb(kg, kb, c):
        g = 1.0 + 0.1 * jax.random.normal(kg, (c,), jnp.float32)
        b = 0.1 * jax.random.normal(kb, (c,), jnp.float32)
        return g, b

    p = {}
    p["w1"] = conv_w(ks[0], planes, cin, 1, 1)
    p["g1"], p["b1"] = bn_gb(ks[1], ks[2], planes)
    p["w2"] = conv_w(ks[3], planes, planes, 3, 3)
    p["g2"], p["b2"] = bn_gb(ks[4], ks[5], planes)
    p["w3"] = conv_w(ks[6], cout, planes, 1, 1)
    p["g3"], p["b3"] = bn_gb(ks[7], ks[8], cout)
    if with_downsample:
        p["wd"] = conv_w(ks[9], cout, cin, 1, 1)
        p["gd"], p["bd"] = bn_gb(ks[10], ks[11], cout)
    return p


# --------------------------------- reference ---------------------------------

def _ref_bn(y, g, b):
    mean = jnp.mean(y, axis=(0, 2, 3), keepdims=True)
    var = jnp.mean((y - mean) ** 2, axis=(0, 2, 3), keepdims=True)
    return (y - mean) * jax.lax.rsqrt(var + EPS) * g.reshape(1, -1, 1, 1) + b.reshape(1, -1, 1, 1)


def _ref_conv(x, w, padding):
    return jax.lax.conv_general_dilated(
        x, w, window_strides=(1, 1), padding=padding,
        dimension_numbers=("NCHW", "OIHW", "NCHW"))


def reference_forward(x, p):
    out = jax.nn.relu(_ref_bn(_ref_conv(x, p["w1"], "VALID"), p["g1"], p["b1"]))
    out = jax.nn.relu(_ref_bn(_ref_conv(out, p["w2"], [(1, 1), (1, 1)]), p["g2"], p["b2"]))
    out = _ref_bn(_ref_conv(out, p["w3"], "VALID"), p["g3"], p["b3"])
    if "wd" in p:
        residual = _ref_bn(_ref_conv(x, p["wd"], "VALID"), p["gd"], p["bd"])
    else:
        residual = x
    return jax.nn.relu(out + residual)


# ----------------------------------- main -------------------------------------

if __name__ == "__main__":
    key = jax.random.PRNGKey(0)
    k_x, k_p = jax.random.split(key)

    N, C_IN, H, W = 2, 16, 16, 16
    PLANES = 8                      # bottleneck width; output channels = 4*PLANES = 32

    x = jax.random.normal(k_x, (N, C_IN, H, W), jnp.float32)
    params = init_params(k_p, C_IN, PLANES, with_downsample=True)

    fwd = jax.jit(clone_bottleneck_forward)
    out = jax.block_until_ready(fwd(x, params))

    ref = jax.block_until_ready(reference_forward(x, params))
    assert out.shape == (N, 4 * PLANES, H, W), out.shape
    max_err = float(jnp.max(jnp.abs(out - ref)))
    # bf16 matmul operands / bf16 intermediates vs an f32 reference -> loosened tolerance.
    assert jnp.allclose(out, ref, atol=5e-2, rtol=5e-2), max_err

    print("KERNEL_OK")
</pallas_src>

<mosaic_0001>
module attributes {stable_mosaic.version = 11 : i64} {
  func.func @_conv1_down_kernel(%arg0: i32, %arg1: memref<256x128xbf16, #tpu.memory_space<vmem>>, %arg2: memref<128x128xbf16, #tpu.memory_space<vmem>>, %arg3: memref<128x128xbf16, #tpu.memory_space<vmem>>, %arg4: memref<256x128xbf16, #tpu.memory_space<vmem>>, %arg5: memref<256x128xbf16, #tpu.memory_space<vmem>>, %arg6: memref<1x2x128xf32, #tpu.memory_space<vmem>>, %arg7: memref<1x2x128xf32, #tpu.memory_space<vmem>>) attributes {dimension_semantics = [#tpu.dimension_semantics<parallel>], iteration_bounds = array<i64: 2>, scalar_prefetch = 0 : i64, scratch_operands = 0 : i64, tpu.core_type = #tpu.core_type<tc>, window_params = [{transform_indices = @transform_0, window_bounds = array<i64: 256, 128>}, {pipeline_mode = #tpu.pipeline_mode<synchronous>, transform_indices = @transform_1, window_bounds = array<i64: 128, 128>}, {pipeline_mode = #tpu.pipeline_mode<synchronous>, transform_indices = @transform_2, window_bounds = array<i64: 128, 128>}, {transform_indices = @transform_3, window_bounds = array<i64: 256, 128>}, {transform_indices = @transform_4, window_bounds = array<i64: 256, 128>}, {transform_indices = @transform_5, window_bounds = array<i64: 1, 2, 128>}, {transform_indices = @transform_6, window_bounds = array<i64: 1, 2, 128>}]} {
    %c0 = arith.constant 0 : index
    %c0_0 = arith.constant 0 : index
    %0 = vector.load %arg1[%c0, %c0_0] : memref<256x128xbf16, #tpu.memory_space<vmem>>, vector<256x128xbf16>
    %c0_1 = arith.constant 0 : index
    %c0_2 = arith.constant 0 : index
    %1 = vector.load %arg2[%c0_1, %c0_2] : memref<128x128xbf16, #tpu.memory_space<vmem>>, vector<128x128xbf16>
    %cst = arith.constant dense<0.000000e+00> : vector<256x128xf32>
    %2 = tpu.matmul %0, %1, %cst {dimension_numbers = #tpu.dot_dimension_numbers<[1], [0], [0], [1], [0, 0, 1, 1], [], []>} : vector<256x128xbf16>, vector<128x128xbf16>, vector<256x128xf32> -> vector<256x128xf32>
    %c0_3 = arith.constant 0 : index
    %c0_4 = arith.constant 0 : index
    %3 = vector.load %arg3[%c0_3, %c0_4] : memref<128x128xbf16, #tpu.memory_space<vmem>>, vector<128x128xbf16>
    %cst_5 = arith.constant dense<0.000000e+00> : vector<256x128xf32>
    %4 = tpu.matmul %0, %3, %cst_5 {dimension_numbers = #tpu.dot_dimension_numbers<[1], [0], [0], [1], [0, 0, 1, 1], [], []>} : vector<256x128xbf16>, vector<128x128xbf16>, vector<256x128xf32> -> vector<256x128xf32>
    %5 = arith.truncf %2 : vector<256x128xf32> to vector<256x128xbf16>
    %c0_6 = arith.constant 0 : index
    %c0_7 = arith.constant 0 : index
    %6 = vector.load %arg4[%c0_6, %c0_7] : memref<256x128xbf16, #tpu.memory_space<vmem>>, vector<256x128xbf16>
    tpu.vector_store %arg4[%c0_6, %c0_7], %5 {strides = array<i32>} : memref<256x128xbf16, #tpu.memory_space<vmem>>, vector<256x128xbf16>,
    %7 = arith.truncf %4 : vector<256x128xf32> to vector<256x128xbf16>
    %c0_8 = arith.constant 0 : index
    %c0_9 = arith.constant 0 : index
    %8 = vector.load %arg5[%c0_8, %c0_9] : memref<256x128xbf16, #tpu.memory_space<vmem>>, vector<256x128xbf16>
    tpu.vector_store %arg5[%c0_8, %c0_9], %7 {strides = array<i32>} : memref<256x128xbf16, #tpu.memory_space<vmem>>, vector<256x128xbf16>,
    %cst_10 = arith.constant dense<0.000000e+00> : vector<128xf32>
    %9 = vector.multi_reduction <add>, %2, %cst_10 [0] : vector<256x128xf32> to vector<128xf32>
    %10 = vector.shape_cast %9 : vector<128xf32> to vector<1x128xf32>
    %c0_11 = arith.constant 0 : index
    %c0_12 = arith.constant 0 : index
    %c0_13 = arith.constant 0 : index
    %11 = vector.load %arg6[%c0_11, %c0_12, %c0_13] : memref<1x2x128xf32, #tpu.memory_space<vmem>>, vector<1x1x128xf32>
    %12 = vector.shape_cast %11 : vector<1x1x128xf32> to vector<1x128xf32>
    %13 = vector.shape_cast %10 : vector<1x128xf32> to vector<1x1x128xf32>
    tpu.vector_store %arg6[%c0_11, %c0_12, %c0_13], %13 {strides = array<i32>} : memref<1x2x128xf32, #tpu.memory_space<vmem>>, vector<1x1x128xf32>,
    %14 = arith.mulf %2, %2 : vector<256x128xf32>
    %cst_14 = arith.constant dense<0.000000e+00> : vector<128xf32>
    %15 = vector.multi_reduction <add>, %14, %cst_14 [0] : vector<256x128xf32> to vector<128xf32>
    %16 = vector.shape_cast %15 : vector<128xf32> to vector<1x128xf32>
    %c0_15 = arith.constant 0 : index
    %c1 = arith.constant 1 : index
    %c0_16 = arith.constant 0 : index
    %17 = vector.load %arg6[%c0_15, %c1, %c0_16] : memref<1x2x128xf32, #tpu.memory_space<vmem>>, vector<1x1x128xf32>
    %18 = vector.shape_cast %17 : vector<1x1x128xf32> to vector<1x128xf32>
    %19 = vector.shape_cast %16 : vector<1x128xf32> to vector<1x1x128xf32>
    tpu.vector_store %arg6[%c0_15, %c1, %c0_16], %19 {strides = array<i32>} : memref<1x2x128xf32, #tpu.memory_space<vmem>>, vector<1x1x128xf32>,
    %cst_17 = arith.constant dense<0.000000e+00> : vector<128xf32>
    %20 = vector.multi_reduction <add>, %4, %cst_17 [0] : vector<256x128xf32> to vector<128xf32>
    %21 = vector.shape_cast %20 : vector<128xf32> to vector<1x128xf32>
    %c0_18 = arith.constant 0 : index
    %c0_19 = arith.constant 0 : index
    %c0_20 = arith.constant 0 : index
    %22 = vector.load %arg7[%c0_18, %c0_19, %c0_20] : memref<1x2x128xf32, #tpu.memory_space<vmem>>, vector<1x1x128xf32>
    %23 = vector.shape_cast %22 : vector<1x1x128xf32> to vector<1x128xf32>
    %24 = vector.shape_cast %21 : vector<1x128xf32> to vector<1x1x128xf32>
    tpu.vector_store %arg7[%c0_18, %c0_19, %c0_20], %24 {strides = array<i32>} : memref<1x2x128xf32, #tpu.memory_space<vmem>>, vector<1x1x128xf32>,
    %25 = arith.mulf %4, %4 : vector<256x128xf32>
    %cst_21 = arith.constant dense<0.000000e+00> : vector<128xf32>
    %26 = vector.multi_reduction <add>, %25, %cst_21 [0] : vector<256x128xf32> to vector<128xf32>
    %27 = vector.shape_cast %26 : vector<128xf32> to vector<1x128xf32>
    %c0_22 = arith.constant 0 : index
    %c1_23 = arith.constant 1 : index
    %c0_24 = arith.constant 0 : index
    %28 = vector.load %arg7[%c0_22, %c1_23, %c0_24] : memref<1x2x128xf32, #tpu.memory_space<vmem>>, vector<1x1x128xf32>
    %29 = vector.shape_cast %28 : vector<1x1x128xf32> to vector<1x128xf32>
    %30 = vector.shape_cast %27 : vector<1x128xf32> to vector<1x1x128xf32>
    tpu.vector_store %arg7[%c0_22, %c1_23, %c0_24], %30 {strides = array<i32>} : memref<1x2x128xf32, #tpu.memory_space<vmem>>, vector<1x1x128xf32>,
    return
  }
  func.func @transform_0(%arg0: i32) -> (i32, i32) {
    %c0_i32 = arith.constant 0 : i32
    %c0_i32_0 = arith.constant 0 : i32
    return %arg0, %c0_i32 : i32, i32
  }
  func.func @transform_1(%arg0: i32) -> (i32, i32) {
    %c0_i32 = arith.constant 0 : i32
    %c0_i32_0 = arith.constant 0 : i32
    %c0_i32_1 = arith.constant 0 : i32
    return %c0_i32, %c0_i32_0 : i32, i32
  }
  func.func @transform_2(%arg0: i32) -> (i32, i32) {
    %c0_i32 = arith.constant 0 : i32
    %c0_i32_0 = arith.constant 0 : i32
    %c0_i32_1 = arith.constant 0 : i32
    return %c0_i32, %c0_i32_0 : i32, i32
  }
  func.func @transform_3(%arg0: i32) -> (i32, i32) {
    %c0_i32 = arith.constant 0 : i32
    %c0_i32_0 = arith.constant 0 : i32
    return %arg0, %c0_i32 : i32, i32
  }
  func.func @transform_4(%arg0: i32) -> (i32, i32) {
    %c0_i32 = arith.constant 0 : i32
    %c0_i32_0 = arith.constant 0 : i32
    return %arg0, %c0_i32 : i32, i32
  }
  func.func @transform_5(%arg0: i32) -> (i32, i32, i32) {
    %c0_i32 = arith.constant 0 : i32
    %c0_i32_0 = arith.constant 0 : i32
    %c0_i32_1 = arith.constant 0 : i32
    return %arg0, %c0_i32, %c0_i32_0 : i32, i32, i32
  }
  func.func @transform_6(%arg0: i32) -> (i32, i32, i32) {
    %c0_i32 = arith.constant 0 : i32
    %c0_i32_0 = arith.constant 0 : i32
    %c0_i32_1 = arith.constant 0 : i32
    return %arg0, %c0_i32, %c0_i32_0 : i32, i32, i32
  }
}

module attributes {stable_mosaic.version = 11 : i64} {
  func.func @_conv2_kernel(%arg0: i32, %arg1: memref<1x16x16x128xbf16, #tpu.memory_space<vmem>>, %arg2: memref<1x128xf32, #tpu.memory_space<vmem>>, %arg3: memref<1x128xf32, #tpu.memory_space<vmem>>, %arg4: memref<9x128x128xbf16, #tpu.memory_space<vmem>>, %arg5: memref<1x256x128xbf16, #tpu.memory_space<vmem>>, %arg6: memref<1x2x128xf32, #tpu.memory_space<vmem>>, %arg7: memref<18x18x128xbf16, #tpu.memory_space<vmem>>) attributes {dimension_semantics = [#tpu.dimension_semantics<parallel>], iteration_bounds = array<i64: 2>, scalar_prefetch = 0 : i64, scratch_operands = 1 : i64, tpu.core_type = #tpu.core_type<tc>, window_params = [{transform_indices = @transform_0, window_bounds = array<i64: 1, 16, 16, 128>}, {pipeline_mode = #tpu.pipeline_mode<synchronous>, transform_indices = @transform_1, window_bounds = array<i64: 1, 128>}, {pipeline_mode = #tpu.pipeline_mode<synchronous>, transform_indices = @transform_2, window_bounds = array<i64: 1, 128>}, {pipeline_mode = #tpu.pipeline_mode<synchronous>, transform_indices = @transform_3, window_bounds = array<i64: 9, 128, 128>}, {transform_indices = @transform_4, window_bounds = array<i64: 1, 256, 128>}, {transform_indices = @transform_5, window_bounds = array<i64: 1, 2, 128>}]} {
    %c0 = arith.constant 0 : index
    %c0_0 = arith.constant 0 : index
    %0 = vector.load %arg2[%c0, %c0_0] : memref<1x128xf32, #tpu.memory_space<vmem>>, vector<1x128xf32>
    %1 = vector.shape_cast %0 : vector<1x128xf32> to vector<1x1x128xf32>
    %c0_1 = arith.constant 0 : index
    %c0_2 = arith.constant 0 : index
    %2 = vector.load %arg3[%c0_1, %c0_2] : memref<1x128xf32, #tpu.memory_space<vmem>>, vector<1x128xf32>
    %3 = vector.shape_cast %2 : vector<1x128xf32> to vector<1x1x128xf32>
    %c0_3 = arith.constant 0 : index
    %c0_4 = arith.constant 0 : index
    %c0_5 = arith.constant 0 : index
    %c0_6 = arith.constant 0 : index
    %4 = vector.load %arg1[%c0_3, %c0_4, %c0_5, %c0_6] : memref<1x16x16x128xbf16, #tpu.memory_space<vmem>>, vector<1x16x16x128xbf16>
    %5 = vector.shape_cast %4 : vector<1x16x16x128xbf16> to vector<16x16x128xbf16>
    %6 = arith.extf %5 : vector<16x16x128xbf16> to vector<16x16x128xf32>
    %7 = vector.broadcast %1 : vector<1x1x128xf32> to vector<16x16x128xf32>
    %8 = arith.mulf %6, %7 : vector<16x16x128xf32>
    %9 = vector.broadcast %3 : vector<1x1x128xf32> to vector<16x16x128xf32>
    %10 = arith.addf %8, %9 : vector<16x16x128xf32>
    %cst = arith.constant 0.000000e+00 : f32
    %11 = vector.broadcast %cst : f32 to vector<16x16x128xf32>
    %12 = arith.maximumf %10, %11 : vector<16x16x128xf32>
    %cst_7 = arith.constant 0.000000e+00 : bf16
    %13 = vector.broadcast %cst_7 : bf16 to vector<18x18x128xbf16>
    %c0_8 = arith.constant 0 : index
    %c0_9 = arith.constant 0 : index
    %c0_10 = arith.constant 0 : index
    %14 = vector.load %arg7[%c0_8, %c0_9, %c0_10] : memref<18x18x128xbf16, #tpu.memory_space<vmem>>, vector<18x18x128xbf16>
    tpu.vector_store %arg7[%c0_8, %c0_9, %c0_10], %13 {strides = array<i32>} : memref<18x18x128xbf16, #tpu.memory_space<vmem>>, vector<18x18x128xbf16>,
    %15 = arith.truncf %12 : vector<16x16x128xf32> to vector<16x16x128xbf16>
    %c1 = arith.constant 1 : index
    %c1_11 = arith.constant 1 : index
    %c0_12 = arith.constant 0 : index
    %16 = vector.load %arg7[%c1, %c1_11, %c0_12] : memref<18x18x128xbf16, #tpu.memory_space<vmem>>, vector<16x16x128xbf16>
    tpu.vector_store %arg7[%c1, %c1_11, %c0_12], %15 {strides = array<i32>} : memref<18x18x128xbf16, #tpu.memory_space<vmem>>, vector<16x16x128xbf16>,
    %cst_13 = arith.constant 0.000000e+00 : f32
    %17 = vector.broadcast %cst_13 : f32 to vector<256x128xf32>
    %c0_14 = arith.constant 0 : index
    %c0_15 = arith.constant 0 : index
    %c0_16 = arith.constant 0 : index
    %18 = vector.load %arg7[%c0_14, %c0_15, %c0_16] : memref<18x18x128xbf16, #tpu.memory_space<vmem>>, vector<16x16x128xbf16>
    %19 = vector.shape_cast %18 : vector<16x16x128xbf16> to vector<256x128xbf16>
    %c0_17 = arith.constant 0 : index
    %c0_18 = arith.constant 0 : index
    %c0_19 = arith.constant 0 : index
    %20 = vector.load %arg4[%c0_17, %c0_18, %c0_19] : memref<9x128x128xbf16, #tpu.memory_space<vmem>>, vector<1x128x128xbf16>
    %21 = vector.shape_cast %20 : vector<1x128x128xbf16> to vector<128x128xbf16>
    %cst_20 = arith.constant dense<0.000000e+00> : vector<256x128xf32>
    %22 = tpu.matmul %19, %21, %cst_20 {dimension_numbers = #tpu.dot_dimension_numbers<[1], [0], [0], [1], [0, 0, 1, 1], [], []>} : vector<256x128xbf16>, vector<128x128xbf16>, vector<256x128xf32> -> vector<256x128xf32>
    %23 = arith.addf %17, %22 : vector<256x128xf32>
    %c0_21 = arith.constant 0 : index
    %c1_22 = arith.constant 1 : index
    %c0_23 = arith.constant 0 : index
    %24 = vector.load %arg7[%c0_21, %c1_22, %c0_23] : memref<18x18x128xbf16, #tpu.memory_space<vmem>>, vector<16x16x128xbf16>
    %25 = vector.shape_cast %24 : vector<16x16x128xbf16> to vector<256x128xbf16>
    %c1_24 = arith.constant 1 : index
    %c0_25 = arith.constant 0 : index
    %c0_26 = arith.constant 0 : index
    %26 = vector.load %arg4[%c1_24, %c0_25, %c0_26] : memref<9x128x128xbf16, #tpu.memory_space<vmem>>, vector<1x128x128xbf16>
    %27 = vector.shape_cast %26 : vector<1x128x128xbf16> to vector<128x128xbf16>
    %cst_27 = arith.constant dense<0.000000e+00> : vector<256x128xf32>
    %28 = tpu.matmul %25, %27, %cst_27 {dimension_numbers = #tpu.dot_dimension_numbers<[1], [0], [0], [1], [0, 0, 1, 1], [], []>} : vector<256x128xbf16>, vector<128x128xbf16>, vector<256x128xf32> -> vector<256x128xf32>
    %29 = arith.addf %23, %28 : vector<256x128xf32>
    %c0_28 = arith.constant 0 : index
    %c2 = arith.constant 2 : index
    %c0_29 = arith.constant 0 : index
    %30 = vector.load %arg7[%c0_28, %c2, %c0_29] : memref<18x18x128xbf16, #tpu.memory_space<vmem>>, vector<16x16x128xbf16>
    %31 = vector.shape_cast %30 : vector<16x16x128xbf16> to vector<256x128xbf16>
    %c2_30 = arith.constant 2 : index
    %c0_31 = arith.constant 0 : index
    %c0_32 = arith.constant 0 : index
    %32 = vector.load %arg4[%c2_30, %c0_31, %c0_32] : memref<9x128x128xbf16, #tpu.memory_space<vmem>>, vector<1x128x128xbf16>
    %33 = vector.shape_cast %32 : vector<1x128x128xbf16> to vector<128x128xbf16>
    %cst_33 = arith.constant dense<0.000000e+00> : vector<256x128xf32>
    %34 = tpu.matmul %31, %33, %cst_33 {dimension_numbers = #tpu.dot_dimension_numbers<[1], [0], [0], [1], [0, 0, 1, 1], [], []>} : vector<256x128xbf16>, vector<128x128xbf16>, vector<256x128xf32> -> vector<256x128xf32>
    %35 = arith.addf %29, %34 : vector<256x128xf32>
    %c1_34 = arith.constant 1 : index
    %c0_35 = arith.constant 0 : index
    %c0_36 = arith.constant 0 : index
    %36 = vector.load %arg7[%c1_34, %c0_35, %c0_36] : memref<18x18x128xbf16, #tpu.memory_space<vmem>>, vector<16x16x128xbf16>
    %37 = vector.shape_cast %36 : vector<16x16x128xbf16> to vector<256x128xbf16>
    %c3 = arith.constant 3 : index
    %c0_37 = arith.constant 0 : index
    %c0_38 = arith.constant 0 : index
    %38 = vector.load %arg4[%c3, %c0_37, %c0_38] : memref<9x128x128xbf16, #tpu.memory_space<vmem>>, vector<1x128x128xbf16>
    %39 = vector.shape_cast %38 : vector<1x128x128xbf16> to vector<128x128xbf16>
    %cst_39 = arith.constant dense<0.000000e+00> : vector<256x128xf32>
    %40 = tpu.matmul %37, %39, %cst_39 {dimension_numbers = #tpu.dot_dimension_numbers<[1], [0], [0], [1], [0, 0, 1, 1], [], []>} : vector<256x128xbf16>, vector<128x128xbf16>, vector<256x128xf32> -> vector<256x128xf32>
    %41 = arith.addf %35, %40 : vector<256x128xf32>
    %c1_40 = arith.constant 1 : index
    %c1_41 = arith.constant 1 : index
    %c0_42 = arith.constant 0 : index
    %42 = vector.load %arg7[%c1_40, %c1_41, %c0_42] : memref<18x18x128xbf16, #tpu.memory_space<vmem>>, vector<16x16x128xbf16>
    %43 = vector.shape_cast %42 : vector<16x16x128xbf16> to vector<256x128xbf16>
    %c4 = arith.constant 4 : index
    %c0_43 = arith.constant 0 : index
    %c0_44 = arith.constant 0 : index
    %44 = vector.load %arg4[%c4, %c0_43, %c0_44] : memref<9x128x128xbf16, #tpu.memory_space<vmem>>, vector<1x128x128xbf16>
    %45 = vector.shape_cast %44 : vector<1x128x128xbf16> to vector<128x128xbf16>
    %cst_45 = arith.constant dense<0.000000e+00> : vector<256x128xf32>
    %46 = tpu.matmul %43, %45, %cst_45 {dimension_numbers = #tpu.dot_dimension_numbers<[1], [0], [0], [1], [0, 0, 1, 1], [], []>} : vector<256x128xbf16>, vector<128x128xbf16>, vector<256x128xf32> -> vector<256x128xf32>
    %47 = arith.addf %41, %46 : vector<256x128xf32>
    %c1_46 = arith.constant 1 : index
    %c2_47 = arith.constant 2 : index
    %c0_48 = arith.constant 0 : index
    %48 = vector.load %arg7[%c1_46, %c2_47, %c0_48] : memref<18x18x128xbf16, #tpu.memory_space<vmem>>, vector<16x16x128xbf16>
    %49 = vector.shape_cast %48 : vector<16x16x128xbf16> to vector<256x128xbf16>
    %c5 = arith.constant 5 : index
    %c0_49 = arith.constant 0 : index
    %c0_50 = arith.constant 0 : index
    %50 = vector.load %arg4[%c5, %c0_49, %c0_50] : memref<9x128x128xbf16, #tpu.memory_space<vmem>>, vector<1x128x128xbf16>
    %51 = vector.shape_cast %50 : vector<1x128x128xbf16> to vector<128x128xbf16>
    %cst_51 = arith.constant dense<0.000000e+00> : vector<256x128xf32>
    %52 = tpu.matmul %49, %51, %cst_51 {dimension_numbers = #tpu.dot_dimension_numbers<[1], [0], [0], [1], [0, 0, 1, 1], [], []>} : vector<256x128xbf16>, vector<128x128xbf16>, vector<256x128xf32> -> vector<256x128xf32>
    %53 = arith.addf %47, %52 : vector<256x128xf32>
    %c2_52 = arith.constant 2 : index
    %c0_53 = arith.constant 0 : index
    %c0_54 = arith.constant 0 : index
    %54 = vector.load %arg7[%c2_52, %c0_53, %c0_54] : memref<18x18x128xbf16, #tpu.memory_space<vmem>>, vector<16x16x128xbf16>
    %55 = vector.shape_cast %54 : vector<16x16x128xbf16> to vector<256x128xbf16>
    %c6 = arith.constant 6 : index
    %c0_55 = arith.constant 0 : index
    %c0_56 = arith.constant 0 : index
    %56 = vector.load %arg4[%c6, %c0_55, %c0_56] : memref<9x128x128xbf16, #tpu.memory_space<vmem>>, vector<1x128x128xbf16>
    %57 = vector.shape_cast %56 : vector<1x128x128xbf16> to vector<128x128xbf16>
    %cst_57 = arith.constant dense<0.000000e+00> : vector<256x128xf32>
    %58 = tpu.matmul %55, %57, %cst_57 {dimension_numbers = #tpu.dot_dimension_numbers<[1], [0], [0], [1], [0, 0, 1, 1], [], []>} : vector<256x128xbf16>, vector<128x128xbf16>, vector<256x128xf32> -> vector<256x128xf32>
    %59 = arith.addf %53, %58 : vector<256x128xf32>
    %c2_58 = arith.constant 2 : index
    %c1_59 = arith.constant 1 : index
    %c0_60 = arith.constant 0 : index
    %60 = vector.load %arg7[%c2_58, %c1_59, %c0_60] : memref<18x18x128xbf16, #tpu.memory_space<vmem>>, vector<16x16x128xbf16>
    %61 = vector.shape_cast %60 : vector<16x16x128xbf16> to vector<256x128xbf16>
    %c7 = arith.constant 7 : index
    %c0_61 = arith.constant 0 : index
    %c0_62 = arith.constant 0 : index
    %62 = vector.load %arg4[%c7, %c0_61, %c0_62] : memref<9x128x128xbf16, #tpu.memory_space<vmem>>, vector<1x128x128xbf16>
    %63 = vector.shape_cast %62 : vector<1x128x128xbf16> to vector<128x128xbf16>
    %cst_63 = arith.constant dense<0.000000e+00> : vector<256x128xf32>
    %64 = tpu.matmul %61, %63, %cst_63 {dimension_numbers = #tpu.dot_dimension_numbers<[1], [0], [0], [1], [0, 0, 1, 1], [], []>} : vector<256x128xbf16>, vector<128x128xbf16>, vector<256x128xf32> -> vector<256x128xf32>
    %65 = arith.addf %59, %64 : vector<256x128xf32>
    %c2_64 = arith.constant 2 : index
    %c2_65 = arith.constant 2 : index
    %c0_66 = arith.constant 0 : index
    %66 = vector.load %arg7[%c2_64, %c2_65, %c0_66] : memref<18x18x128xbf16, #tpu.memory_space<vmem>>, vector<16x16x128xbf16>
    %67 = vector.shape_cast %66 : vector<16x16x128xbf16> to vector<256x128xbf16>
    %c8 = arith.constant 8 : index
    %c0_67 = arith.constant 0 : index
    %c0_68 = arith.constant 0 : index
    %68 = vector.load %arg4[%c8, %c0_67, %c0_68] : memref<9x128x128xbf16, #tpu.memory_space<vmem>>, vector<1x128x128xbf16>
    %69 = vector.shape_cast %68 : vector<1x128x128xbf16> to vector<128x128xbf16>
    %cst_69 = arith.constant dense<0.000000e+00> : vector<256x128xf32>
    %70 = tpu.matmul %67, %69, %cst_69 {dimension_numbers = #tpu.dot_dimension_numbers<[1], [0], [0], [1], [0, 0, 1, 1], [], []>} : vector<256x128xbf16>, vector<128x128xbf16>, vector<256x128xf32> -> vector<256x128xf32>
    %71 = arith.addf %65, %70 : vector<256x128xf32>
    %72 = arith.truncf %71 : vector<256x128xf32> to vector<256x128xbf16>
    %c0_70 = arith.constant 0 : index
    %c0_71 = arith.constant 0 : index
    %c0_72 = arith.constant 0 : index
    %73 = vector.load %arg5[%c0_70, %c0_71, %c0_72] : memref<1x256x128xbf16, #tpu.memory_space<vmem>>, vector<1x256x128xbf16>
    %74 = vector.shape_cast %73 : vector<1x256x128xbf16> to vector<256x128xbf16>
    %75 = vector.shape_cast %72 : vector<256x128xbf16> to vector<1x256x128xbf16>
    tpu.vector_store %arg5[%c0_70, %c0_71, %c0_72], %75 {strides = array<i32>} : memref<1x256x128xbf16, #tpu.memory_space<vmem>>, vector<1x256x128xbf16>,
    %cst_73 = arith.constant dense<0.000000e+00> : vector<128xf32>
    %76 = vector.multi_reduction <add>, %71, %cst_73 [0] : vector<256x128xf32> to vector<128xf32>
    %77 = vector.shape_cast %76 : vector<128xf32> to vector<1x128xf32>
    %c0_74 = arith.constant 0 : index
    %c0_75 = arith.constant 0 : index
    %c0_76 = arith.constant 0 : index
    %78 = vector.load %arg6[%c0_74, %c0_75, %c0_76] : memref<1x2x128xf32, #tpu.memory_space<vmem>>, vector<1x1x128xf32>
    %79 = vector.shape_cast %78 : vector<1x1x128xf32> to vector<1x128xf32>
    %80 = vector.shape_cast %77 : vector<1x128xf32> to vector<1x1x128xf32>
    tpu.vector_store %arg6[%c0_74, %c0_75, %c0_76], %80 {strides = array<i32>} : memref<1x2x128xf32, #tpu.memory_space<vmem>>, vector<1x1x128xf32>,
    %81 = arith.mulf %71, %71 : vector<256x128xf32>
    %cst_77 = arith.constant dense<0.000000e+00> : vector<128xf32>
    %82 = vector.multi_reduction <add>, %81, %cst_77 [0] : vector<256x128xf32> to vector<128xf32>
    %83 = vector.shape_cast %82 : vector<128xf32> to vector<1x128xf32>
    %c0_78 = arith.constant 0 : index
    %c1_79 = arith.constant 1 : index
    %c0_80 = arith.constant 0 : index
    %84 = vector.load %arg6[%c0_78, %c1_79, %c0_80] : memref<1x2x128xf32, #tpu.memory_space<vmem>>, vector<1x1x128xf32>
    %85 = vector.shape_cast %84 : vector<1x1x128xf32> to vector<1x128xf32>
    %86 = vector.shape_cast %83 : vector<1x128xf32> to vector<1x1x128xf32>
    tpu.vector_store %arg6[%c0_78, %c1_79, %c0_80], %86 {strides = array<i32>} : memref<1x2x128xf32, #tpu.memory_space<vmem>>, vector<1x1x128xf32>,
    return
  }
  func.func @transform_0(%arg0: i32) -> (i32, i32, i32, i32) {
    %c0_i32 = arith.constant 0 : i32
    %c0_i32_0 = arith.constant 0 : i32
    %c0_i32_1 = arith.constant 0 : i32
    %c0_i32_2 = arith.constant 0 : i32
    return %arg0, %c0_i32, %c0_i32_0, %c0_i32_1 : i32, i32, i32, i32
  }
  func.func @transform_1(%arg0: i32) -> (i32, i32) {
    %c0_i32 = arith.constant 0 : i32
    %c0_i32_0 = arith.constant 0 : i32
    %c0_i32_1 = arith.constant 0 : i32
    return %c0_i32, %c0_i32_0 : i32, i32
  }
  func.func @transform_2(%arg0: i32) -> (i32, i32) {
    %c0_i32 = arith.constant 0 : i32
    %c0_i32_0 = arith.constant 0 : i32
    %c0_i32_1 = arith.constant 0 : i32
    return %c0_i32, %c0_i32_0 : i32, i32
  }
  func.func @transform_3(%arg0: i32) -> (i32, i32, i32) {
    %c0_i32 = arith.constant 0 : i32
    %c0_i32_0 = arith.constant 0 : i32
    %c0_i32_1 = arith.constant 0 : i32
    %c0_i32_2 = arith.constant 0 : i32
    return %c0_i32, %c0_i32_0, %c0_i32_1 : i32, i32, i32
  }
  func.func @transform_4(%arg0: i32) -> (i32, i32, i32) {
    %c0_i32 = arith.constant 0 : i32
    %c0_i32_0 = arith.constant 0 : i32
    %c0_i32_1 = arith.constant 0 : i32
    return %arg0, %c0_i32, %c0_i32_0 : i32, i32, i32
  }
  func.func @transform_5(%arg0: i32) -> (i32, i32, i32) {
    %c0_i32 = arith.constant 0 : i32
    %c0_i32_0 = arith.constant 0 : i32
    %c0_i32_1 = arith.constant 0 : i32
    return %arg0, %c0_i32, %c0_i32_0 : i32, i32, i32
  }
}

module attributes {stable_mosaic.version = 11 : i64} {
  func.func @_conv3_kernel(%arg0: i32, %arg1: memref<256x128xbf16, #tpu.memory_space<vmem>>, %arg2: memref<1x128xf32, #tpu.memory_space<vmem>>, %arg3: memref<1x128xf32, #tpu.memory_space<vmem>>, %arg4: memref<128x128xbf16, #tpu.memory_space<vmem>>, %arg5: memref<256x128xbf16, #tpu.memory_space<vmem>>, %arg6: memref<1x2x128xf32, #tpu.memory_space<vmem>>) attributes {dimension_semantics = [#tpu.dimension_semantics<parallel>], iteration_bounds = array<i64: 2>, scalar_prefetch = 0 : i64, scratch_operands = 0 : i64, tpu.core_type = #tpu.core_type<tc>, window_params = [{transform_indices = @transform_0, window_bounds = array<i64: 256, 128>}, {pipeline_mode = #tpu.pipeline_mode<synchronous>, transform_indices = @transform_1, window_bounds = array<i64: 1, 128>}, {pipeline_mode = #tpu.pipeline_mode<synchronous>, transform_indices = @transform_2, window_bounds = array<i64: 1, 128>}, {pipeline_mode = #tpu.pipeline_mode<synchronous>, transform_indices = @transform_3, window_bounds = array<i64: 128, 128>}, {transform_indices = @transform_4, window_bounds = array<i64: 256, 128>}, {transform_indices = @transform_5, window_bounds = array<i64: 1, 2, 128>}]} {
    %c0 = arith.constant 0 : index
    %c0_0 = arith.constant 0 : index
    %0 = vector.load %arg1[%c0, %c0_0] : memref<256x128xbf16, #tpu.memory_space<vmem>>, vector<256x128xbf16>
    %1 = arith.extf %0 : vector<256x128xbf16> to vector<256x128xf32>
    %c0_1 = arith.constant 0 : index
    %c0_2 = arith.constant 0 : index
    %2 = vector.load %arg2[%c0_1, %c0_2] : memref<1x128xf32, #tpu.memory_space<vmem>>, vector<1x128xf32>
    %3 = vector.broadcast %2 : vector<1x128xf32> to vector<256x128xf32>
    %4 = arith.mulf %1, %3 : vector<256x128xf32>
    %c0_3 = arith.constant 0 : index
    %c0_4 = arith.constant 0 : index
    %5 = vector.load %arg3[%c0_3, %c0_4] : memref<1x128xf32, #tpu.memory_space<vmem>>, vector<1x128xf32>
    %6 = vector.broadcast %5 : vector<1x128xf32> to vector<256x128xf32>
    %7 = arith.addf %4, %6 : vector<256x128xf32>
    %cst = arith.constant 0.000000e+00 : f32
    %8 = vector.broadcast %cst : f32 to vector<256x128xf32>
    %9 = arith.maximumf %7, %8 : vector<256x128xf32>
    %10 = arith.truncf %9 : vector<256x128xf32> to vector<256x128xbf16>
    %c0_5 = arith.constant 0 : index
    %c0_6 = arith.constant 0 : index
    %11 = vector.load %arg4[%c0_5, %c0_6] : memref<128x128xbf16, #tpu.memory_space<vmem>>, vector<128x128xbf16>
    %cst_7 = arith.constant dense<0.000000e+00> : vector<256x128xf32>
    %12 = tpu.matmul %10, %11, %cst_7 {dimension_numbers = #tpu.dot_dimension_numbers<[1], [0], [0], [1], [0, 0, 1, 1], [], []>} : vector<256x128xbf16>, vector<128x128xbf16>, vector<256x128xf32> -> vector<256x128xf32>
    %13 = arith.truncf %12 : vector<256x128xf32> to vector<256x128xbf16>
    %c0_8 = arith.constant 0 : index
    %c0_9 = arith.constant 0 : index
    %14 = vector.load %arg5[%c0_8, %c0_9] : memref<256x128xbf16, #tpu.memory_space<vmem>>, vector<256x128xbf16>
    tpu.vector_store %arg5[%c0_8, %c0_9], %13 {strides = array<i32>} : memref<256x128xbf16, #tpu.memory_space<vmem>>, vector<256x128xbf16>,
    %cst_10 = arith.constant dense<0.000000e+00> : vector<128xf32>
    %15 = vector.multi_reduction <add>, %12, %cst_10 [0] : vector<256x128xf32> to vector<128xf32>
    %16 = vector.shape_cast %15 : vector<128xf32> to vector<1x128xf32>
    %c0_11 = arith.constant 0 : index
    %c0_12 = arith.constant 0 : index
    %c0_13 = arith.constant 0 : index
    %17 = vector.load %arg6[%c0_11, %c0_12, %c0_13] : memref<1x2x128xf32, #tpu.memory_space<vmem>>, vector<1x1x128xf32>
    %18 = vector.shape_cast %17 : vector<1x1x128xf32> to vector<1x128xf32>
    %19 = vector.shape_cast %16 : vector<1x128xf32> to vector<1x1x128xf32>
    tpu.vector_store %arg6[%c0_11, %c0_12, %c0_13], %19 {strides = array<i32>} : memref<1x2x128xf32, #tpu.memory_space<vmem>>, vector<1x1x128xf32>,
    %20 = arith.mulf %12, %12 : vector<256x128xf32>
    %cst_14 = arith.constant dense<0.000000e+00> : vector<128xf32>
    %21 = vector.multi_reduction <add>, %20, %cst_14 [0] : vector<256x128xf32> to vector<128xf32>
    %22 = vector.shape_cast %21 : vector<128xf32> to vector<1x128xf32>
    %c0_15 = arith.constant 0 : index
    %c1 = arith.constant 1 : index
    %c0_16 = arith.constant 0 : index
    %23 = vector.load %arg6[%c0_15, %c1, %c0_16] : memref<1x2x128xf32, #tpu.memory_space<vmem>>, vector<1x1x128xf32>
    %24 = vector.shape_cast %23 : vector<1x1x128xf32> to vector<1x128xf32>
    %25 = vector.shape_cast %22 : vector<1x128xf32> to vector<1x1x128xf32>
    tpu.vector_store %arg6[%c0_15, %c1, %c0_16], %25 {strides = array<i32>} : memref<1x2x128xf32, #tpu.memory_space<vmem>>, vector<1x1x128xf32>,
    return
  }
  func.func @transform_0(%arg0: i32) -> (i32, i32) {
    %c0_i32 = arith.constant 0 : i32
    %c0_i32_0 = arith.constant 0 : i32
    return %arg0, %c0_i32 : i32, i32
  }
  func.func @transform_1(%arg0: i32) -> (i32, i32) {
    %c0_i32 = arith.constant 0 : i32
    %c0_i32_0 = arith.constant 0 : i32
    %c0_i32_1 = arith.constant 0 : i32
    return %c0_i32, %c0_i32_0 : i32, i32
  }
  func.func @transform_2(%arg0: i32) -> (i32, i32) {
    %c0_i32 = arith.constant 0 : i32
    %c0_i32_0 = arith.constant 0 : i32
    %c0_i32_1 = arith.constant 0 : i32
    return %c0_i32, %c0_i32_0 : i32, i32
  }
  func.func @transform_3(%arg0: i32) -> (i32, i32) {
    %c0_i32 = arith.constant 0 : i32
    %c0_i32_0 = arith.constant 0 : i32
    %c0_i32_1 = arith.constant 0 : i32
    return %c0_i32, %c0_i32_0 : i32, i32
  }
  func.func @transform_4(%arg0: i32) -> (i32, i32) {
    %c0_i32 = arith.constant 0 : i32
    %c0_i32_0 = arith.constant 0 : i32
    return %arg0, %c0_i32 : i32, i32
  }
  func.func @transform_5(%arg0: i32) -> (i32, i32, i32) {
    %c0_i32 = arith.constant 0 : i32
    %c0_i32_0 = arith.constant 0 : i32
    %c0_i32_1 = arith.constant 0 : i32
    return %arg0, %c0_i32, %c0_i32_0 : i32, i32, i32
  }
}

module attributes {stable_mosaic.version = 11 : i64} {
  func.func @_epilogue_kernel(%arg0: i32, %arg1: memref<256x128xbf16, #tpu.memory_space<vmem>>, %arg2: memref<256x128xbf16, #tpu.memory_space<vmem>>, %arg3: memref<1x128xf32, #tpu.memory_space<vmem>>, %arg4: memref<1x128xf32, #tpu.memory_space<vmem>>, %arg5: memref<1x128xf32, #tpu.memory_space<vmem>>, %arg6: memref<1x128xf32, #tpu.memory_space<vmem>>, %arg7: memref<256x128xf32, #tpu.memory_space<vmem>>) attributes {dimension_semantics = [#tpu.dimension_semantics<parallel>], iteration_bounds = array<i64: 2>, scalar_prefetch = 0 : i64, scratch_operands = 0 : i64, tpu.core_type = #tpu.core_type<tc>, window_params = [{transform_indices = @transform_0, window_bounds = array<i64: 256, 128>}, {transform_indices = @transform_1, window_bounds = array<i64: 256, 128>}, {pipeline_mode = #tpu.pipeline_mode<synchronous>, transform_indices = @transform_2, window_bounds = array<i64: 1, 128>}, {pipeline_mode = #tpu.pipeline_mode<synchronous>, transform_indices = @transform_3, window_bounds = array<i64: 1, 128>}, {pipeline_mode = #tpu.pipeline_mode<synchronous>, transform_indices = @transform_4, window_bounds = array<i64: 1, 128>}, {pipeline_mode = #tpu.pipeline_mode<synchronous>, transform_indices = @transform_5, window_bounds = array<i64: 1, 128>}, {transform_indices = @transform_6, window_bounds = array<i64: 256, 128>}]} {
    %c0 = arith.constant 0 : index
    %c0_0 = arith.constant 0 : index
    %0 = vector.load %arg1[%c0, %c0_0] : memref<256x128xbf16, #tpu.memory_space<vmem>>, vector<256x128xbf16>
    %1 = arith.extf %0 : vector<256x128xbf16> to vector<256x128xf32>
    %c0_1 = arith.constant 0 : index
    %c0_2 = arith.constant 0 : index
    %2 = vector.load %arg3[%c0_1, %c0_2] : memref<1x128xf32, #tpu.memory_space<vmem>>, vector<1x128xf32>
    %3 = vector.broadcast %2 : vector<1x128xf32> to vector<256x128xf32>
    %4 = arith.mulf %1, %3 : vector<256x128xf32>
    %c0_3 = arith.constant 0 : index
    %c0_4 = arith.constant 0 : index
    %5 = vector.load %arg4[%c0_3, %c0_4] : memref<1x128xf32, #tpu.memory_space<vmem>>, vector<1x128xf32>
    %6 = vector.broadcast %5 : vector<1x128xf32> to vector<256x128xf32>
    %7 = arith.addf %4, %6 : vector<256x128xf32>
    %c0_5 = arith.constant 0 : index
    %c0_6 = arith.constant 0 : index
    %8 = vector.load %arg2[%c0_5, %c0_6] : memref<256x128xbf16, #tpu.memory_space<vmem>>, vector<256x128xbf16>
    %9 = arith.extf %8 : vector<256x128xbf16> to vector<256x128xf32>
    %c0_7 = arith.constant 0 : index
    %c0_8 = arith.constant 0 : index
    %10 = vector.load %arg5[%c0_7, %c0_8] : memref<1x128xf32, #tpu.memory_space<vmem>>, vector<1x128xf32>
    %11 = vector.broadcast %10 : vector<1x128xf32> to vector<256x128xf32>
    %12 = arith.mulf %9, %11 : vector<256x128xf32>
    %c0_9 = arith.constant 0 : index
    %c0_10 = arith.constant 0 : index
    %13 = vector.load %arg6[%c0_9, %c0_10] : memref<1x128xf32, #tpu.memory_space<vmem>>, vector<1x128xf32>
    %14 = vector.broadcast %13 : vector<1x128xf32> to vector<256x128xf32>
    %15 = arith.addf %12, %14 : vector<256x128xf32>
    %16 = arith.addf %7, %15 : vector<256x128xf32>
    %cst = arith.constant 0.000000e+00 : f32
    %17 = vector.broadcast %cst : f32 to vector<256x128xf32>
    %18 = arith.maximumf %16, %17 : vector<256x128xf32>
    %c0_11 = arith.constant 0 : index
    %c0_12 = arith.constant 0 : index
    %19 = vector.load %arg7[%c0_11, %c0_12] : memref<256x128xf32, #tpu.memory_space<vmem>>, vector<256x128xf32>
    tpu.vector_store %arg7[%c0_11, %c0_12], %18 {strides = array<i32>} : memref<256x128xf32, #tpu.memory_space<vmem>>, vector<256x128xf32>,
    return
  }
  func.func @transform_0(%arg0: i32) -> (i32, i32) {
    %c0_i32 = arith.constant 0 : i32
    %c0_i32_0 = arith.constant 0 : i32
    return %arg0, %c0_i32 : i32, i32
  }
  func.func @transform_1(%arg0: i32) -> (i32, i32) {
    %c0_i32 = arith.constant 0 : i32
    %c0_i32_0 = arith.constant 0 : i32
    return %arg0, %c0_i32 : i32, i32
  }
  func.func @transform_2(%arg0: i32) -> (i32, i32) {
    %c0_i32 = arith.constant 0 : i32
    %c0_i32_0 = arith.constant 0 : i32
    %c0_i32_1 = arith.constant 0 : i32
    return %c0_i32, %c0_i32_0 : i32, i32
  }
  func.func @transform_3(%arg0: i32) -> (i32, i32) {
    %c0_i32 = arith.constant 0 : i32
    %c0_i32_0 = arith.constant 0 : i32
    %c0_i32_1 = arith.constant 0 : i32
    return %c0_i32, %c0_i32_0 : i32, i32
  }
  func.func @transform_4(%arg0: i32) -> (i32, i32) {
    %c0_i32 = arith.constant 0 : i32
    %c0_i32_0 = arith.constant 0 : i32
    %c0_i32_1 = arith.constant 0 : i32
    return %c0_i32, %c0_i32_0 : i32, i32
  }
  func.func @transform_5(%arg0: i32) -> (i32, i32) {
    %c0_i32 = arith.constant 0 : i32
    %c0_i32_0 = arith.constant 0 : i32
    %c0_i32_1 = arith.constant 0 : i32
    return %c0_i32, %c0_i32_0 : i32, i32
  }
  func.func @transform_6(%arg0: i32) -> (i32, i32) {
    %c0_i32 = arith.constant 0 : i32
    %c0_i32_0 = arith.constant 0 : i32
    return %arg0, %c0_i32 : i32, i32
  }
}

</mosaic_0001>

<bundles_post_ra>
// kernel: clone_bottleneck_forward.6
= control target key start
LH: loop header
LB: loop body
LE: loop exit
PB: predicated region body
PF: predicated region fallthrough
CT: control target
= control target key end

     0   :  { %s1412_s18 = smov 0   ;;  %s1686_s0 = inlined_call_operand.vmem [shape: bf16[512,128], index: 0, kind: input, shape index: {}]   ;;  %s1687_s1 = inlined_call_operand.vmem [shape: f32[1,128], index: 1, kind: input, shape index: {}]   ;;  %s1688_s2 = inlined_call_operand.vmem [shape: f32[1,128], index: 2, kind: input, shape index: {}]   ;;  %s1689_s3 = inlined_call_operand.vmem [shape: bf16[128,128], index: 3, kind: input, shape index: {}]   ;;  %s1690_s4 = inlined_call_operand.vmem [shape: bf16[512,128], index: 4, kind: output, shape index: {0}]   ;;  %s1691_s5 = inlined_call_operand.vmem [shape: f32[2,2,128], index: 5, kind: output, shape index: {1}]  }
   0x1 LB: > { %s1418_s19 = sadd.s32 4294967295, %s1380_s18   ;;  %p1014_p0 = scmp.ge.s32.totalorder %s1380_s18, 1  ;;  %s1380_s18 = sphi %s1412_s18, %s16_s18  }
   0x2   : > { %p191_p1 = scmp.lt.s32.totalorder %s1380_s18, 3 }
   0x4   : > { %p192_p2 = pnand %p1014_p0, %p191_p1 }
   0x5   : > { %s1015_s22 = sshll.u32 (!%p192_p2), %s1418_s19, 5  ;;  %p235_p4 = scmp.lt.s32.totalorder (!%p192_p2), %s1418_s19, 1 }
   0x6   : > { %195 = sbr.rel (%p192_p2) target bundleno = 320 (0x140), region = 36  ;;  %p224_p3 = scmp.lt.s32.totalorder (!%p192_p2), %s1015_s22, 63 }
   0xb   : > { %v1366_v0 = vld [vmem:[%s1689_s3 + $0x38] sm:$0xff]   ;;  %v1367_v1 = vld [vmem:[%s1689_s3 + $0x30] sm:$0xff]   ;;  %s1693_s22 = smov (!%p224_p3, %s1015_s22), 63  ;;  %v1368_v2 = vld [vmem:[%s1689_s3 + $0x28] sm:$0xff]   ;;  %s1695_s19 = smov (!%p235_p4, %s1418_s19), 1 }
   0xc   : > { %1294 = vmatprep.subr.bf16.mxu0 %v1366_v0  ;;  %1342 = vmatprep.subr.bf16.mxu1 %v1366_v0  ;;  %s1016_s27 = sshll.u32 %s1693_s22, 2  ;;  %v1369_v3 = vld [vmem:[%s1689_s3 + $0x20] sm:$0xff]   ;;  %v1370_v21 = vld [vmem:[%s1689_s3 + $0x18] sm:$0xff]   ;;  %v1371_v35 = vld [vmem:[%s1689_s3 + $0x10] sm:$0xff]   ;;  %s1019_s22 = sshll.u32 %s1695_s19, 1 }
   0xd   : > { %1295 = vmatpush3.bf16.msra.mxu0 %v1366_v0  ;;  %1350 = vmatpush3.bf16.msra.mxu1 %v1366_v0  ;;  %s1440_s30 = scalar_lea.vmem %s1686_s0, %s1016_s27  ;;  %v1449_v5 = vld [vmem:[%s1687_s1] ss:$0 sm:$0xff]  ;;  %v1372_v50 = vld [vmem:[%s1689_s3 + $0x8] sm:$0xff]   ;;  %s1590_s25 = scalar_lea.vmem %s1690_s4, %s1016_s27 }
   0xe   : > { %1296 = vmatprep.subr.bf16.mxu0 %v1367_v1  ;;  %1343 = vmatprep.subr.bf16.mxu1 %v1367_v1  ;;  %v1097_v4 = vld [vmem:[%s1440_s30] sm:$0xff]   ;;  %v1240_v8 = vld [vmem:[%s1440_s30 + $0x8] sm:$0xff]   ;;  %v1241_v9 = vld [vmem:[%s1440_s30 + $0x10] sm:$0xff]   ;;  %s238_s28 = scalar_lea.vmem %s1691_s5, %s1019_s22 }
   0xf   : > { %v1098_v6 = vunpack.c.l.bf16 %v1097_v4  ;;  %v1099_v7 = vunpack.c.h.bf16 %v1097_v4  ;;  %v1242_v10 = vld [vmem:[%s1440_s30 + $0x18] sm:$0xff]   ;;  %v1457_v11 = vld [vmem:[%s1688_s2] ss:$0 sm:$0xff]  ;;  %v1102_v12 = vunpack.c.l.bf16 %v1240_v8  ;;  %v1103_v13 = vunpack.c.h.bf16 %v1240_v8  ;;  %v1244_v34 = vld [vmem:[%s1440_s30 + $0x28] sm:$0xff]  }
  0x10   : > { %v1106_v14 = vunpack.c.l.bf16 %v1241_v9  ;;  %v1107_v15 = vunpack.c.h.bf16 %v1241_v9  ;;  %v1110_v18 = vunpack.c.l.bf16 %v1242_v10  ;;  %v1111_v19 = vunpack.c.h.bf16 %v1242_v10  ;;  %v1243_v20 = vld [vmem:[%s1440_s30 + $0x20] sm:$0xff]   ;;  %v1245_v39 = vld [vmem:[%s1440_s30 + $0x30] sm:$0xff]   ;;  %v1494_v59 = vld [vmem:[%s1440_s30 + $0x38] sm:$0xff]  }
  0x11   : > { %1297 = vmatpush3.bf16.msra.mxu0 %v1367_v1  ;;  %1351 = vmatpush3.bf16.msra.mxu1 %v1367_v1  ;;  %v311_v16 = vmul.f32 %v1098_v6, %v1449_v5  ;;  %v312_v17 = vmul.f32 %v1099_v7, %v1449_v5  ;;  %v313_v22 = vmul.f32 %v1102_v12, %v1449_v5  ;;  %v1114_v30 = vunpack.c.l.bf16 %v1243_v20  ;;  %v1247_v60 = vld [vmem:[%s1440_s30 + $0x40] sm:$0xff]   ;;  %v1248_v6 = vld [vmem:[%s1440_s30 + $0x48] sm:$0xff]  }
  0x12   : > { %1298 = vmatprep.subr.bf16.mxu0 %v1368_v2  ;;  %1344 = vmatprep.subr.bf16.mxu1 %v1368_v2  ;;  %v314_v23 = vmul.f32 %v1103_v13, %v1449_v5  ;;  %v315_v24 = vmul.f32 %v1106_v14, %v1449_v5  ;;  %v316_v27 = vmul.f32 %v1107_v15, %v1449_v5  ;;  %v1115_v43 = vunpack.c.h.bf16 %v1243_v20  ;;  %v1373_v0 = vld [vmem:[%s1689_s3] sm:$0xff]  }
  0x13   : > { %v350_v25 = vadd.f32 %v1457_v11, %v311_v16  ;;  %v351_v26 = vadd.f32 %v1457_v11, %v312_v17  ;;  %v317_v28 = vmul.f32 %v1110_v18, %v1449_v5  ;;  %v318_v29 = vmul.f32 %v1111_v19, %v1449_v5  ;;  %v1249_v16 = vld [vmem:[%s1440_s30 + $0x50] sm:$0xff]  }
  0x14   : > { %v352_v33 = vadd.f32 %v1457_v11, %v313_v22  ;;  %v353_v36 = vadd.f32 %v1457_v11, %v314_v23  ;;  %v354_v37 = vadd.f32 %v1457_v11, %v315_v24  ;;  %v355_v38 = vadd.f32 %v1457_v11, %v316_v27 }
  0x15   : > { %1299 = vmatpush3.bf16.msra.mxu0 %v1368_v2  ;;  %1352 = vmatpush3.bf16.msra.mxu1 %v1368_v2  ;;  %v382_v31 = vmax.f32 %v350_v25, 0.0  ;;  %v383_v32 = vmax.f32 %v351_v26, 0.0  ;;  %v356_v41 = vadd.f32 %v1457_v11, %v317_v28  ;;  %v357_v42 = vadd.f32 %v1457_v11, %v318_v29 }
  0x16   : > { %1300 = vmatprep.subr.bf16.mxu0 %v1369_v3  ;;  %1345 = vmatprep.subr.bf16.mxu1 %v1369_v3  ;;  %v319_v44 = vmul.f32 %v1114_v30, %v1449_v5  ;;  %v1118_v45 = vunpack.c.l.bf16 %v1244_v34  ;;  %v384_v46 = vmax.f32 %v352_v33, 0.0  ;;  %v320_v47 = vmul.f32 %v1115_v43, %v1449_v5  ;;  %v1251_v30 = vld [vmem:[%s1440_s30 + $0x60] sm:$0xff]  }
  0x17   : > { %v414_v40 = vpack.c.bf16 %v383_v32, %v382_v31  ;;  %v1119_v48 = vunpack.c.h.bf16 %v1244_v34  ;;  %v1122_v49 = vunpack.c.l.bf16 %v1245_v39  ;;  %v385_v51 = vmax.f32 %v353_v36, 0.0 }
  0x18   : > { %v386_v52 = vmax.f32 %v354_v37, 0.0  ;;  %v387_v53 = vmax.f32 %v355_v38, 0.0  ;;  %v321_v54 = vmul.f32 %v1118_v45, %v1449_v5  ;;  %v388_v55 = vmax.f32 %v356_v41, 0.0 }
  0x19   : > { %1301 = vmatpush3.bf16.msra.mxu0 %v1369_v3  ;;  %1353 = vmatpush3.bf16.msra.mxu1 %v1369_v3  ;;  %v389_v56 = vmax.f32 %v357_v42, 0.0  ;;  %v1491_v57 = vadd.f32 %v1457_v11, %v319_v44  ;;  %v1123_v58 = vunpack.c.h.bf16 %v1245_v39  ;;  %v1498_v61 = vadd.f32 %v1457_v11, %v320_v47  ;;  %v1252_v47 = vld [vmem:[%s1440_s30 + $0x68] sm:$0xff]  }
  0x1a   : > { %1302 = vmatprep.subr.bf16.mxu0 %v1370_v21  ;;  %1346 = vmatprep.subr.bf16.mxu1 %v1370_v21  ;;  %v322_v62 = vmul.f32 %v1119_v48, %v1449_v5  ;;  %v323_v63 = vmul.f32 %v1122_v49, %v1449_v5  ;;  %v415_v1 = vpack.c.bf16 %v385_v51, %v384_v46  ;;  %v1126_v3 = vunpack.c.l.bf16 %v1494_v59 }
  0x1b   : > { %1310 = vmatprep.mubr.bf16.mxu0 %v414_v40  ;;  %v1506_v2 = vadd.f32 %v1457_v11, %v321_v54  ;;  %v1130_v4 = vunpack.c.l.bf16 %v1247_v60  ;;  %v416_v7 = vpack.c.bf16 %v387_v53, %v386_v52  ;;  %v1510_v8 = vpack.c.bf16 %v389_v56, %v388_v55  ;;  %v1253_v52 = vld [vmem:[%s1440_s30 + $0x70] sm:$0xff]  }
  0x1c   : > { %v390_v9 = vmax.f32 %v1491_v57, 0.0  ;;  %v324_v10 = vmul.f32 %v1123_v58, %v1449_v5  ;;  %v391_v12 = vmax.f32 %v1498_v61, 0.0  ;;  %v1127_v13 = vunpack.c.h.bf16 %v1494_v59 }
  0x1d   : > { %1303 = vmatpush3.bf16.msra.mxu0 %v1370_v21  ;;  %1354 = vmatpush3.bf16.msra.mxu1 %v1370_v21  ;;  %v1131_v14 = vunpack.c.h.bf16 %v1247_v60  ;;  %v327_v15 = vmul.f32 %v1130_v4, %v1449_v5  ;;  %v1519_v17 = vadd.f32 %v1457_v11, %v322_v62  ;;  %v1522_v18 = vadd.f32 %v1457_v11, %v323_v63  ;;  %v1250_v21 = vld [vmem:[%s1440_s30 + $0x58] sm:$0xff]  }
  0x1e   : > { %1304 = vmatprep.subr.bf16.mxu0 %v1371_v35  ;;  %1347 = vmatprep.subr.bf16.mxu1 %v1371_v35  ;;  %v1134_v19 = vunpack.c.l.bf16 %v1248_v6  ;;  %v1135_v20 = vunpack.c.h.bf16 %v1248_v6  ;;  %v392_v22 = vmax.f32 %v1506_v2, 0.0  ;;  %v1527_v23 = vmul.f32 %v1126_v3, %v1449_v5  ;;  %v1254_v6 = vld [vmem:[%s1440_s30 + $0x78] sm:$0xff]  }
  0x1f   : > { %v328_v24 = vmul.f32 %v1131_v14, %v1449_v5  ;;  %v366_v25 = vadd.f32 %v1457_v11, %v327_v15  ;;  %v1138_v28 = vunpack.c.l.bf16 %v1249_v16  ;;  %v1139_v29 = vunpack.c.h.bf16 %v1249_v16 }
  0x20   : > { %v329_v26 = vmul.f32 %v1134_v19, %v1449_v5  ;;  %v330_v27 = vmul.f32 %v1135_v20, %v1449_v5  ;;  %v1535_v31 = vadd.f32 %v1457_v11, %v324_v10  ;;  %v1142_v34 = vunpack.c.l.bf16 %v1250_v21 }
  0x21   : > { %1305 = vmatpush3.bf16.msra.mxu0 %v1371_v35  ;;  %1355 = vmatpush3.bf16.msra.mxu1 %v1371_v35  ;;  %v367_v32 = vadd.f32 %v1457_v11, %v328_v24  ;;  %v398_v33 = vmax.f32 %v366_v25, 0.0  ;;  %v331_v37 = vmul.f32 %v1138_v28, %v1449_v5  ;;  %v332_v38 = vmul.f32 %v1139_v29, %v1449_v5 }
  0x22   : > { %1306 = vmatprep.subr.bf16.mxu0 %v1372_v50  ;;  %1348 = vmatprep.subr.bf16.mxu1 %v1372_v50  ;;  %v368_v35 = vadd.f32 %v1457_v11, %v329_v26  ;;  %v369_v36 = vadd.f32 %v1457_v11, %v330_v27  ;;  %v1143_v40 = vunpack.c.h.bf16 %v1250_v21  ;;  %v333_v41 = vmul.f32 %v1142_v34, %v1449_v5 }
  0x23   : > { %v399_v39 = vmax.f32 %v367_v32, 0.0  ;;  %v1146_v42 = vunpack.c.l.bf16 %v1251_v30  ;;  %v370_v45 = vadd.f32 %v1457_v11, %v331_v37  ;;  %v371_v46 = vadd.f32 %v1457_v11, %v332_v38 }
  0x24   : > { %v400_v43 = vmax.f32 %v368_v35, 0.0  ;;  %v401_v44 = vmax.f32 %v369_v36, 0.0  ;;  %v334_v49 = vmul.f32 %v1143_v40, %v1449_v5  ;;  %v1147_v51 = vunpack.c.h.bf16 %v1251_v30 }
  0x25   : > { %1307 = vmatpush3.bf16.msra.mxu0 %v1372_v50  ;;  %1356 = vmatpush3.bf16.msra.mxu1 %v1372_v50  ;;  %v422_v48 = vpack.c.bf16 %v399_v39, %v398_v33  ;;  %v372_v50 = vadd.f32 %v1457_v11, %v333_v41  ;;  %v402_v54 = vmax.f32 %v370_v45, 0.0  ;;  %v403_v55 = vmax.f32 %v371_v46, 0.0 }
  0x26   : > { %1308 = vmatprep.subr.bf16.mxu0 %v1373_v0  ;;  %1349 = vmatprep.subr.bf16.mxu1 %v1373_v0  ;;  %v423_v53 = vpack.c.bf16 %v401_v44, %v400_v43  ;;  %v335_v56 = vmul.f32 %v1146_v42, %v1449_v5  ;;  %v373_v58 = vadd.f32 %v1457_v11, %v334_v49  ;;  %v1150_v63 = vunpack.c.l.bf16 %v1252_v47 }
  0x27   : > { %1326 = vmatprep.mubr.bf16.mxu1 %v422_v48  ;;  %v404_v60 = vmax.f32 %v372_v50, 0.0  ;;  %v336_v62 = vmul.f32 %v1147_v51, %v1449_v5  ;;  %v1151_v3 = vunpack.c.h.bf16 %v1252_v47  ;;  %v1154_v4 = vunpack.c.l.bf16 %v1253_v52 }
  0x28   : > { %v337_v14 = vmul.f32 %v1150_v63, %v1449_v5  ;;  %v1155_v15 = vunpack.c.h.bf16 %v1253_v52  ;;  %v418_v16 = vpack.c.bf16 %v391_v12, %v390_v9  ;;  %v326_v24 = vmul.f32 %v1127_v13, %v1449_v5 }
  0x29   : > { %1309 = vmatpush3.bf16.msra.mxu0 %v1373_v0  ;;  %1357 = vmatpush3.bf16.msra.mxu1 %v1373_v0  ;;  %v424_v0 = vpack.c.bf16 %v403_v55, %v402_v54  ;;  %v375_v10 = vadd.f32 %v1457_v11, %v336_v62  ;;  %v338_v20 = vmul.f32 %v1151_v3, %v1449_v5  ;;  %v1158_v27 = vunpack.c.l.bf16 %v1254_v6 }
  0x2a   : > { %v339_v21 = vmul.f32 %v1154_v4, %v1449_v5  ;;  %v340_v26 = vmul.f32 %v1155_v15, %v1449_v5  ;;  %v376_v57 = vadd.f32 %v1457_v11, %v337_v14  ;;  %v1159_v9 = vunpack.c.h.bf16 %v1254_v6 }
  0x2b   : > { %v407_v25 = vmax.f32 %v375_v10, 0.0  ;;  %v377_v61 = vadd.f32 %v1457_v11, %v338_v20  ;;  %v393_v12 = vmax.f32 %v1519_v17, 0.0  ;;  %v394_v13 = vmax.f32 %v1522_v18, 0.0 }
  0x2c   : > { %1311 = vmatmul.mubr.bf16.vlgmr.msra.gmra.mxu0 %v415_v1  ;;  %1327 = vmatmul.mubr.bf16.vlgmr.msra.gmra.mxu1 %v423_v53  ;;  %v374_v1 = vadd.f32 %v1457_v11, %v335_v56  ;;  %v378_v30 = vadd.f32 %v1457_v11, %v339_v21  ;;  %v379_v59 = vadd.f32 %v1457_v11, %v340_v26  ;;  %v395_v32 = vmax.f32 %v1535_v31, 0.0 }
  0x2d   : > { %1314 = vmatprep.mubr.bf16.mxu0 %v416_v7  ;;  %v405_v7 = vmax.f32 %v373_v58, 0.0  ;;  %1330 = vmatprep.mubr.bf16.mxu1 %v424_v0  ;;  %v364_v33 = vadd.f32 %v1457_v11, %v1527_v23  ;;  %v408_v34 = vmax.f32 %v376_v57, 0.0  ;;  %v409_v35 = vmax.f32 %v377_v61, 0.0 }
  0x2e   : > { %v406_v19 = vmax.f32 %v374_v1, 0.0  ;;  %v342_v17 = vmul.f32 %v1159_v9, %v1449_v5  ;;  %v419_v36 = vpack.c.bf16 %v393_v12, %v392_v22  ;;  %v365_v37 = vadd.f32 %v1457_v11, %v326_v24 }
  0x2f   : > { %v425_v28 = vpack.c.bf16 %v405_v7, %v404_v60  ;;  %v410_v38 = vmax.f32 %v378_v30, 0.0  ;;  %v411_v18 = vmax.f32 %v379_v59, 0.0  ;;  %v420_v39 = vpack.c.bf16 %v395_v32, %v394_v13 }
  0x30   : > { %v426_v29 = vpack.c.bf16 %v407_v25, %v406_v19  ;;  %v427_v31 = vpack.c.bf16 %v409_v35, %v408_v34  ;;  %v381_v23 = vadd.f32 %v1457_v11, %v342_v17  ;;  %v396_v41 = vmax.f32 %v364_v33, 0.0 }
  0x31   : > { %v397_v42 = vmax.f32 %v365_v37, 0.0  ;;  %v428_v43 = vpack.c.bf16 %v411_v18, %v410_v38 }
  0x32   : > { %v413_v2 = vmax.f32 %v381_v23, 0.0 }
  0x33   : > { %v421_v22 = vpack.c.bf16 %v397_v42, %v396_v41 }
  0x34   : > { %1315 = vmatmul.mubr.bf16.gmra.mxu0 %v1510_v8  ;;  %1331 = vmatmul.mubr.bf16.gmra.mxu1 %v425_v28  ;;  %v341_v8 = vmul.f32 %v1158_v27, %v1449_v5 }
  0x35   : > { %1318 = vmatprep.mubr.bf16.mxu0 %v418_v16  ;;  %1334 = vmatprep.mubr.bf16.mxu1 %v426_v29 }
  0x36   : > { %v380_v40 = vadd.f32 %v1457_v11, %v341_v8 }
  0x38   : > { %v412_v5 = vmax.f32 %v380_v40, 0.0 }
  0x3a   : > { %v429_v44 = vpack.c.bf16 %v413_v2, %v412_v5 }
  0x3c   : > { %1319 = vmatmul.mubr.bf16.gmra.mxu0 %v419_v36  ;;  %1335 = vmatmul.mubr.bf16.gmra.mxu1 %v427_v31 }
  0x3d   : > { %1322 = vmatprep.mubr.bf16.mxu0 %v420_v39  ;;  %1338 = vmatprep.mubr.bf16.mxu1 %v428_v43 }
  0x44   : > { %1323 = vmatmul.mubr.bf16.gmra.mxu0 %v421_v22  ;;  %1339 = vmatmul.mubr.bf16.gmra.mxu1 %v429_v44 }
  0xec   : > { %v1312_v45 = vpop.f32.mrf.mxu0  ;;  %v1583_v47 = vpop.f32.mrf.mxu1 }
  0xed   : > { %v855_v60 = vmul.f32 %v1312_v45, %v1312_v45 }
  0xee   : > { %v528_v46 = vpop.f32.mrf.mxu0  ;;  %v1592_v49 = vpop.f32.mrf.mxu1 }
  0xef   : > { %v853_v51 = vmul.f32 %v528_v46, %v528_v46 }
  0xf0   : > { %v1313_v11 = vpop.f32.mrf.mxu0  ;;  %v1595_v55 = vpop.f32.mrf.mxu1 }
  0xf1   : > { %v1168_v48 = vpack.c.bf16 %v1313_v11, %v1312_v45  ;;  %v1208_v58 = vpack.c.bf16 %v1595_v55, %v1583_v47  ;;  %v856_v4 = vmul.f32 %v1313_v11, %v1313_v11 }
  0xf2   : > { %v531_v50 = vpop.f32.mrf.mxu0  ;;  %v1600_v0 = vpop.f32.mrf.mxu1 }
  0xf3   : > { %1255 = vst [vmem:[%s1590_s25 + $0x8] sm:$0xff] %v1168_v48   ;;  %v1163_v52 = vpack.c.bf16 %v531_v50, %v528_v46  ;;  %v815_v53 = vadd.f32 %v531_v50, %v528_v46  ;;  %v854_v54 = vmul.f32 %v531_v50, %v531_v50  ;;  %1263 = vst [vmem:[%s1590_s25 + $0x48] sm:$0xff] %v1208_v58  }
  0xf4   : > { %v1316_v56 = vpop.f32.mrf.mxu0  ;;  %v1203_v3 = vpack.c.bf16 %v1600_v0, %v1592_v49  ;;  %v1605_v10 = vpop.f32.mrf.mxu1 }
  0xf5   : > { %1164 = vst [vmem:[%s1590_s25] sm:$0xff] %v1163_v52   ;;  %v816_v62 = vadd.f32 %v1312_v45, %v815_v53  ;;  %v885_v63 = vadd.f32 %v854_v54, %v853_v51  ;;  %v859_v12 = vmul.f32 %v1316_v56, %v1316_v56 }
  0xf6   : > { %v544_v1 = vpop.f32.mrf.mxu0  ;;  %1262 = vst [vmem:[%s1590_s25 + $0x40] sm:$0xff] %v1203_v3   ;;  %v1608_v21 = vpop.f32.mrf.mxu1 }
  0xf7   : > { %v886_v6 = vadd.f32 %v885_v63, %v855_v60  ;;  %v817_v7 = vadd.f32 %v1313_v11, %v816_v62  ;;  %v857_v16 = vmul.f32 %v544_v1, %v544_v1 }
  0xf8   : > { %v1317_v14 = vpop.f32.mrf.mxu0  ;;  %v1611_v57 = vpop.f32.mrf.mxu1 }
  0xf9   : > { %v818_v15 = vadd.f32 %v817_v7, %v544_v1  ;;  %v887_v19 = vadd.f32 %v886_v6, %v856_v4  ;;  %v1178_v20 = vpack.c.bf16 %v1317_v14, %v1316_v56  ;;  %v1218_v9 = vpack.c.bf16 %v1611_v57, %v1605_v10 }
  0xfa   : > { %v547_v24 = vpop.f32.mrf.mxu0  ;;  %v1616_v59 = vpop.f32.mrf.mxu1  ;;  %v860_v33 = vmul.f32 %v1317_v14, %v1317_v14 }
  0xfb   : > { %v888_v25 = vadd.f32 %v887_v19, %v857_v16  ;;  %1257 = vst [vmem:[%s1590_s25 + $0x18] sm:$0xff] %v1178_v20   ;;  %v1173_v26 = vpack.c.bf16 %v547_v24, %v544_v1  ;;  %v819_v27 = vadd.f32 %v818_v15, %v547_v24  ;;  %v858_v28 = vmul.f32 %v547_v24, %v547_v24 }
  0xfc   : > { %v1320_v61 = vpop.f32.mrf.mxu0  ;;  %1265 = vst [vmem:[%s1590_s25 + $0x58] sm:$0xff] %v1218_v9   ;;  %v1213_v32 = vpack.c.bf16 %v1616_v59, %v1608_v21  ;;  %v1621_v8 = vpop.f32.mrf.mxu1 }
  0xfd   : > { %1256 = vst [vmem:[%s1590_s25 + $0x10] sm:$0xff] %v1173_v26   ;;  %v820_v29 = vadd.f32 %v1316_v56, %v819_v27  ;;  %v889_v30 = vadd.f32 %v888_v25, %v858_v28  ;;  %v863_v22 = vmul.f32 %v1320_v61, %v1320_v61 }
  0xfe   : > { %v560_v13 = vpop.f32.mrf.mxu0  ;;  %1264 = vst [vmem:[%s1590_s25 + $0x50] sm:$0xff] %v1213_v32   ;;  %v1624_v39 = vpop.f32.mrf.mxu1  ;;  %v871_v32 = vmul.f32 %v1583_v47, %v1583_v47 }
  0xff   : > { %v890_v34 = vadd.f32 %v889_v30, %v859_v12  ;;  %v821_v35 = vadd.f32 %v1317_v14, %v820_v29  ;;  %v861_v37 = vmul.f32 %v560_v13, %v560_v13  ;;  %v870_v30 = vmul.f32 %v1600_v0, %v1600_v0 }
 0x100   : > { %v1321_v17 = vpop.f32.mrf.mxu0  ;;  %v1627_v43 = vpop.f32.mrf.mxu1 }
 0x101   : > { %v822_v36 = vadd.f32 %v821_v35, %v560_v13  ;;  %v891_v38 = vadd.f32 %v890_v34, %v860_v33  ;;  %v1188_v18 = vpack.c.bf16 %v1321_v17, %v1320_v61  ;;  %v1228_v2 = vpack.c.bf16 %v1627_v43, %v1621_v8 }
 0x102   : > { %v563_v31 = vpop.f32.mrf.mxu0  ;;  %v627_v46 = vpop.f32.mrf.mxu1  ;;  %v864_v50 = vmul.f32 %v1321_v17, %v1321_v17  ;;  %v872_v35 = vmul.f32 %v1595_v55, %v1595_v55 }
 0x103   : > { %v892_v40 = vadd.f32 %v891_v38, %v861_v37  ;;  %1259 = vst [vmem:[%s1590_s25 + $0x28] sm:$0xff] %v1188_v18   ;;  %v1183_v23 = vpack.c.bf16 %v563_v31, %v560_v13  ;;  %v823_v41 = vadd.f32 %v822_v36, %v563_v31  ;;  %v862_v42 = vmul.f32 %v563_v31, %v563_v31 }
 0x104   : > { %v1324_v5 = vpop.f32.mrf.mxu0  ;;  %1267 = vst [vmem:[%s1590_s25 + $0x68] sm:$0xff] %v1228_v2   ;;  %v1223_v48 = vpack.c.bf16 %v627_v46, %v1624_v39  ;;  %v1634_v53 = vpop.f32.mrf.mxu1  ;;  %v873_v37 = vmul.f32 %v1608_v21, %v1608_v21  ;;  %v874_v31 = vmul.f32 %v1616_v59, %v1616_v59 }
 0x105   : > { %1258 = vst [vmem:[%s1590_s25 + $0x20] sm:$0xff] %v1183_v23   ;;  %v824_v44 = vadd.f32 %v1320_v61, %v823_v41  ;;  %v893_v45 = vadd.f32 %v892_v40, %v862_v42  ;;  %v867_v16 = vmul.f32 %v1324_v5, %v1324_v5  ;;  %v869_v61 = vmul.f32 %v1592_v49, %v1592_v49 }
 0x106   : > { %v576_v11 = vpop.f32.mrf.mxu0  ;;  %1266 = vst [vmem:[%s1590_s25 + $0x60] sm:$0xff] %v1223_v48   ;;  %v640_v63 = vpop.f32.mrf.mxu1  ;;  %v880_v48 = vmul.f32 %v1627_v43, %v1627_v43 }
 0x107   : > { %v894_v51 = vadd.f32 %v893_v45, %v863_v22  ;;  %v825_v52 = vadd.f32 %v1321_v17, %v824_v44  ;;  %v865_v58 = vmul.f32 %v576_v11, %v576_v11  ;;  %v878_v44 = vmul.f32 %v627_v46, %v627_v46 }
 0x108   : > { %v1325_v54 = vpop.f32.mrf.mxu0  ;;  %v1341_v14 = vpop.f32.mrf.mxu1  ;;  %v879_v45 = vmul.f32 %v1621_v8, %v1621_v8 }
 0x109   : > { %v826_v56 = vadd.f32 %v825_v52, %v576_v11  ;;  %v895_v60 = vadd.f32 %v894_v51, %v864_v50  ;;  %v1198_v62 = vpack.c.bf16 %v1325_v54, %v1324_v5  ;;  %v1238_v15 = vpack.c.bf16 %v1341_v14, %v1634_v53 }
 0x10a   : > { %v579_v1 = vpop.f32.mrf.mxu0  ;;  %v643_v24 = vpop.f32.mrf.mxu1  ;;  %v868_v26 = vmul.f32 %v1325_v54, %v1325_v54 }
 0x10b   : > { %v896_v3 = vadd.f32 %v895_v60, %v865_v58  ;;  %1261 = vst [vmem:[%s1590_s25 + $0x38] sm:$0xff] %v1198_v62   ;;  %v1193_v4 = vpack.c.bf16 %v579_v1, %v576_v11  ;;  %v827_v6 = vadd.f32 %v826_v56, %v579_v1  ;;  %v866_v7 = vmul.f32 %v579_v1, %v579_v1 }
 0x10c   : > { %1269 = vst [vmem:[%s1590_s25 + $0x78] sm:$0xff] %v1238_v15   ;;  %v1233_v25 = vpack.c.bf16 %v643_v24, %v640_v63  ;;  %v883_v58 = vmul.f32 %v1634_v53, %v1634_v53  ;;  %v884_v62 = vmul.f32 %v1341_v14, %v1341_v14 }
 0x10d   : > { %1260 = vst [vmem:[%s1590_s25 + $0x30] sm:$0xff] %v1193_v4   ;;  %v828_v19 = vadd.f32 %v1324_v5, %v827_v6  ;;  %v897_v20 = vadd.f32 %v896_v3, %v866_v7  ;;  %v877_v5 = vmul.f32 %v1624_v39, %v1624_v39 }
 0x10e   : > { %1268 = vst [vmem:[%s1590_s25 + $0x70] sm:$0xff] %v1233_v25  }
 0x10f   : > { %v829_v27 = vadd.f32 %v1325_v54, %v828_v19  ;;  %v898_v28 = vadd.f32 %v897_v20, %v867_v16 }
 0x111   : > { %v899_v9 = vadd.f32 %v898_v28, %v868_v26  ;;  %v830_v12 = vadd.f32 %v829_v27, %v1592_v49 }
 0x113   : > { %v831_v29 = vadd.f32 %v830_v12, %v1600_v0  ;;  %v900_v13 = vadd.f32 %v899_v9, %v869_v61 }
 0x115   : > { %v832_v33 = vadd.f32 %v1583_v47, %v831_v29  ;;  %v901_v34 = vadd.f32 %v900_v13, %v870_v30  ;;  %v875_v47 = vmul.f32 %v1605_v10, %v1605_v10 }
 0x117   : > { %v902_v17 = vadd.f32 %v901_v34, %v871_v32  ;;  %v833_v36 = vadd.f32 %v1595_v55, %v832_v33  ;;  %v876_v55 = vmul.f32 %v1611_v57, %v1611_v57 }
 0x119   : > { %v834_v49 = vadd.f32 %v833_v36, %v1608_v21  ;;  %v903_v38 = vadd.f32 %v902_v17, %v872_v35 }
 0x11b   : > { %v904_v0 = vadd.f32 %v903_v38, %v873_v37  ;;  %v835_v18 = vadd.f32 %v834_v49, %v1616_v59 }
 0x11d   : > { %v836_v40 = vadd.f32 %v1605_v10, %v835_v18  ;;  %v905_v23 = vadd.f32 %v904_v0, %v874_v31 }
 0x11f   : > { %v906_v41 = vadd.f32 %v905_v23, %v875_v47  ;;  %v837_v42 = vadd.f32 %v1611_v57, %v836_v40 }
 0x121   : > { %v838_v21 = vadd.f32 %v837_v42, %v1624_v39  ;;  %v907_v2 = vadd.f32 %v906_v41, %v876_v55  ;;  %v881_v39 = vmul.f32 %v640_v63, %v640_v63 }
 0x123   : > { %v908_v22 = vadd.f32 %v907_v2, %v877_v5  ;;  %v839_v59 = vadd.f32 %v838_v21, %v627_v46  ;;  %v882_v46 = vmul.f32 %v643_v24, %v643_v24 }
 0x125   : > { %v840_v10 = vadd.f32 %v1621_v8, %v839_v59  ;;  %v909_v11 = vadd.f32 %v908_v22, %v878_v44 }
 0x127   : > { %v910_v57 = vadd.f32 %v909_v11, %v879_v45  ;;  %v841_v50 = vadd.f32 %v1627_v43, %v840_v10 }
 0x129   : > { %v842_v51 = vadd.f32 %v841_v50, %v640_v63  ;;  %v911_v52 = vadd.f32 %v910_v57, %v880_v48 }
 0x12b   : > { %v912_v54 = vadd.f32 %v911_v52, %v881_v39  ;;  %v843_v56 = vadd.f32 %v842_v51, %v643_v24 }
 0x12d   : > { %v844_v60 = vadd.f32 %v1634_v53, %v843_v56  ;;  %v913_v8 = vadd.f32 %v912_v54, %v882_v46 }
 0x12f   : > { %v845_v1 = vadd.f32 %v1341_v14, %v844_v60  ;;  %v914_v3 = vadd.f32 %v913_v8, %v883_v58 }
 0x131   : > { %v846_v4 = vrot.slane %v845_v1, 4  ;;  %v915_v6 = vadd.f32 %v914_v3, %v884_v62 }
 0x133   : > { %v847_v43 = vadd.f32 %v846_v4, %v845_v1  ;;  %v916_v7 = vrot.slane %v915_v6, 4 }
 0x135   : > { %v848_v63 = vrot.slane %v847_v43, 2  ;;  %v917_v15 = vadd.f32 %v916_v7, %v915_v6 }
 0x137   : > { %v849_v16 = vadd.f32 %v848_v63, %v847_v43  ;;  %v918_v19 = vrot.slane %v917_v15, 2 }
 0x139   : > { %v850_v20 = vrot.slane %v849_v16, 1  ;;  %v919_v24 = vadd.f32 %v918_v19, %v917_v15 }
 0x13b   : > { %v851_v53 = vadd.f32 %v850_v20, %v849_v16  ;;  %v920_v25 = vrot.slane %v919_v24, 1 }
 0x13d   : > { %852 = vst [vmem:[%s238_s28] sm:$0x1] %v851_v53  ;;  %v921_v14 = vadd.f32 %v920_v25, %v919_v24 }
 0x13f   : > { %922 = vst [vmem:[%s238_s28 + $0x1] sm:$0x1] %v921_v14 }
 0x140 PF: > { %s16_s18 = sadd.s32 1, %s1380_s18  }
 0x141   : > { %p13_p5 = scmp.ge.s32.totalorder %s16_s18, 4  }
 0x143   :  { %15 = sbr.rel (!%p13_p5) target bundleno = 1 (0x1), region = 78 }

// kernel: clone_bottleneck_forward.4
= control target key start
LH: loop header
LB: loop body
LE: loop exit
PB: predicated region body
PF: predicated region fallthrough
CT: control target
= control target key end

     0   :  { %s2148_s21 = smov 0   ;;  %s2286_s0 = inlined_call_operand.vmem [shape: bf16[512,128], index: 0, kind: input, shape index: {}]   ;;  %s2287_s1 = inlined_call_operand.vmem [shape: bf16[128,128], index: 1, kind: input, shape index: {}]   ;;  %s2288_s2 = inlined_call_operand.vmem [shape: bf16[128,128], index: 2, kind: input, shape index: {}]   ;;  %s2289_s3 = inlined_call_operand.vmem [shape: bf16[512,128], index: 3, kind: output, shape index: {0}]   ;;  %s2290_s4 = inlined_call_operand.vmem [shape: bf16[512,128], index: 4, kind: output, shape index: {1}]   ;;  %s2291_s5 = inlined_call_operand.vmem [shape: f32[2,2,128], index: 5, kind: output, shape index: {2}]   ;;  %s2292_s6 = inlined_call_operand.vmem [shape: f32[2,2,128], index: 6, kind: output, shape index: {3}]  }
   0x1 LB: > { %s2154_s22 = sadd.s32 4294967295, %s2111_s21   ;;  %p1560_p0 = scmp.ge.s32.totalorder %s2111_s21, 1  ;;  %s2111_s21 = sphi %s2148_s21, %s17_s21  }
   0x2   : > { %p220_p1 = scmp.lt.s32.totalorder %s2111_s21, 3 }
   0x4   : > { %p221_p2 = pnand %p1560_p0, %p220_p1 }
   0x5   : > { %s1561_s25 = sshll.u32 (!%p221_p2), %s2154_s22, 5  ;;  %p281_p4 = scmp.lt.s32.totalorder (!%p221_p2), %s2154_s22, 1 }
   0x6   : > { %224 = sbr.rel (%p221_p2) target bundleno = 321 (0x141), region = 32  ;;  %p264_p3 = scmp.lt.s32.totalorder (!%p221_p2), %s1561_s25, 63 }
   0xb   : > { %v2073_v0 = vld [vmem:[%s2287_s1 + $0x38] sm:$0xff]   ;;  %v2075_v2 = vld [vmem:[%s2287_s1 + $0x30] sm:$0xff]   ;;  %v2077_v4 = vld [vmem:[%s2287_s1 + $0x28] sm:$0xff]   ;;  %s2294_s25 = smov (!%p264_p3, %s1561_s25), 63  ;;  %s2296_s22 = smov (!%p281_p4, %s2154_s22), 1 }
   0xc   : > { %v2074_v1 = vld [vmem:[%s2288_s2 + $0x38] sm:$0xff]   ;;  %1969 = vmatprep.subr.bf16.mxu0 %v2073_v0  ;;  %v2076_v3 = vld [vmem:[%s2288_s2 + $0x30] sm:$0xff]   ;;  %v2078_v5 = vld [vmem:[%s2288_s2 + $0x28] sm:$0xff]   ;;  %s2183_s16 = sshll.u32 %s2294_s25, 2 }
   0xd   : > { %2017 = vmatprep.subr.bf16.mxu1 %v2074_v1  ;;  %1970 = vmatpush3.bf16.msra.mxu0 %v2073_v0  ;;  %v2079_v6 = vld [vmem:[%s2287_s1 + $0x20] sm:$0xff]   ;;  %v2081_v8 = vld [vmem:[%s2287_s1 + $0x18] sm:$0xff]   ;;  %s2195_s26 = scalar_lea.vmem %s2286_s0, %s2183_s16  ;;  %v2083_v10 = vld [vmem:[%s2287_s1 + $0x10] sm:$0xff]   ;;  %s2235_s17 = scalar_lea.vmem %s2289_s3, %s2183_s16 }
   0xe   : > { %2018 = vmatpush3.bf16.msra.mxu1 %v2074_v1  ;;  %1971 = vmatprep.subr.bf16.mxu0 %v2075_v2  ;;  %v2080_v7 = vld [vmem:[%s2288_s2 + $0x20] sm:$0xff]   ;;  %v2082_v9 = vld [vmem:[%s2288_s2 + $0x18] sm:$0xff]   ;;  %v2084_v12 = vld [vmem:[%s2288_s2 + $0x10] sm:$0xff]   ;;  %s2241_s20 = scalar_lea.vmem %s2290_s4, %s2183_s16  ;;  %s1567_s16 = sshll.u32 %s2296_s22, 1 }
   0xf   : > { %2019 = vmatprep.subr.bf16.mxu1 %v2076_v3  ;;  %v2089_v11 = vld [vmem:[%s2195_s26] sm:$0xff]   ;;  %v2085_v13 = vld [vmem:[%s2287_s1 + $0x8] sm:$0xff]   ;;  %v2091_v18 = vld [vmem:[%s2195_s26 + $0x10] sm:$0xff]   ;;  %s288_s28 = scalar_lea.vmem %s2292_s6, %s1567_s16 }
  0x10   : > { %1985 = vmatprep.mubr.bf16.mxu0 %v2089_v11  ;;  %2033 = vmatprep.mubr.bf16.mxu1 %v2089_v11  ;;  %v2086_v14 = vld [vmem:[%s2288_s2 + $0x8] sm:$0xff]   ;;  %v2087_v15 = vld [vmem:[%s2287_s1] sm:$0xff]   ;;  %v2092_v19 = vld [vmem:[%s2195_s26 + $0x18] sm:$0xff]  }
  0x11   : > { %1972 = vmatpush3.bf16.msra.mxu0 %v2075_v2  ;;  %v2088_v16 = vld [vmem:[%s2288_s2] sm:$0xff]   ;;  %v2090_v17 = vld [vmem:[%s2195_s26 + $0x8] sm:$0xff]   ;;  %v2095_v22 = vld [vmem:[%s2195_s26 + $0x30] sm:$0xff]  }
  0x12   : > { %2020 = vmatpush3.bf16.msra.mxu1 %v2076_v3  ;;  %1973 = vmatprep.subr.bf16.mxu0 %v2077_v4  ;;  %v2093_v20 = vld [vmem:[%s2195_s26 + $0x20] sm:$0xff]   ;;  %v2094_v21 = vld [vmem:[%s2195_s26 + $0x28] sm:$0xff]   ;;  %v2096_v23 = vld [vmem:[%s2195_s26 + $0x38] sm:$0xff]  }
  0x13   : > { %2021 = vmatprep.subr.bf16.mxu1 %v2078_v5  ;;  %v2097_v24 = vld [vmem:[%s2195_s26 + $0x40] sm:$0xff]   ;;  %v2098_v25 = vld [vmem:[%s2195_s26 + $0x48] sm:$0xff]   ;;  %v2099_v26 = vld [vmem:[%s2195_s26 + $0x50] sm:$0xff]  }
  0x14   : > { %v2100_v27 = vld [vmem:[%s2195_s26 + $0x58] sm:$0xff]   ;;  %v2101_v28 = vld [vmem:[%s2195_s26 + $0x60] sm:$0xff]   ;;  %v2102_v29 = vld [vmem:[%s2195_s26 + $0x68] sm:$0xff]  }
  0x15   : > { %1974 = vmatpush3.bf16.msra.mxu0 %v2077_v4  ;;  %v2103_v30 = vld [vmem:[%s2195_s26 + $0x70] sm:$0xff]   ;;  %v2104_v31 = vld [vmem:[%s2195_s26 + $0x78] sm:$0xff]   ;;  %s284_s26 = scalar_lea.vmem %s2291_s5, %s1567_s16 }
  0x16   : > { %2022 = vmatpush3.bf16.msra.mxu1 %v2078_v5  ;;  %1975 = vmatprep.subr.bf16.mxu0 %v2079_v6 }
  0x17   : > { %2023 = vmatprep.subr.bf16.mxu1 %v2080_v7 }
  0x19   : > { %1976 = vmatpush3.bf16.msra.mxu0 %v2079_v6 }
  0x1a   : > { %2024 = vmatpush3.bf16.msra.mxu1 %v2080_v7  ;;  %1977 = vmatprep.subr.bf16.mxu0 %v2081_v8 }
  0x1b   : > { %2025 = vmatprep.subr.bf16.mxu1 %v2082_v9 }
  0x1d   : > { %1978 = vmatpush3.bf16.msra.mxu0 %v2081_v8 }
  0x1e   : > { %2026 = vmatpush3.bf16.msra.mxu1 %v2082_v9  ;;  %1979 = vmatprep.subr.bf16.mxu0 %v2083_v10 }
  0x1f   : > { %2027 = vmatprep.subr.bf16.mxu1 %v2084_v12 }
  0x21   : > { %1980 = vmatpush3.bf16.msra.mxu0 %v2083_v10 }
  0x22   : > { %2028 = vmatpush3.bf16.msra.mxu1 %v2084_v12  ;;  %1981 = vmatprep.subr.bf16.mxu0 %v2085_v13 }
  0x23   : > { %2029 = vmatprep.subr.bf16.mxu1 %v2086_v14 }
  0x25   : > { %1982 = vmatpush3.bf16.msra.mxu0 %v2085_v13 }
  0x26   : > { %2030 = vmatpush3.bf16.msra.mxu1 %v2086_v14  ;;  %1983 = vmatprep.subr.bf16.mxu0 %v2087_v15 }
  0x27   : > { %2031 = vmatprep.subr.bf16.mxu1 %v2088_v16 }
  0x29   : > { %1984 = vmatpush3.bf16.msra.mxu0 %v2087_v15 }
  0x2a   : > { %2032 = vmatpush3.bf16.msra.mxu1 %v2088_v16 }
  0x2c   : > { %1986 = vmatmul.mubr.bf16.vlgmr.msra.gmra.mxu0 %v2090_v17 }
  0x2d   : > { %2034 = vmatmul.mubr.bf16.vlgmr.msra.gmra.mxu1 %v2090_v17  ;;  %1989 = vmatprep.mubr.bf16.mxu0 %v2091_v18 }
  0x2e   : > { %2037 = vmatprep.mubr.bf16.mxu1 %v2091_v18 }
  0x34   : > { %1990 = vmatmul.mubr.bf16.gmra.mxu0 %v2092_v19 }
  0x35   : > { %2038 = vmatmul.mubr.bf16.gmra.mxu1 %v2092_v19  ;;  %1993 = vmatprep.mubr.bf16.mxu0 %v2093_v20 }
  0x36   : > { %2041 = vmatprep.mubr.bf16.mxu1 %v2093_v20 }
  0x3c   : > { %1994 = vmatmul.mubr.bf16.gmra.mxu0 %v2094_v21 }
  0x3d   : > { %2042 = vmatmul.mubr.bf16.gmra.mxu1 %v2094_v21  ;;  %1997 = vmatprep.mubr.bf16.mxu0 %v2095_v22 }
  0x3e   : > { %2045 = vmatprep.mubr.bf16.mxu1 %v2095_v22 }
  0x44   : > { %1998 = vmatmul.mubr.bf16.gmra.mxu0 %v2096_v23 }
  0x45   : > { %2046 = vmatmul.mubr.bf16.gmra.mxu1 %v2096_v23  ;;  %2001 = vmatprep.mubr.bf16.mxu0 %v2097_v24 }
  0x46   : > { %2049 = vmatprep.mubr.bf16.mxu1 %v2097_v24 }
  0x4c   : > { %2002 = vmatmul.mubr.bf16.gmra.mxu0 %v2098_v25 }
  0x4d   : > { %2050 = vmatmul.mubr.bf16.gmra.mxu1 %v2098_v25  ;;  %2005 = vmatprep.mubr.bf16.mxu0 %v2099_v26 }
  0x4e   : > { %2053 = vmatprep.mubr.bf16.mxu1 %v2099_v26 }
  0x54   : > { %2006 = vmatmul.mubr.bf16.gmra.mxu0 %v2100_v27 }
  0x55   : > { %2054 = vmatmul.mubr.bf16.gmra.mxu1 %v2100_v27  ;;  %2009 = vmatprep.mubr.bf16.mxu0 %v2101_v28 }
  0x56   : > { %2057 = vmatprep.mubr.bf16.mxu1 %v2101_v28 }
  0x5c   : > { %2010 = vmatmul.mubr.bf16.gmra.mxu0 %v2102_v29 }
  0x5d   : > { %2058 = vmatmul.mubr.bf16.gmra.mxu1 %v2102_v29  ;;  %2013 = vmatprep.mubr.bf16.mxu0 %v2103_v30 }
  0x5e   : > { %2061 = vmatprep.mubr.bf16.mxu1 %v2103_v30 }
  0x64   : > { %2014 = vmatmul.mubr.bf16.gmra.mxu0 %v2104_v31 }
  0x65   : > { %2062 = vmatmul.mubr.bf16.gmra.mxu1 %v2104_v31 }
  0xec   : > { %v1987_v32 = vpop.f32.mrf.mxu0 }
  0xed   : > { %v2035_v33 = vpop.f32.mrf.mxu1  ;;  %v1228_v51 = vmul.f32 %v1987_v32, %v1987_v32 }
  0xee   : > { %v516_v34 = vpop.f32.mrf.mxu0  ;;  %v1336_v55 = vmul.f32 %v2035_v33, %v2035_v33 }
  0xef   : > { %v741_v35 = vpop.f32.mrf.mxu1  ;;  %v1226_v41 = vmul.f32 %v516_v34, %v516_v34 }
  0xf0   : > { %v1988_v36 = vpop.f32.mrf.mxu0  ;;  %v1334_v46 = vmul.f32 %v741_v35, %v741_v35 }
  0xf1   : > { %v1739_v37 = vpack.c.bf16 %v1988_v36, %v1987_v32  ;;  %v2036_v38 = vpop.f32.mrf.mxu1  ;;  %v1229_v59 = vmul.f32 %v1988_v36, %v1988_v36 }
  0xf2   : > { %v1819_v39 = vpack.c.bf16 %v2036_v38, %v2035_v33  ;;  %v519_v40 = vpop.f32.mrf.mxu0  ;;  %v1337_v63 = vmul.f32 %v2036_v38, %v2036_v38 }
  0xf3   : > { %1891 = vst [vmem:[%s2235_s17 + $0x8] sm:$0xff] %v1739_v37   ;;  %v1734_v42 = vpack.c.bf16 %v519_v40, %v516_v34  ;;  %v1188_v43 = vadd.f32 %v519_v40, %v516_v34  ;;  %v1227_v44 = vmul.f32 %v519_v40, %v519_v40  ;;  %v744_v45 = vpop.f32.mrf.mxu1 }
  0xf4   : > { %1906 = vst [vmem:[%s2241_s20 + $0x8] sm:$0xff] %v1819_v39   ;;  %v1814_v47 = vpack.c.bf16 %v744_v45, %v741_v35  ;;  %v1296_v48 = vadd.f32 %v744_v45, %v741_v35  ;;  %v1335_v49 = vmul.f32 %v744_v45, %v744_v45  ;;  %v1991_v50 = vpop.f32.mrf.mxu0 }
  0xf5   : > { %1735 = vst [vmem:[%s2235_s17] sm:$0xff] %v1734_v42   ;;  %v1189_v52 = vadd.f32 %v1987_v32, %v1188_v43  ;;  %v1258_v53 = vadd.f32 %v1227_v44, %v1226_v41  ;;  %v2039_v54 = vpop.f32.mrf.mxu1  ;;  %v1232_v23 = vmul.f32 %v1991_v50, %v1991_v50 }
  0xf6   : > { %1815 = vst [vmem:[%s2241_s20] sm:$0xff] %v1814_v47   ;;  %v1297_v56 = vadd.f32 %v2035_v33, %v1296_v48  ;;  %v1366_v57 = vadd.f32 %v1335_v49, %v1334_v46  ;;  %v532_v58 = vpop.f32.mrf.mxu0  ;;  %v1340_v27 = vmul.f32 %v2039_v54, %v2039_v54 }
  0xf7   : > { %v1259_v60 = vadd.f32 %v1258_v53, %v1228_v51  ;;  %v1190_v61 = vadd.f32 %v1988_v36, %v1189_v52  ;;  %v757_v62 = vpop.f32.mrf.mxu1  ;;  %v1230_v4 = vmul.f32 %v532_v58, %v532_v58 }
  0xf8   : > { %v1367_v0 = vadd.f32 %v1366_v57, %v1336_v55  ;;  %v1298_v1 = vadd.f32 %v2036_v38, %v1297_v56  ;;  %v1992_v2 = vpop.f32.mrf.mxu0  ;;  %v1338_v9 = vmul.f32 %v757_v62, %v757_v62 }
  0xf9   : > { %v1191_v3 = vadd.f32 %v1190_v61, %v532_v58  ;;  %v1260_v5 = vadd.f32 %v1259_v60, %v1229_v59  ;;  %v1749_v6 = vpack.c.bf16 %v1992_v2, %v1991_v50  ;;  %v2040_v7 = vpop.f32.mrf.mxu1  ;;  %v1233_v31 = vmul.f32 %v1992_v2, %v1992_v2 }
  0xfa   : > { %v1299_v8 = vadd.f32 %v1298_v1, %v757_v62  ;;  %v1368_v10 = vadd.f32 %v1367_v0, %v1337_v63  ;;  %v1829_v11 = vpack.c.bf16 %v2040_v7, %v2039_v54  ;;  %v535_v12 = vpop.f32.mrf.mxu0  ;;  %v1341_v35 = vmul.f32 %v2040_v7, %v2040_v7 }
  0xfb   : > { %v1261_v13 = vadd.f32 %v1260_v5, %v1230_v4  ;;  %1893 = vst [vmem:[%s2235_s17 + $0x18] sm:$0xff] %v1749_v6   ;;  %v1744_v14 = vpack.c.bf16 %v535_v12, %v532_v58  ;;  %v1192_v15 = vadd.f32 %v1191_v3, %v535_v12  ;;  %v1231_v16 = vmul.f32 %v535_v12, %v535_v12  ;;  %v760_v17 = vpop.f32.mrf.mxu1 }
  0xfc   : > { %v1369_v18 = vadd.f32 %v1368_v10, %v1338_v9  ;;  %1908 = vst [vmem:[%s2241_s20 + $0x18] sm:$0xff] %v1829_v11   ;;  %v1824_v19 = vpack.c.bf16 %v760_v17, %v757_v62  ;;  %v1300_v20 = vadd.f32 %v1299_v8, %v760_v17  ;;  %v1339_v21 = vmul.f32 %v760_v17, %v760_v17  ;;  %v1995_v22 = vpop.f32.mrf.mxu0 }
  0xfd   : > { %1892 = vst [vmem:[%s2235_s17 + $0x10] sm:$0xff] %v1744_v14   ;;  %v1193_v24 = vadd.f32 %v1991_v50, %v1192_v15  ;;  %v1262_v25 = vadd.f32 %v1261_v13, %v1231_v16  ;;  %v2043_v26 = vpop.f32.mrf.mxu1  ;;  %v1236_v59 = vmul.f32 %v1995_v22, %v1995_v22 }
  0xfe   : > { %1907 = vst [vmem:[%s2241_s20 + $0x10] sm:$0xff] %v1824_v19   ;;  %v1301_v28 = vadd.f32 %v2039_v54, %v1300_v20  ;;  %v1370_v29 = vadd.f32 %v1369_v18, %v1339_v21  ;;  %v548_v30 = vpop.f32.mrf.mxu0  ;;  %v1344_v63 = vmul.f32 %v2043_v26, %v2043_v26 }
  0xff   : > { %v1263_v32 = vadd.f32 %v1262_v25, %v1232_v23  ;;  %v1194_v33 = vadd.f32 %v1992_v2, %v1193_v24  ;;  %v773_v34 = vpop.f32.mrf.mxu1  ;;  %v1234_v40 = vmul.f32 %v548_v30, %v548_v30 }
 0x100   : > { %v1371_v36 = vadd.f32 %v1370_v29, %v1340_v27  ;;  %v1302_v37 = vadd.f32 %v2040_v7, %v1301_v28  ;;  %v1996_v38 = vpop.f32.mrf.mxu0  ;;  %v1342_v45 = vmul.f32 %v773_v34, %v773_v34 }
 0x101   : > { %v1195_v39 = vadd.f32 %v1194_v33, %v548_v30  ;;  %v1264_v41 = vadd.f32 %v1263_v32, %v1233_v31  ;;  %v1759_v42 = vpack.c.bf16 %v1996_v38, %v1995_v22  ;;  %v2044_v43 = vpop.f32.mrf.mxu1  ;;  %v1237_v3 = vmul.f32 %v1996_v38, %v1996_v38 }
 0x102   : > { %v1303_v44 = vadd.f32 %v1302_v37, %v773_v34  ;;  %v1372_v46 = vadd.f32 %v1371_v36, %v1341_v35  ;;  %v1839_v47 = vpack.c.bf16 %v2044_v43, %v2043_v26  ;;  %v551_v48 = vpop.f32.mrf.mxu0  ;;  %v1345_v7 = vmul.f32 %v2044_v43, %v2044_v43 }
 0x103   : > { %v1265_v49 = vadd.f32 %v1264_v41, %v1234_v40  ;;  %1895 = vst [vmem:[%s2235_s17 + $0x28] sm:$0xff] %v1759_v42   ;;  %v1754_v50 = vpack.c.bf16 %v551_v48, %v548_v30  ;;  %v1196_v51 = vadd.f32 %v1195_v39, %v551_v48  ;;  %v1235_v52 = vmul.f32 %v551_v48, %v551_v48  ;;  %v776_v53 = vpop.f32.mrf.mxu1 }
 0x104   : > { %v1373_v54 = vadd.f32 %v1372_v46, %v1342_v45  ;;  %1910 = vst [vmem:[%s2241_s20 + $0x28] sm:$0xff] %v1839_v47   ;;  %v1834_v55 = vpack.c.bf16 %v776_v53, %v773_v34  ;;  %v1304_v56 = vadd.f32 %v1303_v44, %v776_v53  ;;  %v1343_v57 = vmul.f32 %v776_v53, %v776_v53  ;;  %v1999_v58 = vpop.f32.mrf.mxu0 }
 0x105   : > { %1894 = vst [vmem:[%s2235_s17 + $0x20] sm:$0xff] %v1754_v50   ;;  %v1197_v60 = vadd.f32 %v1995_v22, %v1196_v51  ;;  %v1266_v61 = vadd.f32 %v1265_v49, %v1235_v52  ;;  %v2047_v62 = vpop.f32.mrf.mxu1  ;;  %v1240_v31 = vmul.f32 %v1999_v58, %v1999_v58 }
 0x106   : > { %1909 = vst [vmem:[%s2241_s20 + $0x20] sm:$0xff] %v1834_v55   ;;  %v1305_v0 = vadd.f32 %v2043_v26, %v1304_v56  ;;  %v1374_v1 = vadd.f32 %v1373_v54, %v1343_v57  ;;  %v564_v2 = vpop.f32.mrf.mxu0  ;;  %v1348_v35 = vmul.f32 %v2047_v62, %v2047_v62 }
 0x107   : > { %v1267_v4 = vadd.f32 %v1266_v61, %v1236_v59  ;;  %v1198_v5 = vadd.f32 %v1996_v38, %v1197_v60  ;;  %v789_v6 = vpop.f32.mrf.mxu1  ;;  %v1238_v12 = vmul.f32 %v564_v2, %v564_v2 }
 0x108   : > { %v1375_v8 = vadd.f32 %v1374_v1, %v1344_v63  ;;  %v1306_v9 = vadd.f32 %v2044_v43, %v1305_v0  ;;  %v2000_v10 = vpop.f32.mrf.mxu0  ;;  %v1346_v17 = vmul.f32 %v789_v6, %v789_v6 }
 0x109   : > { %v1199_v11 = vadd.f32 %v1198_v5, %v564_v2  ;;  %v1268_v13 = vadd.f32 %v1267_v4, %v1237_v3  ;;  %v1769_v14 = vpack.c.bf16 %v2000_v10, %v1999_v58  ;;  %v2048_v15 = vpop.f32.mrf.mxu1  ;;  %v1241_v39 = vmul.f32 %v2000_v10, %v2000_v10 }
 0x10a   : > { %v1307_v16 = vadd.f32 %v1306_v9, %v789_v6  ;;  %v1376_v18 = vadd.f32 %v1375_v8, %v1345_v7  ;;  %v1849_v19 = vpack.c.bf16 %v2048_v15, %v2047_v62  ;;  %v567_v20 = vpop.f32.mrf.mxu0  ;;  %v1349_v43 = vmul.f32 %v2048_v15, %v2048_v15 }
 0x10b   : > { %v1269_v21 = vadd.f32 %v1268_v13, %v1238_v12  ;;  %1897 = vst [vmem:[%s2235_s17 + $0x38] sm:$0xff] %v1769_v14   ;;  %v1764_v22 = vpack.c.bf16 %v567_v20, %v564_v2  ;;  %v1200_v23 = vadd.f32 %v1199_v11, %v567_v20  ;;  %v1239_v24 = vmul.f32 %v567_v20, %v567_v20  ;;  %v792_v25 = vpop.f32.mrf.mxu1 }
 0x10c   : > { %v1377_v26 = vadd.f32 %v1376_v18, %v1346_v17  ;;  %1912 = vst [vmem:[%s2241_s20 + $0x38] sm:$0xff] %v1849_v19   ;;  %v1844_v27 = vpack.c.bf16 %v792_v25, %v789_v6  ;;  %v1308_v28 = vadd.f32 %v1307_v16, %v792_v25  ;;  %v1347_v29 = vmul.f32 %v792_v25, %v792_v25  ;;  %v2003_v30 = vpop.f32.mrf.mxu0 }
 0x10d   : > { %1896 = vst [vmem:[%s2235_s17 + $0x30] sm:$0xff] %v1764_v22   ;;  %v1201_v32 = vadd.f32 %v1999_v58, %v1200_v23  ;;  %v1270_v33 = vadd.f32 %v1269_v21, %v1239_v24  ;;  %v2051_v34 = vpop.f32.mrf.mxu1  ;;  %v1244_v3 = vmul.f32 %v2003_v30, %v2003_v30 }
 0x10e   : > { %1911 = vst [vmem:[%s2241_s20 + $0x30] sm:$0xff] %v1844_v27   ;;  %v1309_v36 = vadd.f32 %v2047_v62, %v1308_v28  ;;  %v1378_v37 = vadd.f32 %v1377_v26, %v1347_v29  ;;  %v580_v38 = vpop.f32.mrf.mxu0  ;;  %v1352_v7 = vmul.f32 %v2051_v34, %v2051_v34 }
 0x10f   : > { %v1271_v40 = vadd.f32 %v1270_v33, %v1240_v31  ;;  %v1202_v41 = vadd.f32 %v2000_v10, %v1201_v32  ;;  %v805_v42 = vpop.f32.mrf.mxu1  ;;  %v1242_v48 = vmul.f32 %v580_v38, %v580_v38 }
 0x110   : > { %v1379_v44 = vadd.f32 %v1378_v37, %v1348_v35  ;;  %v1310_v45 = vadd.f32 %v2048_v15, %v1309_v36  ;;  %v2004_v46 = vpop.f32.mrf.mxu0  ;;  %v1350_v53 = vmul.f32 %v805_v42, %v805_v42 }
 0x111   : > { %v1203_v47 = vadd.f32 %v1202_v41, %v580_v38  ;;  %v1272_v49 = vadd.f32 %v1271_v40, %v1241_v39  ;;  %v1779_v50 = vpack.c.bf16 %v2004_v46, %v2003_v30  ;;  %v2052_v51 = vpop.f32.mrf.mxu1  ;;  %v1245_v11 = vmul.f32 %v2004_v46, %v2004_v46 }
 0x112   : > { %v1311_v52 = vadd.f32 %v1310_v45, %v805_v42  ;;  %v1380_v54 = vadd.f32 %v1379_v44, %v1349_v43  ;;  %v1859_v55 = vpack.c.bf16 %v2052_v51, %v2051_v34  ;;  %v583_v56 = vpop.f32.mrf.mxu0  ;;  %v1353_v15 = vmul.f32 %v2052_v51, %v2052_v51 }
 0x113   : > { %v1273_v57 = vadd.f32 %v1272_v49, %v1242_v48  ;;  %1899 = vst [vmem:[%s2235_s17 + $0x48] sm:$0xff] %v1779_v50   ;;  %v1774_v58 = vpack.c.bf16 %v583_v56, %v580_v38  ;;  %v1204_v59 = vadd.f32 %v1203_v47, %v583_v56  ;;  %v1243_v60 = vmul.f32 %v583_v56, %v583_v56  ;;  %v808_v61 = vpop.f32.mrf.mxu1 }
 0x114   : > { %v1381_v62 = vadd.f32 %v1380_v54, %v1350_v53  ;;  %1914 = vst [vmem:[%s2241_s20 + $0x48] sm:$0xff] %v1859_v55   ;;  %v1854_v63 = vpack.c.bf16 %v808_v61, %v805_v42  ;;  %v1312_v0 = vadd.f32 %v1311_v52, %v808_v61  ;;  %v1351_v1 = vmul.f32 %v808_v61, %v808_v61  ;;  %v2007_v2 = vpop.f32.mrf.mxu0 }
 0x115   : > { %1898 = vst [vmem:[%s2235_s17 + $0x40] sm:$0xff] %v1774_v58   ;;  %v1205_v4 = vadd.f32 %v2003_v30, %v1204_v59  ;;  %v1274_v5 = vadd.f32 %v1273_v57, %v1243_v60  ;;  %v2055_v6 = vpop.f32.mrf.mxu1  ;;  %v1248_v39 = vmul.f32 %v2007_v2, %v2007_v2 }
 0x116   : > { %1913 = vst [vmem:[%s2241_s20 + $0x40] sm:$0xff] %v1854_v63   ;;  %v1313_v8 = vadd.f32 %v2051_v34, %v1312_v0  ;;  %v1382_v9 = vadd.f32 %v1381_v62, %v1351_v1  ;;  %v596_v10 = vpop.f32.mrf.mxu0  ;;  %v1356_v43 = vmul.f32 %v2055_v6, %v2055_v6 }
 0x117   : > { %v1275_v12 = vadd.f32 %v1274_v5, %v1244_v3  ;;  %v1206_v13 = vadd.f32 %v2004_v46, %v1205_v4  ;;  %v821_v14 = vpop.f32.mrf.mxu1  ;;  %v1246_v20 = vmul.f32 %v596_v10, %v596_v10 }
 0x118   : > { %v1383_v16 = vadd.f32 %v1382_v9, %v1352_v7  ;;  %v1314_v17 = vadd.f32 %v2052_v51, %v1313_v8  ;;  %v2008_v18 = vpop.f32.mrf.mxu0  ;;  %v1354_v25 = vmul.f32 %v821_v14, %v821_v14 }
 0x119   : > { %v1207_v19 = vadd.f32 %v1206_v13, %v596_v10  ;;  %v1276_v21 = vadd.f32 %v1275_v12, %v1245_v11  ;;  %v1789_v22 = vpack.c.bf16 %v2008_v18, %v2007_v2  ;;  %v2056_v23 = vpop.f32.mrf.mxu1  ;;  %v1249_v47 = vmul.f32 %v2008_v18, %v2008_v18 }
 0x11a   : > { %v1315_v24 = vadd.f32 %v1314_v17, %v821_v14  ;;  %v1384_v26 = vadd.f32 %v1383_v16, %v1353_v15  ;;  %v1869_v27 = vpack.c.bf16 %v2056_v23, %v2055_v6  ;;  %v599_v28 = vpop.f32.mrf.mxu0  ;;  %v1357_v51 = vmul.f32 %v2056_v23, %v2056_v23 }
 0x11b   : > { %v1277_v29 = vadd.f32 %v1276_v21, %v1246_v20  ;;  %1901 = vst [vmem:[%s2235_s17 + $0x58] sm:$0xff] %v1789_v22   ;;  %v1784_v30 = vpack.c.bf16 %v599_v28, %v596_v10  ;;  %v1208_v31 = vadd.f32 %v1207_v19, %v599_v28  ;;  %v1247_v32 = vmul.f32 %v599_v28, %v599_v28  ;;  %v824_v33 = vpop.f32.mrf.mxu1 }
 0x11c   : > { %v1385_v34 = vadd.f32 %v1384_v26, %v1354_v25  ;;  %1916 = vst [vmem:[%s2241_s20 + $0x58] sm:$0xff] %v1869_v27   ;;  %v1864_v35 = vpack.c.bf16 %v824_v33, %v821_v14  ;;  %v1316_v36 = vadd.f32 %v1315_v24, %v824_v33  ;;  %v1355_v37 = vmul.f32 %v824_v33, %v824_v33  ;;  %v2011_v38 = vpop.f32.mrf.mxu0 }
 0x11d   : > { %1900 = vst [vmem:[%s2235_s17 + $0x50] sm:$0xff] %v1784_v30   ;;  %v1209_v40 = vadd.f32 %v2007_v2, %v1208_v31  ;;  %v1278_v41 = vadd.f32 %v1277_v29, %v1247_v32  ;;  %v2059_v42 = vpop.f32.mrf.mxu1  ;;  %v1252_v11 = vmul.f32 %v2011_v38, %v2011_v38 }
 0x11e   : > { %1915 = vst [vmem:[%s2241_s20 + $0x50] sm:$0xff] %v1864_v35   ;;  %v1317_v44 = vadd.f32 %v2055_v6, %v1316_v36  ;;  %v1386_v45 = vadd.f32 %v1385_v34, %v1355_v37  ;;  %v612_v46 = vpop.f32.mrf.mxu0  ;;  %v1360_v15 = vmul.f32 %v2059_v42, %v2059_v42 }
 0x11f   : > { %v1279_v48 = vadd.f32 %v1278_v41, %v1248_v39  ;;  %v1210_v49 = vadd.f32 %v2008_v18, %v1209_v40  ;;  %v837_v50 = vpop.f32.mrf.mxu1  ;;  %v1250_v56 = vmul.f32 %v612_v46, %v612_v46 }
 0x120   : > { %v1387_v52 = vadd.f32 %v1386_v45, %v1356_v43  ;;  %v1318_v53 = vadd.f32 %v2056_v23, %v1317_v44  ;;  %v2012_v54 = vpop.f32.mrf.mxu0  ;;  %v1358_v61 = vmul.f32 %v837_v50, %v837_v50 }
 0x121   : > { %v1211_v55 = vadd.f32 %v1210_v49, %v612_v46  ;;  %v1280_v57 = vadd.f32 %v1279_v48, %v1249_v47  ;;  %v1799_v58 = vpack.c.bf16 %v2012_v54, %v2011_v38  ;;  %v2060_v59 = vpop.f32.mrf.mxu1  ;;  %v1253_v19 = vmul.f32 %v2012_v54, %v2012_v54 }
 0x122   : > { %v1319_v60 = vadd.f32 %v1318_v53, %v837_v50  ;;  %v1388_v62 = vadd.f32 %v1387_v52, %v1357_v51  ;;  %v1879_v63 = vpack.c.bf16 %v2060_v59, %v2059_v42  ;;  %v615_v0 = vpop.f32.mrf.mxu0  ;;  %v1361_v23 = vmul.f32 %v2060_v59, %v2060_v59 }
 0x123   : > { %v1281_v1 = vadd.f32 %v1280_v57, %v1250_v56  ;;  %1903 = vst [vmem:[%s2235_s17 + $0x68] sm:$0xff] %v1799_v58   ;;  %v1794_v2 = vpack.c.bf16 %v615_v0, %v612_v46  ;;  %v1212_v3 = vadd.f32 %v1211_v55, %v615_v0  ;;  %v1251_v4 = vmul.f32 %v615_v0, %v615_v0  ;;  %v840_v5 = vpop.f32.mrf.mxu1 }
 0x124   : > { %v1389_v6 = vadd.f32 %v1388_v62, %v1358_v61  ;;  %1918 = vst [vmem:[%s2241_s20 + $0x68] sm:$0xff] %v1879_v63   ;;  %v1874_v7 = vpack.c.bf16 %v840_v5, %v837_v50  ;;  %v1320_v8 = vadd.f32 %v1319_v60, %v840_v5  ;;  %v1359_v9 = vmul.f32 %v840_v5, %v840_v5  ;;  %v2015_v10 = vpop.f32.mrf.mxu0 }
 0x125   : > { %1902 = vst [vmem:[%s2235_s17 + $0x60] sm:$0xff] %v1794_v2   ;;  %v1213_v12 = vadd.f32 %v2011_v38, %v1212_v3  ;;  %v1282_v13 = vadd.f32 %v1281_v1, %v1251_v4  ;;  %v2063_v14 = vpop.f32.mrf.mxu1  ;;  %v1256_v46 = vmul.f32 %v2015_v10, %v2015_v10 }
 0x126   : > { %1917 = vst [vmem:[%s2241_s20 + $0x60] sm:$0xff] %v1874_v7   ;;  %v1321_v16 = vadd.f32 %v2059_v42, %v1320_v8  ;;  %v1390_v17 = vadd.f32 %v1389_v6, %v1359_v9  ;;  %v628_v18 = vpop.f32.mrf.mxu0  ;;  %v1364_v49 = vmul.f32 %v2063_v14, %v2063_v14 }
 0x127   : > { %v1283_v20 = vadd.f32 %v1282_v13, %v1252_v11  ;;  %v1214_v21 = vadd.f32 %v2012_v54, %v1213_v12  ;;  %v853_v22 = vpop.f32.mrf.mxu1  ;;  %v1254_v28 = vmul.f32 %v628_v18, %v628_v18 }
 0x128   : > { %v1391_v24 = vadd.f32 %v1390_v17, %v1360_v15  ;;  %v1322_v25 = vadd.f32 %v2060_v59, %v1321_v16  ;;  %v2016_v26 = vpop.f32.mrf.mxu0  ;;  %v1362_v33 = vmul.f32 %v853_v22, %v853_v22 }
 0x129   : > { %v1215_v27 = vadd.f32 %v1214_v21, %v628_v18  ;;  %v1284_v29 = vadd.f32 %v1283_v20, %v1253_v19  ;;  %v1809_v30 = vpack.c.bf16 %v2016_v26, %v2015_v10  ;;  %v2064_v31 = vpop.f32.mrf.mxu1  ;;  %v1257_v52 = vmul.f32 %v2016_v26, %v2016_v26 }
 0x12a   : > { %v1323_v32 = vadd.f32 %v1322_v25, %v853_v22  ;;  %v1392_v34 = vadd.f32 %v1391_v24, %v1361_v23  ;;  %v1889_v35 = vpack.c.bf16 %v2064_v31, %v2063_v14  ;;  %v631_v36 = vpop.f32.mrf.mxu0  ;;  %v1365_v55 = vmul.f32 %v2064_v31, %v2064_v31 }
 0x12b   : > { %v1285_v37 = vadd.f32 %v1284_v29, %v1254_v28  ;;  %1905 = vst [vmem:[%s2235_s17 + $0x78] sm:$0xff] %v1809_v30   ;;  %v1804_v38 = vpack.c.bf16 %v631_v36, %v628_v18  ;;  %v1216_v39 = vadd.f32 %v1215_v27, %v631_v36  ;;  %v1255_v40 = vmul.f32 %v631_v36, %v631_v36  ;;  %v856_v41 = vpop.f32.mrf.mxu1 }
 0x12c   : > { %v1393_v42 = vadd.f32 %v1392_v34, %v1362_v33  ;;  %1920 = vst [vmem:[%s2241_s20 + $0x78] sm:$0xff] %v1889_v35   ;;  %v1884_v43 = vpack.c.bf16 %v856_v41, %v853_v22  ;;  %v1324_v44 = vadd.f32 %v1323_v32, %v856_v41  ;;  %v1363_v45 = vmul.f32 %v856_v41, %v856_v41 }
 0x12d   : > { %1904 = vst [vmem:[%s2235_s17 + $0x70] sm:$0xff] %v1804_v38   ;;  %v1217_v47 = vadd.f32 %v2015_v10, %v1216_v39  ;;  %v1286_v48 = vadd.f32 %v1285_v37, %v1255_v40 }
 0x12e   : > { %1919 = vst [vmem:[%s2241_s20 + $0x70] sm:$0xff] %v1884_v43   ;;  %v1325_v50 = vadd.f32 %v2063_v14, %v1324_v44  ;;  %v1394_v51 = vadd.f32 %v1393_v42, %v1363_v45 }
 0x12f   : > { %v1218_v53 = vadd.f32 %v2016_v26, %v1217_v47  ;;  %v1287_v54 = vadd.f32 %v1286_v48, %v1256_v46 }
 0x130   : > { %v1326_v56 = vadd.f32 %v2064_v31, %v1325_v50  ;;  %v1395_v57 = vadd.f32 %v1394_v51, %v1364_v49 }
 0x131   : > { %v1219_v58 = vrot.slane %v1218_v53, 4  ;;  %v1288_v59 = vadd.f32 %v1287_v54, %v1257_v52 }
 0x132   : > { %v1327_v60 = vrot.slane %v1326_v56, 4  ;;  %v1396_v61 = vadd.f32 %v1395_v57, %v1365_v55 }
 0x133   : > { %v1220_v62 = vadd.f32 %v1219_v58, %v1218_v53  ;;  %v1289_v63 = vrot.slane %v1288_v59, 4 }
 0x134   : > { %v1328_v0 = vadd.f32 %v1327_v60, %v1326_v56  ;;  %v1397_v1 = vrot.slane %v1396_v61, 4 }
 0x135   : > { %v1221_v2 = vrot.slane %v1220_v62, 2  ;;  %v1290_v3 = vadd.f32 %v1289_v63, %v1288_v59 }
 0x136   : > { %v1329_v4 = vrot.slane %v1328_v0, 2  ;;  %v1398_v5 = vadd.f32 %v1397_v1, %v1396_v61 }
 0x137   : > { %v1222_v6 = vadd.f32 %v1221_v2, %v1220_v62  ;;  %v1291_v7 = vrot.slane %v1290_v3, 2 }
 0x138   : > { %v1330_v8 = vadd.f32 %v1329_v4, %v1328_v0  ;;  %v1399_v9 = vrot.slane %v1398_v5, 2 }
 0x139   : > { %v1223_v10 = vrot.slane %v1222_v6, 1  ;;  %v1292_v11 = vadd.f32 %v1291_v7, %v1290_v3 }
 0x13a   : > { %v1331_v12 = vrot.slane %v1330_v8, 1  ;;  %v1400_v13 = vadd.f32 %v1399_v9, %v1398_v5 }
 0x13b   : > { %v1224_v14 = vadd.f32 %v1223_v10, %v1222_v6  ;;  %v1293_v15 = vrot.slane %v1292_v11, 1 }
 0x13c   : > { %v1332_v16 = vadd.f32 %v1331_v12, %v1330_v8  ;;  %v1401_v17 = vrot.slane %v1400_v13, 1 }
 0x13d   : > { %1225 = vst [vmem:[%s284_s26] sm:$0x1] %v1224_v14  ;;  %v1294_v18 = vadd.f32 %v1293_v15, %v1292_v11 }
 0x13e   : > { %1333 = vst [vmem:[%s288_s28] sm:$0x1] %v1332_v16  ;;  %v1402_v19 = vadd.f32 %v1401_v17, %v1400_v13 }
 0x13f   : > { %1295 = vst [vmem:[%s284_s26 + $0x1] sm:$0x1] %v1294_v18 }
 0x140   : > { %1403 = vst [vmem:[%s288_s28 + $0x1] sm:$0x1] %v1402_v19 }
 0x141 PF: > { %s17_s21 = sadd.s32 1, %s2111_s21  }
 0x142   : > { %p14_p5 = scmp.ge.s32.totalorder %s17_s21, 4  }
 0x144   :  { %16 = sbr.rel (!%p14_p5) target bundleno = 1 (0x1), region = 98 }

// kernel: clone_bottleneck_forward.7
= control target key start
LH: loop header
LB: loop body
LE: loop exit
PB: predicated region body
PF: predicated region fallthrough
CT: control target
= control target key end

     0   :  { %11 = vsyncpa [#allocation3], 0  ;;  %s1388_s0 = inlined_call_operand.vmem [shape: bf16[512,128], index: 0, kind: input, shape index: {}]   ;;  %s1389_s1 = inlined_call_operand.vmem [shape: bf16[512,128], index: 1, kind: input, shape index: {}]   ;;  %s1390_s2 = inlined_call_operand.vmem [shape: f32[1,128], index: 2, kind: input, shape index: {}]   ;;  %s1391_s3 = inlined_call_operand.vmem [shape: f32[1,128], index: 3, kind: input, shape index: {}]   ;;  %s1392_s4 = inlined_call_operand.vmem [shape: f32[1,128], index: 4, kind: input, shape index: {}]   ;;  %s1393_s5 = inlined_call_operand.vmem [shape: f32[1,128], index: 5, kind: input, shape index: {}]   ;;  %s1394_s6 = inlined_call_operand.hbm [shape: f32[512,128], index: 6, kind: output, shape index: {}]  }
   0x1   :  { %13 = vsyncpa [#allocation3 + $0x1], 0  ;;  %s1061_s21 = smov 0   ;;  %s1063_s22 = smov 0  }
   0x2   :  { %s1065_s23 = smov 0   ;;  %s1067_s24 = smov 0  }
   0x3 LB: > { %s1082_s25 = sadd.s32 4294967295, %s1021_s24   ;;  %s743_s26 = sadd.s32 4294967294, %s1021_s24   ;;  %s1021_s24 = sphi %s1067_s24, %s1400_s24   ;;  %s1017_s23 = sphi %s1065_s23, %s1399_s23   ;;  %s1013_s22 = sphi %s1063_s22, %s1398_s22   ;;  %s1009_s21 = sphi %s1061_s21, %s1397_s21  }
   0x4   : > { %s1086_s27 = sadd.s32 1, %s1021_s24   ;;  %s162_s28 = sadd.s32 1, %s1017_s23 }
   0x5   : > { %s159_s29 = ssub.s32 %s1021_s24, %s1086_s27  ;;  %p172_p0 = scmp.ne.s32.totalorder %s1017_s23, %s1013_s22 }
   0x6   : > { %p160_p1 = scmp.eq.s32.totalorder %s159_s29, 0  ;;  %p173_p2 = scmp.eq.s32.totalorder %s1082_s25, 1 }
   0x7   : > { %p178_p3 = scmp.ne.s32.totalorder %s1013_s22, %s1009_s21  ;;  %p179_p4 = scmp.eq.s32.totalorder %s743_s26, 1 }
   0x8   : > { %s1097_s30 = scalar_select %p160_p1, %s1017_s23, %s162_s28  }
   0x9   : > { %p1099_p5 = por %p173_p2, %p172_p0  ;;  %p1103_p6 = por %p179_p4, %p178_p3 }
   0xa   : > { %p746_p7 = scmp.ge.s32.totalorder %s1021_s24, 1  ;;  %p227_p8 = scmp.lt.s32.totalorder %s1021_s24, 3 }
   0xc   : > { %p228_p9 = pnand %p746_p7, %p227_p8 }
   0xd   : > { %s748_s9 = sshll.u32 (!%p228_p9), %s1082_s25, 5  ;;  %s259_s26 = sand.u32 (!%p228_p9), 1, %s1013_s22  }
   0xe   : > { %231 = sbr.rel (%p228_p9) target bundleno = 107 (0x6b), region = 44  ;;  %p263_p10 = scmp.lt.s32.totalorder (!%p228_p9), %s748_s9, 63 }
   0xf   : > { %s747_s11 = sshll.u32 (!%p228_p9), %s259_s26, 8  ;;  %s1348_s18 = scalar_lea.sflag (!%p228_p9), [#allocation3], %s259_s26 }
  0x10   : > { %s1172_s12 = scalar_lea.vmem (!%p228_p9), [#allocation2], %s747_s11  ;;  %s1023_s19 = smov (!%p228_p9), [#allocation2]  }
  0x11   : > { %s669_s14 = sshll.u32 (!%p228_p9), %s1172_s12, 4  ;;  %s965_s20 = sshll.u32 (!%p228_p9), %s1023_s19, 4  ;;  %s1343_s14 = int_to_ptr.vmem [resolvable:$true] %s669_s14  ;;  %s966_s20 = int_to_ptr.vmem [resolvable:$false] %s965_s20 }
  0x12   : > { %s967_s28 = scalar_lea.vmem (!%p228_p9), %s966_s20, 8192  ;;  %p968_p0 = scmp.lt.s32.totalorder (!%p228_p9), %s1343_s14, %s966_s20 }
  0x13   : > { %s1402_s9 = smov (!%p263_p10, %s748_s9), 63  ;;  %v1123_v0 = vld [vmem:[%s1390_s2] ss:$0 sm:$0xff] }
  0x14   : > { %s749_s10 = sshll.u32 %s1402_s9, 2  ;;  %v1128_v1 = vld [vmem:[%s1392_s4] ss:$0 sm:$0xff] }
  0x15   : > { %s1113_s13 = scalar_lea.vmem %s1388_s0, %s749_s10  ;;  %s1118_s16 = scalar_lea.vmem %s1389_s1, %s749_s10  ;;  %v1138_v10 = vld [vmem:[%s1391_s3] ss:$0 sm:$0xff] }
  0x16   : > { %v763_v2 = vld [vmem:[%s1113_s13] sm:$0xff]   ;;  %v890_v4 = vld [vmem:[%s1113_s13 + $0x8] sm:$0xff]   ;;  %v891_v24 = vld [vmem:[%s1113_s13 + $0x10] sm:$0xff]  }
  0x17   : > { %v827_v3 = vld [vmem:[%s1118_s16] sm:$0xff]   ;;  %v764_v5 = vunpack.c.l.bf16 %v763_v2  ;;  %v765_v7 = vunpack.c.h.bf16 %v763_v2  ;;  %v905_v9 = vld [vmem:[%s1118_s16 + $0x8] sm:$0xff]   ;;  %v768_v12 = vunpack.c.l.bf16 %v890_v4  ;;  %v769_v14 = vunpack.c.h.bf16 %v890_v4  ;;  %v906_v25 = vld [vmem:[%s1118_s16 + $0x10] sm:$0xff]  }
  0x18   : > { %v828_v6 = vunpack.c.l.bf16 %v827_v3  ;;  %v829_v8 = vunpack.c.h.bf16 %v827_v3  ;;  %v1143_v11 = vld [vmem:[%s1393_s5] ss:$0 sm:$0xff]  ;;  %v832_v13 = vunpack.c.l.bf16 %v905_v9  ;;  %v833_v15 = vunpack.c.h.bf16 %v905_v9  ;;  %v892_v42 = vld [vmem:[%s1113_s13 + $0x18] sm:$0xff]  }
  0x19   : > { %v346_v16 = vmul.f32 %v764_v5, %v1123_v0  ;;  %v347_v18 = vmul.f32 %v765_v7, %v1123_v0  ;;  %v348_v20 = vmul.f32 %v768_v12, %v1123_v0  ;;  %v349_v22 = vmul.f32 %v769_v14, %v1123_v0  ;;  %v907_v43 = vld [vmem:[%s1118_s16 + $0x18] sm:$0xff]   ;;  %v893_v52 = vld [vmem:[%s1113_s13 + $0x20] sm:$0xff]   ;;  %v894_v14 = vld [vmem:[%s1113_s13 + $0x28] sm:$0xff]  }
  0x1a   : > { %v488_v17 = vmul.f32 %v828_v6, %v1128_v1  ;;  %v489_v19 = vmul.f32 %v829_v8, %v1128_v1  ;;  %v490_v21 = vmul.f32 %v832_v13, %v1128_v1  ;;  %v491_v23 = vmul.f32 %v833_v15, %v1128_v1  ;;  %v908_v57 = vld [vmem:[%s1118_s16 + $0x20] sm:$0xff]   ;;  %v909_v15 = vld [vmem:[%s1118_s16 + $0x28] sm:$0xff]  }
  0x1b   : > { %v385_v26 = vadd.f32 %v1138_v10, %v346_v16  ;;  %v386_v28 = vadd.f32 %v1138_v10, %v347_v18  ;;  %v387_v30 = vadd.f32 %v1138_v10, %v348_v20  ;;  %v388_v32 = vadd.f32 %v1138_v10, %v349_v22 }
  0x1c   : > { %v527_v27 = vadd.f32 %v1143_v11, %v488_v17  ;;  %v528_v29 = vadd.f32 %v1143_v11, %v489_v19  ;;  %v529_v31 = vadd.f32 %v1143_v11, %v490_v21  ;;  %v530_v33 = vadd.f32 %v1143_v11, %v491_v23 }
  0x1d   : > { %v772_v36 = vunpack.c.l.bf16 %v891_v24  ;;  %v836_v37 = vunpack.c.l.bf16 %v906_v25  ;;  %v773_v40 = vunpack.c.h.bf16 %v891_v24  ;;  %v837_v41 = vunpack.c.h.bf16 %v906_v25 }
  0x1e   : > { %v559_v34 = vadd.f32 %v527_v27, %v385_v26  ;;  %v560_v35 = vadd.f32 %v528_v29, %v386_v28  ;;  %v561_v38 = vadd.f32 %v529_v31, %v387_v30  ;;  %v562_v39 = vadd.f32 %v530_v33, %v388_v32  ;;  %v895_v32 = vld [vmem:[%s1113_s13 + $0x30] sm:$0xff]  }
  0x1f   : > { %v350_v46 = vmul.f32 %v772_v36, %v1123_v0  ;;  %v492_v47 = vmul.f32 %v836_v37, %v1128_v1  ;;  %v351_v50 = vmul.f32 %v773_v40, %v1123_v0  ;;  %v493_v51 = vmul.f32 %v837_v41, %v1128_v1  ;;  %v910_v37 = vld [vmem:[%s1118_s16 + $0x30] sm:$0xff]  }
  0x20   : > { %v591_v44 = vmax.f32 %v559_v34, 0.0  ;;  %v592_v45 = vmax.f32 %v560_v35, 0.0  ;;  %v593_v48 = vmax.f32 %v561_v38, 0.0  ;;  %v594_v49 = vmax.f32 %v562_v39, 0.0 }
  0x21   : > { %v389_v53 = vadd.f32 %v1138_v10, %v350_v46  ;;  %v531_v54 = vadd.f32 %v1143_v11, %v492_v47  ;;  %v776_v55 = vunpack.c.l.bf16 %v892_v42  ;;  %v840_v56 = vunpack.c.l.bf16 %v907_v43  ;;  %v896_v46 = vld [vmem:[%s1113_s13 + $0x38] sm:$0xff]  }
  0x22   : > { %623 = vst [vmem:[%s1172_s12] sm:$0xff] %v591_v44  ;;  %624 = vst [vmem:[%s1172_s12 + $0x8] sm:$0xff] %v592_v45  ;;  %v390_v58 = vadd.f32 %v1138_v10, %v351_v50  ;;  %v532_v59 = vadd.f32 %v1143_v11, %v493_v51  ;;  %v777_v60 = vunpack.c.h.bf16 %v892_v42  ;;  %v841_v61 = vunpack.c.h.bf16 %v907_v43 }
  0x23   : > { %625 = vst [vmem:[%s1172_s12 + $0x10] sm:$0xff] %v593_v48  ;;  %626 = vst [vmem:[%s1172_s12 + $0x18] sm:$0xff] %v594_v49  ;;  %v563_v62 = vadd.f32 %v531_v54, %v389_v53  ;;  %v352_v63 = vmul.f32 %v776_v55, %v1123_v0  ;;  %v494_v2 = vmul.f32 %v840_v56, %v1128_v1  ;;  %v780_v3 = vunpack.c.l.bf16 %v893_v52  ;;  %v911_v55 = vld [vmem:[%s1118_s16 + $0x38] sm:$0xff]  }
  0x24   : > { %v564_v4 = vadd.f32 %v532_v59, %v390_v58  ;;  %v353_v5 = vmul.f32 %v777_v60, %v1123_v0  ;;  %v495_v6 = vmul.f32 %v841_v61, %v1128_v1  ;;  %v844_v7 = vunpack.c.l.bf16 %v908_v57 }
  0x25   : > { %v595_v8 = vmax.f32 %v563_v62, 0.0  ;;  %v391_v9 = vadd.f32 %v1138_v10, %v352_v63  ;;  %v533_v12 = vadd.f32 %v1143_v11, %v494_v2  ;;  %v354_v13 = vmul.f32 %v780_v3, %v1123_v0 }
  0x26   : > { %v596_v16 = vmax.f32 %v564_v4, 0.0  ;;  %v392_v17 = vadd.f32 %v1138_v10, %v353_v5  ;;  %v534_v18 = vadd.f32 %v1143_v11, %v495_v6  ;;  %v496_v19 = vmul.f32 %v844_v7, %v1128_v1  ;;  %v897_v6 = vld [vmem:[%s1113_s13 + $0x40] sm:$0xff]  }
  0x27   : > { %627 = vst [vmem:[%s1172_s12 + $0x20] sm:$0xff] %v595_v8  ;;  %v565_v20 = vadd.f32 %v533_v12, %v391_v9  ;;  %v393_v21 = vadd.f32 %v1138_v10, %v354_v13  ;;  %v781_v22 = vunpack.c.h.bf16 %v893_v52  ;;  %v845_v23 = vunpack.c.h.bf16 %v908_v57  ;;  %v912_v13 = vld [vmem:[%s1118_s16 + $0x40] sm:$0xff]  }
  0x28   : > { %628 = vst [vmem:[%s1172_s12 + $0x28] sm:$0xff] %v596_v16  ;;  %v566_v24 = vadd.f32 %v534_v18, %v392_v17  ;;  %v535_v25 = vadd.f32 %v1143_v11, %v496_v19  ;;  %v784_v26 = vunpack.c.l.bf16 %v894_v14  ;;  %v848_v27 = vunpack.c.l.bf16 %v909_v15 }
  0x29   : > { %v597_v28 = vmax.f32 %v565_v20, 0.0  ;;  %v355_v29 = vmul.f32 %v781_v22, %v1123_v0  ;;  %v497_v30 = vmul.f32 %v845_v23, %v1128_v1  ;;  %v785_v31 = vunpack.c.h.bf16 %v894_v14 }
  0x2a   : > { %v598_v33 = vmax.f32 %v566_v24, 0.0  ;;  %v567_v34 = vadd.f32 %v535_v25, %v393_v21  ;;  %v356_v35 = vmul.f32 %v784_v26, %v1123_v0  ;;  %v498_v36 = vmul.f32 %v848_v27, %v1128_v1  ;;  %v898_v26 = vld [vmem:[%s1113_s13 + $0x48] sm:$0xff]  }
  0x2b   : > { %629 = vst [vmem:[%s1172_s12 + $0x30] sm:$0xff] %v597_v28  ;;  %v394_v38 = vadd.f32 %v1138_v10, %v355_v29  ;;  %v536_v39 = vadd.f32 %v1143_v11, %v497_v30  ;;  %v357_v40 = vmul.f32 %v785_v31, %v1123_v0  ;;  %v849_v41 = vunpack.c.h.bf16 %v909_v15  ;;  %v913_v27 = vld [vmem:[%s1118_s16 + $0x48] sm:$0xff]  }
  0x2c   : > { %630 = vst [vmem:[%s1172_s12 + $0x38] sm:$0xff] %v598_v33  ;;  %v599_v42 = vmax.f32 %v567_v34, 0.0  ;;  %v395_v43 = vadd.f32 %v1138_v10, %v356_v35  ;;  %v537_v44 = vadd.f32 %v1143_v11, %v498_v36  ;;  %v788_v45 = vunpack.c.l.bf16 %v895_v32 }
  0x2d   : > { %v568_v47 = vadd.f32 %v536_v39, %v394_v38  ;;  %v396_v48 = vadd.f32 %v1138_v10, %v357_v40  ;;  %v499_v49 = vmul.f32 %v849_v41, %v1128_v1  ;;  %v852_v50 = vunpack.c.l.bf16 %v910_v37  ;;  %v899_v40 = vld [vmem:[%s1113_s13 + $0x50] sm:$0xff]  }
  0x2e   : > { %631 = vst [vmem:[%s1172_s12 + $0x40] sm:$0xff] %v599_v42  ;;  %v569_v51 = vadd.f32 %v537_v44, %v395_v43  ;;  %v358_v52 = vmul.f32 %v788_v45, %v1123_v0  ;;  %v789_v53 = vunpack.c.h.bf16 %v895_v32  ;;  %v853_v54 = vunpack.c.h.bf16 %v910_v37  ;;  %v914_v45 = vld [vmem:[%s1118_s16 + $0x50] sm:$0xff]  }
  0x2f   : > { %v600_v56 = vmax.f32 %v568_v47, 0.0  ;;  %v538_v57 = vadd.f32 %v1143_v11, %v499_v49  ;;  %v500_v58 = vmul.f32 %v852_v50, %v1128_v1  ;;  %v792_v59 = vunpack.c.l.bf16 %v896_v46 }
  0x30   : > { %v601_v60 = vmax.f32 %v569_v51, 0.0  ;;  %v397_v61 = vadd.f32 %v1138_v10, %v358_v52  ;;  %v359_v62 = vmul.f32 %v789_v53, %v1123_v0  ;;  %v501_v63 = vmul.f32 %v853_v54, %v1128_v1 }
  0x31   : > { %632 = vst [vmem:[%s1172_s12 + $0x48] sm:$0xff] %v600_v56  ;;  %v570_v2 = vadd.f32 %v538_v57, %v396_v48  ;;  %v539_v3 = vadd.f32 %v1143_v11, %v500_v58  ;;  %v360_v4 = vmul.f32 %v792_v59, %v1123_v0  ;;  %v856_v5 = vunpack.c.l.bf16 %v911_v55 }
  0x32   : > { %633 = vst [vmem:[%s1172_s12 + $0x50] sm:$0xff] %v601_v60  ;;  %v398_v7 = vadd.f32 %v1138_v10, %v359_v62  ;;  %v540_v8 = vadd.f32 %v1143_v11, %v501_v63  ;;  %v793_v9 = vunpack.c.h.bf16 %v896_v46  ;;  %v857_v12 = vunpack.c.h.bf16 %v911_v55  ;;  %v900_v62 = vld [vmem:[%s1113_s13 + $0x58] sm:$0xff]  }
  0x33   : > { %v602_v14 = vmax.f32 %v570_v2, 0.0  ;;  %v571_v15 = vadd.f32 %v539_v3, %v397_v61  ;;  %v399_v16 = vadd.f32 %v1138_v10, %v360_v4  ;;  %v502_v17 = vmul.f32 %v856_v5, %v1128_v1  ;;  %v915_v5 = vld [vmem:[%s1118_s16 + $0x58] sm:$0xff]  }
  0x34   : > { %v572_v18 = vadd.f32 %v540_v8, %v398_v7  ;;  %v361_v19 = vmul.f32 %v793_v9, %v1123_v0  ;;  %v503_v20 = vmul.f32 %v857_v12, %v1128_v1  ;;  %v796_v21 = vunpack.c.l.bf16 %v897_v6 }
  0x35   : > { %634 = vst [vmem:[%s1172_s12 + $0x58] sm:$0xff] %v602_v14  ;;  %v603_v22 = vmax.f32 %v571_v15, 0.0  ;;  %v541_v23 = vadd.f32 %v1143_v11, %v502_v17  ;;  %v860_v24 = vunpack.c.l.bf16 %v912_v13  ;;  %v797_v25 = vunpack.c.h.bf16 %v897_v6 }
  0x36   : > { %v604_v28 = vmax.f32 %v572_v18, 0.0  ;;  %v400_v29 = vadd.f32 %v1138_v10, %v361_v19  ;;  %v542_v30 = vadd.f32 %v1143_v11, %v503_v20  ;;  %v362_v31 = vmul.f32 %v796_v21, %v1123_v0  ;;  %v901_v20 = vld [vmem:[%s1113_s13 + $0x60] sm:$0xff]  }
  0x37   : > { %635 = vst [vmem:[%s1172_s12 + $0x60] sm:$0xff] %v603_v22  ;;  %v573_v32 = vadd.f32 %v541_v23, %v399_v16  ;;  %v504_v33 = vmul.f32 %v860_v24, %v1128_v1  ;;  %v363_v34 = vmul.f32 %v797_v25, %v1123_v0  ;;  %v861_v35 = vunpack.c.h.bf16 %v912_v13  ;;  %v916_v25 = vld [vmem:[%s1118_s16 + $0x60] sm:$0xff]  }
  0x38   : > { %636 = vst [vmem:[%s1172_s12 + $0x68] sm:$0xff] %v604_v28  ;;  %v574_v36 = vadd.f32 %v542_v30, %v400_v29  ;;  %v401_v37 = vadd.f32 %v1138_v10, %v362_v31  ;;  %v800_v38 = vunpack.c.l.bf16 %v898_v26  ;;  %v864_v39 = vunpack.c.l.bf16 %v913_v27 }
  0x39   : > { %v605_v41 = vmax.f32 %v573_v32, 0.0  ;;  %v543_v42 = vadd.f32 %v1143_v11, %v504_v33  ;;  %v402_v43 = vadd.f32 %v1138_v10, %v363_v34  ;;  %v505_v44 = vmul.f32 %v861_v35, %v1128_v1  ;;  %v902_v34 = vld [vmem:[%s1113_s13 + $0x68] sm:$0xff]  }
  0x3a   : > { %v606_v46 = vmax.f32 %v574_v36, 0.0  ;;  %v364_v47 = vmul.f32 %v800_v38, %v1123_v0  ;;  %v506_v48 = vmul.f32 %v864_v39, %v1128_v1  ;;  %v801_v49 = vunpack.c.h.bf16 %v898_v26 }
  0x3b   : > { %637 = vst [vmem:[%s1172_s12 + $0x70] sm:$0xff] %v605_v41  ;;  %v575_v50 = vadd.f32 %v543_v42, %v401_v37  ;;  %v544_v51 = vadd.f32 %v1143_v11, %v505_v44  ;;  %v865_v52 = vunpack.c.h.bf16 %v913_v27  ;;  %v804_v53 = vunpack.c.l.bf16 %v899_v40 }
  0x3c   : > { %638 = vst [vmem:[%s1172_s12 + $0x78] sm:$0xff] %v606_v46  ;;  %v403_v54 = vadd.f32 %v1138_v10, %v364_v47  ;;  %v545_v55 = vadd.f32 %v1143_v11, %v506_v48  ;;  %v365_v56 = vmul.f32 %v801_v49, %v1123_v0  ;;  %v868_v57 = vunpack.c.l.bf16 %v914_v45 }
  0x3d   : > { %v607_v58 = vmax.f32 %v575_v50, 0.0  ;;  %v576_v59 = vadd.f32 %v544_v51, %v402_v43  ;;  %v507_v60 = vmul.f32 %v865_v52, %v1128_v1  ;;  %v366_v61 = vmul.f32 %v804_v53, %v1123_v0  ;;  %v917_v43 = vld [vmem:[%s1118_s16 + $0x68] sm:$0xff]  }
  0x3e   : > { %v577_v63 = vadd.f32 %v545_v55, %v403_v54  ;;  %v404_v2 = vadd.f32 %v1138_v10, %v365_v56  ;;  %v508_v3 = vmul.f32 %v868_v57, %v1128_v1  ;;  %v805_v4 = vunpack.c.h.bf16 %v899_v40  ;;  %v903_v56 = vld [vmem:[%s1113_s13 + $0x70] sm:$0xff]  }
  0x3f   : > { %639 = vst [vmem:[%s1172_s12 + $0x80] sm:$0xff] %v607_v58  ;;  %v608_v6 = vmax.f32 %v576_v59, 0.0  ;;  %v546_v7 = vadd.f32 %v1143_v11, %v507_v60  ;;  %v405_v8 = vadd.f32 %v1138_v10, %v366_v61  ;;  %v869_v9 = vunpack.c.h.bf16 %v914_v45  ;;  %v918_v57 = vld [vmem:[%s1118_s16 + $0x70] sm:$0xff]  }
  0x40   : > { %v609_v12 = vmax.f32 %v577_v63, 0.0  ;;  %v547_v13 = vadd.f32 %v1143_v11, %v508_v3  ;;  %v367_v14 = vmul.f32 %v805_v4, %v1123_v0  ;;  %v808_v15 = vunpack.c.l.bf16 %v900_v62 }
  0x41   : > { %640 = vst [vmem:[%s1172_s12 + $0x88] sm:$0xff] %v608_v6  ;;  %v578_v16 = vadd.f32 %v546_v7, %v404_v2  ;;  %v509_v17 = vmul.f32 %v869_v9, %v1128_v1  ;;  %v872_v18 = vunpack.c.l.bf16 %v915_v5  ;;  %v809_v19 = vunpack.c.h.bf16 %v900_v62 }
  0x42   : > { %641 = vst [vmem:[%s1172_s12 + $0x90] sm:$0xff] %v609_v12  ;;  %v579_v21 = vadd.f32 %v547_v13, %v405_v8  ;;  %v406_v22 = vadd.f32 %v1138_v10, %v367_v14  ;;  %v368_v23 = vmul.f32 %v808_v15, %v1123_v0  ;;  %v873_v24 = vunpack.c.h.bf16 %v915_v5  ;;  %v904_v14 = vld [vmem:[%s1113_s13 + $0x78] sm:$0xff]   ;;  %s761_s13 = sshll.u32 %s1082_s25, 12  ;;  %s961_s25 = scalar_lea.vmem %s1343_s14, 4096 }
  0x43   : > { %v610_v26 = vmax.f32 %v578_v16, 0.0  ;;  %v548_v27 = vadd.f32 %v1143_v11, %v509_v17  ;;  %v510_v28 = vmul.f32 %v872_v18, %v1128_v1  ;;  %v369_v29 = vmul.f32 %v809_v19, %v1123_v0  ;;  %v919_v15 = vld [vmem:[%s1118_s16 + $0x78] sm:$0xff]   ;;  %s1341_s17 = scalar_lea.hbm %s1394_s6, %s761_s13  ;;  %p962_p11 = scmp.ne.s32.totalorder %s1343_s14, %s961_s25 }
  0x44   : > { %v611_v30 = vmax.f32 %v579_v21, 0.0  ;;  %v407_v31 = vadd.f32 %v1138_v10, %v368_v23  ;;  %v511_v32 = vmul.f32 %v873_v24, %v1128_v1  ;;  %v812_v33 = vunpack.c.l.bf16 %v901_v20  ;;  %p969_p1 = scmp.lt.s32.totalorder %s967_s28, %s961_s25 }
  0x45   : > { %642 = vst [vmem:[%s1172_s12 + $0x98] sm:$0xff] %v610_v26  ;;  %v580_v35 = vadd.f32 %v548_v27, %v406_v22  ;;  %v549_v36 = vadd.f32 %v1143_v11, %v510_v28  ;;  %v408_v37 = vadd.f32 %v1138_v10, %v369_v29  ;;  %v876_v38 = vunpack.c.l.bf16 %v916_v25  ;;  %p963_p12 = pnand %p962_p11, %p1099_p5 }
  0x46   : > { %643 = vst [vmem:[%s1172_s12 + $0xa0] sm:$0xff] %v611_v30  ;;  %v550_v39 = vadd.f32 %v1143_v11, %v511_v32  ;;  %v370_v40 = vmul.f32 %v812_v33, %v1123_v0  ;;  %v813_v41 = vunpack.c.h.bf16 %v901_v20  ;;  %v877_v42 = vunpack.c.h.bf16 %v916_v25  ;;  %p970_p2 = por %p969_p1, %p968_p0 }
  0x47   : > { %v612_v44 = vmax.f32 %v580_v35, 0.0  ;;  %v581_v45 = vadd.f32 %v549_v36, %v407_v31  ;;  %v512_v46 = vmul.f32 %v876_v38, %v1128_v1  ;;  %v816_v47 = vunpack.c.l.bf16 %v902_v34  ;;  %p964_p13 = pneg %p963_p12 }
  0x48   : > { %v582_v48 = vadd.f32 %v550_v39, %v408_v37  ;;  %v409_v49 = vadd.f32 %v1138_v10, %v370_v40  ;;  %v371_v50 = vmul.f32 %v813_v41, %v1123_v0  ;;  %v513_v51 = vmul.f32 %v877_v42, %v1128_v1 }
  0x49   : > { %644 = vst [vmem:[%s1172_s12 + $0xa8] sm:$0xff] %v612_v44  ;;  %v613_v52 = vmax.f32 %v581_v45, 0.0  ;;  %v551_v53 = vadd.f32 %v1143_v11, %v512_v46  ;;  %v372_v54 = vmul.f32 %v816_v47, %v1123_v0  ;;  %v880_v55 = vunpack.c.l.bf16 %v917_v43  ;;  %p971_p3 = pnand %p970_p2, %p964_p13 }
  0x4a   : > { %v614_v58 = vmax.f32 %v582_v48, 0.0  ;;  %v410_v59 = vadd.f32 %v1138_v10, %v371_v50  ;;  %v552_v60 = vadd.f32 %v1143_v11, %v513_v51  ;;  %v817_v61 = vunpack.c.h.bf16 %v902_v34 }
  0x4b   : > { %645 = vst [vmem:[%s1172_s12 + $0xb0] sm:$0xff] %v613_v52  ;;  %v583_v62 = vadd.f32 %v551_v53, %v409_v49  ;;  %v411_v63 = vadd.f32 %v1138_v10, %v372_v54  ;;  %v514_v2 = vmul.f32 %v880_v55, %v1128_v1  ;;  %v881_v3 = vunpack.c.h.bf16 %v917_v43 }
  0x4c   : > { %646 = vst [vmem:[%s1172_s12 + $0xb8] sm:$0xff] %v614_v58  ;;  %v584_v4 = vadd.f32 %v552_v60, %v410_v59  ;;  %v373_v5 = vmul.f32 %v817_v61, %v1123_v0  ;;  %v820_v6 = vunpack.c.l.bf16 %v903_v56  ;;  %v884_v7 = vunpack.c.l.bf16 %v918_v57 }
  0x4d   : > { %v615_v8 = vmax.f32 %v583_v62, 0.0  ;;  %v553_v9 = vadd.f32 %v1143_v11, %v514_v2  ;;  %v515_v12 = vmul.f32 %v881_v3, %v1128_v1  ;;  %v821_v13 = vunpack.c.h.bf16 %v903_v56 }
  0x4e   : > { %v616_v16 = vmax.f32 %v584_v4, 0.0  ;;  %v412_v17 = vadd.f32 %v1138_v10, %v373_v5  ;;  %v374_v18 = vmul.f32 %v820_v6, %v1123_v0  ;;  %v516_v19 = vmul.f32 %v884_v7, %v1128_v1 }
  0x4f   : > { %647 = vst [vmem:[%s1172_s12 + $0xc0] sm:$0xff] %v615_v8  ;;  %v585_v20 = vadd.f32 %v553_v9, %v411_v63  ;;  %v554_v21 = vadd.f32 %v1143_v11, %v515_v12  ;;  %v375_v22 = vmul.f32 %v821_v13, %v1123_v0  ;;  %v885_v23 = vunpack.c.h.bf16 %v918_v57 }
  0x50   : > { %648 = vst [vmem:[%s1172_s12 + $0xc8] sm:$0xff] %v616_v16  ;;  %v413_v24 = vadd.f32 %v1138_v10, %v374_v18  ;;  %v555_v25 = vadd.f32 %v1143_v11, %v516_v19  ;;  %v824_v26 = vunpack.c.l.bf16 %v904_v14  ;;  %v888_v27 = vunpack.c.l.bf16 %v919_v15 }
  0x51   : > { %v617_v28 = vmax.f32 %v585_v20, 0.0  ;;  %v586_v29 = vadd.f32 %v554_v21, %v412_v17  ;;  %v414_v30 = vadd.f32 %v1138_v10, %v375_v22  ;;  %v517_v31 = vmul.f32 %v885_v23, %v1128_v1 }
  0x52   : > { %v587_v32 = vadd.f32 %v555_v25, %v413_v24  ;;  %v376_v33 = vmul.f32 %v824_v26, %v1123_v0  ;;  %v518_v34 = vmul.f32 %v888_v27, %v1128_v1  ;;  %v825_v35 = vunpack.c.h.bf16 %v904_v14 }
  0x53   : > { %649 = vst [vmem:[%s1172_s12 + $0xd0] sm:$0xff] %v617_v28  ;;  %v618_v36 = vmax.f32 %v586_v29, 0.0  ;;  %v556_v37 = vadd.f32 %v1143_v11, %v517_v31  ;;  %v889_v38 = vunpack.c.h.bf16 %v919_v15 }
  0x54   : > { %v619_v39 = vmax.f32 %v587_v32, 0.0  ;;  %v415_v40 = vadd.f32 %v1138_v10, %v376_v33  ;;  %v557_v41 = vadd.f32 %v1143_v11, %v518_v34  ;;  %v377_v42 = vmul.f32 %v825_v35, %v1123_v0 }
  0x55   : > { %650 = vst [vmem:[%s1172_s12 + $0xd8] sm:$0xff] %v618_v36  ;;  %v588_v43 = vadd.f32 %v556_v37, %v414_v30  ;;  %v519_v44 = vmul.f32 %v889_v38, %v1128_v1 }
  0x56   : > { %651 = vst [vmem:[%s1172_s12 + $0xe0] sm:$0xff] %v619_v39  ;;  %v589_v45 = vadd.f32 %v557_v41, %v415_v40  ;;  %v416_v46 = vadd.f32 %v1138_v10, %v377_v42 }
  0x57   : > { %v620_v47 = vmax.f32 %v588_v43, 0.0  ;;  %v558_v48 = vadd.f32 %v1143_v11, %v519_v44 }
  0x58   : > { %v621_v49 = vmax.f32 %v589_v45, 0.0 }
  0x59   : > { %652 = vst [vmem:[%s1172_s12 + $0xe8] sm:$0xff] %v620_v47  ;;  %v590_v50 = vadd.f32 %v558_v48, %v416_v46 }
  0x5a   : > { %653 = vst [vmem:[%s1172_s12 + $0xf0] sm:$0xff] %v621_v49 }
  0x5b   : > { %v622_v0 = vmax.f32 %v590_v50, 0.0 }
  0x5d   : > { %654 = vst [vmem:[%s1172_s12 + $0xf8] sm:$0xff] %v622_v0 }
  0x5e   : > { %974 = shalt.err (!%p971_p3)
}
  0x5f   : > { %s975_s26 = scalar_lea.hbm %s1341_s17, 4096  ;;  %s979_s10 = scalar_lea.hbm %s1394_s6, 8192 }
  0x60   : > { %p976_p4 = scmp.ne.s32.totalorder %s1341_s17, %s975_s26  ;;  %p980_p9 = scmp.lt.s32.totalorder %s1341_s17, %s1394_s6 }
  0x61   : > { %p981_p10 = scmp.lt.s32.totalorder %s979_s10, %s975_s26 }
  0x62   : > { %p977_p7 = pnand %p976_p4, %p1099_p5 }
  0x63   : > { %p982_p11 = por %p981_p10, %p980_p9 }
  0x64   : > { %p978_p8 = pneg %p977_p7 }
  0x66   : > { %p983_p12 = pnand %p982_p11, %p978_p8 }
  0x68   : > { %986 = shalt.err (!%p983_p12)
}
  0x69   : > { %s1024_s13 = smov 128   ;;  %s1025_s15 = smov 8  }
  0x6a   : > { %920 = dma.vmem_to_hbm [thread:$0]  (%p1099_p5), %s1343_s14, 4096, %s1341_s17, %s1348_s18, %s1024_s13, %s1024_s13, %s1025_s15  }
  0x6b PF: > { %p926_p13 = scmp.ge.s32.totalorder %s1021_s24, 2  ;;  %s684_s16 = sand.u32 1, %s1009_s21  }
  0x6c   : > { %s685_s25 = scalar_lea.sflag [#allocation3], %s684_s16 }
  0x6d   : > { %p923_p0 = pnand %p926_p13, %p1103_p6 }
  0x6f   : > { %p924_p1 = pneg %p923_p0 }
  0x71   : > { %1004 = dma.done.wait (%p924_p1), %s685_s25, 4096  }
  0x72   : > { %1006 = vsyncadd (%p924_p1), %s685_s25, 4294963200  ;;  %p16_p2 = scmp.ge.s32.totalorder %s1086_s27, 4   ;;  %s1397_s21 = smov %s1013_s22 }
  0x73   : > { %s1398_s22 = smov %s1017_s23  ;;  %s1399_s23 = smov %s1097_s30 }
  0x74   : > { %s1400_s24 = smov %s1086_s27  ;;  %18 = sbr.rel (!%p16_p2) target bundleno = 3 (0x3), region = 82 }
  0x79   :  { %690 = vsyncpa [#allocation3], 1 }
  0x7a   :  { %692 = vsyncpa [#allocation3 + $0x1], 1 }

// kernel: clone_bottleneck_forward.5
= control target key start
LH: loop header
LB: loop body
LE: loop exit
PB: predicated region body
PF: predicated region fallthrough
CT: control target
= control target key end

     0   :  { %s7734_s18 = smov 0   ;;  %s10327_s0 = inlined_call_operand.vmem [shape: bf16[2,16,16,128], index: 0, kind: input, shape index: {}]   ;;  %s10328_s1 = inlined_call_operand.vmem [shape: f32[1,128], index: 1, kind: input, shape index: {}]   ;;  %s10329_s2 = inlined_call_operand.vmem [shape: f32[1,128], index: 2, kind: input, shape index: {}]   ;;  %s10330_s3 = inlined_call_operand.vmem [shape: bf16[9,128,128], index: 3, kind: input, shape index: {}]   ;;  %s10331_s4 = inlined_call_operand.vmem [shape: bf16[2,256,128], index: 4, kind: output, shape index: {0}]   ;;  %s10332_s5 = inlined_call_operand.vmem [shape: f32[2,2,128], index: 5, kind: output, shape index: {1}]  }
   0x1 LB: > { %s6164_s19 = sadd.s32 4294967295, %s7701_s18   ;;  %p6168_p0 = scmp.ge.s32.totalorder %s7701_s18, 1  ;;  %s7701_s18 = sphi %s7734_s18, %s16_s18  }
   0x2   : > { %p190_p1 = scmp.lt.s32.totalorder %s7701_s18, 3 }
   0x4   : > { %p191_p2 = pnand %p6168_p0, %p190_p1 }
   0x6   : > { %194 = sbr.rel (%p191_p2) target bundleno = 684 (0x2ac), region = 36 }
   0xb   : > { %v7547_v0 = vld [vmem:[%s10330_s3 + $0x78] sm:$0xff]   ;;  %v7748_v1 = vld [vmem:[%s10330_s3 + $0x70] sm:$0xff]   ;;  %v7703_v2 = vmov 0   ;;  %p222_p3 = scmp.lt.s32.totalorder %s6164_s19, 1  ;;  %v7549_v3 = vld [vmem:[%s10330_s3 + $0x68] sm:$0xff]   ;;  %vm885_vm4 = vcmask 1043456  }
   0xc   : > { %411 = vst [vmem:[#allocation2] sm:$0xf] %v7703_v2  ;;  %412 = vst [vmem:[#allocation2 + $0x4] sm:$0xf] %v7703_v2  ;;  %7090 = vmatprep.subr.bf16.mxu0 %v7547_v0  ;;  %7522 = vmatprep.subr.bf16.mxu1 %v7547_v0  ;;  %v7550_v4 = vld [vmem:[%s10330_s3 + $0x60] sm:$0xff]   ;;  %v7551_v18 = vld [vmem:[%s10330_s3 + $0x58] sm:$0xff]  }
   0xd   : > { %413 = vst [vmem:[#allocation2 + $0x8] sm:$0x1] %v7703_v2  ;;  %414 = vst [vmem:[#allocation2 + $0xc] sm:$0xf] %v7703_v2  ;;  %7091 = vmatpush3.bf16.msra.mxu0 %v7547_v0  ;;  %7530 = vmatpush3.bf16.msra.mxu1 %v7547_v0  ;;  %s10561_s19 = smov (!%p222_p3, %s6164_s19), 1  ;;  %vm892_vm5 = vcmask 1040384  }
   0xe   : > { %415 = vst [vmem:[#allocation2 + $0x10] sm:$0xf] %v7703_v2  ;;  %416 = vst [vmem:[#allocation2 + $0x14] sm:$0x1] %v7703_v2  ;;  %7092 = vmatprep.subr.bf16.mxu0 %v7748_v1  ;;  %7523 = vmatprep.subr.bf16.mxu1 %v7748_v1  ;;  %s6634_s26 = sshll.u32 %s10561_s19, 7  ;;  %v7552_v33 = vld [vmem:[%s10330_s3 + $0x50] sm:$0xff]  }
   0xf   : > { %417 = vst [vmem:[#allocation2 + $0x18] sm:$0xf] %v7703_v2  ;;  %418 = vst [vmem:[#allocation2 + $0x1c] sm:$0xf] %v7703_v2  ;;  %s7774_s6 = scalar_lea.vmem %s10327_s0, %s6634_s26  ;;  %vm1066_vm0 = vsmask.f32 3328  ;;  %s10190_s11 = scalar_lea.vmem %s10331_s4, %s6634_s26 }
  0x10   : > { %419 = vst [vmem:[#allocation2 + $0x20] sm:$0x1] %v7703_v2  ;;  %420 = vst [vmem:[#allocation2 + $0x24] sm:$0xf] %v7703_v2  ;;  %vm1067_vm1 = vsmask.f32 7440 }
  0x11   : > { %421 = vst [vmem:[#allocation2 + $0x28] sm:$0xf] %v7703_v2  ;;  %422 = vst [vmem:[#allocation2 + $0x2c] sm:$0x1] %v7703_v2  ;;  %7093 = vmatpush3.bf16.msra.mxu0 %v7748_v1  ;;  %7531 = vmatpush3.bf16.msra.mxu1 %v7748_v1  ;;  %v7780_v15 = vld [vmem:[%s10328_s1] ss:$0 sm:$0xff] }
  0x12   : > { %423 = vst [vmem:[#allocation2 + $0x30] sm:$0xf] %v7703_v2  ;;  %424 = vst [vmem:[#allocation2 + $0x34] sm:$0xf] %v7703_v2  ;;  %7094 = vmatprep.subr.bf16.mxu0 %v7549_v3  ;;  %7524 = vmatprep.subr.bf16.mxu1 %v7549_v3  ;;  %v6701_v16 = vld [vmem:[%s7774_s6] sm:$0xff]   ;;  %v6850_v17 = vld [vmem:[%s7774_s6 + $0x38] sm:$0xff]  }
  0x13   : > { %425 = vst [vmem:[#allocation2 + $0x38] sm:$0x1] %v7703_v2  ;;  %426 = vst [vmem:[#allocation2 + $0x3c] sm:$0xf] %v7703_v2  ;;  %v1002_v5 = vld [vmem:[#allocation2] sm:$0xf]  ;;  %v6702_v21 = vunpack.c.l.bf16 %v6701_v16  ;;  %v6703_v25 = vunpack.c.h.bf16 %v6701_v16  ;;  %v6730_v29 = vunpack.c.l.bf16 %v6850_v17  ;;  %v6731_v32 = vunpack.c.h.bf16 %v6850_v17 }
  0x14   : > { %427 = vst [vmem:[#allocation2 + $0x40] sm:$0xf] %v7703_v2  ;;  %428 = vst [vmem:[#allocation2 + $0x44] sm:$0x1] %v7703_v2  ;;  %v1003_v6 = vld [vmem:[#allocation2 + $0x4] sm:$0xf] }
  0x15   : > { %429 = vst [vmem:[#allocation2 + $0x48] sm:$0xf] %v7703_v2  ;;  %430 = vst [vmem:[#allocation2 + $0x4c] sm:$0xf] %v7703_v2  ;;  %v7767_v7 = vld [vmem:[#allocation2 + $0x8] sm:$0x1]  ;;  %7095 = vmatpush3.bf16.msra.mxu0 %v7549_v3  ;;  %7532 = vmatpush3.bf16.msra.mxu1 %v7549_v3  ;;  %v309_v28 = vmul.f32 %v6702_v21, %v7780_v15  ;;  %v310_v31 = vmul.f32 %v6703_v25, %v7780_v15 }
  0x16   : > { %431 = vst [vmem:[#allocation2 + $0x50] sm:$0x1] %v7703_v2  ;;  %432 = vst [vmem:[#allocation2 + $0x54] sm:$0xf] %v7703_v2  ;;  %v1070_v8 = vshrl.u32 %v1002_v5, 16  ;;  %v1073_v9 = vshll.u32 %v1002_v5, 16  ;;  %7096 = vmatprep.subr.bf16.mxu0 %v7550_v4  ;;  %7525 = vmatprep.subr.bf16.mxu1 %v7550_v4  ;;  %v323_v36 = vmul.f32 %v6730_v29, %v7780_v15 }
  0x17   : > { %433 = vst [vmem:[#allocation2 + $0x58] sm:$0xf] %v7703_v2  ;;  %434 = vst [vmem:[#allocation2 + $0x5c] sm:$0x1] %v7703_v2  ;;  %v1079_v10 = vshll.u32 %v1003_v6, 16  ;;  %v1083_v11 = vshrl.u32 %v1003_v6, 16  ;;  %v324_v39 = vmul.f32 %v6731_v32, %v7780_v15 }
  0x18   : > { %435 = vst [vmem:[#allocation2 + $0x60] sm:$0xf] %v7703_v2  ;;  %436 = vst [vmem:[#allocation2 + $0x64] sm:$0xf] %v7703_v2  ;;  %v1089_v12 = vshll.u32 %v7767_v7, 16  ;;  %v1072_v13 = vrot.slane %v1070_v8, 4 }
  0x19   : > { %437 = vst [vmem:[#allocation2 + $0x68] sm:$0x1] %v7703_v2  ;;  %438 = vst [vmem:[#allocation2 + $0x6c] sm:$0xf] %v7703_v2  ;;  %v1075_v14 = vrot.slane %v1073_v9, 5  ;;  %v1081_v19 = vrot.slane %v1079_v10, 5  ;;  %7097 = vmatpush3.bf16.msra.mxu0 %v7550_v4  ;;  %7533 = vmatpush3.bf16.msra.mxu1 %v7550_v4 }
  0x1a   : > { %439 = vst [vmem:[#allocation2 + $0x70] sm:$0xf] %v7703_v2  ;;  %440 = vst [vmem:[#allocation2 + $0x74] sm:$0x1] %v7703_v2  ;;  %v1085_v20 = vrot.slane %v1083_v11, 4  ;;  %v1091_v23 = vrot.slane %v1089_v12, 5  ;;  %7098 = vmatprep.subr.bf16.mxu0 %v7551_v18  ;;  %7526 = vmatprep.subr.bf16.mxu1 %v7551_v18 }
  0x1b   : > { %441 = vst [vmem:[#allocation2 + $0x78] sm:$0xf] %v7703_v2  ;;  %442 = vst [vmem:[#allocation2 + $0x7c] sm:$0xf] %v7703_v2  ;;  %v1076_v22 = vor.u32 %v1075_v14, %v1072_v13  ;;  %v7790_v24 = vld [vmem:[%s10329_s2] ss:$0 sm:$0xff] }
  0x1c   : > { %443 = vst [vmem:[#allocation2 + $0x80] sm:$0x1] %v7703_v2  ;;  %444 = vst [vmem:[#allocation2 + $0x84] sm:$0xf] %v7703_v2  ;;  %v1086_v27 = vor.u32 %v1085_v20, %v1081_v19  ;;  %vm561_vm3 = vsmask.f32 256  ;;  %v347_v35 = vadd.f32 %v7790_v24, %v309_v28  ;;  %v348_v38 = vadd.f32 %v7790_v24, %v310_v31 }
  0x1d   : > { %445 = vst [vmem:[#allocation2 + $0x88] sm:$0xf] %v7703_v2  ;;  %446 = vst [vmem:[#allocation2 + $0x8c] sm:$0x1] %v7703_v2  ;;  %v1077_v30 = vrot.slane %v1076_v22, 4  ;;  %v6851_v40 = vld [vmem:[%s7774_s6 + $0x40] sm:$0xff]   ;;  %v361_v43 = vadd.f32 %v7790_v24, %v323_v36  ;;  %7099 = vmatpush3.bf16.msra.mxu0 %v7551_v18  ;;  %7534 = vmatpush3.bf16.msra.mxu1 %v7551_v18  ;;  %v362_v48 = vadd.f32 %v7790_v24, %v324_v39 }
  0x1e   : > { %447 = vst [vmem:[#allocation2 + $0x90] sm:$0xf] %v7703_v2  ;;  %448 = vst [vmem:[#allocation2 + $0x94] sm:$0xf] %v7703_v2  ;;  %v1087_v34 = vrot.slane %v1086_v27, 4  ;;  %v379_v42 = vmax.f32 %v347_v35, 0.0  ;;  %v6734_v44 = vunpack.c.l.bf16 %v6851_v40  ;;  %v6735_v49 = vunpack.c.h.bf16 %v6851_v40  ;;  %7100 = vmatprep.subr.bf16.mxu0 %v7552_v33  ;;  %7527 = vmatprep.subr.bf16.mxu1 %v7552_v33 }
  0x1f   : > { %449 = vst [vmem:[#allocation2 + $0x98] sm:$0x1] %v7703_v2  ;;  %450 = vst [vmem:[#allocation2 + $0x9c] sm:$0xf] %v7703_v2  ;;  %vm562_vm6 = vsmask.f32 4368 }
  0x20   : > { %451 = vst [vmem:[#allocation2 + $0xa0] sm:$0xf] %v7703_v2  ;;  %452 = vst [vmem:[#allocation2 + $0xa4] sm:$0x1] %v7703_v2  ;;  %v7553_v45 = vld [vmem:[%s10330_s3 + $0x48] sm:$0xff]   ;;  %v380_v47 = vmax.f32 %v348_v38, 0.0  ;;  %v6636_v50 = vpack.c.bf16 %v379_v42, %v379_v42  ;;  %v325_v52 = vmul.f32 %v6734_v44, %v7780_v15  ;;  %v326_v56 = vmul.f32 %v6735_v49, %v7780_v15 }
  0x21   : > { %453 = vst [vmem:[#allocation2 + $0xa8] sm:$0xf] %v7703_v2  ;;  %454 = vst [vmem:[#allocation2 + $0xac] sm:$0xf] %v7703_v2  ;;  %vm886_vm7 = vsmask.f32 7938  ;;  %7101 = vmatpush3.bf16.msra.mxu0 %v7552_v33  ;;  %7535 = vmatpush3.bf16.msra.mxu1 %v7552_v33 }
  0x22   : > { %455 = vst [vmem:[#allocation2 + $0xb0] sm:$0x1] %v7703_v2  ;;  %456 = vst [vmem:[#allocation2 + $0xb4] sm:$0xf] %v7703_v2  ;;  %v393_v51 = vmax.f32 %v361_v43, 0.0  ;;  %v7819_v53 = vld [vmem:[%s7774_s6 + $0x8] sm:$0xff]   ;;  %v6637_v54 = vpack.c.bf16 %v380_v47, %v380_v47  ;;  %v363_v61 = vadd.f32 %v7790_v24, %v325_v52  ;;  %v364_v3 = vadd.f32 %v7790_v24, %v326_v56 }
  0x23   : > { %457 = vst [vmem:[#allocation2 + $0xb8] sm:$0xf] %v7703_v2  ;;  %458 = vst [vmem:[#allocation2 + $0xbc] sm:$0x1] %v7703_v2  ;;  %v394_v55 = vmax.f32 %v362_v48, 0.0  ;;  %v6706_v57 = vunpack.c.l.bf16 %v7819_v53  ;;  %v565_v58 = vshrl.u32 %v6636_v50, 16  ;;  %7102 = vmatprep.subr.bf16.mxu0 %v7553_v45  ;;  %7528 = vmatprep.subr.bf16.mxu1 %v7553_v45 }
  0x24   : > { %459 = vst [vmem:[#allocation2 + $0xc0] sm:$0xf] %v7703_v2  ;;  %460 = vst [vmem:[#allocation2 + $0xc4] sm:$0xf] %v7703_v2  ;;  %v568_v59 = vshll.u32 %v6636_v50, 16  ;;  %v6650_v60 = vpack.c.bf16 %v393_v51, %v393_v51  ;;  %v7554_v62 = vld [vmem:[%s10330_s3 + $0x40] sm:$0xff]   ;;  %v6707_v50 = vunpack.c.h.bf16 %v7819_v53 }
  0x25   : > { %461 = vst [vmem:[#allocation2 + $0xc8] sm:$0x1] %v7703_v2  ;;  %462 = vst [vmem:[#allocation2 + $0xcc] sm:$0xf] %v7703_v2  ;;  %v573_v63 = vshrl.u32 %v6637_v54, 16  ;;  %v576_v0 = vshll.u32 %v6637_v54, 16  ;;  %7103 = vmatpush3.bf16.msra.mxu0 %v7553_v45  ;;  %7536 = vmatpush3.bf16.msra.mxu1 %v7553_v45 }
  0x26   : > { %463 = vst [vmem:[#allocation2 + $0xd0] sm:$0xf] %v7703_v2  ;;  %464 = vst [vmem:[#allocation2 + $0xd4] sm:$0x1] %v7703_v2  ;;  %v888_v1 = vld [vmem:[#allocation2 + $0xc] sm:$0xf]  ;;  %v6651_v2 = vpack.c.bf16 %v394_v55, %v394_v55  ;;  %7104 = vmatprep.subr.bf16.mxu0 %v7554_v62  ;;  %7529 = vmatprep.subr.bf16.mxu1 %v7554_v62  ;;  %v311_v55 = vmul.f32 %v6706_v57, %v7780_v15 }
  0x27   : > { %vm7794_vm2 = vmor %vm1066_vm0, %vm1067_vm1  ;;  %v10346_v4 = vmov 0  ;;  %v567_v5 = vrot.slane %v565_v58, 7  ;;  %v894_v6 = vld [vmem:[#allocation2 + $0x14] sm:$0x1]  ;;  %v684_v8 = vshrl.u32 %v6650_v60, 16  ;;  %v687_v9 = vshll.u32 %v6650_v60, 16 }
  0x28   : > { %v1082_v37 = vsel %vm7794_vm2, %v1077_v30, %v1081_v19  ;;  %v1092_v41 = vsel %vm7794_vm2, %v1087_v34, %v1091_v23  ;;  %vm7830_vm8 = vmor %vm561_vm3, %vm562_vm6  ;;  %v395_v10 = vmax.f32 %v363_v61, 0.0  ;;  %v575_v11 = vrot.slane %v573_v63, 7  ;;  %v939_v27 = vld [vmem:[#allocation2 + $0x60] sm:$0xf]  ;;  %v943_v28 = vld [vmem:[#allocation2 + $0x68] sm:$0x1] }
  0x29   : > { %v6224_v46 = vcombine.low %v1082_v37, %v1092_v41  ;;  %v10347_v4 = vsel %vm7830_vm8, 4294967295, %v10346_v4  ;;  %vm7836_vm9 = vmand %vm885_vm4, %vm886_vm7  ;;  %v10349_v12 = vmov 0  ;;  %v692_v13 = vshrl.u32 %v6651_v2, 16  ;;  %v7851_v33 = vld [vmem:[%s10330_s3 + $0x38] sm:$0xff]   ;;  %v6845_v40 = vld [vmem:[%s7774_s6 + $0x10] sm:$0xff]   ;;  %7105 = vmatpush3.bf16.msra.mxu0 %v7554_v62  ;;  %7537 = vmatpush3.bf16.msra.mxu1 %v7554_v62  ;;  %s6173_s26 = sshll.u32 %s10561_s19, 1 }
  0x2a   : > { %10348 = vst [vmem:[#allocation3_spill] sm:$0xff] %v10347_v4  ;;  %v10350_v12 = vsel %vm7836_vm9, 4294967295, %v10349_v12  ;;  %v695_v14 = vshll.u32 %v6651_v2, 16  ;;  %v396_v16 = vmax.f32 %v364_v3, 0.0  ;;  %v570_v17 = vor.u32 %v568_v59, %v567_v5  ;;  %vm7842_vm10 = vmand %vm892_vm5, %vm561_vm3  ;;  %v7856_v34 = vld [vmem:[%s10330_s3 + $0xb8] sm:$0xff]   ;;  %v6852_v45 = vld [vmem:[%s7774_s6 + $0x48] sm:$0xff]   ;;  %7138 = vmatprep.subr.bf16.mxu1 %v7851_v33  ;;  %s235_s14 = scalar_lea.vmem %s10332_s5, %s6173_s26 }
  0x2b   : > { %7106 = vmatprep.mubr.bf16.mxu0 %v6224_v46  ;;  %10351 = vst [vmem:[#allocation4_spill] sm:$0xff] %v10350_v12  ;;  %v571_v18 = vrot.slane %v567_v5, 4  ;;  %v10352_v19 = vmov 0  ;;  %v686_v20 = vrot.slane %v684_v8, 7  ;;  %v6652_v21 = vpack.c.bf16 %v395_v10, %v395_v10  ;;  %v946_v49 = vld [vmem:[#allocation2 + $0x6c] sm:$0xf]  ;;  %7186 = vmatprep.subr.bf16.mxu0 %v7856_v34 }
  0x2c   : > { %v10353_v19 = vsel %vm7842_vm10, 4294967295, %v10352_v19  ;;  %v578_v22 = vor.u32 %v576_v0, %v575_v11  ;;  %v580_v23 = vrot.slane %v575_v11, 4  ;;  %v694_v25 = vrot.slane %v692_v13, 7  ;;  %v950_v56 = vld [vmem:[#allocation2 + $0x74] sm:$0x1] }
  0x2d   : > { %10354 = vst [vmem:[#allocation5_spill] sm:$0xff] %v10353_v19  ;;  %v6653_v29 = vpack.c.bf16 %v396_v16, %v396_v16  ;;  %v889_v30 = vsel %vm7836_vm9, %v570_v17, %v888_v1  ;;  %v689_v31 = vor.u32 %v687_v9, %v686_v20  ;;  %v690_v32 = vrot.slane %v686_v20, 4 }
  0x2e   : > { %v701_v35 = vshrl.u32 %v6652_v21, 16  ;;  %v579_v36 = vsel %vm7830_vm8, %v571_v18, %v578_v22  ;;  %890 = vst [vmem:[#allocation2 + $0xc] sm:$0xf] %v889_v30  ;;  %v895_v37 = vsel %vm7842_vm10, %v580_v23, %v894_v6  ;;  %v697_v38 = vor.u32 %v695_v14, %v694_v25 }
  0x2f   : > { %v699_v39 = vrot.slane %v694_v25, 4  ;;  %891 = vst [vmem:[#allocation2 + $0x10] sm:$0xf] %v579_v36  ;;  %896 = vst [vmem:[#allocation2 + $0x14] sm:$0x1] %v895_v37  ;;  %v940_v41 = vsel %vm7836_vm9, %v689_v31, %v939_v27  ;;  %v704_v43 = vshll.u32 %v6652_v21, 16  ;;  %v312_v58 = vmul.f32 %v6707_v50, %v7780_v15 }
  0x30   : > { %v703_v42 = vrot.slane %v701_v35, 7  ;;  %v709_v44 = vshrl.u32 %v6653_v29, 16  ;;  %v698_v46 = vsel %vm7830_vm8, %v690_v32, %v697_v38  ;;  %941 = vst [vmem:[#allocation2 + $0x60] sm:$0xf] %v940_v41  ;;  %v712_v48 = vshll.u32 %v6653_v29, 16 }
  0x31   : > { %v944_v47 = vsel %vm7842_vm10, %v699_v39, %v943_v28  ;;  %942 = vst [vmem:[#allocation2 + $0x64] sm:$0xf] %v698_v46  ;;  %v6710_v59 = vunpack.c.l.bf16 %v6845_v40  ;;  %v6711_v60 = vunpack.c.h.bf16 %v6845_v40  ;;  %v6738_v61 = vunpack.c.l.bf16 %v6852_v45 }
  0x32   : > { %945 = vst [vmem:[#allocation2 + $0x68] sm:$0x1] %v944_v47  ;;  %v706_v51 = vor.u32 %v704_v43, %v703_v42  ;;  %v707_v52 = vrot.slane %v703_v42, 4  ;;  %v711_v54 = vrot.slane %v709_v44, 7  ;;  %v349_v1 = vadd.f32 %v7790_v24, %v311_v55 }
  0x33   : > { %v2104_v2 = vrot.slane %v7767_v7, 5  ;;  %v7882_v3 = vadd.f32 %v7790_v24, %v312_v58  ;;  %v313_v53 = vmul.f32 %v6710_v59, %v7780_v15  ;;  %v314_v57 = vmul.f32 %v6711_v60, %v7780_v15 }
  0x34   : > { %v714_v62 = vor.u32 %v712_v48, %v711_v54  ;;  %v716_v63 = vrot.slane %v711_v54, 4  ;;  %v947_v0 = vsel %vm7836_vm9, %v706_v51, %v946_v49  ;;  %v381_v9 = vmax.f32 %v349_v1, 0.0 }
  0x35   : > { %948 = vst [vmem:[#allocation2 + $0x6c] sm:$0xf] %v947_v0  ;;  %v1004_v5 = vld [vmem:[#allocation2 + $0xc] sm:$0xf]  ;;  %v6739_v10 = vunpack.c.h.bf16 %v6852_v45  ;;  %v7893_v17 = vadd.f32 %v7790_v24, %v313_v53  ;;  %v327_v18 = vmul.f32 %v6738_v61, %v7780_v15  ;;  %v7901_v32 = vadd.f32 %v7790_v24, %v314_v57 }
  0x36   : > { %v715_v6 = vsel %vm7830_vm8, %v707_v52, %v714_v62  ;;  %v951_v8 = vsel %vm7842_vm10, %v716_v63, %v950_v56  ;;  %v1005_v11 = vld [vmem:[#allocation2 + $0x10] sm:$0xf]  ;;  %v7890_v13 = vld [vmem:[#allocation2 + $0x14] sm:$0x1]  ;;  %v1094_v14 = vshrl.u32 %v1004_v5, 16  ;;  %v1097_v16 = vshll.u32 %v1004_v5, 16 }
  0x37   : > { %949 = vst [vmem:[#allocation2 + $0x70] sm:$0xf] %v715_v6  ;;  %952 = vst [vmem:[#allocation2 + $0x74] sm:$0x1] %v951_v8  ;;  %v1103_v20 = vshll.u32 %v1005_v11, 16  ;;  %v1107_v21 = vshrl.u32 %v1005_v11, 16  ;;  %v7898_v31 = vpack.c.bf16 %v381_v9, %v381_v9  ;;  %v328_v38 = vmul.f32 %v6739_v10, %v7780_v15 }
  0x38   : > { %v1113_v22 = vshll.u32 %v7890_v13, 16  ;;  %v2111_v23 = vrot.slane %v7890_v13, 5  ;;  %v1018_v25 = vld [vmem:[#allocation2 + $0x60] sm:$0xf]  ;;  %v1096_v27 = vrot.slane %v1094_v14, 4  ;;  %v1099_v28 = vrot.slane %v1097_v16, 5 }
  0x39   : > { %v1019_v29 = vld [vmem:[#allocation2 + $0x64] sm:$0xf]  ;;  %v1058_v30 = vld [vmem:[#allocation2 + $0x68] sm:$0x1]  ;;  %v1105_v35 = vrot.slane %v1103_v20, 5  ;;  %v1109_v36 = vrot.slane %v1107_v21, 4  ;;  %v7905_v58 = vadd.f32 %v7790_v24, %v327_v18  ;;  %v7908_v59 = vadd.f32 %v7790_v24, %v328_v38 }
  0x3a   : > { %v1262_v37 = vshrl.u32 %v1018_v25, 16  ;;  %v1100_v39 = vor.u32 %v1099_v28, %v1096_v27  ;;  %v1265_v40 = vshll.u32 %v1018_v25, 16  ;;  %v1271_v41 = vshll.u32 %v1019_v29, 16  ;;  %v7558_v10 = vld [vmem:[%s10330_s3 + $0xb0] sm:$0xff]  }
  0x3b   : > { %v1275_v42 = vshrl.u32 %v1019_v29, 16  ;;  %v1110_v43 = vor.u32 %v1109_v36, %v1105_v35  ;;  %v1115_v44 = vrot.slane %v1113_v22, 5  ;;  %v1281_v46 = vshll.u32 %v1058_v30, 16 }
  0x3c   : > { %v1264_v45 = vrot.slane %v1262_v37, 4  ;;  %v1020_v47 = vld [vmem:[#allocation2 + $0x6c] sm:$0xf]  ;;  %v1101_v48 = vrot.slane %v1100_v39, 4  ;;  %v1267_v49 = vrot.slane %v1265_v40, 5  ;;  %v1273_v50 = vrot.slane %v1271_v41, 5 }
  0x3d   : > { %v1277_v51 = vrot.slane %v1275_v42, 4  ;;  %v1111_v52 = vrot.slane %v1110_v43, 4  ;;  %v1283_v54 = vrot.slane %v1281_v46, 5  ;;  %v1286_v63 = vshrl.u32 %v1020_v47, 16 }
  0x3e   : > { %v1021_v55 = vld [vmem:[#allocation2 + $0x70] sm:$0xf]  ;;  %v1059_v56 = vld [vmem:[#allocation2 + $0x74] sm:$0x1]  ;;  %v1106_v60 = vsel %vm7794_vm2, %v1101_v48, %v1105_v35  ;;  %v1268_v61 = vor.u32 %v1267_v49, %v1264_v45  ;;  %v1289_v1 = vshll.u32 %v1020_v47, 16  ;;  %v382_v22 = vmax.f32 %v7882_v3, 0.0 }
  0x3f   : > { %v1278_v62 = vor.u32 %v1277_v51, %v1273_v50  ;;  %v1116_v0 = vsel %vm7794_vm2, %v1111_v52, %v1115_v44  ;;  %v1295_v53 = vshll.u32 %v1021_v55, 16  ;;  %v1299_v57 = vshrl.u32 %v1021_v55, 16  ;;  %v897_v35 = vld [vmem:[#allocation2 + $0x18] sm:$0xf]  ;;  %v7560_v3 = vld [vmem:[%s10330_s3 + $0xa8] sm:$0xff]   ;;  %v7557_v47 = vld [vmem:[%s10330_s3 + $0x30] sm:$0xff]  }
  0x40   : > { %v6225_v5 = vcombine.low %v1106_v60, %v1116_v0  ;;  %v1269_v6 = vrot.slane %v1268_v61, 4  ;;  %v1288_v9 = vrot.slane %v1286_v63, 4  ;;  %v1291_v11 = vrot.slane %v1289_v1, 5  ;;  %v901_v48 = vld [vmem:[#allocation2 + $0x20] sm:$0x1]  ;;  %v6853_v55 = vld [vmem:[%s7774_s6 + $0x50] sm:$0xff]  }
  0x41   : > { %v1279_v8 = vrot.slane %v1278_v62, 4  ;;  %v1297_v14 = vrot.slane %v1295_v53, 5  ;;  %v1301_v16 = vrot.slane %v1299_v57, 4  ;;  %v1305_v18 = vshll.u32 %v1059_v56, 16  ;;  %v7562_v56 = vld [vmem:[%s10330_s3 + $0xa0] sm:$0xff]  }
  0x42   : > { %7107 = vmatmul.mubr.bf16.vlgmr.msra.gmra.mxu0 %v6225_v5  ;;  %v1274_v20 = vsel %vm7794_vm2, %v1269_v6, %v1273_v50  ;;  %v582_v25 = vshrl.u32 %v7898_v31, 16  ;;  %v1292_v28 = vor.u32 %v1291_v11, %v1288_v9  ;;  %v6639_v36 = vpack.c.bf16 %v382_v22, %v382_v22  ;;  %v904_v1 = vld [vmem:[#allocation2 + $0x24] sm:$0xf]  ;;  %v908_v53 = vld [vmem:[#allocation2 + $0x2c] sm:$0x1]  ;;  %v7952_v11 = vld [vmem:[%s10330_s3 + $0x98] sm:$0xff]  }
  0x43   : > { %v1284_v21 = vsel %vm7794_vm2, %v1279_v8, %v1283_v54  ;;  %v1302_v29 = vor.u32 %v1301_v16, %v1297_v14  ;;  %v1307_v30 = vrot.slane %v1305_v18, 5  ;;  %7187 = vmatpush3.bf16.msra.mxu0 %v7856_v34  ;;  %v585_v38 = vshll.u32 %v7898_v31, 16  ;;  %v7559_v8 = vld [vmem:[%s10330_s3 + $0x28] sm:$0xff]  }
  0x44   : > { %v6232_v27 = vcombine.low %v1274_v20, %v1284_v21  ;;  %7188 = vmatprep.subr.bf16.mxu0 %v7558_v10  ;;  %v584_v37 = vrot.slane %v582_v25, 7  ;;  %v383_v39 = vmax.f32 %v7893_v17, 0.0  ;;  %v1293_v40 = vrot.slane %v1292_v28, 4 }
  0x45   : > { %v1303_v41 = vrot.slane %v1302_v29, 4  ;;  %v384_v42 = vmax.f32 %v7901_v32, 0.0  ;;  %v397_v43 = vmax.f32 %v7905_v58, 0.0  ;;  %v590_v45 = vshrl.u32 %v6639_v36, 16 }
  0x46   : > { %7122 = vmatprep.mubr.bf16.mxu1 %v6232_v27  ;;  %v587_v34 = vor.u32 %v585_v38, %v584_v37  ;;  %v588_v44 = vrot.slane %v584_v37, 4  ;;  %v593_v46 = vshll.u32 %v6639_v36, 16  ;;  %v1298_v31 = vsel %vm7794_vm2, %v1293_v40, %v1297_v14 }
  0x47   : > { %v1308_v17 = vsel %vm7794_vm2, %v1303_v41, %v1307_v30  ;;  %7189 = vmatpush3.bf16.msra.mxu0 %v7558_v10  ;;  %v6640_v32 = vpack.c.bf16 %v383_v39, %v383_v39  ;;  %v6641_v49 = vpack.c.bf16 %v384_v42, %v384_v42  ;;  %v592_v51 = vrot.slane %v590_v45, 7  ;;  %v953_v39 = vld [vmem:[#allocation2 + $0x78] sm:$0xf]  ;;  %v7561_v45 = vld [vmem:[%s10330_s3 + $0x20] sm:$0xff]  }
  0x48   : > { %v6233_v50 = vcombine.low %v1298_v31, %v1308_v17  ;;  %v898_v52 = vsel %vm7836_vm9, %v587_v34, %v897_v35  ;;  %v398_v54 = vmax.f32 %v7908_v59, 0.0  ;;  %7190 = vmatprep.subr.bf16.mxu0 %v7560_v3  ;;  %v6654_v57 = vpack.c.bf16 %v397_v43, %v397_v43  ;;  %v6846_v35 = vld [vmem:[%s7774_s6 + $0x18] sm:$0xff]  }
  0x49   : > { %899 = vst [vmem:[#allocation2 + $0x18] sm:$0xf] %v898_v52  ;;  %v599_v58 = vshrl.u32 %v6640_v32, 16  ;;  %v602_v60 = vshll.u32 %v6640_v32, 16  ;;  %v607_v61 = vshrl.u32 %v6641_v49, 16  ;;  %v610_v62 = vshll.u32 %v6641_v49, 16 }
  0x4a   : > { %7123 = vmatmul.mubr.bf16.vlgmr.msra.gmra.mxu1 %v6233_v50  ;;  %v595_v63 = vor.u32 %v593_v46, %v592_v51  ;;  %v597_v0 = vrot.slane %v592_v51, 4  ;;  %v6655_v5 = vpack.c.bf16 %v398_v54, %v398_v54  ;;  %v6742_v9 = vunpack.c.l.bf16 %v6853_v55  ;;  %v7566_v46 = vld [vmem:[%s10330_s3 + $0x90] sm:$0xff]  }
  0x4b   : > { %7139 = vmatpush3.bf16.msra.mxu1 %v7851_v33  ;;  %v601_v59 = vrot.slane %v599_v58, 7  ;;  %v609_v6 = vrot.slane %v607_v61, 7  ;;  %v6743_v10 = vunpack.c.h.bf16 %v6853_v55  ;;  %7191 = vmatpush3.bf16.msra.mxu0 %v7560_v3  ;;  %v718_v16 = vshrl.u32 %v6654_v57, 16  ;;  %v957_v3 = vld [vmem:[#allocation2 + $0x80] sm:$0x1]  ;;  %v7563_v58 = vld [vmem:[%s10330_s3 + $0x18] sm:$0xff]  }
  0x4c   : > { %7140 = vmatprep.subr.bf16.mxu1 %v7557_v47  ;;  %v596_v14 = vsel %vm7830_vm8, %v588_v44, %v595_v63  ;;  %v902_v33 = vsel %vm7842_vm10, %v597_v0, %v901_v48  ;;  %v721_v18 = vshll.u32 %v6654_v57, 16  ;;  %7192 = vmatprep.subr.bf16.mxu0 %v7562_v56  ;;  %v726_v28 = vshrl.u32 %v6655_v5, 16 }
  0x4d   : > { %900 = vst [vmem:[#allocation2 + $0x1c] sm:$0xf] %v596_v14  ;;  %903 = vst [vmem:[#allocation2 + $0x20] sm:$0x1] %v902_v33  ;;  %v604_v20 = vor.u32 %v602_v60, %v601_v59  ;;  %v605_v21 = vrot.slane %v601_v59, 4  ;;  %v612_v22 = vor.u32 %v610_v62, %v609_v6  ;;  %v614_v25 = vrot.slane %v609_v6, 4 }
  0x4e   : > { %v720_v27 = vrot.slane %v718_v16, 7  ;;  %v729_v29 = vshll.u32 %v6655_v5, 16  ;;  %v329_v30 = vmul.f32 %v6742_v9, %v7780_v15  ;;  %v330_v40 = vmul.f32 %v6743_v10, %v7780_v15  ;;  %v7565_v14 = vld [vmem:[%s10330_s3 + $0x10] sm:$0xff]   ;;  %v7568_v33 = vld [vmem:[%s10330_s3 + $0x88] sm:$0xff]  }
  0x4f   : > { %7141 = vmatpush3.bf16.msra.mxu1 %v7557_v47  ;;  %v613_v36 = vsel %vm7830_vm8, %v605_v21, %v612_v22  ;;  %v905_v37 = vsel %vm7836_vm9, %v604_v20, %v904_v1  ;;  %v909_v38 = vsel %vm7842_vm10, %v614_v25, %v908_v53  ;;  %v728_v34 = vrot.slane %v726_v28, 7  ;;  %7193 = vmatpush3.bf16.msra.mxu0 %v7562_v56 }
  0x50   : > { %v1006_v41 = vld [vmem:[#allocation2 + $0x18] sm:$0xf]  ;;  %906 = vst [vmem:[#allocation2 + $0x24] sm:$0xf] %v905_v37  ;;  %907 = vst [vmem:[#allocation2 + $0x28] sm:$0xf] %v613_v36  ;;  %v723_v42 = vor.u32 %v721_v18, %v720_v27  ;;  %7142 = vmatprep.subr.bf16.mxu1 %v7559_v8  ;;  %v367_v44 = vadd.f32 %v7790_v24, %v329_v30  ;;  %v368_v47 = vadd.f32 %v7790_v24, %v330_v40 }
  0x51   : > { %910 = vst [vmem:[#allocation2 + $0x2c] sm:$0x1] %v909_v38  ;;  %v724_v43 = vrot.slane %v720_v27, 4  ;;  %v1118_v31 = vshrl.u32 %v1006_v41, 16  ;;  %v1121_v17 = vshll.u32 %v1006_v41, 16  ;;  %v6714_v48 = vunpack.c.l.bf16 %v6846_v35  ;;  %7194 = vmatprep.subr.bf16.mxu0 %v7952_v11 }
  0x52   : > { %v731_v32 = vor.u32 %v729_v29, %v728_v34  ;;  %v733_v49 = vrot.slane %v728_v34, 4  ;;  %v954_v50 = vsel %vm7836_vm9, %v723_v42, %v953_v39  ;;  %v399_v51 = vmax.f32 %v367_v44, 0.0  ;;  %v7570_v39 = vld [vmem:[%s10330_s3 + $0x80] sm:$0xff]   ;;  %v7567_v34 = vld [vmem:[%s10330_s3 + $0x8] sm:$0xff]  }
  0x53   : > { %v1120_v52 = vrot.slane %v1118_v31, 4  ;;  %v1123_v54 = vrot.slane %v1121_v17, 5  ;;  %955 = vst [vmem:[#allocation2 + $0x78] sm:$0xf] %v954_v50  ;;  %v400_v55 = vmax.f32 %v368_v47, 0.0  ;;  %7143 = vmatpush3.bf16.msra.mxu1 %v7559_v8  ;;  %v6715_v56 = vunpack.c.h.bf16 %v6846_v35  ;;  %7195 = vmatpush3.bf16.msra.mxu0 %v7952_v11 }
  0x54   : > { %v1007_v60 = vld [vmem:[#allocation2 + $0x1c] sm:$0xf]  ;;  %v1052_v61 = vld [vmem:[#allocation2 + $0x20] sm:$0x1]  ;;  %v732_v62 = vsel %vm7830_vm8, %v724_v43, %v731_v32  ;;  %v958_v63 = vsel %vm7842_vm10, %v733_v49, %v957_v3  ;;  %v6656_v0 = vpack.c.bf16 %v399_v51, %v399_v51  ;;  %7144 = vmatprep.subr.bf16.mxu1 %v7561_v45  ;;  %v315_v1 = vmul.f32 %v6714_v48, %v7780_v15  ;;  %v960_v51 = vld [vmem:[#allocation2 + $0x84] sm:$0xf] }
  0x55   : > { %v1124_v53 = vor.u32 %v1123_v54, %v1120_v52  ;;  %v1127_v57 = vshll.u32 %v1007_v60, 16  ;;  %v1131_v5 = vshrl.u32 %v1007_v60, 16  ;;  %v1137_v59 = vshll.u32 %v1052_v61, 16  ;;  %956 = vst [vmem:[#allocation2 + $0x7c] sm:$0xf] %v732_v62  ;;  %7196 = vmatprep.subr.bf16.mxu0 %v7566_v46 }
  0x56   : > { %959 = vst [vmem:[#allocation2 + $0x80] sm:$0x1] %v958_v63  ;;  %v7987_v6 = vpack.c.bf16 %v400_v55, %v400_v55  ;;  %v735_v8 = vshrl.u32 %v6656_v0, 16  ;;  %v738_v9 = vshll.u32 %v6656_v0, 16  ;;  %v316_v10 = vmul.f32 %v6715_v56, %v7780_v15  ;;  %v7574_v63 = vld [vmem:[%s10330_s3 + $0x138] sm:$0xff]  }
  0x57   : > { %v1125_v16 = vrot.slane %v1124_v53, 4  ;;  %v1129_v18 = vrot.slane %v1127_v57, 5  ;;  %v1133_v20 = vrot.slane %v1131_v5, 4  ;;  %v1139_v21 = vrot.slane %v1137_v59, 5  ;;  %v1008_v11 = vld [vmem:[#allocation2 + $0x24] sm:$0xf]  ;;  %7145 = vmatpush3.bf16.msra.mxu1 %v7561_v45  ;;  %7197 = vmatpush3.bf16.msra.mxu0 %v7566_v46 }
  0x58   : > { %v1009_v22 = vld [vmem:[#allocation2 + $0x28] sm:$0xf]  ;;  %v1053_v25 = vld [vmem:[#allocation2 + $0x2c] sm:$0x1]  ;;  %v1142_v27 = vshrl.u32 %v1008_v11, 16  ;;  %v1145_v28 = vshll.u32 %v1008_v11, 16  ;;  %v7997_v29 = vadd.f32 %v7790_v24, %v315_v1  ;;  %v8000_v30 = vadd.f32 %v7790_v24, %v316_v10  ;;  %7146 = vmatprep.subr.bf16.mxu1 %v7563_v58  ;;  %7198 = vmatprep.subr.bf16.mxu0 %v7568_v33 }
  0x59   : > { %v1130_v35 = vsel %vm7794_vm2, %v1125_v16, %v1129_v18  ;;  %v1134_v36 = vor.u32 %v1133_v20, %v1129_v18  ;;  %v1151_v37 = vshll.u32 %v1009_v22, 16  ;;  %v1155_v38 = vshrl.u32 %v1009_v22, 16  ;;  %v6847_v5 = vld [vmem:[%s7774_s6 + $0x20] sm:$0xff]   ;;  %v8032_v11 = vld [vmem:[%s7774_s6 + $0x58] sm:$0xff]   ;;  %v8576_v12 = vld [vmem:[#allocation2 + $0x28] sm:$0xf] }
  0x5a   : > { %v1144_v3 = vrot.slane %v1142_v27, 4  ;;  %v1147_v40 = vrot.slane %v1145_v28, 5  ;;  %v1161_v41 = vshll.u32 %v1053_v25, 16  ;;  %v1022_v42 = vld [vmem:[#allocation2 + $0x78] sm:$0xf]  ;;  %v8007_v43 = vrot.slane %v735_v8, 7 }
  0x5b   : > { %v1135_v44 = vrot.slane %v1134_v36, 4  ;;  %v1153_v45 = vrot.slane %v1151_v37, 5  ;;  %v1157_v31 = vrot.slane %v1155_v38, 4  ;;  %v1310_v17 = vshrl.u32 %v1022_v42, 16  ;;  %7147 = vmatpush3.bf16.msra.mxu1 %v7563_v58  ;;  %7199 = vmatpush3.bf16.msra.mxu0 %v7568_v33  ;;  %v7569_v59 = vld [vmem:[%s10330_s3] sm:$0xff]  }
  0x5c   : > { %v1148_v46 = vor.u32 %v1147_v40, %v1144_v3  ;;  %v1163_v47 = vrot.slane %v1161_v41, 5  ;;  %v1023_v48 = vld [vmem:[#allocation2 + $0x7c] sm:$0xf]  ;;  %v1313_v49 = vshll.u32 %v1022_v42, 16  ;;  %v740_v50 = vor.u32 %v738_v9, %v8007_v43  ;;  %7148 = vmatprep.subr.bf16.mxu1 %v7565_v14  ;;  %7200 = vmatprep.subr.bf16.mxu0 %v7570_v39  ;;  %v8314_v13 = vld [vmem:[#allocation2 + $0x24] sm:$0xf] }
  0x5d   : > { %v1060_v32 = vld [vmem:[#allocation2 + $0x80] sm:$0x1]  ;;  %v1140_v52 = vsel %vm7794_vm2, %v1135_v44, %v1139_v21  ;;  %v1158_v54 = vor.u32 %v1157_v31, %v1153_v45  ;;  %v1312_v55 = vrot.slane %v1310_v17, 4  ;;  %v1319_v56 = vshll.u32 %v1023_v48, 16  ;;  %v964_v21 = vld [vmem:[#allocation2 + $0x8c] sm:$0x1] }
  0x5e   : > { %v6226_v60 = vcombine.low %v1130_v35, %v1140_v52  ;;  %v1149_v61 = vrot.slane %v1148_v46, 4  ;;  %v1315_v58 = vrot.slane %v1313_v49, 5  ;;  %v1323_v62 = vshrl.u32 %v1023_v48, 16  ;;  %v7572_v35 = vld [vmem:[%s10330_s3 + $0xf8] sm:$0xff]   ;;  %v8051_v17 = vld [vmem:[%s7774_s6 + $0x60] sm:$0xff]  }
  0x5f   : > { %v1159_v0 = vrot.slane %v1158_v54, 4  ;;  %v1321_v1 = vrot.slane %v1319_v56, 5  ;;  %v1329_v53 = vshll.u32 %v1060_v32, 16  ;;  %v741_v57 = vrot.slane %v8007_v43, 4  ;;  %7149 = vmatpush3.bf16.msra.mxu1 %v7565_v14  ;;  %7201 = vmatpush3.bf16.msra.mxu0 %v7570_v39  ;;  %v911_v49 = vld [vmem:[#allocation2 + $0x30] sm:$0xf] }
  0x60   : > { %7110 = vmatprep.mubr.bf16.mxu0 %v6226_v60  ;;  %v1154_v8 = vsel %vm7794_vm2, %v1149_v61, %v1153_v45  ;;  %v1316_v9 = vor.u32 %v1315_v58, %v1312_v55  ;;  %v1325_v10 = vrot.slane %v1323_v62, 4  ;;  %v743_v33 = vshrl.u32 %v7987_v6, 16  ;;  %7150 = vmatprep.subr.bf16.mxu1 %v7567_v34  ;;  %v8059_v61 = vld [vmem:[%s10328_s1] ss:$0 sm:$0xff] }
  0x61   : > { %v1164_v16 = vsel %vm7794_vm2, %v1159_v0, %v1163_v47  ;;  %v1331_v18 = vrot.slane %v1329_v53, 5  ;;  %v746_v20 = vshll.u32 %v7987_v6, 16  ;;  %v961_v14 = vsel %vm7836_vm9, %v740_v50, %v960_v51  ;;  %7282 = vmatprep.subr.bf16.mxu0 %v7574_v63  ;;  %v915_v50 = vld [vmem:[#allocation2 + $0x38] sm:$0x1] }
  0x62   : > { %v6227_v22 = vcombine.low %v1154_v8, %v1164_v16  ;;  %v1317_v25 = vrot.slane %v1316_v9, 4  ;;  %v1326_v27 = vor.u32 %v1325_v10, %v1321_v1  ;;  %v745_v28 = vrot.slane %v743_v33, 7  ;;  %962 = vst [vmem:[#allocation2 + $0x84] sm:$0xf] %v961_v14 }
  0x63   : > { %v385_v36 = vmax.f32 %v7997_v29, 0.0  ;;  %v386_v6 = vmax.f32 %v8000_v30, 0.0  ;;  %v6718_v37 = vunpack.c.l.bf16 %v6847_v5  ;;  %v6719_v38 = vunpack.c.h.bf16 %v6847_v5  ;;  %7151 = vmatpush3.bf16.msra.mxu1 %v7567_v34 }
  0x64   : > { %7111 = vmatmul.mubr.bf16.gmra.mxu0 %v6227_v22  ;;  %v1322_v39 = vsel %vm7794_vm2, %v1317_v25, %v1321_v1  ;;  %v1327_v3 = vrot.slane %v1326_v27, 4  ;;  %v748_v40 = vor.u32 %v746_v20, %v745_v28  ;;  %v750_v41 = vrot.slane %v745_v28, 4  ;;  %7152 = vmatprep.subr.bf16.mxu1 %v7569_v59  ;;  %v8073_v28 = vld [vmem:[%s10329_s2] ss:$0 sm:$0xff] }
  0x65   : > { %v6642_v42 = vpack.c.bf16 %v385_v36, %v385_v36  ;;  %v6643_v43 = vpack.c.bf16 %v386_v6, %v386_v6  ;;  %v317_v44 = vmul.f32 %v6718_v37, %v7780_v15  ;;  %v318_v29 = vmul.f32 %v6719_v38, %v7780_v15 }
  0x66   : > { %v1332_v30 = vsel %vm7794_vm2, %v1327_v3, %v1331_v18  ;;  %v749_v34 = vsel %vm7830_vm8, %v741_v57, %v748_v40  ;;  %v965_v45 = vsel %vm7842_vm10, %v750_v41, %v964_v21  ;;  %v6746_v31 = vunpack.c.l.bf16 %v8032_v11  ;;  %v918_v41 = vld [vmem:[#allocation2 + $0x3c] sm:$0xf] }
  0x67   : > { %v6234_v46 = vcombine.low %v1322_v39, %v1332_v30  ;;  %963 = vst [vmem:[#allocation2 + $0x88] sm:$0xf] %v749_v34  ;;  %966 = vst [vmem:[#allocation2 + $0x8c] sm:$0x1] %v965_v45  ;;  %v616_v47 = vshrl.u32 %v6642_v42, 16  ;;  %v619_v48 = vshll.u32 %v6642_v42, 16  ;;  %7153 = vmatpush3.bf16.msra.mxu1 %v7569_v59  ;;  %v355_v51 = vadd.f32 %v7790_v24, %v317_v44 }
  0x68   : > { %v624_v32 = vshrl.u32 %v6643_v43, 16  ;;  %v627_v15 = vshll.u32 %v6643_v43, 16  ;;  %v356_v52 = vadd.f32 %v7790_v24, %v318_v29  ;;  %v6747_v54 = vunpack.c.h.bf16 %v8032_v11  ;;  %7234 = vmatprep.subr.bf16.mxu1 %v7572_v35  ;;  %v922_v34 = vld [vmem:[#allocation2 + $0x44] sm:$0x1] }
  0x69   : > { %7126 = vmatprep.mubr.bf16.mxu1 %v6234_v46  ;;  %v1024_v55 = vld [vmem:[#allocation2 + $0x84] sm:$0xf]  ;;  %v618_v56 = vrot.slane %v616_v47, 7  ;;  %v331_v58 = vmul.f32 %v8059_v61, %v6746_v31  ;;  %v6750_v62 = vunpack.c.l.bf16 %v8051_v17  ;;  %v387_v1 = vmax.f32 %v355_v51, 0.0 }
  0x6a   : > { %v626_v60 = vrot.slane %v624_v32, 7  ;;  %v1334_v63 = vshrl.u32 %v1024_v55, 16  ;;  %v1337_v0 = vshll.u32 %v1024_v55, 16  ;;  %v388_v24 = vmax.f32 %v356_v52, 0.0 }
  0x6b   : > { %v621_v53 = vor.u32 %v619_v48, %v618_v56  ;;  %v622_v57 = vrot.slane %v618_v56, 4  ;;  %v6644_v10 = vpack.c.bf16 %v387_v1, %v387_v1  ;;  %v332_v14 = vmul.f32 %v8059_v61, %v6747_v54 }
  0x6c   : > { %v629_v5 = vor.u32 %v627_v15, %v626_v60  ;;  %v631_v59 = vrot.slane %v626_v60, 4  ;;  %v1336_v8 = vrot.slane %v1334_v63, 4  ;;  %v1339_v9 = vrot.slane %v1337_v0, 5 }
  0x6d   : > { %v6645_v33 = vpack.c.bf16 %v388_v24, %v388_v24  ;;  %v912_v18 = vsel %vm7836_vm9, %v621_v53, %v911_v49  ;;  %v633_v25 = vshrl.u32 %v6644_v10, 16  ;;  %v636_v27 = vshll.u32 %v6644_v10, 16 }
  0x6e   : > { %v630_v16 = vsel %vm7830_vm8, %v622_v57, %v629_v5  ;;  %v916_v20 = vsel %vm7842_vm10, %v631_v59, %v915_v50  ;;  %v1025_v21 = vld [vmem:[#allocation2 + $0x88] sm:$0xf]  ;;  %v1061_v11 = vld [vmem:[#allocation2 + $0x8c] sm:$0x1]  ;;  %v1340_v22 = vor.u32 %v1339_v9, %v1336_v8  ;;  %913 = vst [vmem:[#allocation2 + $0x30] sm:$0xf] %v912_v18  ;;  %v369_v35 = vadd.f32 %v8073_v28, %v331_v58 }
  0x6f   : > { %914 = vst [vmem:[#allocation2 + $0x34] sm:$0xf] %v630_v16  ;;  %917 = vst [vmem:[#allocation2 + $0x38] sm:$0x1] %v916_v20  ;;  %v1343_v36 = vshll.u32 %v1025_v21, 16  ;;  %v1347_v6 = vshrl.u32 %v1025_v21, 16  ;;  %v370_v42 = vadd.f32 %v8073_v28, %v332_v14  ;;  %v6751_v54 = vunpack.c.h.bf16 %v8051_v17 }
  0x70   : > { %v1353_v37 = vshll.u32 %v1061_v11, 16  ;;  %v641_v38 = vshrl.u32 %v6645_v33, 16  ;;  %v1341_v39 = vrot.slane %v1340_v22, 4  ;;  %v635_v3 = vrot.slane %v633_v25, 7  ;;  %v967_v18 = vld [vmem:[#allocation2 + $0x90] sm:$0xf] }
  0x71   : > { %v644_v40 = vshll.u32 %v6645_v33, 16  ;;  %v1345_v43 = vrot.slane %v1343_v36, 5  ;;  %v1349_v44 = vrot.slane %v1347_v6, 4  ;;  %v401_v46 = vmax.f32 %v369_v35, 0.0  ;;  %v6848_v20 = vld [vmem:[%s7774_s6 + $0x28] sm:$0xff]  }
  0x72   : > { %v1355_v29 = vrot.slane %v1353_v37, 5  ;;  %v643_v30 = vrot.slane %v641_v38, 7  ;;  %v638_v45 = vor.u32 %v636_v27, %v635_v3  ;;  %v639_v31 = vrot.slane %v635_v3, 4 }
  0x73   : > { %v402_v47 = vmax.f32 %v370_v42, 0.0  ;;  %v1346_v48 = vsel %vm7794_vm2, %v1341_v39, %v1345_v43  ;;  %v1350_v32 = vor.u32 %v1349_v44, %v1345_v43  ;;  %v6658_v51 = vpack.c.bf16 %v401_v46, %v401_v46 }
  0x74   : > { %v646_v15 = vor.u32 %v644_v40, %v643_v30  ;;  %v648_v49 = vrot.slane %v643_v30, 4  ;;  %v919_v50 = vsel %vm7836_vm9, %v638_v45, %v918_v41  ;;  %v333_v0 = vmul.f32 %v8059_v61, %v6750_v62 }
  0x75   : > { %v6659_v52 = vpack.c.bf16 %v402_v47, %v402_v47  ;;  %v1351_v55 = vrot.slane %v1350_v32, 4  ;;  %v8082_v56 = vld [vmem:[#allocation2 + $0x30] sm:$0xf]  ;;  %920 = vst [vmem:[#allocation2 + $0x3c] sm:$0xf] %v919_v50  ;;  %v752_v8 = vshrl.u32 %v6658_v51, 16  ;;  %v334_v35 = vmul.f32 %v8059_v61, %v6751_v54 }
  0x76   : > { %v8084_v60 = vld [vmem:[#allocation2 + $0x34] sm:$0xf]  ;;  %v647_v58 = vsel %vm7830_vm8, %v639_v31, %v646_v15  ;;  %v923_v63 = vsel %vm7842_vm10, %v648_v49, %v922_v34  ;;  %v8091_v1 = vld [vmem:[#allocation2 + $0x38] sm:$0x1]  ;;  %v1166_v24 = vshrl.u32 %v8082_v56, 16  ;;  %v1169_v17 = vshll.u32 %v8082_v56, 16 }
  0x77   : > { %v1175_v53 = vshll.u32 %v8084_v60, 16  ;;  %v1179_v57 = vshrl.u32 %v8084_v60, 16  ;;  %921 = vst [vmem:[#allocation2 + $0x40] sm:$0xf] %v647_v58  ;;  %924 = vst [vmem:[#allocation2 + $0x44] sm:$0x1] %v923_v63  ;;  %v1356_v5 = vsel %vm7794_vm2, %v1351_v55, %v1355_v29  ;;  %v371_v36 = vadd.f32 %v8073_v28, %v333_v0 }
  0x78   : > { %v1185_v59 = vshll.u32 %v8091_v1, 16  ;;  %v755_v62 = vshll.u32 %v6658_v51, 16  ;;  %v6235_v9 = vcombine.low %v1346_v48, %v1356_v5  ;;  %v1168_v10 = vrot.slane %v1166_v24, 4  ;;  %v971_v63 = vld [vmem:[#allocation2 + $0x98] sm:$0x1] }
  0x79   : > { %v1171_v33 = vrot.slane %v1169_v17, 5  ;;  %v1177_v16 = vrot.slane %v1175_v53, 5  ;;  %v1181_v14 = vrot.slane %v1179_v57, 4  ;;  %v754_v11 = vrot.slane %v752_v8, 7 }
  0x7a   : > { %v1187_v21 = vrot.slane %v1185_v59, 5  ;;  %v760_v22 = vshrl.u32 %v6659_v52, 16  ;;  %7127 = vmatmul.mubr.bf16.gmra.mxu1 %v6235_v9  ;;  %v763_v27 = vshll.u32 %v6659_v52, 16  ;;  %v372_v41 = vadd.f32 %v8073_v28, %v334_v35 }
  0x7b   : > { %v1172_v25 = vor.u32 %v1171_v33, %v1168_v10  ;;  %v1182_v6 = vor.u32 %v1181_v14, %v1177_v16  ;;  %v757_v37 = vor.u32 %v755_v62, %v754_v11  ;;  %v758_v38 = vrot.slane %v754_v11, 4  ;;  %v6849_v62 = vld [vmem:[%s7774_s6 + $0x30] sm:$0xff]  }
  0x7c   : > { %v762_v39 = vrot.slane %v760_v22, 7  ;;  %v8103_v40 = vld [vmem:[#allocation2 + $0x3c] sm:$0xf]  ;;  %v403_v42 = vmax.f32 %v371_v36, 0.0  ;;  %v6722_v43 = vunpack.c.l.bf16 %v6848_v20  ;;  %v404_v17 = vmax.f32 %v372_v41, 0.0 }
  0x7d   : > { %v1173_v3 = vrot.slane %v1172_v25, 4  ;;  %v1183_v44 = vrot.slane %v1182_v6, 4  ;;  %v1190_v34 = vshrl.u32 %v8103_v40, 16  ;;  %v968_v31 = vsel %vm7836_vm9, %v757_v37, %v967_v18 }
  0x7e   : > { %v8106_v29 = vld [vmem:[#allocation2 + $0x40] sm:$0xf]  ;;  %v8108_v30 = vld [vmem:[#allocation2 + $0x44] sm:$0x1]  ;;  %v765_v45 = vor.u32 %v763_v27, %v762_v39  ;;  %v1193_v47 = vshll.u32 %v8103_v40, 16  ;;  %v767_v24 = vrot.slane %v762_v39, 4  ;;  %v6660_v53 = vpack.c.bf16 %v403_v42, %v403_v42 }
  0x7f   : > { %v1178_v46 = vsel %vm7794_vm2, %v1173_v3, %v1177_v16  ;;  %v1199_v48 = vshll.u32 %v8106_v29, 16  ;;  %v1203_v32 = vshrl.u32 %v8106_v29, 16  ;;  %969 = vst [vmem:[#allocation2 + $0x90] sm:$0xf] %v968_v31  ;;  %v1188_v15 = vsel %vm7794_vm2, %v1183_v44, %v1187_v21  ;;  %v974_v39 = vld [vmem:[#allocation2 + $0x9c] sm:$0xf] }
  0x80   : > { %v1192_v49 = vrot.slane %v1190_v34, 4  ;;  %v1209_v50 = vshll.u32 %v8108_v30, 16  ;;  %v766_v51 = vsel %vm7830_vm8, %v758_v38, %v765_v45  ;;  %v6228_v52 = vcombine.low %v1178_v46, %v1188_v15 }
  0x81   : > { %v1195_v54 = vrot.slane %v1193_v47, 5  ;;  %v1201_v55 = vrot.slane %v1199_v48, 5  ;;  %v1205_v58 = vrot.slane %v1203_v32, 4  ;;  %970 = vst [vmem:[#allocation2 + $0x94] sm:$0xf] %v766_v51  ;;  %v6723_v59 = vunpack.c.h.bf16 %v6848_v20 }
  0x82   : > { %v1211_v0 = vrot.slane %v1209_v50, 5  ;;  %7114 = vmatprep.mubr.bf16.mxu0 %v6228_v52  ;;  %v319_v8 = vmul.f32 %v8059_v61, %v6722_v43  ;;  %v972_v9 = vsel %vm7842_vm10, %v767_v24, %v971_v63  ;;  %v6661_v10 = vpack.c.bf16 %v404_v17, %v404_v17  ;;  %v978_v47 = vld [vmem:[#allocation2 + $0xa4] sm:$0x1] }
  0x83   : > { %v1196_v57 = vor.u32 %v1195_v54, %v1192_v49  ;;  %v1206_v5 = vor.u32 %v1205_v58, %v1201_v55  ;;  %v769_v33 = vshrl.u32 %v6660_v53, 16  ;;  %v772_v16 = vshll.u32 %v6660_v53, 16  ;;  %973 = vst [vmem:[#allocation2 + $0x98] sm:$0x1] %v972_v9 }
  0x84   : > { %v320_v21 = vmul.f32 %v8059_v61, %v6723_v59  ;;  %v357_v11 = vadd.f32 %v8073_v28, %v319_v8  ;;  %v777_v20 = vshrl.u32 %v6661_v10, 16  ;;  %v780_v27 = vshll.u32 %v6661_v10, 16 }
  0x85   : > { %v1197_v18 = vrot.slane %v1196_v57, 4  ;;  %v1207_v14 = vrot.slane %v1206_v5, 4  ;;  %v771_v25 = vrot.slane %v769_v33, 7  ;;  %v6726_v35 = vunpack.c.l.bf16 %v6849_v62 }
  0x86   : > { %v8129_v22 = vld [vmem:[#allocation2 + $0x90] sm:$0xf]  ;;  %v779_v44 = vrot.slane %v777_v20, 7  ;;  %v358_v49 = vadd.f32 %v8073_v28, %v320_v21  ;;  %v389_v54 = vmax.f32 %v357_v11, 0.0  ;;  %v6727_v17 = vunpack.c.h.bf16 %v6849_v62 }
  0x87   : > { %v1202_v36 = vsel %vm7794_vm2, %v1197_v18, %v1201_v55  ;;  %v1212_v6 = vsel %vm7794_vm2, %v1207_v14, %v1211_v0  ;;  %v1358_v37 = vshrl.u32 %v8129_v22, 16  ;;  %v1361_v38 = vshll.u32 %v8129_v22, 16  ;;  %v8145_v55 = vld [vmem:[%s7774_s6 + $0x68] sm:$0xff]  }
  0x88   : > { %v6229_v3 = vcombine.low %v1202_v36, %v1212_v6  ;;  %v8137_v41 = vld [vmem:[#allocation2 + $0x94] sm:$0xf]  ;;  %v774_v42 = vor.u32 %v772_v16, %v771_v25  ;;  %v775_v43 = vrot.slane %v771_v25, 4  ;;  %v782_v48 = vor.u32 %v780_v27, %v779_v44 }
  0x89   : > { %v1360_v34 = vrot.slane %v1358_v37, 4  ;;  %v1363_v45 = vrot.slane %v1361_v38, 5  ;;  %v1367_v31 = vshll.u32 %v8137_v41, 16  ;;  %v1371_v46 = vshrl.u32 %v8137_v41, 16 }
  0x8a   : > { %7115 = vmatmul.mubr.bf16.gmra.mxu0 %v6229_v3  ;;  %v784_v32 = vrot.slane %v779_v44, 4  ;;  %v975_v15 = vsel %vm7836_vm9, %v774_v42, %v974_v39  ;;  %v8147_v58 = vld [vmem:[#allocation2 + $0x98] sm:$0x1]  ;;  %v783_v63 = vsel %vm7830_vm8, %v775_v43, %v782_v48  ;;  %v390_v24 = vmax.f32 %v358_v49, 0.0  ;;  %v929_v42 = vld [vmem:[#allocation2 + $0x50] sm:$0x1] }
  0x8b   : > { %v1364_v50 = vor.u32 %v1363_v45, %v1360_v34  ;;  %v1369_v51 = vrot.slane %v1367_v31, 5  ;;  %v1373_v52 = vrot.slane %v1371_v46, 4  ;;  %976 = vst [vmem:[#allocation2 + $0x9c] sm:$0xf] %v975_v15  ;;  %v1377_v5 = vshll.u32 %v8147_v58, 16 }
  0x8c   : > { %v979_v0 = vsel %vm7842_vm10, %v784_v32, %v978_v47  ;;  %977 = vst [vmem:[#allocation2 + $0xa0] sm:$0xf] %v783_v63  ;;  %v6646_v59 = vpack.c.bf16 %v389_v54, %v389_v54  ;;  %v6647_v8 = vpack.c.bf16 %v390_v24, %v390_v24  ;;  %v321_v9 = vmul.f32 %v8059_v61, %v6726_v35  ;;  %v925_v35 = vld [vmem:[#allocation2 + $0x48] sm:$0xf] }
  0x8d   : > { %v1365_v53 = vrot.slane %v1364_v50, 4  ;;  %v1374_v57 = vor.u32 %v1373_v52, %v1369_v51  ;;  %980 = vst [vmem:[#allocation2 + $0xa4] sm:$0x1] %v979_v0  ;;  %v322_v10 = vmul.f32 %v8059_v61, %v6727_v17  ;;  %v6754_v33 = vunpack.c.l.bf16 %v8145_v55 }
  0x8e   : > { %v1379_v14 = vrot.slane %v1377_v5, 5  ;;  %v650_v62 = vshrl.u32 %v6646_v59, 16  ;;  %v653_v21 = vshll.u32 %v6646_v59, 16  ;;  %v658_v11 = vshrl.u32 %v6647_v8, 16 }
  0x8f   : > { %v1370_v16 = vsel %vm7794_vm2, %v1365_v53, %v1369_v51  ;;  %v1375_v18 = vrot.slane %v1374_v57, 4  ;;  %v661_v25 = vshll.u32 %v6647_v8, 16  ;;  %v359_v20 = vadd.f32 %v8073_v28, %v321_v9  ;;  %v6857_v8 = vld [vmem:[%s7774_s6 + $0x70] sm:$0xff]  }
  0x90   : > { %v652_v36 = vrot.slane %v650_v62, 7  ;;  %v360_v6 = vadd.f32 %v8073_v28, %v322_v10  ;;  %v6755_v37 = vunpack.c.h.bf16 %v8145_v55  ;;  %v660_v3 = vrot.slane %v658_v11, 7 }
  0x91   : > { %v1380_v27 = vsel %vm7794_vm2, %v1375_v18, %v1379_v14  ;;  %v391_v43 = vmax.f32 %v359_v20, 0.0  ;;  %v335_v44 = vmul.f32 %v8059_v61, %v6754_v33  ;;  %vm2096_vm11 = vcmask 1042432  }
  0x92   : > { %v6236_v38 = vcombine.low %v1370_v16, %v1380_v27  ;;  %v8164_v39 = vld [vmem:[#allocation2 + $0x9c] sm:$0xf]  ;;  %v655_v31 = vor.u32 %v653_v21, %v652_v36  ;;  %v656_v46 = vrot.slane %v652_v36, 4  ;;  %v663_v32 = vor.u32 %v661_v25, %v660_v3  ;;  %v932_v25 = vld [vmem:[#allocation2 + $0x54] sm:$0xf] }
  0x93   : > { %v1382_v34 = vshrl.u32 %v8164_v39, 16  ;;  %v1385_v45 = vshll.u32 %v8164_v39, 16  ;;  %v8169_v47 = vld [vmem:[#allocation2 + $0xa0] sm:$0xf]  ;;  %v665_v15 = vrot.slane %v660_v3, 4  ;;  %v392_v49 = vmax.f32 %v360_v6, 0.0 }
  0x94   : > { %7130 = vmatprep.mubr.bf16.mxu1 %v6236_v38  ;;  %v8171_v48 = vld [vmem:[#allocation2 + $0xa4] sm:$0x1]  ;;  %v6648_v50 = vpack.c.bf16 %v391_v43, %v391_v43  ;;  %v1391_v54 = vshll.u32 %v8169_v47, 16  ;;  %v1395_v55 = vshrl.u32 %v8169_v47, 16  ;;  %v664_v0 = vsel %vm7830_vm8, %v656_v46, %v663_v32  ;;  %v936_v3 = vld [vmem:[#allocation2 + $0x5c] sm:$0x1] }
  0x95   : > { %v1384_v51 = vrot.slane %v1382_v34, 4  ;;  %v1387_v52 = vrot.slane %v1385_v45, 5  ;;  %v1401_v63 = vshll.u32 %v8171_v48, 16  ;;  %v926_v24 = vsel %vm7836_vm9, %v655_v31, %v925_v35  ;;  %928 = vst [vmem:[#allocation2 + $0x4c] sm:$0xf] %v664_v0 }
  0x96   : > { %v930_v17 = vsel %vm7842_vm10, %v665_v15, %v929_v42  ;;  %v1393_v57 = vrot.slane %v1391_v54, 5  ;;  %v1397_v5 = vrot.slane %v1395_v55, 4  ;;  %927 = vst [vmem:[#allocation2 + $0x48] sm:$0xf] %v926_v24  ;;  %v6649_v59 = vpack.c.bf16 %v392_v49, %v392_v49 }
  0x97   : > { %v1388_v53 = vor.u32 %v1387_v52, %v1384_v51  ;;  %931 = vst [vmem:[#allocation2 + $0x50] sm:$0x1] %v930_v17  ;;  %v1403_v9 = vrot.slane %v1401_v63, 5  ;;  %v667_v10 = vshrl.u32 %v6648_v50, 16  ;;  %v670_v33 = vshll.u32 %v6648_v50, 16 }
  0x98   : > { %v336_v16 = vmul.f32 %v8059_v61, %v6755_v37  ;;  %v1398_v14 = vor.u32 %v1397_v5, %v1393_v57  ;;  %v675_v62 = vshrl.u32 %v6649_v59, 16  ;;  %v678_v21 = vshll.u32 %v6649_v59, 16 }
  0x99   : > { %v1389_v18 = vrot.slane %v1388_v53, 4  ;;  %v669_v11 = vrot.slane %v667_v10, 7  ;;  %v373_v20 = vadd.f32 %v8073_v28, %v335_v44  ;;  %v6758_v36 = vunpack.c.l.bf16 %v6857_v8 }
  0x9a   : > { %v374_v27 = vadd.f32 %v8073_v28, %v336_v16  ;;  %v1399_v6 = vrot.slane %v1398_v14, 4  ;;  %v677_v38 = vrot.slane %v675_v62, 7  ;;  %v6759_v42 = vunpack.c.h.bf16 %v6857_v8 }
  0x9b   : > { %v1394_v35 = vsel %vm7794_vm2, %v1389_v18, %v1393_v57  ;;  %v672_v43 = vor.u32 %v670_v33, %v669_v11  ;;  %v673_v37 = vrot.slane %v669_v11, 4  ;;  %v405_v34 = vmax.f32 %v373_v20, 0.0  ;;  %v981_v20 = vld [vmem:[#allocation2 + $0xa8] sm:$0xf] }
  0x9c   : > { %v406_v45 = vmax.f32 %v374_v27, 0.0  ;;  %v1404_v31 = vsel %vm7794_vm2, %v1399_v6, %v1403_v9  ;;  %v680_v46 = vor.u32 %v678_v21, %v677_v38  ;;  %v682_v32 = vrot.slane %v677_v38, 4  ;;  %v8193_v50 = vld [vmem:[#allocation2 + $0x4c] sm:$0xf] }
  0x9d   : > { %v337_v44 = vmul.f32 %v8059_v61, %v6758_v36  ;;  %v6237_v15 = vcombine.low %v1394_v35, %v1404_v31  ;;  %v8191_v49 = vld [vmem:[#allocation2 + $0x48] sm:$0xf]  ;;  %v933_v52 = vsel %vm7836_vm9, %v672_v43, %v932_v25  ;;  %v6662_v54 = vpack.c.bf16 %v405_v34, %v405_v34 }
  0x9e   : > { %v8195_v51 = vld [vmem:[#allocation2 + $0x50] sm:$0x1]  ;;  %v6663_v55 = vpack.c.bf16 %v406_v45, %v406_v45  ;;  %v1214_v63 = vshrl.u32 %v8191_v49, 16  ;;  %v1217_v0 = vshll.u32 %v8191_v49, 16  ;;  %v1223_v24 = vshll.u32 %v8193_v50, 16 }
  0x9f   : > { %v1227_v17 = vshrl.u32 %v8193_v50, 16  ;;  %934 = vst [vmem:[#allocation2 + $0x54] sm:$0xf] %v933_v52  ;;  %7131 = vmatmul.mubr.bf16.gmra.mxu1 %v6237_v15  ;;  %v1233_v53 = vshll.u32 %v8195_v51, 16  ;;  %v681_v57 = vsel %vm7830_vm8, %v673_v37, %v680_v46  ;;  %v937_v5 = vsel %vm7842_vm10, %v682_v32, %v936_v3  ;;  %v8210_v3 = vld [vmem:[#allocation2 + $0x68] sm:$0x1] }
  0xa0   : > { %v786_v59 = vshrl.u32 %v6662_v54, 16  ;;  %v1216_v8 = vrot.slane %v1214_v63, 4  ;;  %v1219_v9 = vrot.slane %v1217_v0, 5  ;;  %v1225_v10 = vrot.slane %v1223_v24, 5  ;;  %935 = vst [vmem:[#allocation2 + $0x58] sm:$0xf] %v681_v57 }
  0xa1   : > { %v1229_v33 = vrot.slane %v1227_v17, 4  ;;  %938 = vst [vmem:[#allocation2 + $0x5c] sm:$0x1] %v937_v5  ;;  %v1235_v16 = vrot.slane %v1233_v53, 5  ;;  %v789_v14 = vshll.u32 %v6662_v54, 16  ;;  %v794_v62 = vshrl.u32 %v6663_v55, 16 }
  0xa2   : > { %v788_v18 = vrot.slane %v786_v59, 7  ;;  %v1220_v21 = vor.u32 %v1219_v9, %v1216_v8  ;;  %v797_v25 = vshll.u32 %v6663_v55, 16  ;;  %v338_v27 = vmul.f32 %v8059_v61, %v6759_v42  ;;  %v985_v45 = vld [vmem:[#allocation2 + $0xb0] sm:$0x1] }
  0xa3   : > { %v1230_v11 = vor.u32 %v1229_v33, %v1225_v10  ;;  %v796_v6 = vrot.slane %v794_v62, 7  ;;  %v375_v38 = vadd.f32 %v8073_v28, %v337_v44  ;;  %vm2097_vm12 = vcmask 1046532  }
  0xa4   : > { %v791_v36 = vor.u32 %v789_v14, %v788_v18  ;;  %v792_v35 = vrot.slane %v788_v18, 4  ;;  %v1221_v37 = vrot.slane %v1220_v21, 4  ;;  %v376_v31 = vadd.f32 %v8073_v28, %v338_v27  ;;  %v8224_v28 = vld [vmem:[#allocation2] sm:$0xe]  ;;  %vm8263_vm13 = vmor %vm2096_vm11, %vm2097_vm12 }
  0xa5   : > { %v1231_v34 = vrot.slane %v1230_v11, 4  ;;  %v799_v32 = vor.u32 %v797_v25, %v796_v6  ;;  %v801_v15 = vrot.slane %v796_v6, 4  ;;  %v407_v42 = vmax.f32 %v375_v38, 0.0  ;;  %v8238_v11 = vld [vmem:[#allocation2 + $0xc] sm:$0xe] }
  0xa6   : > { %v8214_v46 = vld [vmem:[#allocation2 + $0x54] sm:$0xf]  ;;  %v982_v61 = vsel %vm7836_vm9, %v791_v36, %v981_v20  ;;  %v1226_v44 = vsel %vm7794_vm2, %v1221_v37, %v1225_v10  ;;  %v408_v57 = vmax.f32 %v376_v31, 0.0  ;;  %v6272_v21 = vrot.slane %v8224_v28, 9  ;;  %v8240_v37 = vld [vmem:[#allocation2 + $0x4] sm:$0xf] }
  0xa7   : > { %v1236_v52 = vsel %vm7794_vm2, %v1231_v34, %v1235_v16  ;;  %v1238_v54 = vshrl.u32 %v8214_v46, 16  ;;  %v1241_v55 = vshll.u32 %v8214_v46, 16  ;;  %983 = vst [vmem:[#allocation2 + $0xa8] sm:$0xf] %v982_v61  ;;  %v8226_v0 = vld [vmem:[#allocation2 + $0x58] sm:$0xf]  ;;  %v800_v17 = vsel %vm7830_vm8, %v792_v35, %v799_v32 }
  0xa8   : > { %v6230_v63 = vcombine.low %v1226_v44, %v1236_v52  ;;  %v8228_v24 = vld [vmem:[#allocation2 + $0x5c] sm:$0x1]  ;;  %v986_v53 = vsel %vm7842_vm10, %v801_v15, %v985_v45  ;;  %v1247_v8 = vshll.u32 %v8226_v0, 16  ;;  %v1251_v9 = vshrl.u32 %v8226_v0, 16  ;;  %984 = vst [vmem:[#allocation2 + $0xac] sm:$0xf] %v800_v17 }
  0xa9   : > { %v1240_v5 = vrot.slane %v1238_v54, 4  ;;  %v1243_v59 = vrot.slane %v1241_v55, 5  ;;  %987 = vst [vmem:[#allocation2 + $0xb0] sm:$0x1] %v986_v53  ;;  %v1257_v10 = vshll.u32 %v8228_v24, 16  ;;  %v6664_v33 = vpack.c.bf16 %v407_v42, %v407_v42 }
  0xaa   : > { %7118 = vmatprep.mubr.bf16.mxu0 %v6230_v63  ;;  %v6665_v16 = vpack.c.bf16 %v408_v57, %v408_v57  ;;  %v1249_v14 = vrot.slane %v1247_v8, 5  ;;  %v1253_v62 = vrot.slane %v1251_v9, 4  ;;  %v2101_v34 = vrot.slane %v8240_v37, 5  ;;  %v988_v15 = vld [vmem:[#allocation2 + $0xb4] sm:$0xf] }
  0xab   : > { %v1244_v18 = vor.u32 %v1243_v59, %v1240_v5  ;;  %v1259_v25 = vrot.slane %v1257_v10, 5  ;;  %v803_v20 = vshrl.u32 %v6664_v33, 16  ;;  %v806_v27 = vshll.u32 %v6664_v33, 16  ;;  %v8245_v61 = vld [vmem:[#allocation2] sm:$0xf] }
  0xac   : > { %v811_v36 = vshrl.u32 %v6665_v16, 16  ;;  %v1254_v6 = vor.u32 %v1253_v62, %v1249_v14  ;;  %v814_v38 = vshll.u32 %v6665_v16, 16  ;;  %v6248_v42 = vcombine.low %v8245_v61, %v8240_v37  ;;  %v992_v63 = vld [vmem:[#allocation2 + $0xbc] sm:$0x1]  ;;  %v8396_v37 = vld [vmem:[#allocation2 + $0x70] sm:$0xf] }
  0xad   : > { %v1245_v35 = vrot.slane %v1244_v18, 4  ;;  %v805_v31 = vrot.slane %v803_v20, 7  ;;  %v6273_v44 = vrot.slane %v8238_v11, 9  ;;  %v10355_v18 = vmov 0 }
  0xae   : > { %v8243_v45 = vld [vmem:[#allocation2 + $0xa8] sm:$0xf]  ;;  %v813_v32 = vrot.slane %v811_v36, 7  ;;  %v1255_v54 = vrot.slane %v1254_v6, 4  ;;  %v10356_v18 = vsel %vm8263_vm13, 4294967295, %v10355_v18  ;;  %v2164_v61 = vrot.slane %v8396_v37, 5 }
  0xaf   : > { %v1250_v52 = vsel %vm7794_vm2, %v1245_v35, %v1249_v14  ;;  %v1406_v55 = vshrl.u32 %v8243_v45, 16  ;;  %v1409_v28 = vshll.u32 %v8243_v45, 16  ;;  %v8254_v17 = vld [vmem:[#allocation2 + $0xac] sm:$0xf]  ;;  %v808_v57 = vor.u32 %v806_v27, %v805_v31  ;;  %10357 = vst [vmem:[#allocation6_spill] sm:$0xff] %v10356_v18 }
  0xb0   : > { %v8256_v53 = vld [vmem:[#allocation2 + $0xb0] sm:$0x1]  ;;  %v809_v5 = vrot.slane %v805_v31, 4  ;;  %v816_v59 = vor.u32 %v814_v38, %v813_v32  ;;  %v818_v8 = vrot.slane %v813_v32, 4  ;;  %v1260_v9 = vsel %vm7794_vm2, %v1255_v54, %v1259_v25  ;;  %v2050_v27 = vld [vmem:[#allocation2 + $0x18] sm:$0xe] }
  0xb1   : > { %v1408_v10 = vrot.slane %v1406_v55, 4  ;;  %v1411_v33 = vrot.slane %v1409_v28, 5  ;;  %v1415_v16 = vshll.u32 %v8254_v17, 16  ;;  %v6231_v14 = vcombine.low %v1250_v52, %v1260_v9  ;;  %v8277_v55 = vld [vmem:[#allocation2 + $0x10] sm:$0xf] }
  0xb2   : > { %v1419_v62 = vshrl.u32 %v8254_v17, 16  ;;  %v1425_v11 = vshll.u32 %v8256_v53, 16  ;;  %v817_v20 = vsel %vm7830_vm8, %v809_v5, %v816_v59  ;;  %v989_v35 = vsel %vm7836_vm9, %v808_v57, %v988_v15  ;;  %v8280_v5 = vld [vmem:[#allocation2 + $0xc] sm:$0xf] }
  0xb3   : > { %v1412_v25 = vor.u32 %v1411_v33, %v1408_v10  ;;  %v1417_v36 = vrot.slane %v1415_v16, 5  ;;  %991 = vst [vmem:[#allocation2 + $0xb8] sm:$0xf] %v817_v20  ;;  %v993_v6 = vsel %vm7842_vm10, %v818_v8, %v992_v63  ;;  %7119 = vmatmul.mubr.bf16.gmra.mxu0 %v6231_v14  ;;  %990 = vst [vmem:[#allocation2 + $0xb4] sm:$0xf] %v989_v35  ;;  %v2103_v52 = vrot.slane %v2101_v34, 4 }
  0xb4   : > { %v1421_v38 = vrot.slane %v1419_v62, 4  ;;  %v1427_v31 = vrot.slane %v1425_v11, 5  ;;  %994 = vst [vmem:[#allocation2 + $0xbc] sm:$0x1] %v993_v6  ;;  %v2102_v32 = vsel %vm8263_vm13, %v6272_v21, %v2101_v34  ;;  %v2108_v28 = vrot.slane %v8277_v55, 5 }
  0xb5   : > { %v1413_v54 = vrot.slane %v1412_v25, 4  ;;  %v6274_v63 = vrot.slane %v2050_v27, 9  ;;  %v2105_v59 = vsel %vm8263_vm13, %v2103_v52, %v2104_v2  ;;  %v8288_v8 = vld [vmem:[#allocation2 + $0x1c] sm:$0xf]  ;;  %v7675_v34 = vld [vmem:[#allocation2 + $0x20] sm:$0x1] }
  0xb6   : > { %v1422_v57 = vor.u32 %v1421_v38, %v1417_v36  ;;  %v2115_v21 = vrot.slane %v8288_v8, 5  ;;  %v2118_v9 = vrot.slane %v7675_v34, 5  ;;  %v2051_v10 = vld [vmem:[#allocation2 + $0x24] sm:$0xe]  ;;  %v6304_v16 = vcombine.low %v2102_v32, %v2105_v59  ;;  %v8297_v20 = vld [vmem:[#allocation2 + $0x18] sm:$0xf] }
  0xb7   : > { %v1418_v33 = vsel %vm7794_vm2, %v1413_v54, %v1417_v36  ;;  %v2109_v14 = vsel %vm8263_vm13, %v6273_v44, %v2108_v28  ;;  %v2110_v62 = vrot.slane %v2108_v28, 4  ;;  %v6275_v36 = vrot.slane %v2051_v10, 9  ;;  %v8305_v35 = vld [vmem:[#allocation2 + $0x28] sm:$0xf]  ;;  %v7678_v6 = vld [vmem:[#allocation2 + $0x2c] sm:$0x1] }
  0xb8   : > { %v1423_v11 = vrot.slane %v1422_v57, 4  ;;  %v2116_v7 = vsel %vm8263_vm13, %v6274_v63, %v2115_v21  ;;  %v2117_v2 = vrot.slane %v2115_v21, 4  ;;  %7202 = vmatprep.mubr.bf16.mxu0 %v6304_v16  ;;  %v2122_v44 = vrot.slane %v8305_v35, 5  ;;  %v7578_v63 = vld [vmem:[%s10330_s3 + $0x130] sm:$0xff]  }
  0xb9   : > { %v2112_v25 = vsel %vm8263_vm13, %v2110_v62, %v2111_v23  ;;  %v2125_v38 = vrot.slane %v7678_v6, 5  ;;  %v2052_v57 = vld [vmem:[#allocation2 + $0x30] sm:$0xe]  ;;  %v2054_v23 = vld [vmem:[#allocation2 + $0x48] sm:$0xe] }
  0xba   : > { %v1428_v32 = vsel %vm7794_vm2, %v1423_v11, %v1427_v31  ;;  %v8310_v52 = vld [vmem:[#allocation2 + $0xb8] sm:$0xf]  ;;  %v6305_v54 = vcombine.low %v2109_v14, %v2112_v25  ;;  %v2119_v28 = vsel %vm8263_vm13, %v2117_v2, %v2118_v9  ;;  %v8321_v21 = vld [vmem:[#allocation2 + $0xb4] sm:$0xf]  ;;  %v2123_v11 = vsel %vm8263_vm13, %v6275_v36, %v2122_v44  ;;  %v7582_v2 = vld [vmem:[%s10330_s3 + $0x128] sm:$0xff]  }
  0xbb   : > { %v6238_v59 = vcombine.low %v1418_v33, %v1428_v32  ;;  %v8323_v31 = vld [vmem:[#allocation2 + $0xbc] sm:$0x1]  ;;  %v1439_v34 = vshll.u32 %v8310_v52, 16  ;;  %v1443_v10 = vshrl.u32 %v8310_v52, 16  ;;  %v6306_v9 = vcombine.low %v2116_v7, %v2119_v28  ;;  %v2053_v33 = vld [vmem:[#allocation2 + $0x3c] sm:$0xe] }
  0xbc   : > { %v1430_v16 = vshrl.u32 %v8321_v21, 16  ;;  %v1433_v14 = vshll.u32 %v8321_v21, 16  ;;  %v1449_v62 = vshll.u32 %v8323_v31, 16  ;;  %7203 = vmatmul.mubr.bf16.vlgmr.msra.gmra.mxu0 %v6305_v54  ;;  %v7680_v7 = vld [vmem:[%s10330_s3 + $0x138] sm:$0xff]   ;;  %v2124_v32 = vrot.slane %v2122_v44, 4 }
  0xbd   : > { %7134 = vmatprep.mubr.bf16.mxu1 %v6238_v59  ;;  %v1441_v25 = vrot.slane %v1439_v34, 5  ;;  %v1445_v6 = vrot.slane %v1443_v10, 4  ;;  %7283 = vmatpush3.bf16.msra.mxu0 %v7680_v7  ;;  %v6276_v28 = vrot.slane %v2052_v57, 9  ;;  %v2129_v36 = vrot.slane %v8084_v60, 5 }
  0xbe   : > { %v1432_v54 = vrot.slane %v1430_v16, 4  ;;  %v1435_v27 = vrot.slane %v1433_v14, 5  ;;  %v1451_v15 = vrot.slane %v1449_v62, 5  ;;  %7206 = vmatprep.mubr.bf16.mxu0 %v6306_v9  ;;  %7284 = vmatprep.subr.bf16.mxu0 %v7578_v63  ;;  %v2126_v59 = vsel %vm8263_vm13, %v2124_v32, %v2125_v38 }
  0xbf   : > { %v1446_v43 = vor.u32 %v1445_v6, %v1441_v25  ;;  %v2132_v34 = vrot.slane %v8091_v1, 5  ;;  %v6307_v44 = vcombine.low %v2123_v11, %v2126_v59  ;;  %v2130_v57 = vsel %vm8263_vm13, %v6276_v28, %v2129_v36  ;;  %v7586_v1 = vld [vmem:[%s10330_s3 + $0x120] sm:$0xff]  }
  0xc0   : > { %v1436_v7 = vor.u32 %v1435_v27, %v1432_v54  ;;  %v2131_v16 = vrot.slane %v2129_v36, 4  ;;  %v6277_v9 = vrot.slane %v2053_v33, 9  ;;  %v2136_v62 = vrot.slane %v8106_v29, 5 }
  0xc1   : > { %v1447_v14 = vrot.slane %v1446_v43, 4  ;;  %7285 = vmatpush3.bf16.msra.mxu0 %v7578_v63  ;;  %v2139_v6 = vrot.slane %v8108_v30, 5  ;;  %v6278_v32 = vrot.slane %v2054_v23, 9  ;;  %v2055_v43 = vld [vmem:[#allocation2 + $0x54] sm:$0xe]  ;;  %v2143_v59 = vrot.slane %v8193_v50, 5 }
  0xc2   : > { %v1437_v38 = vrot.slane %v1436_v7, 4  ;;  %v2133_v27 = vsel %vm8263_vm13, %v2131_v16, %v2132_v34  ;;  %7286 = vmatprep.subr.bf16.mxu0 %v7582_v2  ;;  %v2056_v63 = vld [vmem:[#allocation2 + $0x60] sm:$0xe]  ;;  %v2137_v30 = vsel %vm8263_vm13, %v6277_v9, %v2136_v62  ;;  %v2138_v54 = vrot.slane %v2136_v62, 4  ;;  %v2057_v7 = vld [vmem:[#allocation2 + $0x6c] sm:$0xe] }
  0xc3   : > { %v1452_v33 = vsel %vm7794_vm2, %v1447_v14, %v1451_v15  ;;  %v6308_v28 = vcombine.low %v2130_v57, %v2133_v27  ;;  %v2146_v34 = vrot.slane %v8195_v51, 5  ;;  %v7590_v15 = vld [vmem:[%s10330_s3 + $0x118] sm:$0xff]   ;;  %v2144_v51 = vsel %vm8263_vm13, %v6278_v32, %v2143_v59 }
  0xc4   : > { %v1442_v36 = vsel %vm7794_vm2, %v1437_v38, %v1441_v25  ;;  %7207 = vmatmul.mubr.bf16.gmra.mxu0 %v6307_v44  ;;  %v2140_v16 = vsel %vm8263_vm13, %v2138_v54, %v2139_v6  ;;  %v6279_v25 = vrot.slane %v2055_v43, 9  ;;  %v2150_v44 = vrot.slane %v8226_v0, 5  ;;  %v2058_v43 = vld [vmem:[#allocation2 + $0x78] sm:$0xe] }
  0xc5   : > { %v6239_v57 = vcombine.low %v1442_v36, %v1452_v33  ;;  %7210 = vmatprep.mubr.bf16.mxu0 %v6308_v28  ;;  %7287 = vmatpush3.bf16.msra.mxu0 %v7582_v2  ;;  %v6309_v14 = vcombine.low %v2137_v30, %v2140_v16  ;;  %v2145_v9 = vrot.slane %v2143_v59, 4  ;;  %v2153_v62 = vrot.slane %v8228_v24, 5  ;;  %v8385_v24 = vld [vmem:[#allocation2 + $0x64] sm:$0xf]  ;;  %v8388_v28 = vld [vmem:[#allocation2 + $0x60] sm:$0xf] }
  0xc6   : > { %7288 = vmatprep.subr.bf16.mxu0 %v7586_v1  ;;  %v8376_v38 = vsel %vm8263_vm13, %v6279_v25, %v2150_v44  ;;  %v2152_v27 = vrot.slane %v2150_v44, 4  ;;  %v6280_v6 = vrot.slane %v2056_v63, 9  ;;  %v2157_v33 = vrot.slane %v8385_v24, 5  ;;  %v2059_v36 = vld [vmem:[#allocation2 + $0x84] sm:$0xe] }
  0xc7   : > { %7135 = vmatmul.mubr.bf16.gmra.mxu1 %v6239_v57  ;;  %v2147_v32 = vsel %vm8263_vm13, %v2145_v9, %v2146_v34  ;;  %v6281_v54 = vrot.slane %v2057_v7, 9  ;;  %v8405_v25 = vld [vmem:[#allocation2 + $0x6c] sm:$0xf]  ;;  %v7687_v30 = vld [vmem:[#allocation2 + $0x80] sm:$0x1]  ;;  %v2188_v10 = vrot.slane %v8147_v58, 5 }
  0xc8   : > { %7154 = vmatprep.mubr.bf16.mxu1 %v6248_v42  ;;  %v6310_v63 = vcombine.low %v2144_v51, %v2147_v32  ;;  %v8394_v59 = vsel %vm8263_vm13, %v2152_v27, %v2153_v62  ;;  %v7684_v42 = vld [vmem:[#allocation2 + $0x74] sm:$0x1]  ;;  %v8403_v16 = vsel %vm8263_vm13, %v6280_v6, %v2157_v33  ;;  %v2159_v7 = vrot.slane %v2157_v33, 4  ;;  %v8421_v6 = vld [vmem:[#allocation2 + $0x7c] sm:$0xf] }
  0xc9   : > { %7289 = vmatpush3.bf16.msra.mxu0 %v7586_v1  ;;  %v2167_v34 = vrot.slane %v7684_v42, 5  ;;  %v6311_v57 = vcombine.low %v8376_v38, %v8394_v59  ;;  %v7594_v1 = vld [vmem:[%s10330_s3 + $0x110] sm:$0xff]   ;;  %v8419_v9 = vsel %vm8263_vm13, %v6281_v54, %v2164_v61  ;;  %v2166_v62 = vrot.slane %v2164_v61, 4  ;;  %v8430_v23 = vld [vmem:[#allocation2 + $0x78] sm:$0xf] }
  0xca   : > { %7290 = vmatprep.subr.bf16.mxu0 %v7590_v15  ;;  %v8415_v51 = vld [vmem:[%s10330_s3 + $0xf0] sm:$0xff]   ;;  %v6282_v27 = vrot.slane %v2058_v43, 9  ;;  %v2171_v32 = vrot.slane %v8421_v6, 5  ;;  %v10358_v42 = vrot.slane %v8210_v3, 5  ;;  %v2174_v2 = vrot.slane %v7687_v30, 5 }
  0xcb   : > { %v2060_v33 = vld [vmem:[#allocation2 + $0x90] sm:$0xe]  ;;  %v6283_v43 = vrot.slane %v2059_v36, 9  ;;  %v2061_v61 = vld [vmem:[#allocation2 + $0x9c] sm:$0xe]  ;;  %v8438_v3 = vsel %vm8263_vm13, %v2166_v62, %v2167_v34  ;;  %v10360_v62 = vcombine.low %v8297_v20, %v8288_v8 }
  0xcc   : > { %7211 = vmatmul.mubr.bf16.gmra.mxu0 %v6309_v14  ;;  %v8428_v44 = vsel %vm8263_vm13, %v2159_v7, %v10358_v42  ;;  %v8442_v14 = vsel %vm8263_vm13, %v6282_v27, %v2171_v32  ;;  %v2173_v30 = vrot.slane %v2171_v32, 4  ;;  %v7598_v7 = vld [vmem:[%s10330_s3 + $0x108] sm:$0xff]   ;;  %v10359_v27 = vcombine.low %v8280_v5, %v8277_v55 }
  0xcd   : > { %7214 = vmatprep.mubr.bf16.mxu0 %v6310_v63  ;;  %v6312_v11 = vcombine.low %v8403_v16, %v8428_v44  ;;  %7291 = vmatpush3.bf16.msra.mxu0 %v7590_v15  ;;  %v2062_v36 = vld [vmem:[#allocation2 + $0xa8] sm:$0xe]  ;;  %v7690_v34 = vld [vmem:[#allocation2 + $0x8c] sm:$0x1]  ;;  %v8452_v15 = vld [vmem:[#allocation2 + $0x84] sm:$0xf] }
  0xce   : > { %v8449_v42 = vld [vmem:[#allocation2 + $0x88] sm:$0xf]  ;;  %v2181_v44 = vrot.slane %v7690_v34, 5  ;;  %7292 = vmatprep.subr.bf16.mxu0 %v7594_v1  ;;  %v8461_v32 = vsel %vm8263_vm13, %v2173_v30, %v2174_v2  ;;  %v6284_v54 = vrot.slane %v2060_v33, 9  ;;  %v2185_v63 = vrot.slane %v8137_v41, 5  ;;  %v7692_v34 = vld [vmem:[%s10330_s3 + $0xf8] sm:$0xff]  }
  0xcf   : > { %v2178_v16 = vrot.slane %v8449_v42, 5  ;;  %7155 = vmatmul.mubr.bf16.vlgmr.msra.gmra.mxu1 %v10359_v27  ;;  %v7580_v33 = vld [vmem:[%s10330_s3 + $0xe8] sm:$0xff]   ;;  %v6285_v30 = vrot.slane %v2061_v61, 9  ;;  %v7584_v27 = vld [vmem:[%s10330_s3 + $0xe0] sm:$0xff]  }
  0xd0   : > { %7235 = vmatpush3.bf16.msra.mxu1 %v7692_v34  ;;  %7158 = vmatprep.mubr.bf16.mxu1 %v10360_v62  ;;  %v8485_v8 = vsel %vm8263_vm13, %v6284_v54, %v2185_v63  ;;  %v2187_v20 = vrot.slane %v2185_v63, 4  ;;  %v2195_v62 = vrot.slane %v8171_v48, 5  ;;  %v6286_v34 = vrot.slane %v2062_v36, 9  ;;  %v2919_v58 = vld [vmem:[#allocation2 + $0xc] sm:$0xf]  ;;  %v7602_v48 = vld [vmem:[%s10330_s3 + $0x100] sm:$0xff]  }
  0xd1   : > { %v8475_v5 = vsel %vm8263_vm13, %v6283_v43, %v2178_v16  ;;  %v2180_v2 = vrot.slane %v2178_v16, 4  ;;  %7236 = vmatprep.subr.bf16.mxu1 %v8415_v51  ;;  %7293 = vmatpush3.bf16.msra.mxu0 %v7594_v1  ;;  %v2192_v43 = vrot.slane %v8169_v47, 5  ;;  %v2063_v1 = vld [vmem:[#allocation2 + $0xb4] sm:$0xe]  ;;  %v8510_v36 = vld [vmem:[#allocation2 + $0x14] sm:$0x1] }
  0xd2   : > { %7294 = vmatprep.subr.bf16.mxu0 %v7598_v7  ;;  %v8499_v61 = vsel %vm8263_vm13, %v2187_v20, %v2188_v10  ;;  %10362 = vst [vmem:[#allocation8_spill] sm:$0xff] %v8510_v36  ;;  %v2199_v20 = vrot.slane %v8254_v17, 5  ;;  %v6287_v59 = vrot.slane %v2063_v1, 9  ;;  %v2922_v54 = vld [vmem:[#allocation2 + $0x18] sm:$0xf] }
  0xd3   : > { %v8490_v16 = vsel %vm8263_vm13, %v2180_v2, %v2181_v44  ;;  %v8503_v63 = vsel %vm8263_vm13, %v6285_v30, %v2192_v43  ;;  %v2194_v44 = vrot.slane %v2192_v43, 4  ;;  %v8508_v2 = vld [vmem:[#allocation2 + $0x10] sm:$0xf]  ;;  %v2202_v30 = vrot.slane %v8256_v53, 5  ;;  %v8546_v53 = vld [vmem:[#allocation2 + $0x1c] sm:$0xf] }
  0xd4   : > { %10361 = vst [vmem:[#allocation7_spill] sm:$0xff] %v8508_v2  ;;  %7237 = vmatpush3.bf16.msra.mxu1 %v8415_v51  ;;  %7215 = vmatmul.mubr.bf16.gmra.mxu0 %v6311_v57  ;;  %v2206_v57 = vrot.slane %v8310_v52, 5  ;;  %v2209_v51 = vrot.slane %v8323_v31, 5  ;;  %v8535_v43 = vsel %vm8263_vm13, %v6286_v34, %v2199_v20  ;;  %v2201_v10 = vrot.slane %v2199_v20, 4  ;;  %10364 = vst [vmem:[#allocation9_spill] sm:$0xff] %v8546_v53  ;;  %v8551_v34 = vld [vmem:[%s10330_s3 + $0x1b8] sm:$0xff]  }
  0xd5   : > { %7238 = vmatprep.subr.bf16.mxu1 %v7580_v33  ;;  %7218 = vmatprep.mubr.bf16.mxu0 %v6312_v11  ;;  %v8527_v38 = vsel %vm8263_vm13, %v2194_v44, %v2195_v62  ;;  %v10363_v62 = vcombine.low %v8314_v13, %v8305_v35  ;;  %v2971_v44 = vshll.u32 %v2919_v58, 16  ;;  %v10365_v20 = vcombine.low %v8082_v56, %v8084_v60  ;;  %v7588_v35 = vld [vmem:[%s10330_s3 + $0xd8] sm:$0xff]  }
  0xd6   : > { %7295 = vmatpush3.bf16.msra.mxu0 %v7598_v7  ;;  %v8544_v31 = vsel %vm8263_vm13, %v6287_v59, %v2206_v57  ;;  %v2208_v1 = vrot.slane %v2206_v57, 4  ;;  %v2968_v7 = vshrl.u32 %v2919_v58, 16  ;;  %v8561_v13 = vsel %vm8263_vm13, %v2201_v10, %v2202_v30  ;;  %v2925_v10 = vld [vmem:[#allocation2 + $0x24] sm:$0xf] }
  0xd7   : > { %7159 = vmatmul.mubr.bf16.gmra.mxu1 %v10363_v62  ;;  %7296 = vmatprep.subr.bf16.mxu0 %v7602_v48  ;;  %v2977_v58 = vshll.u32 %v8508_v2, 16  ;;  %v2981_v59 = vshrl.u32 %v8508_v2, 16  ;;  %v2987_v57 = vshll.u32 %v8510_v36, 16  ;;  %v8566_v62 = vld [vmem:[#allocation2 + $0x20] sm:$0x1]  ;;  %v2992_v36 = vshrl.u32 %v2922_v54, 16 }
  0xd8   : > { %7162 = vmatprep.mubr.bf16.mxu1 %v10365_v20  ;;  %7239 = vmatpush3.bf16.msra.mxu1 %v7580_v33  ;;  %10366 = vst [vmem:[#allocation10_spill] sm:$0xff] %v8566_v62  ;;  %v8572_v60 = vsel %vm8263_vm13, %v2208_v1, %v2209_v51  ;;  %v2970_v33 = vrot.slane %v2968_v7, 4  ;;  %v2973_v20 = vrot.slane %v2971_v44, 5  ;;  %v2995_v2 = vshll.u32 %v2922_v54, 16  ;;  %v8580_v51 = vld [vmem:[#allocation2 + $0x2c] sm:$0x1] }
  0xd9   : > { %7240 = vmatprep.subr.bf16.mxu1 %v7584_v27  ;;  %v2979_v11 = vrot.slane %v2977_v58, 5  ;;  %v2983_v55 = vrot.slane %v2981_v59, 4  ;;  %v2989_v19 = vrot.slane %v2987_v57, 5  ;;  %v3001_v56 = vshll.u32 %v8546_v53, 16 }
  0xda   : > { %7297 = vmatpush3.bf16.msra.mxu0 %v7602_v48  ;;  %v2974_v4 = vor.u32 %v2973_v20, %v2970_v33  ;;  %v10367_v1 = vcombine.low %v8419_v9, %v8438_v3  ;;  %v7592_v48 = vld [vmem:[%s10330_s3 + $0xd0] sm:$0xff]   ;;  %v3005_v44 = vshrl.u32 %v8546_v53, 16  ;;  %v3011_v54 = vshll.u32 %v8566_v62, 16 }
  0xdb   : > { %7378 = vmatprep.subr.bf16.mxu0 %v8551_v34  ;;  %v2984_v7 = vor.u32 %v2983_v55, %v2979_v11  ;;  %v3016_v58 = vshrl.u32 %v2925_v10, 16  ;;  %v10368_v59 = vcombine.low %v8442_v14, %v8461_v32  ;;  %v2994_v57 = vrot.slane %v2992_v36, 4  ;;  %v2928_v32 = vld [vmem:[#allocation2 + $0x30] sm:$0xf] }
  0xdc   : > { %7241 = vmatpush3.bf16.msra.mxu1 %v7584_v27  ;;  %7219 = vmatmul.mubr.bf16.gmra.mxu0 %v10367_v1  ;;  %v2975_v27 = vrot.slane %v2974_v4, 4  ;;  %v2997_v33 = vrot.slane %v2995_v2, 5  ;;  %v3003_v9 = vrot.slane %v3001_v56, 5  ;;  %v3007_v20 = vrot.slane %v3005_v44, 4  ;;  %v8599_v4 = vld [vmem:[#allocation2 + $0x34] sm:$0xf] }
  0xdd   : > { %7242 = vmatprep.subr.bf16.mxu1 %v7588_v35  ;;  %7222 = vmatprep.mubr.bf16.mxu0 %v10368_v59  ;;  %v2985_v3 = vrot.slane %v2984_v7, 4  ;;  %v3013_v1 = vrot.slane %v3011_v54, 5  ;;  %v3018_v30 = vrot.slane %v3016_v58, 4  ;;  %v10369_v55 = vcombine.low %v8103_v40, %v8106_v29  ;;  %v7596_v56 = vld [vmem:[%s10330_s3 + $0xc8] sm:$0xff]  }
  0xde   : > { %v2980_v62 = vsel %vm7794_vm2, %v2975_v27, %v2979_v11  ;;  %v2998_v18 = vor.u32 %v2997_v33, %v2994_v57  ;;  %v3019_v53 = vshll.u32 %v2925_v10, 16  ;;  %v3025_v14 = vshll.u32 %v8576_v12, 16 }
  0xdf   : > { %7163 = vmatmul.mubr.bf16.gmra.mxu1 %v10369_v55  ;;  %v10370_v2 = vcombine.low %v8191_v49, %v8193_v50  ;;  %v2990_v36 = vsel %vm7794_vm2, %v2985_v3, %v2989_v19  ;;  %v3008_v40 = vor.u32 %v3007_v20, %v3003_v9  ;;  %v3029_v29 = vshrl.u32 %v8576_v12, 16  ;;  %v8613_v50 = vld [vmem:[#allocation2 + $0x38] sm:$0x1]  ;;  %v2931_v3 = vld [vmem:[#allocation2 + $0x3c] sm:$0xf] }
  0xe0   : > { %7243 = vmatpush3.bf16.msra.mxu1 %v7588_v35  ;;  %v3035_v11 = vshll.u32 %v8580_v51, 16  ;;  %v8611_v10 = vcombine.low %v2980_v62, %v2990_v36  ;;  %v2999_v7 = vrot.slane %v2998_v18, 4  ;;  %v3021_v44 = vrot.slane %v3019_v53, 5  ;;  %v8618_v20 = vld [vmem:[#allocation2 + $0x40] sm:$0xf] }
  0xe1   : > { %7166 = vmatprep.mubr.bf16.mxu1 %v10370_v2  ;;  %7244 = vmatprep.subr.bf16.mxu1 %v7592_v48  ;;  %v3027_v49 = vrot.slane %v3025_v14, 5  ;;  %v3009_v35 = vrot.slane %v3008_v40, 4  ;;  %v3031_v54 = vrot.slane %v3029_v29, 4  ;;  %v3040_v58 = vshrl.u32 %v2928_v32, 16  ;;  %v8634_v2 = vld [vmem:[#allocation2 + $0x44] sm:$0x1] }
  0xe2   : > { %v3037_v19 = vrot.slane %v3035_v11, 5  ;;  %v3004_v59 = vsel %vm7794_vm2, %v2999_v7, %v3003_v9  ;;  %v3022_v27 = vor.u32 %v3021_v44, %v3018_v30  ;;  %v3043_v57 = vshll.u32 %v2928_v32, 16  ;;  %v7600_v9 = vld [vmem:[%s10330_s3 + $0xc0] sm:$0xff]  }
  0xe3   : > { %v3049_v33 = vshll.u32 %v8599_v4, 16  ;;  %v10371_v18 = vcombine.low %v8475_v5, %v8490_v16  ;;  %v3014_v53 = vsel %vm7794_vm2, %v3009_v35, %v3013_v1  ;;  %v3032_v62 = vor.u32 %v3031_v54, %v3027_v49  ;;  %v2934_v35 = vld [vmem:[#allocation2 + $0x48] sm:$0xf]  ;;  %v8643_v54 = vld [vmem:[#allocation2 + $0x4c] sm:$0xf] }
  0xe4   : > { %7245 = vmatpush3.bf16.msra.mxu1 %v7592_v48  ;;  %v3042_v55 = vrot.slane %v3040_v58, 4  ;;  %v3053_v14 = vshrl.u32 %v8599_v4, 16  ;;  %v10372_v30 = vcombine.low %v8485_v8, %v8499_v61  ;;  %v8632_v32 = vcombine.low %v3004_v59, %v3014_v53 }
  0xe5   : > { %7223 = vmatmul.mubr.bf16.gmra.mxu0 %v10371_v18  ;;  %7246 = vmatprep.subr.bf16.mxu1 %v7596_v56  ;;  %v3023_v5 = vrot.slane %v3022_v27, 4  ;;  %v3045_v16 = vrot.slane %v3043_v57, 5  ;;  %v3051_v48 = vrot.slane %v3049_v33, 5  ;;  %v3033_v1 = vrot.slane %v3032_v62, 4 }
  0xe6   : > { %7226 = vmatprep.mubr.bf16.mxu0 %v10372_v30  ;;  %v3055_v36 = vrot.slane %v3053_v14, 4  ;;  %v3059_v40 = vshll.u32 %v8613_v50, 16  ;;  %v3064_v29 = vshrl.u32 %v2931_v3, 16  ;;  %v10373_v8 = vcombine.low %v8214_v46, %v8226_v0 }
  0xe7   : > { %v3028_v61 = vsel %vm7794_vm2, %v3023_v5, %v3027_v49  ;;  %v3046_v11 = vor.u32 %v3045_v16, %v3042_v55  ;;  %v3067_v7 = vshll.u32 %v2931_v3, 16  ;;  %v3073_v44 = vshll.u32 %v8618_v20, 16  ;;  %v8653_v49 = vld [vmem:[%s10330_s3 + $0x178] sm:$0xff]   ;;  %v2937_v5 = vld [vmem:[#allocation2 + $0x54] sm:$0xf] }
  0xe8   : > { %7167 = vmatmul.mubr.bf16.gmra.mxu1 %v10373_v8  ;;  %v10374_v58 = vcombine.low %v8388_v28, %v8385_v24  ;;  %v3038_v59 = vsel %vm7794_vm2, %v3033_v1, %v3037_v19  ;;  %v3056_v46 = vor.u32 %v3055_v36, %v3051_v48  ;;  %v3061_v0 = vrot.slane %v3059_v40, 5  ;;  %v8657_v24 = vld [vmem:[#allocation2 + $0x50] sm:$0x1]  ;;  %v8664_v16 = vld [vmem:[#allocation2 + $0x58] sm:$0xf] }
  0xe9   : > { %7247 = vmatpush3.bf16.msra.mxu1 %v7596_v56  ;;  %v3066_v27 = vrot.slane %v3064_v29, 4  ;;  %v8655_v57 = vcombine.low %v3028_v61, %v3038_v59  ;;  %v3047_v33 = vrot.slane %v3046_v11, 4  ;;  %v3069_v3 = vrot.slane %v3067_v7, 5 }
  0xea   : > { %7170 = vmatprep.mubr.bf16.mxu1 %v10374_v58  ;;  %7248 = vmatprep.subr.bf16.mxu1 %v7600_v9  ;;  %v3075_v18 = vrot.slane %v3073_v44, 5  ;;  %v3057_v28 = vrot.slane %v3056_v46, 4  ;;  %v3077_v56 = vshrl.u32 %v8618_v20, 16  ;;  %v3083_v19 = vshll.u32 %v8634_v2, 16  ;;  %v8684_v46 = vld [vmem:[#allocation2 + $0x5c] sm:$0x1] }
  0xeb   : > { %v3088_v53 = vshrl.u32 %v2934_v35, 16  ;;  %v3052_v62 = vsel %vm7794_vm2, %v3047_v33, %v3051_v48  ;;  %v3070_v55 = vor.u32 %v3069_v3, %v3066_v27  ;;  %v3091_v14 = vshll.u32 %v2934_v35, 16 }
  0xec   : > { %v3097_v30 = vshll.u32 %v8643_v54, 16  ;;  %v10375_v1 = vcombine.low %v8503_v63, %v8527_v38  ;;  %v3062_v36 = vsel %vm7794_vm2, %v3057_v28, %v3061_v0  ;;  %v3079_v40 = vrot.slane %v3077_v56, 4  ;;  %v2940_v63 = vld [vmem:[#allocation2 + $0x60] sm:$0xf] }
  0xed   : > { %7249 = vmatpush3.bf16.msra.mxu1 %v7600_v9  ;;  %v3085_v29 = vrot.slane %v3083_v19, 5  ;;  %v3090_v8 = vrot.slane %v3088_v53, 4  ;;  %v10376_v48 = vcombine.low %v8535_v43, %v8561_v13  ;;  %v8675_v61 = vcombine.low %v3052_v62, %v3062_v36  ;;  %v8690_v53 = vld [vmem:[#allocation2 + $0x64] sm:$0xf] }
  0xee   : > { %7227 = vmatmul.mubr.bf16.gmra.mxu0 %v10375_v1  ;;  %7330 = vmatprep.subr.bf16.mxu1 %v8653_v49  ;;  %v3071_v11 = vrot.slane %v3070_v55, 4  ;;  %v3093_v7 = vrot.slane %v3091_v14, 5  ;;  %v3099_v44 = vrot.slane %v3097_v30, 5  ;;  %v3080_v38 = vor.u32 %v3079_v40, %v3075_v18  ;;  %v8693_v55 = vld [vmem:[#allocation2 + $0x68] sm:$0x1] }
  0xef   : > { %7230 = vmatprep.mubr.bf16.mxu0 %v10376_v48  ;;  %v3101_v9 = vshrl.u32 %v8643_v54, 16  ;;  %v3107_v35 = vshll.u32 %v8657_v24, 16  ;;  %v3112_v58 = vshrl.u32 %v2937_v5, 16  ;;  %v10377_v59 = vcombine.low %v8405_v25, %v8396_v37 }
  0xf0   : > { %v3076_v43 = vsel %vm7794_vm2, %v3071_v11, %v3075_v18  ;;  %v3094_v13 = vor.u32 %v3093_v7, %v3090_v8  ;;  %v3115_v0 = vshll.u32 %v2937_v5, 16  ;;  %v3121_v27 = vshll.u32 %v8664_v16, 16  ;;  %v2943_v5 = vld [vmem:[#allocation2 + $0x6c] sm:$0xf] }
  0xf1   : > { %7171 = vmatmul.mubr.bf16.gmra.mxu1 %v10377_v59  ;;  %v10378_v33 = vcombine.low %v8430_v23, %v8421_v6  ;;  %v3081_v3 = vrot.slane %v3080_v38, 4  ;;  %v3103_v28 = vrot.slane %v3101_v9, 4  ;;  %v3109_v56 = vrot.slane %v3107_v35, 5  ;;  %v8705_v9 = vld [vmem:[#allocation2 + $0x70] sm:$0xf] }
  0xf2   : > { %v3114_v19 = vrot.slane %v3112_v58, 4  ;;  %v3095_v37 = vrot.slane %v3094_v13, 4  ;;  %v3117_v25 = vrot.slane %v3115_v0, 5  ;;  %v3123_v62 = vrot.slane %v3121_v27, 5 }
  0xf3   : > { %7174 = vmatprep.mubr.bf16.mxu1 %v10378_v33  ;;  %v3125_v18 = vshrl.u32 %v8664_v16, 16  ;;  %v3086_v14 = vsel %vm7794_vm2, %v3081_v3, %v3085_v29  ;;  %v3104_v30 = vor.u32 %v3103_v28, %v3099_v44  ;;  %v3131_v23 = vshll.u32 %v8684_v46, 16  ;;  %v2946_v28 = vld [vmem:[#allocation2 + $0x78] sm:$0xf] }
  0xf4   : > { %v3136_v6 = vshrl.u32 %v2940_v63, 16  ;;  %v8698_v1 = vcombine.low %v3076_v43, %v3086_v14  ;;  %v3100_v36 = vsel %vm7794_vm2, %v3095_v37, %v3099_v44  ;;  %v3118_v40 = vor.u32 %v3117_v25, %v3114_v19  ;;  %v8710_v43 = vld [vmem:[#allocation2 + $0x74] sm:$0x1]  ;;  %v8725_v14 = vld [vmem:[#allocation2 + $0x7c] sm:$0xf] }
  0xf5   : > { %v3127_v8 = vrot.slane %v3125_v18, 4  ;;  %v10379_v48 = vcombine.low %v8544_v31, %v8572_v60  ;;  %v3105_v11 = vrot.slane %v3104_v30, 4  ;;  %v3133_v7 = vrot.slane %v3131_v23, 5 }
  0xf6   : > { %v3138_v38 = vrot.slane %v3136_v6, 4  ;;  %v3139_v29 = vshll.u32 %v2940_v63, 16  ;;  %v3119_v35 = vrot.slane %v3118_v40, 4  ;;  %v3145_v59 = vshll.u32 %v8690_v53, 16 }
  0xf7   : > { %7231 = vmatmul.mubr.bf16.gmra.mxu0 %v10379_v48  ;;  %v3128_v58 = vor.u32 %v3127_v8, %v3123_v62  ;;  %v3149_v44 = vshrl.u32 %v8690_v53, 16  ;;  %v3110_v31 = vsel %vm7794_vm2, %v3105_v11, %v3109_v56  ;;  %v3155_v13 = vshll.u32 %v8693_v55, 16 }
  0xf8   : > { %7298 = vmatprep.mubr.bf16.mxu0 %v8611_v10  ;;  %v3141_v60 = vrot.slane %v3139_v29, 5  ;;  %v3160_v0 = vshrl.u32 %v2943_v5, 16  ;;  %v10380_v63 = vcombine.low %v8452_v15, %v8449_v42  ;;  %v8718_v10 = vcombine.low %v3100_v36, %v3110_v31  ;;  %v7610_v42 = vld [vmem:[%s10330_s3 + $0x1b0] sm:$0xff]   ;;  %v2949_v29 = vld [vmem:[#allocation2 + $0x84] sm:$0xf] }
  0xf9   : > { %v3124_v27 = vsel %vm7794_vm2, %v3119_v35, %v3123_v62  ;;  %v3129_v33 = vrot.slane %v3128_v58, 4  ;;  %v3147_v3 = vrot.slane %v3145_v59, 5  ;;  %v10381_v19 = vcombine.low %v8129_v22, %v8137_v41  ;;  %v8734_v22 = vld [vmem:[#allocation2 + $0x80] sm:$0x1] }
  0xfa   : > { %7175 = vmatmul.mubr.bf16.gmra.mxu1 %v10380_v63  ;;  %v3142_v56 = vor.u32 %v3141_v60, %v3138_v38  ;;  %v3151_v37 = vrot.slane %v3149_v44, 4  ;;  %v3157_v25 = vrot.slane %v3155_v13, 5  ;;  %v3162_v18 = vrot.slane %v3160_v0, 4  ;;  %v8745_v13 = vld [vmem:[#allocation2 + $0x88] sm:$0xf] }
  0xfb   : > { %7178 = vmatprep.mubr.bf16.mxu1 %v10381_v19  ;;  %v3134_v15 = vsel %vm7794_vm2, %v3129_v33, %v3133_v7  ;;  %v3163_v62 = vshll.u32 %v2943_v5, 16  ;;  %v3169_v30 = vshll.u32 %v8705_v9, 16  ;;  %v3173_v23 = vshrl.u32 %v8705_v9, 16 }
  0xfc   : > { %v8736_v41 = vcombine.low %v3124_v27, %v3134_v15  ;;  %v3143_v6 = vrot.slane %v3142_v56, 4  ;;  %v3152_v36 = vor.u32 %v3151_v37, %v3147_v3  ;;  %v3179_v40 = vshll.u32 %v8710_v43, 16  ;;  %v8754_v27 = vld [vmem:[#allocation2 + $0x8c] sm:$0x1]  ;;  %v2952_v37 = vld [vmem:[#allocation2 + $0x90] sm:$0xf] }
  0xfd   : > { %v3165_v8 = vrot.slane %v3163_v62, 5  ;;  %v3171_v48 = vrot.slane %v3169_v30, 5  ;;  %v3175_v11 = vrot.slane %v3173_v23, 4  ;;  %v3184_v38 = vshrl.u32 %v2946_v28, 16 }
  0xfe   : > { %v3148_v5 = vsel %vm7794_vm2, %v3143_v6, %v3147_v3  ;;  %v3153_v7 = vrot.slane %v3152_v36, 4  ;;  %v3181_v35 = vrot.slane %v3179_v40, 5  ;;  %v3187_v58 = vshll.u32 %v2946_v28, 16 }
  0xff   : > { %7299 = vmatmul.mubr.bf16.vlgmr.msra.gmra.mxu0 %v8632_v32  ;;  %v3166_v59 = vor.u32 %v3165_v8, %v3162_v18  ;;  %v3176_v44 = vor.u32 %v3175_v11, %v3171_v48  ;;  %v3186_v31 = vrot.slane %v3184_v38, 4  ;;  %v3193_v60 = vshll.u32 %v8725_v14, 16  ;;  %v7614_v32 = vld [vmem:[%s10330_s3 + $0x1a8] sm:$0xff]   ;;  %v7618_v18 = vld [vmem:[%s10330_s3 + $0x1a0] sm:$0xff]   ;;  %v8774_v11 = vld [vmem:[#allocation2 + $0x94] sm:$0xf] }
 0x100   : > { %7379 = vmatpush3.bf16.msra.mxu0 %v8551_v34  ;;  %7302 = vmatprep.mubr.bf16.mxu0 %v8655_v57  ;;  %v3158_v0 = vsel %vm7794_vm2, %v3153_v7, %v3157_v25  ;;  %v3189_v63 = vrot.slane %v3187_v58, 5  ;;  %v3197_v34 = vshrl.u32 %v8725_v14, 16  ;;  %v3203_v57 = vshll.u32 %v8734_v22, 16  ;;  %v8778_v7 = vld [vmem:[#allocation2 + $0x98] sm:$0x1] }
 0x101   : > { %7380 = vmatprep.subr.bf16.mxu0 %v7610_v42  ;;  %v10382_v33 = vcombine.low %v8164_v39, %v8169_v47  ;;  %v8759_v3 = vcombine.low %v3148_v5, %v3158_v0  ;;  %v3167_v28 = vrot.slane %v3166_v59, 4  ;;  %v3177_v19 = vrot.slane %v3176_v44, 4 }
 0x102   : > { %v3195_v56 = vrot.slane %v3193_v60, 5  ;;  %v10383_v25 = vcombine.low %v8243_v45, %v8254_v17  ;;  %v3190_v15 = vor.u32 %v3189_v63, %v3186_v31  ;;  %v3199_v62 = vrot.slane %v3197_v34, 4  ;;  %v2955_v34 = vld [vmem:[#allocation2 + $0x9c] sm:$0xf] }
 0x103   : > { %7179 = vmatmul.mubr.bf16.gmra.mxu1 %v10382_v33  ;;  %v3205_v30 = vrot.slane %v3203_v57, 5  ;;  %v3208_v23 = vshrl.u32 %v2949_v29, 16  ;;  %v3172_v39 = vsel %vm7794_vm2, %v3167_v28, %v3171_v48  ;;  %v3182_v47 = vsel %vm7794_vm2, %v3177_v19, %v3181_v35  ;;  %v7603_v35 = vld [vmem:[#allocation2 + $0xc] sm:$0xff]  }
 0x104   : > { %7182 = vmatprep.mubr.bf16.mxu1 %v10383_v25  ;;  %7381 = vmatpush3.bf16.msra.mxu0 %v7610_v42  ;;  %v3211_v6 = vshll.u32 %v2949_v29, 16  ;;  %v3217_v36 = vshll.u32 %v8745_v13, 16  ;;  %v8772_v45 = vcombine.low %v3172_v39, %v3182_v47  ;;  %v3191_v17 = vrot.slane %v3190_v15, 4 }
 0x105   : > { %7382 = vmatprep.subr.bf16.mxu0 %v7614_v32  ;;  %v3200_v40 = vor.u32 %v3199_v62, %v3195_v56  ;;  %v3210_v8 = vrot.slane %v3208_v23, 4  ;;  %v3221_v42 = vshrl.u32 %v8745_v13, 16  ;;  %v3227_v48 = vshll.u32 %v8754_v27, 16 }
 0x106   : > { %v3213_v38 = vrot.slane %v3211_v6, 5  ;;  %v3219_v5 = vrot.slane %v3217_v36, 5  ;;  %v3196_v29 = vsel %vm7794_vm2, %v3191_v17, %v3195_v56  ;;  %v3232_v59 = vshrl.u32 %v2952_v37, 16  ;;  %v8801_v36 = vld [vmem:[#allocation2 + $0xa4] sm:$0x1] }
 0x107   : > { %7303 = vmatmul.mubr.bf16.gmra.mxu0 %v8675_v61  ;;  %v3201_v58 = vrot.slane %v3200_v40, 4  ;;  %v3235_v44 = vshll.u32 %v2952_v37, 16  ;;  %v3223_v60 = vrot.slane %v3221_v42, 4  ;;  %v3229_v0 = vrot.slane %v3227_v48, 5  ;;  %v7622_v61 = vld [vmem:[%s10330_s3 + $0x198] sm:$0xff]  }
 0x108   : > { %7306 = vmatprep.mubr.bf16.mxu0 %v8698_v1  ;;  %7383 = vmatpush3.bf16.msra.mxu0 %v7614_v32  ;;  %v3214_v31 = vor.u32 %v3213_v38, %v3210_v8  ;;  %v3241_v63 = vshll.u32 %v8774_v11, 16  ;;  %v3234_v33 = vrot.slane %v3232_v59, 4  ;;  %v3245_v19 = vshrl.u32 %v8774_v11, 16  ;;  %v8791_v1 = vld [vmem:[#allocation2 + $0xa0] sm:$0xf]  ;;  %v7626_v38 = vld [vmem:[%s10330_s3 + $0x190] sm:$0xff]  }
 0x109   : > { %7384 = vmatprep.subr.bf16.mxu0 %v7618_v18  ;;  %v3206_v57 = vsel %vm7794_vm2, %v3201_v58, %v3205_v30  ;;  %v3237_v28 = vrot.slane %v3235_v44, 5  ;;  %v10384_v32 = vcombine.low %v8321_v21, %v8310_v52  ;;  %v3224_v25 = vor.u32 %v3223_v60, %v3219_v5  ;;  %v2958_v48 = vld [vmem:[#allocation2 + $0xa8] sm:$0xf]  ;;  %v8810_v59 = vld [vmem:[#allocation2 + $0xac] sm:$0xf] }
 0x10a   : > { %v8796_v56 = vcombine.low %v3196_v29, %v3206_v57  ;;  %v3215_v37 = vrot.slane %v3214_v31, 4  ;;  %v3243_v15 = vrot.slane %v3241_v63, 5  ;;  %v3247_v30 = vrot.slane %v3245_v19, 4  ;;  %v7607_v44 = vld [vmem:[#allocation2 + $0x24] sm:$0xff]  }
 0x10b   : > { %7183 = vmatmul.mubr.bf16.gmra.mxu1 %v10384_v32  ;;  %v3238_v62 = vor.u32 %v3237_v28, %v3234_v33  ;;  %v3251_v23 = vshll.u32 %v8778_v7, 16  ;;  %v3256_v39 = vshrl.u32 %v2955_v34, 16  ;;  %v3225_v6 = vrot.slane %v3224_v25, 4  ;;  %v8822_v28 = vld [vmem:[#allocation2 + $0xb0] sm:$0x1] }
 0x10c   : > { %7250 = vmatprep.mubr.bf16.mxu1 %v7603_v35  ;;  %7385 = vmatpush3.bf16.msra.mxu0 %v7618_v18  ;;  %v3220_v47 = vsel %vm7794_vm2, %v3215_v37, %v3219_v5  ;;  %v3259_v52 = vshll.u32 %v2955_v34, 16  ;;  %v3265_v21 = vshll.u32 %v8791_v1, 16  ;;  %v3248_v40 = vor.u32 %v3247_v30, %v3243_v15  ;;  %v7605_v18 = vld [vmem:[#allocation2 + $0x18] sm:$0xff]  }
 0x10d   : > { %7386 = vmatprep.subr.bf16.mxu0 %v7622_v61  ;;  %v3239_v17 = vrot.slane %v3238_v62, 4  ;;  %v3253_v8 = vrot.slane %v3251_v23, 5  ;;  %v3258_v42 = vrot.slane %v3256_v39, 4  ;;  %v3230_v5 = vsel %vm7794_vm2, %v3225_v6, %v3229_v0  ;;  %v7608_v0 = vld [vmem:[%s10330_s3 + $0x170] sm:$0xff]  }
 0x10e   : > { %v3261_v35 = vrot.slane %v3259_v52, 5  ;;  %v3267_v29 = vrot.slane %v3265_v21, 5  ;;  %v3269_v58 = vshrl.u32 %v8791_v1, 16  ;;  %v8813_v31 = vcombine.low %v3220_v47, %v3230_v5  ;;  %v8833_v47 = vld [vmem:[#allocation2 + $0xb8] sm:$0xf] }
 0x10f   : > { %7307 = vmatmul.mubr.bf16.gmra.mxu0 %v8718_v10  ;;  %v3244_v60 = vsel %vm7794_vm2, %v3239_v17, %v3243_v15  ;;  %v3249_v63 = vrot.slane %v3248_v40, 4  ;;  %v3275_v34 = vshll.u32 %v8801_v36, 16  ;;  %v3280_v10 = vshrl.u32 %v2958_v48, 16  ;;  %v7612_v40 = vld [vmem:[%s10330_s3 + $0x168] sm:$0xff]  }
 0x110   : > { %7310 = vmatprep.mubr.bf16.mxu0 %v8736_v41  ;;  %7387 = vmatpush3.bf16.msra.mxu0 %v7622_v61  ;;  %v3262_v57 = vor.u32 %v3261_v35, %v3258_v42  ;;  %v3271_v33 = vrot.slane %v3269_v58, 4  ;;  %v3283_v19 = vshll.u32 %v2958_v48, 16  ;;  %v3289_v25 = vshll.u32 %v8810_v59, 16  ;;  %v7630_v41 = vld [vmem:[%s10330_s3 + $0x188] sm:$0xff]   ;;  %v2961_v61 = vld [vmem:[#allocation2 + $0xb4] sm:$0xf] }
 0x111   : > { %v3254_v32 = vsel %vm7794_vm2, %v3249_v63, %v3253_v8  ;;  %7388 = vmatprep.subr.bf16.mxu0 %v7626_v38  ;;  %v3277_v37 = vrot.slane %v3275_v34, 5  ;;  %v3293_v15 = vshrl.u32 %v8810_v59, 16  ;;  %v3282_v39 = vrot.slane %v3280_v10, 4  ;;  %v6858_v63 = vld [vmem:[%s7774_s6 + $0x78] sm:$0xff]   ;;  %v3673_v10 = vld [vmem:[#allocation2 + $0xc] sm:$0xe] }
 0x112   : > { %v8831_v62 = vcombine.low %v3244_v60, %v3254_v32  ;;  %v3263_v30 = vrot.slane %v3262_v57, 4  ;;  %v3272_v23 = vor.u32 %v3271_v33, %v3267_v29  ;;  %v3285_v6 = vrot.slane %v3283_v19, 5  ;;  %v7634_v33 = vld [vmem:[%s10330_s3 + $0x180] sm:$0xff]  }
 0x113   : > { %7251 = vmatmul.mubr.bf16.vlgmr.msra.gmra.mxu1 %v7605_v18  ;;  %v3291_v52 = vrot.slane %v3289_v25, 5  ;;  %v3295_v21 = vrot.slane %v3293_v15, 4  ;;  %v3299_v17 = vshll.u32 %v8822_v28, 16  ;;  %v3304_v48 = vshrl.u32 %v2961_v61, 16  ;;  %v7611_v19 = vld [vmem:[#allocation2 + $0x3c] sm:$0xff]  }
 0x114   : > { %7331 = vmatpush3.bf16.msra.mxu1 %v8653_v49  ;;  %7254 = vmatprep.mubr.bf16.mxu1 %v7607_v44  ;;  %v3268_v8 = vsel %vm7794_vm2, %v3263_v30, %v3267_v29  ;;  %v3273_v42 = vrot.slane %v3272_v23, 4  ;;  %v3307_v18 = vshll.u32 %v2961_v61, 16  ;;  %v7609_v49 = vld [vmem:[#allocation2 + $0x30] sm:$0xff]   ;;  %v3286_v5 = vor.u32 %v3285_v6, %v3282_v39  ;;  %v8842_v44 = vld [vmem:[#allocation2 + $0xbc] sm:$0x1] }
 0x115   : > { %7332 = vmatprep.subr.bf16.mxu1 %v7608_v0  ;;  %7389 = vmatpush3.bf16.msra.mxu0 %v7626_v38  ;;  %v3296_v35 = vor.u32 %v3295_v21, %v3291_v52  ;;  %v3301_v58 = vrot.slane %v3299_v17, 5  ;;  %v3313_v60 = vshll.u32 %v8833_v47, 16  ;;  %v3306_v38 = vrot.slane %v3304_v48, 4 }
 0x116   : > { %7390 = vmatprep.subr.bf16.mxu0 %v7630_v41  ;;  %v3278_v34 = vsel %vm7794_vm2, %v3273_v42, %v3277_v37  ;;  %v3309_v57 = vrot.slane %v3307_v18, 5  ;;  %v3317_v29 = vshrl.u32 %v8833_v47, 16  ;;  %v3287_v25 = vrot.slane %v3286_v5, 4  ;;  %v7616_v37 = vld [vmem:[%s10330_s3 + $0x160] sm:$0xff]   ;;  %v8869_v5 = vld [vmem:[%s10330_s3 + $0x238] sm:$0xff]  }
 0x117   : > { %7311 = vmatmul.mubr.bf16.gmra.mxu0 %v8759_v3  ;;  %v8853_v32 = vcombine.low %v3268_v8, %v3278_v34  ;;  %v3297_v15 = vrot.slane %v3296_v35, 4  ;;  %v3315_v61 = vrot.slane %v3313_v60, 5  ;;  %v3323_v39 = vshll.u32 %v8842_v44, 16  ;;  %v3674_v8 = vld [vmem:[#allocation2 + $0x18] sm:$0xe]  ;;  %v10386_v60 = vld [vmem:[#allocation8_spill] sm:$0xff] }
 0x118   : > { %7333 = vmatpush3.bf16.msra.mxu1 %v7608_v0  ;;  %7314 = vmatprep.mubr.bf16.mxu0 %v8772_v45  ;;  %v3310_v30 = vor.u32 %v3309_v57, %v3306_v38  ;;  %v3319_v23 = vrot.slane %v3317_v29, 4  ;;  %v6762_v0 = vunpack.c.l.bf16 %v6858_v63  ;;  %v3292_v3 = vsel %vm7794_vm2, %v3287_v25, %v3291_v52  ;;  %v7620_v34 = vld [vmem:[%s10330_s3 + $0x158] sm:$0xff]   ;;  %v10387_v29 = vld [vmem:[#allocation9_spill] sm:$0xff] }
 0x119   : > { %7334 = vmatprep.subr.bf16.mxu1 %v7612_v40  ;;  %v3302_v6 = vsel %vm7794_vm2, %v3297_v15, %v3301_v58  ;;  %7391 = vmatpush3.bf16.msra.mxu0 %v7630_v41  ;;  %v6763_v21 = vunpack.c.h.bf16 %v6858_v63  ;;  %v6408_v17 = vrot.slane %v3673_v10, 9  ;;  %v3325_v18 = vrot.slane %v3323_v39, 5  ;;  %v7693_v41 = vld [vmem:[%s10328_s1] ss:$0 sm:$0xff] }
 0x11a   : > { %v8864_v42 = vcombine.low %v3292_v3, %v3302_v6  ;;  %v3311_v48 = vrot.slane %v3310_v30, 4  ;;  %v3320_v45 = vor.u32 %v3319_v23, %v3315_v61  ;;  %7392 = vmatprep.subr.bf16.mxu0 %v7634_v33  ;;  %v339_v52 = vmul.f32 %v7693_v41, %v6762_v0  ;;  %v3675_v0 = vld [vmem:[#allocation2 + $0x24] sm:$0xe]  ;;  %v7613_v3 = vld [vmem:[#allocation2 + $0x48] sm:$0xff]  }
 0x11b   : > { %7255 = vmatmul.mubr.bf16.gmra.mxu1 %v7609_v49  ;;  %v340_v35 = vmul.f32 %v7693_v41, %v6763_v21  ;;  %v10385_v49 = vld [vmem:[#allocation7_spill] sm:$0xff]  ;;  %v3742_v63 = vrot.slane %v10386_v60, 5  ;;  %v3746_v10 = vrot.slane %v10387_v29, 5 }
 0x11c   : > { %7258 = vmatprep.mubr.bf16.mxu1 %v7611_v19  ;;  %7335 = vmatpush3.bf16.msra.mxu1 %v7612_v40  ;;  %v3739_v58 = vrot.slane %v10385_v49, 5  ;;  %v3316_v38 = vsel %vm7794_vm2, %v3311_v48, %v3315_v61  ;;  %v3321_v57 = vrot.slane %v3320_v45, 4  ;;  %v6409_v40 = vrot.slane %v3674_v8, 9  ;;  %v7694_v19 = vld [vmem:[%s10329_s2] ss:$0 sm:$0xff]  ;;  %v10389_v8 = vld [vmem:[#allocation10_spill] sm:$0xff] }
 0x11d   : > { %7336 = vmatprep.subr.bf16.mxu1 %v7616_v37  ;;  %v377_v25 = vadd.f32 %v7694_v19, %v339_v52  ;;  %v378_v15 = vadd.f32 %v7694_v19, %v340_v35  ;;  %7393 = vmatpush3.bf16.msra.mxu0 %v7634_v33  ;;  %v3748_v21 = vrot.slane %v3746_v10, 4  ;;  %v3749_v48 = vrot.slane %v10389_v8, 5  ;;  %v7615_v33 = vld [vmem:[#allocation2 + $0x54] sm:$0xff]   ;;  %v3676_v52 = vld [vmem:[#allocation2 + $0x30] sm:$0xe] }
 0x11e   : > { %v8887_v23 = vsel %vm8263_vm13, %v6408_v17, %v3739_v58  ;;  %v3741_v39 = vrot.slane %v3739_v58, 4  ;;  %v3326_v61 = vsel %vm7794_vm2, %v3321_v57, %v3325_v18  ;;  %v8893_v6 = vsel %vm8263_vm13, %v6409_v40, %v3746_v10  ;;  %7474 = vmatprep.subr.bf16.mxu0 %v8869_v5  ;;  %v7624_v35 = vld [vmem:[%s10330_s3 + $0x150] sm:$0xff]   ;;  %v3677_v19 = vld [vmem:[#allocation2 + $0x3c] sm:$0xe] }
 0x11f   : > { %7315 = vmatmul.mubr.bf16.gmra.mxu0 %v8796_v56  ;;  %v8898_v17 = vcombine.low %v3316_v38, %v3326_v61  ;;  %v409_v45 = vmax.f32 %v377_v25, 0.0  ;;  %v410_v41 = vmax.f32 %v378_v15, 0.0  ;;  %v8912_v56 = vsel %vm8263_vm13, %v3748_v21, %v3749_v48  ;;  %v995_v48 = vld [vmem:[#allocation2 + $0xc0] sm:$0xf] }
 0x120   : > { %7337 = vmatpush3.bf16.msra.mxu1 %v7616_v37  ;;  %v8902_v18 = vsel %vm8263_vm13, %v3741_v39, %v3742_v63  ;;  %7318 = vmatprep.mubr.bf16.mxu0 %v8813_v31  ;;  %v6410_v49 = vrot.slane %v3675_v0, 9  ;;  %v3753_v58 = vrot.slane %v8576_v12, 5  ;;  %v6441_v38 = vcombine.low %v8893_v6, %v8912_v56  ;;  %v3678_v0 = vld [vmem:[#allocation2 + $0x48] sm:$0xe] }
 0x121   : > { %7338 = vmatprep.subr.bf16.mxu1 %v7620_v34  ;;  %v6440_v37 = vcombine.low %v8887_v23, %v8902_v18  ;;  %v6666_v60 = vpack.c.bf16 %v409_v45, %v409_v45  ;;  %v6667_v63 = vpack.c.bf16 %v410_v41, %v410_v41  ;;  %v3756_v31 = vrot.slane %v8580_v51, 5  ;;  %v7628_v51 = vld [vmem:[%s10330_s3 + $0x148] sm:$0xff]   ;;  %v7617_v41 = vld [vmem:[#allocation2 + $0x60] sm:$0xff]   ;;  %v7641_v18 = vld [vmem:[%s10330_s3 + $0x1f0] sm:$0xff]  }
 0x122   : > { %v8920_v57 = vsel %vm8263_vm13, %v6410_v49, %v3753_v58  ;;  %v3755_v40 = vrot.slane %v3753_v58, 4  ;;  %v6411_v29 = vrot.slane %v3676_v52, 9  ;;  %v3760_v10 = vrot.slane %v8599_v4, 5  ;;  %v999_v52 = vld [vmem:[#allocation2 + $0xc8] sm:$0x1] }
 0x123   : > { %7259 = vmatmul.mubr.bf16.gmra.mxu1 %v7613_v3  ;;  %v820_v12 = vshrl.u32 %v6666_v60, 16  ;;  %v823_v25 = vshll.u32 %v6666_v60, 16  ;;  %v828_v15 = vshrl.u32 %v6667_v63, 16  ;;  %v831_v39 = vshll.u32 %v6667_v63, 16  ;;  %v7645_v6 = vld [vmem:[%s10330_s3 + $0x1e8] sm:$0xff]  }
 0x124   : > { %7262 = vmatprep.mubr.bf16.mxu1 %v7615_v33  ;;  %7339 = vmatpush3.bf16.msra.mxu1 %v7620_v34  ;;  %v8928_v3 = vsel %vm8263_vm13, %v3755_v40, %v3756_v31  ;;  %v8932_v4 = vsel %vm8263_vm13, %v6411_v29, %v3760_v10  ;;  %v3762_v61 = vrot.slane %v3760_v10, 4  ;;  %v3763_v34 = vrot.slane %v8613_v50, 5  ;;  %v7619_v31 = vld [vmem:[#allocation2 + $0x6c] sm:$0xff]  }
 0x125   : > { %7340 = vmatprep.subr.bf16.mxu1 %v7624_v35  ;;  %v822_v21 = vrot.slane %v820_v12, 7  ;;  %v830_v8 = vrot.slane %v828_v15, 7  ;;  %v6442_v33 = vcombine.low %v8920_v57, %v8928_v3  ;;  %v6412_v45 = vrot.slane %v3677_v19, 9  ;;  %v3679_v19 = vld [vmem:[#allocation2 + $0x54] sm:$0xe]  ;;  %v7632_v12 = vld [vmem:[%s10330_s3 + $0x140] sm:$0xff]  }
 0x126   : > { %v8939_v49 = vsel %vm8263_vm13, %v3762_v61, %v3763_v34  ;;  %v3767_v58 = vrot.slane %v8618_v20, 5  ;;  %v3770_v60 = vrot.slane %v8634_v2, 5  ;;  %v6413_v63 = vrot.slane %v3678_v0, 9 }
 0x127   : > { %7319 = vmatmul.mubr.bf16.gmra.mxu0 %v8831_v62  ;;  %v825_v50 = vor.u32 %v823_v25, %v822_v21  ;;  %v826_v40 = vrot.slane %v822_v21, 4  ;;  %v833_v29 = vor.u32 %v831_v39, %v830_v8  ;;  %v835_v10 = vrot.slane %v830_v8, 4  ;;  %v3680_v25 = vld [vmem:[#allocation2 + $0x60] sm:$0xe]  ;;  %v3681_v8 = vld [vmem:[#allocation2 + $0x6c] sm:$0xe] }
 0x128   : > { %7341 = vmatpush3.bf16.msra.mxu1 %v7624_v35  ;;  %7322 = vmatprep.mubr.bf16.mxu0 %v8853_v32  ;;  %v6443_v20 = vcombine.low %v8932_v4, %v8939_v49  ;;  %v8952_v2 = vsel %vm8263_vm13, %v6412_v45, %v3767_v58  ;;  %v3769_v62 = vrot.slane %v3767_v58, 4  ;;  %v3774_v35 = vrot.slane %v8643_v54, 5  ;;  %v7666_v4 = vld [vmem:[%s10330_s3 + $0x200] sm:$0xff]  }
 0x129   : > { %7342 = vmatprep.subr.bf16.mxu1 %v7628_v51  ;;  %v834_v39 = vsel %vm7830_vm8, %v826_v40, %v833_v29  ;;  %v996_v0 = vsel %vm7836_vm9, %v825_v50, %v995_v48  ;;  %v1000_v34 = vsel %vm7842_vm10, %v835_v10, %v999_v52  ;;  %v3777_v21 = vrot.slane %v8657_v24, 5  ;;  %v3682_v40 = vld [vmem:[#allocation2 + $0x78] sm:$0xe]  ;;  %v4567_v24 = vld [vmem:[#allocation2 + $0x3c] sm:$0xf] }
 0x12a   : > { %997 = vst [vmem:[#allocation2 + $0xc0] sm:$0xf] %v996_v0  ;;  %998 = vst [vmem:[#allocation2 + $0xc4] sm:$0xf] %v834_v39  ;;  %v8964_v54 = vsel %vm8263_vm13, %v3769_v62, %v3770_v60  ;;  %v8968_v45 = vsel %vm8263_vm13, %v6413_v63, %v3774_v35  ;;  %v3776_v58 = vrot.slane %v3774_v35, 4  ;;  %v6414_v48 = vrot.slane %v3679_v19, 9 }
 0x12b   : > { %7263 = vmatmul.mubr.bf16.gmra.mxu1 %v7617_v41  ;;  %1001 = vst [vmem:[#allocation2 + $0xc8] sm:$0x1] %v1000_v34  ;;  %v3781_v41 = vrot.slane %v8664_v16, 5  ;;  %v3784_v52 = vrot.slane %v8684_v46, 5  ;;  %v6415_v50 = vrot.slane %v3680_v25, 9  ;;  %v8977_v60 = vld [vmem:[%s10330_s3 + $0x1f8] sm:$0xff]  }
 0x12c   : > { %7266 = vmatprep.mubr.bf16.mxu1 %v7619_v31  ;;  %7343 = vmatpush3.bf16.msra.mxu1 %v7628_v51  ;;  %v8981_v63 = vsel %vm8263_vm13, %v3776_v58, %v3777_v21  ;;  %v3788_v51 = vrot.slane %v8690_v53, 5  ;;  %v3791_v31 = vrot.slane %v8693_v55, 5  ;;  %v6416_v29 = vrot.slane %v3681_v8, 9  ;;  %v3683_v62 = vld [vmem:[#allocation2 + $0x84] sm:$0xe]  ;;  %v7621_v35 = vld [vmem:[#allocation2 + $0x78] sm:$0xff]  }
 0x12d   : > { %7344 = vmatprep.subr.bf16.mxu1 %v7632_v12  ;;  %v8989_v46 = vsel %vm8263_vm13, %v6414_v48, %v3781_v41  ;;  %v3783_v10 = vrot.slane %v3781_v41, 4  ;;  %v3795_v19 = vrot.slane %v8705_v9, 5  ;;  %v3798_v55 = vrot.slane %v8710_v43, 5  ;;  %v7623_v39 = vld [vmem:[#allocation2 + $0x84] sm:$0xff]  }
 0x12e   : > { %v8994_v25 = vsel %vm8263_vm13, %v6415_v50, %v3788_v51  ;;  %v3790_v53 = vrot.slane %v3788_v51, 4  ;;  %v6417_v15 = vrot.slane %v3682_v40, 9  ;;  %v3802_v61 = vrot.slane %v8725_v14, 5  ;;  %v3684_v40 = vld [vmem:[#allocation2 + $0x90] sm:$0xe] }
 0x12f   : > { %7323 = vmatmul.mubr.bf16.gmra.mxu0 %v8864_v42  ;;  %v9000_v32 = vsel %vm8263_vm13, %v3783_v10, %v3784_v52  ;;  %v9004_v9 = vsel %vm8263_vm13, %v6416_v29, %v3795_v19  ;;  %v3797_v0 = vrot.slane %v3795_v19, 4  ;;  %v6418_v34 = vrot.slane %v3683_v62, 9  ;;  %v3685_v51 = vld [vmem:[#allocation2 + $0x9c] sm:$0xe]  ;;  %v7625_v14 = vld [vmem:[#allocation2 + $0x90] sm:$0xff]  }
 0x130   : > { %7345 = vmatpush3.bf16.msra.mxu1 %v7632_v12  ;;  %7326 = vmatprep.mubr.bf16.mxu0 %v8898_v17  ;;  %v9013_v42 = vsel %vm8263_vm13, %v3790_v53, %v3791_v31  ;;  %v3805_v12 = vrot.slane %v8734_v22, 5  ;;  %v9028_v48 = vsel %vm8263_vm13, %v6417_v15, %v3802_v61  ;;  %v3804_v10 = vrot.slane %v3802_v61, 4 }
 0x131   : > { %7426 = vmatprep.subr.bf16.mxu1 %v8977_v60  ;;  %v2964_v21 = vld [vmem:[#allocation2 + $0xc0] sm:$0xf]  ;;  %v9016_v8 = vld [vmem:[#allocation2 + $0xc4] sm:$0xf]  ;;  %v9024_v17 = vsel %vm8263_vm13, %v3797_v0, %v3798_v55  ;;  %v3809_v19 = vrot.slane %v8745_v13, 5  ;;  %v3812_v61 = vrot.slane %v8754_v27, 5 }
 0x132   : > { %v9018_v58 = vld [vmem:[#allocation2 + $0xc8] sm:$0x1]  ;;  %v3328_v41 = vshrl.u32 %v2964_v21, 16  ;;  %v3331_v22 = vshll.u32 %v2964_v21, 16  ;;  %v3337_v52 = vshll.u32 %v9016_v8, 16  ;;  %v3341_v50 = vshrl.u32 %v9016_v8, 16 }
 0x133   : > { %7267 = vmatmul.mubr.bf16.gmra.mxu1 %v7621_v35  ;;  %v3347_v31 = vshll.u32 %v9018_v58, 16  ;;  %v9038_v0 = vsel %vm8263_vm13, %v3804_v10, %v3805_v12  ;;  %v3811_v21 = vrot.slane %v3809_v19, 4  ;;  %v3819_v12 = vrot.slane %v8778_v7, 5 }
 0x134   : > { %7270 = vmatprep.mubr.bf16.mxu1 %v7623_v39  ;;  %v3330_v62 = vrot.slane %v3328_v41, 4  ;;  %v3333_v53 = vrot.slane %v3331_v22, 5  ;;  %v3339_v35 = vrot.slane %v3337_v52, 5  ;;  %v3343_v55 = vrot.slane %v3341_v50, 4  ;;  %v7627_v41 = vld [vmem:[#allocation2 + $0x9c] sm:$0xff]  }
 0x135   : > { %v3349_v15 = vrot.slane %v3347_v31, 5  ;;  %v9042_v39 = vsel %vm8263_vm13, %v6418_v34, %v3809_v19  ;;  %v6419_v22 = vrot.slane %v3684_v40, 9  ;;  %v3816_v52 = vrot.slane %v8774_v11, 5  ;;  %v3687_v40 = vld [vmem:[#allocation2 + $0xb4] sm:$0xe] }
 0x136   : > { %v3334_v43 = vor.u32 %v3333_v53, %v3330_v62  ;;  %v3344_v29 = vor.u32 %v3343_v55, %v3339_v35  ;;  %v6420_v50 = vrot.slane %v3685_v51, 9  ;;  %v9051_v34 = vsel %vm8263_vm13, %v3811_v21, %v3812_v61  ;;  %v3686_v62 = vld [vmem:[#allocation2 + $0xa8] sm:$0xe] }
 0x137   : > { %v3823_v19 = vrot.slane %v8791_v1, 5  ;;  %v9058_v27 = vsel %vm8263_vm13, %v6419_v22, %v3816_v52  ;;  %v3818_v11 = vrot.slane %v3816_v52, 4  ;;  %v3826_v7 = vrot.slane %v8801_v36, 5  ;;  %v7635_v1 = vld [vmem:[#allocation2 + $0x18] sm:$0xff]   ;;  %v3688_v22 = vld [vmem:[#allocation2 + $0xc0] sm:$0xe] }
 0x138   : > { %v3335_v31 = vrot.slane %v3334_v43, 4  ;;  %v3345_v10 = vrot.slane %v3344_v29, 4  ;;  %v6421_v36 = vrot.slane %v3686_v62, 9  ;;  %v3833_v52 = vrot.slane %v8822_v28, 5 }
 0x139   : > { %v9067_v29 = vsel %vm8263_vm13, %v6420_v50, %v3823_v19  ;;  %v3825_v55 = vrot.slane %v3823_v19, 4  ;;  %v9071_v61 = vsel %vm8263_vm13, %v3818_v11, %v3819_v12  ;;  %v6422_v50 = vrot.slane %v3687_v40, 9 }
 0x13a   : > { %v3340_v43 = vsel %vm7794_vm2, %v3335_v31, %v3339_v35  ;;  %v3350_v51 = vsel %vm7794_vm2, %v3345_v10, %v3349_v15  ;;  %v3837_v31 = vrot.slane %v8833_v47, 5  ;;  %v7629_v10 = vld [vmem:[#allocation2 + $0xa8] sm:$0xff]   ;;  %v3840_v19 = vrot.slane %v8842_v44, 5  ;;  %v4561_v47 = vld [vmem:[#allocation2 + $0x24] sm:$0xf] }
 0x13b   : > { %7271 = vmatmul.mubr.bf16.gmra.mxu1 %v7625_v14  ;;  %v6399_v21 = vcombine.low %v3340_v43, %v3350_v51  ;;  %v3830_v14 = vrot.slane %v8810_v59, 5  ;;  %v9078_v15 = vsel %vm8263_vm13, %v3825_v55, %v3826_v7  ;;  %v6423_v62 = vrot.slane %v3688_v22, 9  ;;  %v7631_v7 = vld [vmem:[#allocation2 + $0xb4] sm:$0xff]  }
 0x13c   : > { %7274 = vmatprep.mubr.bf16.mxu1 %v7627_v41  ;;  %v3844_v11 = vrot.slane %v9016_v8, 5  ;;  %v3847_v28 = vrot.slane %v9018_v58, 5  ;;  %v9097_v43 = vsel %vm8263_vm13, %v6422_v50, %v3837_v31  ;;  %v3839_v51 = vrot.slane %v3837_v31, 4  ;;  %v7639_v55 = vld [vmem:[#allocation2 + $0x30] sm:$0xff]   ;;  %v7646_v50 = vld [vmem:[%s10330_s3 + $0x228] sm:$0xff]   ;;  %v7640_v31 = vld [vmem:[#allocation2 + $0x3c] sm:$0xff]  }
 0x13d   : > { %7327 = vmatmul.mubr.bf16.gmra.mxu0 %v6399_v21  ;;  %v9085_v12 = vsel %vm8263_vm13, %v6421_v36, %v3830_v14  ;;  %v3832_v59 = vrot.slane %v3830_v14, 4  ;;  %v7642_v14 = vld [vmem:[%s10330_s3 + $0x230] sm:$0xff]   ;;  %v9157_v21 = vld [vmem:[#allocation2 + $0x28] sm:$0xf]  ;;  %v9175_v41 = vld [vmem:[#allocation2 + $0x2c] sm:$0x1] }
 0x13e   : > { %7394 = vmatprep.mubr.bf16.mxu0 %v7635_v1  ;;  %v9103_v44 = vsel %vm8263_vm13, %v6423_v62, %v3844_v11  ;;  %v3846_v8 = vrot.slane %v3844_v11, 4  ;;  %v7636_v1 = vld [vmem:[#allocation2 + $0x24] sm:$0xff]   ;;  %v9107_v58 = vsel %vm8263_vm13, %v3839_v51, %v3840_v19  ;;  %v4558_v19 = vld [vmem:[#allocation2 + $0x18] sm:$0xf]  ;;  %v4559_v11 = vld [vmem:[#allocation2 + $0x1c] sm:$0xf] }
 0x13f   : > { %v9093_v40 = vsel %vm8263_vm13, %v3832_v59, %v3833_v52  ;;  %10393 = vst [vmem:[#allocation7_spill] sm:$0xff] %v9103_v44  ;;  %v7633_v52 = vld [vmem:[#allocation2 + $0xc0] sm:$0xff]   ;;  %v9124_v59 = vpop.f32.mrf.mxu0  ;;  %v5378_v51 = vrot.slane %v4559_v11, 5  ;;  %v4644_v35 = vshrl.u32 %v9157_v21, 16  ;;  %v5388_v16 = vrot.slane %v9175_v41, 5 }
 0x140   : > { %v9113_v36 = vsel %vm8263_vm13, %v3846_v8, %v3847_v28  ;;  %10395 = vst [vmem:[#allocation9_spill] sm:$0xff] %v9124_v59  ;;  %v9134_v28 = vld [vmem:[#allocation2 + $0x20] sm:$0x1]  ;;  %v4607_v8 = vshrl.u32 %v4558_v19, 16  ;;  %v7655_v59 = vld [vmem:[#allocation2 + $0x90] sm:$0xff]  }
 0x141   : > { %10394 = vst [vmem:[#allocation8_spill] sm:$0xff] %v9113_v36  ;;  %v9132_v62 = vpop.f32.mrf.mxu0 }
 0x142   : > { %10396 = vst [vmem:[#allocation6_spill] sm:$0xff] %v9132_v62  ;;  %v4609_v22 = vrot.slane %v4607_v8, 4  ;;  %v7658_v8 = vld [vmem:[%s10330_s3 + $0x210] sm:$0xff]   ;;  %v4646_v62 = vrot.slane %v4644_v35, 4  ;;  %v7653_v35 = vld [vmem:[%s10330_s3 + $0x1d8] sm:$0xff]  }
 0x143   : > { %7275 = vmatmul.mubr.bf16.gmra.mxu1 %v7629_v10  ;;  %v7643_v10 = vld [vmem:[#allocation2 + $0x48] sm:$0xff]   ;;  %v9136_v23 = vpop.f32.mrf.mxu0 }
 0x144   : > { %7278 = vmatprep.mubr.bf16.mxu1 %v7631_v7  ;;  %v5312_v7 = vld [vmem:[#allocation2 + $0x18] sm:$0xe]  ;;  %10397 = vst [vmem:[#allocation10_spill] sm:$0xff] %v9136_v23 }
 0x145   : > { %7395 = vmatmul.mubr.bf16.vlgmr.msra.gmra.mxu0 %v7636_v1  ;;  %v4610_v1 = vshll.u32 %v4558_v19, 16 }
 0x146   : > { %7475 = vmatpush3.bf16.msra.mxu0 %v8869_v5  ;;  %7398 = vmatprep.mubr.bf16.mxu0 %v7639_v55  ;;  %v7650_v5 = vld [vmem:[%s10330_s3 + $0x220] sm:$0xff]   ;;  %v6544_v55 = vrot.slane %v5312_v7, 9  ;;  %v9152_v7 = vpop.f32.mrf.mxu0 }
 0x147   : > { %7476 = vmatprep.subr.bf16.mxu0 %v7642_v14  ;;  %v4612_v19 = vrot.slane %v4610_v1, 5  ;;  %10398 = vst [vmem:[#allocation3_spill] sm:$0xff] %v9152_v7  ;;  %v4620_v1 = vshrl.u32 %v4559_v11, 16 }
 0x148   : > { %v9164_v56 = vsel %vm8263_vm13, %v6544_v55, %v5378_v51  ;;  %v4634_v55 = vshll.u32 %v4561_v47, 16 }
 0x149   : > { %v4613_v3 = vor.u32 %v4612_v19, %v4609_v22  ;;  %v4622_v22 = vrot.slane %v4620_v1, 4  ;;  %v7651_v1 = vld [vmem:[#allocation2 + $0x78] sm:$0xff]  }
 0x14a   : > { %7477 = vmatpush3.bf16.msra.mxu0 %v7642_v14  ;;  %v5381_v14 = vrot.slane %v9134_v28, 5  ;;  %v4636_v7 = vrot.slane %v4634_v55, 5  ;;  %v4682_v55 = vshll.u32 %v4567_v24, 16 }
 0x14b   : > { %7279 = vmatmul.mubr.bf16.gmra.mxu1 %v7633_v52  ;;  %7478 = vmatprep.subr.bf16.mxu0 %v7646_v50  ;;  %v7644_v52 = vld [vmem:[#allocation2 + $0x54] sm:$0xff]  }
 0x14c   : > { %7346 = vmatprep.mubr.bf16.mxu1 %v6440_v37  ;;  %v7654_v37 = vld [vmem:[%s10330_s3 + $0x218] sm:$0xff]  }
 0x14d   : > { %7399 = vmatmul.mubr.bf16.gmra.mxu0 %v7640_v31  ;;  %v5380_v31 = vrot.slane %v5378_v51, 4  ;;  %v4631_v51 = vshrl.u32 %v4561_v47, 16  ;;  %v7662_v47 = vld [vmem:[%s10330_s3 + $0x208] sm:$0xff]  }
 0x14e   : > { %7402 = vmatprep.mubr.bf16.mxu0 %v7643_v10  ;;  %7479 = vmatpush3.bf16.msra.mxu0 %v7646_v50  ;;  %v4616_v10 = vshll.u32 %v4559_v11, 16  ;;  %v7647_v50 = vld [vmem:[#allocation2 + $0x60] sm:$0xff]   ;;  %v9173_v11 = vld [vmem:[#allocation2 + $0x34] sm:$0xf] }
 0x14f   : > { %7480 = vmatprep.subr.bf16.mxu0 %v7650_v5  ;;  %v9168_v57 = vsel %vm8263_vm13, %v5380_v31, %v5381_v14  ;;  %v9179_v14 = vpop.f32.mrf.mxu0  ;;  %v4668_v53 = vshrl.u32 %v9173_v11, 16 }
 0x150   : > { %10399 = vst [vmem:[#allocation4_spill] sm:$0xff] %v9179_v14  ;;  %v4633_v14 = vrot.slane %v4631_v51, 4 }
 0x152   : > { %7481 = vmatpush3.bf16.msra.mxu0 %v7650_v5  ;;  %v5313_v5 = vld [vmem:[#allocation2 + $0x24] sm:$0xe] }
 0x153   : > { %7347 = vmatmul.mubr.bf16.vlgmr.msra.gmra.mxu1 %v6441_v38  ;;  %7482 = vmatprep.subr.bf16.mxu0 %v7654_v37  ;;  %v4564_v38 = vld [vmem:[#allocation2 + $0x30] sm:$0xf] }
 0x154   : > { %7427 = vmatpush3.bf16.msra.mxu1 %v8977_v60  ;;  %7350 = vmatprep.mubr.bf16.mxu1 %v6442_v33  ;;  %v9170_v33 = vrot.slane %v4616_v10, 5  ;;  %v4626_v60 = vshll.u32 %v9134_v28, 16  ;;  %v5385_v28 = vrot.slane %v9157_v21, 5  ;;  %v4655_v31 = vshrl.u32 %v4564_v38, 16  ;;  %v7648_v10 = vld [vmem:[#allocation2 + $0x6c] sm:$0xff]  }
 0x155   : > { %7428 = vmatprep.subr.bf16.mxu1 %v7641_v18  ;;  %7403 = vmatmul.mubr.bf16.gmra.mxu0 %v7644_v52  ;;  %v4640_v52 = vshll.u32 %v9157_v21, 16  ;;  %v4658_v19 = vshll.u32 %v4564_v38, 16  ;;  %v9192_v38 = vrot.slane %v4613_v3, 4  ;;  %v9204_v21 = vld [vmem:[#allocation2 + $0x40] sm:$0xf]  ;;  %v10401_v3 = vcombine.low %v8952_v2, %v8964_v54 }
 0x156   : > { %7406 = vmatprep.mubr.bf16.mxu0 %v7647_v50  ;;  %7483 = vmatpush3.bf16.msra.mxu0 %v7654_v37  ;;  %v7649_v37 = vld [vmem:[%s10330_s3 + $0x1e0] sm:$0xff]   ;;  %v6545_v50 = vrot.slane %v5313_v5, 9  ;;  %v9194_v13 = vrot.slane %v4626_v60, 5  ;;  %v9200_v5 = vpop.f32.mrf.mxu1  ;;  %v9209_v60 = vpop.f32.mrf.mxu0  ;;  %v4623_v49 = vor.u32 %v4622_v22, %v9170_v33  ;;  %v4670_v54 = vrot.slane %v4668_v53, 4 }
 0x157   : > { %7484 = vmatprep.subr.bf16.mxu0 %v7658_v8  ;;  %10400 = vst [vmem:[#allocation5_spill] sm:$0xff] %v9200_v5  ;;  %v9202_v23 = vrot.slane %v4640_v52, 5  ;;  %10402 = vst [vmem:[#allocation11_spill] sm:$0xff] %v9209_v60  ;;  %v4660_v51 = vrot.slane %v4658_v19, 5  ;;  %v4650_v22 = vshll.u32 %v9175_v41, 16  ;;  %v4688_v19 = vshll.u32 %v9204_v21, 16 }
 0x158   : > { %7429 = vmatpush3.bf16.msra.mxu1 %v7641_v18  ;;  %v4664_v18 = vshll.u32 %v9173_v11, 16  ;;  %v9222_v52 = vsel %vm8263_vm13, %v6545_v50, %v5385_v28  ;;  %v9229_v5 = vpop.f32.mrf.mxu1  ;;  %v4637_v53 = vor.u32 %v4636_v7, %v4633_v14  ;;  %v5392_v41 = vrot.slane %v9173_v11, 5  ;;  %v9237_v50 = vpop.f32.mrf.mxu0  ;;  %v5315_v14 = vld [vmem:[#allocation2 + $0x3c] sm:$0xe] }
 0x159   : > { %7430 = vmatprep.subr.bf16.mxu1 %v7645_v6  ;;  %10403 = vst [vmem:[#allocation12_spill] sm:$0xff] %v9229_v5  ;;  %10404 = vst [vmem:[#allocation13_spill] sm:$0xff] %v9237_v50  ;;  %v4569_v5 = vld [vmem:[#allocation2 + $0x44] sm:$0x1]  ;;  %v9251_v60 = vrot.slane %v4650_v22, 5 }
 0x15a   : > { %7485 = vmatpush3.bf16.msra.mxu0 %v7658_v8  ;;  %v4657_v8 = vrot.slane %v4655_v31, 4  ;;  %v9218_v2 = vrot.slane %v4664_v18, 5  ;;  %v9225_v31 = vld [vmem:[#allocation2 + $0x38] sm:$0x1]  ;;  %v9239_v18 = vrot.slane %v4623_v49, 4  ;;  %v4684_v49 = vrot.slane %v4682_v55, 5  ;;  %v9264_v22 = vpop.f32.mrf.mxu0 }
 0x15b   : > { %7351 = vmatmul.mubr.bf16.gmra.mxu1 %v6443_v20  ;;  %v5387_v20 = vrot.slane %v5385_v28, 4  ;;  %7486 = vmatprep.subr.bf16.mxu0 %v7662_v47  ;;  %v4647_v28 = vor.u32 %v4646_v62, %v9202_v23  ;;  %v7657_v62 = vld [vmem:[%s10330_s3 + $0x1d0] sm:$0xff]   ;;  %v4674_v11 = vshll.u32 %v9225_v31, 16  ;;  %v7652_v50 = vld [vmem:[#allocation2 + $0x84] sm:$0xff]   ;;  %v5394_v44 = vrot.slane %v5392_v41, 4 }
 0x15c   : > { %7354 = vmatprep.mubr.bf16.mxu1 %v10401_v3  ;;  %7431 = vmatpush3.bf16.msra.mxu1 %v7645_v6  ;;  %v4679_v6 = vshrl.u32 %v4567_v24, 16  ;;  %v4692_v3 = vshrl.u32 %v9204_v21, 16  ;;  %v5399_v24 = vrot.slane %v9204_v21, 5  ;;  %v4671_v7 = vor.u32 %v4670_v54, %v9218_v2 }
 0x15d   : > { %7432 = vmatprep.subr.bf16.mxu1 %v7649_v37  ;;  %7407 = vmatmul.mubr.bf16.gmra.mxu0 %v7648_v10  ;;  %v5314_v10 = vld [vmem:[#allocation2 + $0x30] sm:$0xe]  ;;  %v10405_v21 = vcombine.low %v8968_v45, %v8981_v63  ;;  %v4638_v54 = vrot.slane %v4637_v53, 4  ;;  %v4648_v36 = vrot.slane %v4647_v28, 4  ;;  %v10407_v55 = vcombine.low %v8989_v46, %v9000_v32 }
 0x15e   : > { %7410 = vmatprep.mubr.bf16.mxu0 %v7651_v1  ;;  %7487 = vmatpush3.bf16.msra.mxu0 %v7662_v47  ;;  %v9243_v47 = vsel %vm8263_vm13, %v5387_v20, %v5388_v16  ;;  %v4661_v1 = vor.u32 %v4660_v51, %v4657_v8  ;;  %v6546_v16 = vrot.slane %v5314_v10, 9  ;;  %v9253_v20 = vrot.slane %v4688_v19, 5  ;;  %v9258_v51 = vpop.f32.mrf.mxu1  ;;  %v4570_v10 = vld [vmem:[#allocation2 + $0x48] sm:$0xf] }
 0x15f   : > { %7488 = vmatprep.subr.bf16.mxu0 %v7666_v4  ;;  %v4694_v8 = vrot.slane %v4692_v3, 4  ;;  %10406 = vst [vmem:[#allocation14_spill] sm:$0xff] %v9258_v51  ;;  %v6547_v3 = vrot.slane %v5315_v14, 9  ;;  %v5401_v45 = vrot.slane %v5399_v24, 4  ;;  %v5402_v63 = vrot.slane %v4569_v5, 5 }
 0x160   : > { %7433 = vmatpush3.bf16.msra.mxu1 %v7649_v37  ;;  %v4681_v37 = vrot.slane %v4679_v6, 4  ;;  %v5395_v6 = vrot.slane %v9225_v31, 5  ;;  %v4662_v19 = vrot.slane %v4661_v1, 4  ;;  %v4672_v53 = vrot.slane %v4671_v7, 4  ;;  %v4571_v51 = vld [vmem:[#allocation2 + $0x4c] sm:$0xf]  ;;  %v9289_v7 = vpop.f32.mrf.mxu0 }
 0x161   : > { %7434 = vmatprep.subr.bf16.mxu1 %v7653_v35  ;;  %v4676_v28 = vrot.slane %v4674_v11, 5  ;;  %v4629_v46 = vsel %vm7794_vm2, %v9239_v18, %v9194_v13  ;;  %v9275_v32 = vsel %vm8263_vm13, %v6546_v16, %v5392_v41  ;;  %v5316_v1 = vld [vmem:[#allocation2 + $0x48] sm:$0xe]  ;;  %v5406_v14 = vrot.slane %v4571_v51, 5  ;;  %v9287_v13 = vld [vmem:[#allocation2 + $0x50] sm:$0x1] }
 0x162   : > { %7489 = vmatpush3.bf16.msra.mxu0 %v7666_v4  ;;  %v7661_v4 = vld [vmem:[%s10330_s3 + $0x1c8] sm:$0xff]   ;;  %v4685_v31 = vor.u32 %v4684_v49, %v4681_v37  ;;  %v4703_v18 = vshrl.u32 %v4570_v10, 16  ;;  %v4706_v41 = vshll.u32 %v4570_v10, 16  ;;  %v4653_v11 = vsel %vm7794_vm2, %v4648_v36, %v9251_v60 }
 0x163   : > { %7355 = vmatmul.mubr.bf16.gmra.mxu1 %v10405_v21  ;;  %v4698_v21 = vshll.u32 %v4569_v5, 16  ;;  %v4643_v5 = vsel %vm7794_vm2, %v4638_v54, %v9202_v23  ;;  %v9299_v23 = vsel %vm8263_vm13, %v6547_v3, %v5399_v24  ;;  %v4677_v36 = vsel %vm7794_vm2, %v4672_v53, %v4676_v28  ;;  %v7659_v3 = vld [vmem:[#allocation2 + $0xa8] sm:$0xff]  }
 0x164   : > { %7358 = vmatprep.mubr.bf16.mxu1 %v10407_v55  ;;  %7435 = vmatpush3.bf16.msra.mxu1 %v7653_v35  ;;  %v4695_v35 = vor.u32 %v4694_v8, %v9253_v20  ;;  %v9278_v55 = vpop.f32.mrf.mxu1  ;;  %v4686_v60 = vrot.slane %v4685_v31, 4  ;;  %v6548_v49 = vrot.slane %v5316_v1, 9  ;;  %v5408_v8 = vrot.slane %v5406_v14, 4  ;;  %v9321_v31 = vpop.f32.mrf.mxu0 }
 0x165   : > { %7436 = vmatprep.subr.bf16.mxu1 %v7657_v62  ;;  %7411 = vmatmul.mubr.bf16.gmra.mxu0 %v7652_v50  ;;  %10408 = vst [vmem:[#allocation15_spill] sm:$0xff] %v9278_v55  ;;  %v9285_v50 = vsel %vm8263_vm13, %v5394_v44, %v5395_v6  ;;  %v9303_v44 = vsel %vm8263_vm13, %v5401_v45, %v5402_v63  ;;  %v4700_v37 = vrot.slane %v4698_v21, 5  ;;  %v5409_v24 = vrot.slane %v9287_v13, 5 }
 0x166   : > { %7414 = vmatprep.mubr.bf16.mxu0 %v7655_v59  ;;  %v4667_v59 = vsel %vm7794_vm2, %v4662_v19, %v9218_v2  ;;  %v7656_v2 = vld [vmem:[#allocation2 + $0x9c] sm:$0xff]   ;;  %v4696_v16 = vrot.slane %v4695_v35, 4  ;;  %v4712_v54 = vshll.u32 %v4571_v51, 16  ;;  %v10409_v6 = vcombine.low %v8994_v25, %v9013_v42  ;;  %v9314_v19 = vpop.f32.mrf.mxu1  ;;  %10412 = vst [vmem:[#allocation17_spill] sm:$0xff] %v9321_v31 }
 0x167   : > { %10410 = vst [vmem:[#allocation16_spill] sm:$0xff] %v9314_v19  ;;  %v4705_v63 = vrot.slane %v4703_v18, 4  ;;  %v4708_v10 = vrot.slane %v4706_v41, 5  ;;  %v4716_v53 = vshrl.u32 %v4571_v51, 16  ;;  %v10411_v28 = vcombine.low %v9004_v9, %v9024_v17  ;;  %v4573_v51 = vld [vmem:[#allocation2 + $0x54] sm:$0xf] }
 0x168   : > { %7437 = vmatpush3.bf16.msra.mxu1 %v7657_v62  ;;  %v7665_v62 = vld [vmem:[%s10330_s3 + $0x1c0] sm:$0xff]   ;;  %v10413_v25 = vsel %vm7794_vm2, %v9192_v38, %v9170_v33  ;;  %v9330_v21 = vcombine.low %v4643_v5, %v4653_v11  ;;  %v9334_v1 = vcombine.low %v4667_v59, %v4677_v36  ;;  %v4691_v17 = vsel %vm7794_vm2, %v4686_v60, %v9253_v20  ;;  %v4574_v38 = vld [vmem:[#allocation2 + $0x58] sm:$0xf]  ;;  %v9356_v59 = vpop.f32.mrf.mxu1  ;;  %v9358_v60 = vld [vmem:[#allocation2 + $0x5c] sm:$0x1] }
 0x169   : > { %7438 = vmatprep.subr.bf16.mxu1 %v7661_v4  ;;  %v9328_v42 = vcombine.low %v10413_v25, %v4629_v46  ;;  %v9343_v33 = vsel %vm8263_vm13, %v6548_v49, %v5406_v14  ;;  %v4701_v46 = vsel %vm7794_vm2, %v4696_v16, %v4700_v37  ;;  %v9349_v5 = vsel %vm8263_vm13, %v5408_v8, %v5409_v24  ;;  %v9354_v11 = vld [vmem:[#allocation2 + $0x64] sm:$0xf]  ;;  %v4576_v20 = vld [vmem:[#allocation2 + $0x60] sm:$0xf] }
 0x16a   : > { %v9351_v18 = vrot.slane %v4712_v54, 5  ;;  %v4722_v41 = vshll.u32 %v9287_v13, 16  ;;  %10414 = vst [vmem:[#allocation18_spill] sm:$0xff] %v9356_v59  ;;  %v4709_v14 = vor.u32 %v4708_v10, %v4705_v63  ;;  %v4718_v36 = vrot.slane %v4716_v53, 4  ;;  %v4579_v10 = vld [vmem:[#allocation2 + $0x6c] sm:$0xf] }
 0x16b   : > { %7359 = vmatmul.mubr.bf16.gmra.mxu1 %v10409_v6  ;;  %v4727_v49 = vshrl.u32 %v4573_v51, 16  ;;  %v4730_v37 = vshll.u32 %v4573_v51, 16  ;;  %v5413_v8 = vrot.slane %v4574_v38, 5  ;;  %v4736_v24 = vshll.u32 %v4574_v38, 16  ;;  %v9371_v51 = vld [vmem:[#allocation2 + $0x70] sm:$0xf] }
 0x16c   : > { %7362 = vmatprep.mubr.bf16.mxu1 %v10411_v28  ;;  %7439 = vmatpush3.bf16.msra.mxu1 %v7661_v4  ;;  %v5317_v4 = vld [vmem:[#allocation2 + $0x54] sm:$0xe]  ;;  %v4740_v54 = vshrl.u32 %v4574_v38, 16  ;;  %v4751_v13 = vshrl.u32 %v4576_v20, 16  ;;  %v4754_v6 = vshll.u32 %v4576_v20, 16  ;;  %v4760_v28 = vshll.u32 %v9354_v11, 16 }
 0x16d   : > { %7440 = vmatprep.subr.bf16.mxu1 %v7665_v62  ;;  %7415 = vmatmul.mubr.bf16.gmra.mxu0 %v7656_v2  ;;  %v9360_v2 = vpop.f32.mrf.mxu0  ;;  %v6549_v16 = vrot.slane %v5317_v4, 9  ;;  %v4764_v25 = vshrl.u32 %v9354_v11, 16  ;;  %v9364_v63 = vcombine.low %v4691_v17, %v4701_v46  ;;  %v9368_v53 = vrot.slane %v4722_v41, 5  ;;  %v9376_v4 = vpop.f32.mrf.mxu1  ;;  %v7663_v20 = vld [vmem:[#allocation2 + $0xc0] sm:$0xff]  }
 0x16e   : > { %7418 = vmatprep.mubr.bf16.mxu0 %v7659_v3  ;;  %10415 = vst [vmem:[#allocation19_spill] sm:$0xff] %v9360_v2  ;;  %v7660_v3 = vld [vmem:[#allocation2 + $0xb4] sm:$0xff]   ;;  %v10416_v38 = vcombine.low %v9028_v48, %v9038_v0  ;;  %10417 = vst [vmem:[#allocation20_spill] sm:$0xff] %v9376_v4  ;;  %v9378_v9 = vrot.slane %v4709_v14, 4  ;;  %v4719_v17 = vor.u32 %v4718_v36, %v9351_v18  ;;  %v4729_v46 = vrot.slane %v4727_v49, 4 }
 0x16f   : > { %v4732_v35 = vrot.slane %v4730_v37, 5  ;;  %v10418_v41 = vcombine.low %v9042_v39, %v9051_v34  ;;  %v9384_v45 = vpop.f32.mrf.mxu0  ;;  %v9388_v48 = vsel %vm8263_vm13, %v6549_v16, %v5413_v8  ;;  %v5415_v0 = vrot.slane %v5413_v8, 4  ;;  %v9392_v4 = vld [vmem:[#allocation2 + $0x60] sm:$0xe]  ;;  %v4578_v39 = vld [vmem:[#allocation2 + $0x68] sm:$0x1]  ;;  %v9398_v55 = vpop.f32.mrf.mxu1 }
 0x170   : > { %7441 = vmatpush3.bf16.msra.mxu1 %v7665_v62  ;;  %v5416_v62 = vrot.slane %v9358_v60, 5  ;;  %10419 = vst [vmem:[#allocation21_spill] sm:$0xff] %v9384_v45  ;;  %v4742_v14 = vrot.slane %v4740_v54, 4  ;;  %v4753_v36 = vrot.slane %v4751_v13, 4  ;;  %v4756_v49 = vrot.slane %v4754_v6, 5  ;;  %10420 = vst [vmem:[#allocation22_spill] sm:$0xff] %v9398_v55 }
 0x171   : > { %v9394_v37 = vrot.slane %v4760_v28, 5  ;;  %v4766_v59 = vrot.slane %v4764_v25, 4  ;;  %v4775_v34 = vshrl.u32 %v4579_v10, 16  ;;  %v4784_v19 = vshll.u32 %v9371_v51, 16 }
 0x172   : > { %v4788_v16 = vshrl.u32 %v9371_v51, 16  ;;  %v4733_v54 = vor.u32 %v4732_v35, %v4729_v46  ;;  %v5420_v13 = vrot.slane %v9354_v11, 5  ;;  %v9411_v28 = vsel %vm8263_vm13, %v5415_v0, %v5416_v62  ;;  %v5319_v35 = vld [vmem:[#allocation2 + $0x6c] sm:$0xe] }
 0x173   : > { %7363 = vmatmul.mubr.bf16.gmra.mxu1 %v10416_v38  ;;  %v9390_v38 = vrot.slane %v4736_v24, 5  ;;  %v9404_v24 = vrot.slane %v4719_v17, 4  ;;  %v9407_v6 = vpop.f32.mrf.mxu0  ;;  %v4757_v55 = vor.u32 %v4756_v49, %v4753_v36  ;;  %v4767_v17 = vor.u32 %v4766_v59, %v9394_v37 }
 0x174   : > { %7366 = vmatprep.mubr.bf16.mxu1 %v10418_v41  ;;  %v4778_v41 = vshll.u32 %v4579_v10, 16  ;;  %10421 = vst [vmem:[#allocation23_spill] sm:$0xff] %v9407_v6  ;;  %v6550_v10 = vrot.slane %v9392_v4, 9  ;;  %v4770_v8 = vshll.u32 %v4578_v39, 16  ;;  %v5427_v11 = vrot.slane %v9371_v51, 5  ;;  %v9425_v4 = vpop.f32.mrf.mxu1 }
 0x175   : > { %7419 = vmatmul.mubr.bf16.gmra.mxu0 %v7660_v3  ;;  %v4743_v25 = vor.u32 %v4742_v14, %v9390_v38  ;;  %v4746_v3 = vshll.u32 %v9358_v60, 16  ;;  %v9418_v46 = vpop.f32.mrf.mxu0  ;;  %v4581_v6 = vld [vmem:[#allocation2 + $0x74] sm:$0x1]  ;;  %v4777_v45 = vrot.slane %v4775_v34, 4  ;;  %v9420_v0 = vrot.slane %v4784_v19, 5  ;;  %10424 = vst [vmem:[#allocation25_spill] sm:$0xff] %v9425_v4 }
 0x176   : > { %7422 = vmatprep.mubr.bf16.mxu0 %v7663_v20  ;;  %v7664_v20 = vld [vmem:[#allocation2 + $0xcc] sm:$0xff]   ;;  %10422 = vst [vmem:[#allocation24_spill] sm:$0xff] %v9418_v46  ;;  %v4780_v62 = vrot.slane %v4778_v41, 5  ;;  %v4790_v14 = vrot.slane %v4788_v16, 4  ;;  %v10423_v60 = vcombine.low %v9058_v27, %v9071_v61  ;;  %v4725_v59 = vsel %vm7794_vm2, %v9404_v24, %v9368_v53  ;;  %v4582_v53 = vld [vmem:[#allocation2 + $0x78] sm:$0xf] }
 0x177   : > { %v4734_v51 = vrot.slane %v4733_v54, 4  ;;  %v5422_v36 = vrot.slane %v5420_v13, 4  ;;  %v5423_v49 = vrot.slane %v4578_v39, 5  ;;  %v10425_v34 = vcombine.low %v9067_v29, %v9078_v15  ;;  %v9434_v19 = vpop.f32.mrf.mxu0  ;;  %v4591_v27 = vld [vmem:[#allocation2 + $0x9c] sm:$0xf] }
 0x178   : > { %10426 = vst [vmem:[#allocation26_spill] sm:$0xff] %v9434_v19  ;;  %v4744_v61 = vrot.slane %v4743_v25, 4  ;;  %v4748_v41 = vrot.slane %v4746_v3, 5  ;;  %v6551_v16 = vrot.slane %v5319_v35, 9  ;;  %v4772_v4 = vrot.slane %v4770_v8, 5  ;;  %v9441_v19 = vpop.f32.mrf.mxu1 }
 0x179   : > { %v5429_v46 = vrot.slane %v5427_v11, 4  ;;  %v5430_v2 = vrot.slane %v4581_v6, 5  ;;  %v9438_v24 = vpop.f32.mrf.mxu0  ;;  %v4768_v39 = vrot.slane %v4767_v17, 4  ;;  %v4781_v54 = vor.u32 %v4780_v62, %v4777_v45  ;;  %10428 = vst [vmem:[#allocation28_spill] sm:$0xff] %v9441_v19 }
 0x17a   : > { %10427 = vst [vmem:[#allocation27_spill] sm:$0xff] %v9438_v24  ;;  %v4791_v29 = vor.u32 %v4790_v14, %v9420_v0  ;;  %v4794_v15 = vshll.u32 %v4581_v6, 16  ;;  %v10429_v25 = vcombine.low %v9164_v56, %v9168_v57  ;;  %v9451_v8 = vsel %vm8263_vm13, %v6550_v10, %v5420_v13  ;;  %v9465_v57 = vld [vmem:[#allocation2 + $0x80] sm:$0x1] }
 0x17b   : > { %7367 = vmatmul.mubr.bf16.gmra.mxu1 %v10423_v60  ;;  %v4758_v60 = vrot.slane %v4757_v55, 4  ;;  %v4739_v55 = vsel %vm7794_vm2, %v4734_v51, %v9390_v38  ;;  %v9455_v45 = vsel %vm8263_vm13, %v5422_v36, %v5423_v49  ;;  %v9463_v56 = vsel %vm8263_vm13, %v6551_v16, %v5427_v11  ;;  %v5320_v38 = vld [vmem:[#allocation2 + $0x78] sm:$0xe]  ;;  %v9481_v16 = vpop.f32.mrf.mxu1 }
 0x17c   : > { %7370 = vmatprep.mubr.bf16.mxu1 %v10425_v34  ;;  %v4583_v34 = vld [vmem:[#allocation2 + $0x7c] sm:$0xf]  ;;  %v9457_v3 = vpop.f32.mrf.mxu0  ;;  %v4799_v17 = vshrl.u32 %v4582_v53, 16  ;;  %v4802_v13 = vshll.u32 %v4582_v53, 16  ;;  %v9472_v35 = vsel %vm8263_vm13, %v5429_v46, %v5430_v2  ;;  %v4773_v11 = vsel %vm7794_vm2, %v4768_v39, %v4772_v4  ;;  %10431 = vst [vmem:[#allocation29_spill] sm:$0xff] %v9481_v16 }
 0x17d   : > { %7423 = vmatmul.mubr.bf16.gmra.mxu0 %v7664_v20  ;;  %v5434_v6 = vrot.slane %v4583_v34, 5  ;;  %v4749_v20 = vsel %vm7794_vm2, %v4744_v61, %v4748_v41  ;;  %v4763_v10 = vsel %vm7794_vm2, %v4758_v60, %v9394_v37  ;;  %v4808_v62 = vshll.u32 %v4583_v34, 16  ;;  %v4585_v53 = vld [vmem:[#allocation2 + $0x84] sm:$0xf] }
 0x17e   : > { %7490 = vmatprep.mubr.bf16.mxu0 %v10429_v25  ;;  %v4812_v14 = vshrl.u32 %v4583_v34, 16  ;;  %v9474_v51 = vpop.f32.mrf.mxu0  ;;  %v4782_v36 = vrot.slane %v4781_v54, 4  ;;  %v4792_v49 = vrot.slane %v4791_v29, 4  ;;  %v4796_v61 = vrot.slane %v4794_v15, 5 }
 0x17f   : > { %v10430_v41 = vcombine.low %v9085_v12, %v9093_v40  ;;  %v10432_v2 = vsel %vm7794_vm2, %v9378_v9, %v9351_v18  ;;  %v6552_v46 = vrot.slane %v5320_v38, 9  ;;  %v5436_v60 = vrot.slane %v5434_v6, 4  ;;  %v9500_v18 = vld [vmem:[#allocation2 + $0x88] sm:$0xf] }
 0x180   : > { %v9488_v37 = vcombine.low %v10432_v2, %v4725_v59  ;;  %v5437_v4 = vrot.slane %v9465_v57, 5  ;;  %v10433_v39 = vcombine.low %v9097_v43, %v9107_v58  ;;  %v9494_v12 = vpop.f32.mrf.mxu0  ;;  %v9496_v40 = vcombine.low %v4739_v55, %v4749_v20  ;;  %v4588_v58 = vld [vmem:[#allocation2 + $0x90] sm:$0xf] }
 0x181   : > { %v4801_v29 = vrot.slane %v4799_v17, 4  ;;  %v4804_v9 = vrot.slane %v4802_v13, 5  ;;  %v9502_v59 = vcombine.low %v4763_v10, %v4773_v11  ;;  %v9506_v34 = vrot.slane %v4808_v62, 5  ;;  %v9518_v10 = vld [vmem:[#allocation2 + $0x94] sm:$0xf]  ;;  %v9520_v62 = vpop.f32.mrf.mxu1 }
 0x182   : > { %v4814_v43 = vrot.slane %v4812_v14, 4  ;;  %v10434_v25 = vcombine.low %v9222_v52, %v9243_v47  ;;  %v9511_v55 = vpop.f32.mrf.mxu0  ;;  %v4787_v20 = vsel %vm7794_vm2, %v4782_v36, %v9420_v0  ;;  %v4797_v38 = vsel %vm7794_vm2, %v4792_v49, %v4796_v61  ;;  %10435 = vst [vmem:[#allocation30_spill] sm:$0xff] %v9520_v62  ;;  %v5321_v0 = vld [vmem:[#allocation2 + $0x84] sm:$0xe] }
 0x183   : > { %7371 = vmatmul.mubr.bf16.gmra.mxu1 %v10430_v41  ;;  %v4823_v17 = vshrl.u32 %v4585_v53, 16  ;;  %v4826_v13 = vshll.u32 %v4585_v53, 16  ;;  %v10436_v14 = vcombine.low %v9275_v32, %v9285_v50  ;;  %v9527_v52 = vsel %vm8263_vm13, %v6552_v46, %v5434_v6  ;;  %v9538_v32 = vld [vmem:[#allocation2 + $0x8c] sm:$0x1] }
 0x184   : > { %7374 = vmatprep.mubr.bf16.mxu1 %v10433_v39  ;;  %v9531_v47 = vsel %vm8263_vm13, %v5436_v60, %v5437_v4  ;;  %v4832_v11 = vshll.u32 %v9500_v18, 16  ;;  %v4836_v36 = vshrl.u32 %v9500_v18, 16  ;;  %v9535_v49 = vpop.f32.mrf.mxu0  ;;  %v4805_v61 = vor.u32 %v4804_v9, %v4801_v29 }
 0x185   : > { %7491 = vmatmul.mubr.bf16.vlgmr.msra.gmra.mxu0 %v10434_v25  ;;  %v4818_v41 = vshll.u32 %v9465_v57, 16  ;;  %v4847_v50 = vshrl.u32 %v4588_v58, 16  ;;  %v4850_v2 = vshll.u32 %v4588_v58, 16  ;;  %v9540_v6 = vcombine.low %v4787_v20, %v4797_v38  ;;  %v10440_v58 = vld [vmem:[#allocation8_spill] sm:$0xff] }
 0x186   : > { %7494 = vmatprep.mubr.bf16.mxu0 %v10436_v14  ;;  %v4815_v46 = vor.u32 %v4814_v43, %v9506_v34  ;;  %v4856_v60 = vshll.u32 %v9518_v10, 16  ;;  %v4860_v4 = vshrl.u32 %v9518_v10, 16  ;;  %v9545_v53 = vpop.f32.mrf.mxu0  ;;  %v6553_v29 = vrot.slane %v5321_v0, 9  ;;  %v10439_v14 = vld [vmem:[#allocation7_spill] sm:$0xff] }
 0x187   : > { %10437 = vst [vmem:[#allocation31_spill] sm:$0xff] %v9540_v6  ;;  %v4825_v9 = vrot.slane %v4823_v17, 4  ;;  %v4828_v57 = vrot.slane %v4826_v13, 5  ;;  %v9549_v25 = vpop.f32.mrf.mxu1  ;;  %v10441_v20 = vcombine.low %v10439_v14, %v10440_v58  ;;  %v5441_v43 = vrot.slane %v9500_v18, 5  ;;  %v9565_v14 = vld [vmem:[#allocation2 + $0xa0] sm:$0xf] }
 0x188   : > { %10438 = vst [vmem:[#allocation32_spill] sm:$0xff] %v9549_v25  ;;  %v5444_v38 = vrot.slane %v9538_v32, 5  ;;  %v9556_v15 = vrot.slane %v4832_v11, 5  ;;  %v4838_v54 = vrot.slane %v4836_v36, 4  ;;  %v9559_v39 = vpop.f32.mrf.mxu0  ;;  %v9561_v17 = vrot.slane %v4805_v61, 4 }
 0x189   : > { %v9563_v13 = vrot.slane %v4818_v41, 5  ;;  %v4849_v0 = vrot.slane %v4847_v50, 4  ;;  %v4852_v25 = vrot.slane %v4850_v2, 5  ;;  %v9567_v58 = vpop.f32.mrf.mxu1  ;;  %v9569_v18 = vrot.slane %v4815_v46, 4  ;;  %v5322_v36 = vld [vmem:[#allocation2 + $0x90] sm:$0xe] }
 0x18a   : > { %10442 = vst [vmem:[#allocation7_spill] sm:$0xff] %v9567_v58  ;;  %v4842_v11 = vshll.u32 %v9538_v32, 16  ;;  %v10443_v61 = vcombine.low %v9299_v23, %v9303_v44  ;;  %v9577_v41 = vpop.f32.mrf.mxu0  ;;  %v9581_v50 = vsel %vm8263_vm13, %v6553_v29, %v5441_v43  ;;  %v4829_v2 = vor.u32 %v4828_v57, %v4825_v9  ;;  %v4590_v58 = vld [vmem:[#allocation2 + $0x98] sm:$0x1] }
 0x18b   : > { %7375 = vmatmul.mubr.bf16.gmra.mxu1 %v10441_v20  ;;  %v9572_v20 = vrot.slane %v4856_v60, 5  ;;  %v4871_v46 = vshrl.u32 %v4591_v27, 16  ;;  %v4874_v62 = vshll.u32 %v4591_v27, 16  ;;  %v9583_v16 = vpop.f32.mrf.mxu1  ;;  %v10445_v32 = vcombine.low %v9343_v33, %v9349_v5 }
 0x18c   : > { %7442 = vmatprep.mubr.bf16.mxu1 %v9328_v42  ;;  %v4862_v42 = vrot.slane %v4860_v4, 4  ;;  %10444 = vst [vmem:[#allocation8_spill] sm:$0xff] %v9583_v16  ;;  %v4839_v60 = vor.u32 %v4838_v54, %v9556_v15  ;;  %v5448_v23 = vrot.slane %v9518_v10, 5  ;;  %v4880_v44 = vshll.u32 %v9565_v14, 16  ;;  %v9592_v29 = vpop.f32.mrf.mxu0 }
 0x18d   : > { %7495 = vmatmul.mubr.bf16.gmra.mxu0 %v10443_v61  ;;  %v4884_v4 = vshrl.u32 %v9565_v14, 16  ;;  %10446 = vst [vmem:[#allocation33_spill] sm:$0xff] %v9592_v29  ;;  %v5443_v9 = vrot.slane %v5441_v43, 4  ;;  %v6554_v57 = vrot.slane %v5322_v36, 9  ;;  %v4853_v61 = vor.u32 %v4852_v25, %v4849_v0  ;;  %v9598_v33 = vpop.f32.mrf.mxu1  ;;  %v4593_v29 = vld [vmem:[#allocation2 + $0xa4] sm:$0x1] }
 0x18e   : > { %7498 = vmatprep.mubr.bf16.mxu0 %v10445_v32  ;;  %10447 = vst [vmem:[#allocation34_spill] sm:$0xff] %v9598_v33  ;;  %v9600_v5 = vrot.slane %v4842_v11, 5  ;;  %v4863_v54 = vor.u32 %v4862_v42, %v9572_v20  ;;  %v4866_v10 = vshll.u32 %v4590_v58, 16  ;;  %v5323_v32 = vld [vmem:[#allocation2 + $0x9c] sm:$0xe]  ;;  %v5455_v16 = vrot.slane %v9565_v14, 5  ;;  %v9604_v19 = vpop.f32.mrf.mxu0 }
 0x18f   : > { %10448 = vst [vmem:[#allocation35_spill] sm:$0xff] %v9604_v19  ;;  %v4830_v24 = vrot.slane %v4829_v2, 4  ;;  %v5451_v6 = vrot.slane %v4590_v58, 5  ;;  %v4873_v31 = vrot.slane %v4871_v46, 4  ;;  %v4876_v27 = vrot.slane %v4874_v62, 5  ;;  %v9606_v43 = vpop.f32.mrf.mxu1 }
 0x190   : > { %v4840_v25 = vrot.slane %v4839_v60, 4  ;;  %v5450_v0 = vrot.slane %v5448_v23, 4  ;;  %v9609_v11 = vrot.slane %v4880_v44, 5  ;;  %v4886_v36 = vrot.slane %v4884_v4, 4  ;;  %v9612_v42 = vpop.f32.mrf.mxu0  ;;  %v4595_v2 = vld [vmem:[#allocation2 + $0xac] sm:$0xf] }
 0x191   : > { %10449 = vst [vmem:[#allocation36_spill] sm:$0xff] %v9612_v42  ;;  %v4821_v14 = vsel %vm7794_vm2, %v9569_v18, %v9563_v13  ;;  %v9620_v62 = vsel %vm8263_vm13, %v5443_v9, %v5444_v38  ;;  %v4854_v58 = vrot.slane %v4853_v61, 4  ;;  %v1921_v46 = vpop.f32.mrf.mxu1  ;;  %v4864_v60 = vrot.slane %v4863_v54, 4 }
 0x192   : > { %v4868_v44 = vrot.slane %v4866_v10, 5  ;;  %v5457_v4 = vrot.slane %v5455_v16, 4  ;;  %v5458_v33 = vrot.slane %v4593_v29, 5  ;;  %v10450_v42 = vcombine.low %v9388_v48, %v9411_v28  ;;  %v9625_v19 = vpop.f32.mrf.mxu0 }
 0x193   : > { %7443 = vmatmul.mubr.bf16.vlgmr.msra.gmra.mxu1 %v9330_v21  ;;  %v6555_v21 = vrot.slane %v5323_v32, 9  ;;  %v4835_v38 = vsel %vm7794_vm2, %v4830_v24, %v9556_v15  ;;  %v9632_v13 = vsel %vm8263_vm13, %v6554_v57, %v5448_v23  ;;  %v4877_v18 = vor.u32 %v4876_v27, %v4873_v31  ;;  %v7157_v61 = vpop.f32.mrf.mxu1  ;;  %v4596_v23 = vld [vmem:[#allocation2 + $0xb0] sm:$0x1]  ;;  %v5324_v57 = vld [vmem:[#allocation2 + $0xa8] sm:$0xe] }
 0x194   : > { %7446 = vmatprep.mubr.bf16.mxu1 %v9334_v1  ;;  %v4594_v1 = vld [vmem:[#allocation2 + $0xa8] sm:$0xf]  ;;  %v5462_v9 = vrot.slane %v4595_v2, 5  ;;  %v10451_v54 = vcombine.low %v9451_v8, %v9455_v45  ;;  %v4845_v48 = vsel %vm7794_vm2, %v4840_v25, %v9600_v5  ;;  %v9642_v28 = vsel %vm8263_vm13, %v5450_v0, %v5451_v6  ;;  %v9645_v31 = vpop.f32.mrf.mxu0 }
 0x195   : > { %7499 = vmatmul.mubr.bf16.gmra.mxu0 %v10450_v42  ;;  %v4887_v24 = vor.u32 %v4886_v36, %v9609_v11  ;;  %v4890_v15 = vshll.u32 %v4593_v29, 16  ;;  %v4859_v8 = vsel %vm7794_vm2, %v4854_v58, %v9572_v20  ;;  %v9652_v45 = vsel %vm8263_vm13, %v6555_v21, %v5455_v16  ;;  %v1924_v10 = vpop.f32.mrf.mxu1 }
 0x196   : > { %7502 = vmatprep.mubr.bf16.mxu0 %v10451_v54  ;;  %v4895_v27 = vshrl.u32 %v4594_v1, 16  ;;  %v4898_v5 = vshll.u32 %v4594_v1, 16  ;;  %v4869_v6 = vsel %vm7794_vm2, %v4864_v60, %v4868_v44  ;;  %v9658_v29 = vsel %vm8263_vm13, %v5457_v4, %v5458_v33  ;;  %v9660_v0 = vpop.f32.mrf.mxu0 }
 0x197   : > { %v4904_v32 = vshll.u32 %v4595_v2, 16  ;;  %v4908_v25 = vshrl.u32 %v4595_v2, 16  ;;  %v4878_v36 = vrot.slane %v4877_v18, 4  ;;  %v6556_v20 = vrot.slane %v5324_v57, 9  ;;  %v7160_v16 = vpop.f32.mrf.mxu1 }
 0x198   : > { %v5464_v42 = vrot.slane %v5462_v9, 4  ;;  %v5465_v58 = vrot.slane %v4596_v23, 5  ;;  %v10452_v21 = vsel %vm7794_vm2, %v9561_v17, %v9506_v34  ;;  %v6585_v33 = vcombine.low %v9581_v50, %v9620_v62  ;;  %v9673_v4 = vpop.f32.mrf.mxu0 }
 0x199   : > { %v9668_v60 = vcombine.low %v10452_v21, %v4821_v14  ;;  %v4888_v2 = vrot.slane %v4887_v24, 4  ;;  %v4892_v44 = vrot.slane %v4890_v15, 5  ;;  %v9675_v1 = vcombine.low %v4835_v38, %v4845_v48  ;;  %v1937_v57 = vpop.f32.mrf.mxu1  ;;  %v5325_v15 = vld [vmem:[#allocation2 + $0xb4] sm:$0xe] }
 0x19a   : > { %v4897_v18 = vrot.slane %v4895_v27, 4  ;;  %v4900_v54 = vrot.slane %v4898_v5, 5  ;;  %v9679_v34 = vcombine.low %v4859_v8, %v4869_v6  ;;  %v9683_v14 = vrot.slane %v4904_v32, 5  ;;  %v9688_v38 = vpop.f32.mrf.mxu0  ;;  %v10454_v6 = vld [vmem:[#allocation9_spill] sm:$0xff] }
 0x19b   : > { %7447 = vmatmul.mubr.bf16.gmra.mxu1 %v9364_v63  ;;  %v4910_v24 = vrot.slane %v4908_v25, 4  ;;  %v4883_v48 = vsel %vm7794_vm2, %v4878_v36, %v9609_v11  ;;  %v9695_v8 = vsel %vm8263_vm13, %v6556_v20, %v5462_v9  ;;  %v9699_v27 = vsel %vm8263_vm13, %v5464_v42, %v5465_v58  ;;  %v10456_v25 = vld [vmem:[#allocation10_spill] sm:$0xff]  ;;  %v10458_v36 = vld [vmem:[#allocation3_spill] sm:$0xff]  ;;  %v10459_v42 = vld [vmem:[#allocation4_spill] sm:$0xff] }
 0x19c   : > { %7450 = vmatprep.mubr.bf16.mxu1 %v9488_v37  ;;  %v10453_v37 = vcombine.low %v9463_v56, %v9472_v35  ;;  %v4914_v5 = vshll.u32 %v4596_v23, 16  ;;  %v1930_v32 = vadd.f32 %v9606_v43, %v10454_v6  ;;  %v10455_v56 = vld [vmem:[#allocation6_spill] sm:$0xff]  ;;  %v1933_v21 = vadd.f32 %v7157_v61, %v10456_v25  ;;  %v9712_v23 = vpop.f32.mrf.mxu0  ;;  %v9714_v43 = vld [vmem:[#allocation2 + $0xbc] sm:$0x1] }
 0x19d   : > { %v1922_v35 = vadd.f32 %v1921_v46, %v10455_v56  ;;  %v10457_v11 = vcombine.low %v9527_v52, %v9531_v47  ;;  %v4893_v9 = vsel %vm7794_vm2, %v4888_v2, %v4892_v44  ;;  %v1925_v20 = vadd.f32 %v1924_v10, %v10458_v36  ;;  %v10460_v6 = vld [vmem:[#allocation11_spill] sm:$0xff]  ;;  %v10461_v56 = vld [vmem:[#allocation13_spill] sm:$0xff] }
 0x19e   : > { %7503 = vmatmul.mubr.bf16.gmra.mxu0 %v10453_v37  ;;  %v7161_v37 = vpop.f32.mrf.mxu1  ;;  %v1946_v58 = vadd.f32 %v7160_v16, %v10459_v42  ;;  %v4901_v17 = vor.u32 %v4900_v54, %v4897_v18  ;;  %v6557_v46 = vrot.slane %v5325_v15, 9  ;;  %v1938_v61 = vadd.f32 %v1937_v57, %v10460_v6  ;;  %v9721_v2 = vld [vmem:[#allocation2 + $0xb8] sm:$0xf]  ;;  %v9724_v16 = vpop.f32.mrf.mxu0  ;;  %v9779_v6 = vld [vmem:[#allocation2 + $0xc8] sm:$0x1] }
 0x19f   : > { %7506 = vmatprep.mubr.bf16.mxu0 %v10457_v11  ;;  %v1949_v25 = vadd.f32 %v7161_v37, %v10461_v56  ;;  %v4911_v47 = vor.u32 %v4910_v24, %v9683_v14  ;;  %v9726_v44 = vcombine.low %v4883_v48, %v4893_v9  ;;  %v4916_v18 = vrot.slane %v4914_v5, 5  ;;  %v4597_v37 = vld [vmem:[#allocation2 + $0xb4] sm:$0xf] }
 0x1a0   : > { %v1940_v63 = vpop.f32.mrf.mxu1  ;;  %v5469_v54 = vrot.slane %v9721_v2, 5  ;;  %v5472_v15 = vrot.slane %v9714_v43, 5  ;;  %v9732_v11 = vadd.f32 %v9457_v3, %v1930_v32  ;;  %v9735_v24 = vadd.f32 %v9474_v51, %v1922_v35  ;;  %v9742_v48 = vpop.f32.mrf.mxu0  ;;  %v9750_v51 = vld [vmem:[#allocation2 + $0xc4] sm:$0xf] }
 0x1a1   : > { %v1941_v10 = vadd.f32 %v1940_v63, %v9264_v22  ;;  %v9738_v22 = vadd.f32 %v9494_v12, %v1933_v21  ;;  %v4902_v5 = vrot.slane %v4901_v17, 4  ;;  %v9748_v9 = vadd.f32 %v9535_v49, %v1946_v58  ;;  %v10462_v17 = vld [vmem:[#allocation17_spill] sm:$0xff]  ;;  %v5326_v21 = vld [vmem:[#allocation2 + $0xc0] sm:$0xe] }
 0x1a2   : > { %v7164_v57 = vpop.f32.mrf.mxu1  ;;  %v4912_v32 = vrot.slane %v4911_v47, 4  ;;  %v9753_v12 = vadd.f32 %v9545_v53, %v1938_v61  ;;  %v4919_v49 = vshrl.u32 %v4597_v37, 16  ;;  %v5476_v36 = vrot.slane %v9750_v51, 5  ;;  %v4600_v53 = vld [vmem:[#allocation2 + $0xc0] sm:$0xf]  ;;  %v10465_v61 = vld [vmem:[#allocation19_spill] sm:$0xff] }
 0x1a3   : > { %7451 = vmatmul.mubr.bf16.gmra.mxu1 %v9496_v40  ;;  %v1962_v63 = vadd.f32 %v7164_v57, %v9289_v7  ;;  %v9745_v40 = vadd.f32 %v9511_v55, %v1925_v20  ;;  %v9756_v7 = vadd.f32 %v9559_v39, %v1949_v25  ;;  %v9765_v55 = vpop.f32.mrf.mxu0  ;;  %v10463_v20 = vld [vmem:[#allocation33_spill] sm:$0xff]  ;;  %v9776_v58 = vsel %vm8263_vm13, %v6557_v46, %v5469_v54 }
 0x1a4   : > { %7454 = vmatprep.mubr.bf16.mxu1 %v9502_v59  ;;  %v1953_v3 = vpop.f32.mrf.mxu1  ;;  %v9759_v59 = vadd.f32 %v9577_v41, %v1941_v10  ;;  %v10464_v41 = vcombine.low %v9632_v13, %v9642_v28  ;;  %v5471_v50 = vrot.slane %v5469_v54, 4  ;;  %v4922_v62 = vshll.u32 %v4597_v37, 16  ;;  %v10466_v28 = vld [vmem:[#allocation35_spill] sm:$0xff] }
 0x1a5   : > { %v1954_v35 = vadd.f32 %v1953_v3, %v10462_v17  ;;  %v9769_v42 = vadd.f32 %v10463_v20, %v1962_v63  ;;  %v9782_v25 = vpop.f32.mrf.mxu0  ;;  %v4907_v47 = vsel %vm7794_vm2, %v4902_v5, %v9683_v14  ;;  %v4932_v13 = vshrl.u32 %v9721_v2, 16  ;;  %v10467_v3 = vld [vmem:[#allocation21_spill] sm:$0xff]  ;;  %v10468_v14 = vld [vmem:[#allocation36_spill] sm:$0xff] }
 0x1a6   : > { %7507 = vmatmul.mubr.bf16.gmra.mxu0 %v6585_v33  ;;  %v7165_v39 = vpop.f32.mrf.mxu1  ;;  %v4928_v33 = vshll.u32 %v9721_v2, 16  ;;  %v4917_v54 = vsel %vm7794_vm2, %v4912_v32, %v4916_v18  ;;  %v6558_v57 = vrot.slane %v5326_v21, 9  ;;  %v4943_v37 = vshrl.u32 %v4600_v53, 16  ;;  %v10471_v21 = vld [vmem:[#allocation23_spill] sm:$0xff] }
 0x1a7   : > { %7510 = vmatprep.mubr.bf16.mxu0 %v10464_v41  ;;  %v1965_v56 = vadd.f32 %v7165_v39, %v10465_v61  ;;  %v9789_v10 = vadd.f32 %v10466_v28, %v1954_v35  ;;  %v4946_v63 = vshll.u32 %v4600_v53, 16  ;;  %v9794_v20 = vpop.f32.mrf.mxu0  ;;  %v5478_v39 = vrot.slane %v5476_v36, 4  ;;  %v10470_v35 = vld [vmem:[#allocation31_spill] sm:$0xff] }
 0x1a8   : > { %v1956_v46 = vpop.f32.mrf.mxu1  ;;  %v5479_v41 = vrot.slane %v9779_v6, 5  ;;  %v4921_v61 = vrot.slane %v4919_v49, 4  ;;  %v4924_v28 = vrot.slane %v4922_v62, 5  ;;  %v4952_v18 = vshll.u32 %v9750_v51, 16 }
 0x1a9   : > { %v1957_v17 = vadd.f32 %v1956_v46, %v10467_v3  ;;  %v9798_v5 = vadd.f32 %v10468_v14, %v1965_v56  ;;  %v4956_v32 = vshrl.u32 %v9750_v51, 16  ;;  %v9805_v46 = vpop.f32.mrf.mxu0  ;;  %v9807_v3 = vcombine.low %v4907_v47, %v4917_v54 }
 0x1aa   : > { %v7168_v2 = vpop.f32.mrf.mxu1  ;;  %v5473_v56 = vsel %vm8263_vm13, %v5471_v50, %v5472_v15  ;;  %v9814_v62 = vrot.slane %v4928_v33, 5  ;;  %v4945_v52 = vrot.slane %v4943_v37, 4  ;;  %v4948_v51 = vrot.slane %v4946_v63, 5  ;;  %v4604_v50 = vld [vmem:[#allocation2 + $0xd0] sm:$0xf] }
 0x1ab   : > { %10469 = vst [vmem:[#allocation9_spill] sm:$0xff] %v9798_v5  ;;  %7455 = vmatmul.mubr.bf16.gmra.mxu1 %v10470_v35  ;;  %v1978_v53 = vadd.f32 %v7168_v2, %v10471_v21  ;;  %v9812_v14 = vadd.f32 %v9625_v19, %v1957_v17  ;;  %v4934_v35 = vrot.slane %v4932_v13, 4  ;;  %v10472_v5 = vld [vmem:[#allocation24_spill] sm:$0xff]  ;;  %v9820_v47 = vpop.f32.mrf.mxu0  ;;  %v5477_v15 = vsel %vm8263_vm13, %v6558_v57, %v5476_v36  ;;  %v9826_v33 = vld [vmem:[#allocation2 + $0xd4] sm:$0x1] }
 0x1ac   : > { %7458 = vmatprep.mubr.bf16.mxu1 %v9668_v60  ;;  %v1969_v49 = vpop.f32.mrf.mxu1  ;;  %v10473_v60 = vcombine.low %v9652_v45, %v9658_v29  ;;  %v5480_v19 = vsel %vm8263_vm13, %v5478_v39, %v5479_v41  ;;  %v10474_v37 = vcombine.low %v9695_v8, %v9699_v27  ;;  %v6589_v45 = vcombine.low %v9776_v58, %v5473_v56  ;;  %v5327_v36 = vld [vmem:[#allocation2 + $0xcc] sm:$0xe]  ;;  %v10475_v17 = vld [vmem:[#allocation26_spill] sm:$0xff]  ;;  %v10476_v56 = vld [vmem:[#allocation27_spill] sm:$0xff] }
 0x1ad   : > { %v1970_v2 = vadd.f32 %v1969_v49, %v10472_v5  ;;  %v9829_v13 = vadd.f32 %v9645_v31, %v1978_v53  ;;  %v9835_v29 = vrot.slane %v4952_v18, 5  ;;  %v4958_v63 = vrot.slane %v4956_v32, 4  ;;  %v4603_v21 = vld [vmem:[#allocation2 + $0xcc] sm:$0xf] }
 0x1ae   : > { %7511 = vmatmul.mubr.bf16.gmra.mxu0 %v10473_v60  ;;  %v7169_v54 = vpop.f32.mrf.mxu1  ;;  %v5483_v57 = vrot.slane %v4604_v50, 5  ;;  %v9838_v41 = vpop.f32.mrf.mxu0  ;;  %v4925_v5 = vor.u32 %v4924_v28, %v4921_v61  ;;  %v4938_v31 = vshll.u32 %v9714_v43, 16  ;;  %v4935_v27 = vor.u32 %v4934_v35, %v9814_v62 }
 0x1af   : > { %7514 = vmatprep.mubr.bf16.mxu0 %v10474_v37  ;;  %v1981_v39 = vadd.f32 %v7169_v54, %v10475_v17  ;;  %v9842_v53 = vadd.f32 %v9660_v0, %v1970_v2  ;;  %v6590_v58 = vcombine.low %v5477_v15, %v5480_v19  ;;  %v4949_v18 = vor.u32 %v4948_v51, %v4945_v52  ;;  %v10477_v51 = vld [vmem:[#allocation5_spill] sm:$0xff] }
 0x1b0   : > { %v1972_v8 = vpop.f32.mrf.mxu1  ;;  %v4962_v32 = vshll.u32 %v9779_v6, 16  ;;  %v9847_v60 = vpop.f32.mrf.mxu0  ;;  %v6559_v54 = vrot.slane %v5327_v36, 9  ;;  %v5486_v61 = vrot.slane %v9826_v33, 5  ;;  %v4959_v0 = vor.u32 %v4958_v63, %v9835_v29  ;;  %v10478_v63 = vld [vmem:[#allocation12_spill] sm:$0xff] }
 0x1b1   : > { %v1973_v49 = vadd.f32 %v1972_v8, %v10476_v56  ;;  %v9851_v43 = vadd.f32 %v9673_v4, %v1981_v39  ;;  %v5485_v35 = vrot.slane %v5483_v57, 4  ;;  %v4967_v2 = vshrl.u32 %v4603_v21, 16 }
 0x1b2   : > { %v7172_v28 = vpop.f32.mrf.mxu1  ;;  %v4970_v52 = vshll.u32 %v4603_v21, 16  ;;  %v9857_v15 = vpop.f32.mrf.mxu0  ;;  %v4976_v19 = vshll.u32 %v4604_v50, 16  ;;  %v4980_v37 = vshrl.u32 %v4604_v50, 16  ;;  %v4926_v17 = vrot.slane %v4925_v5, 4 }
 0x1b3   : > { %7459 = vmatmul.mubr.bf16.gmra.mxu1 %v9675_v1  ;;  %v1994_v6 = vadd.f32 %v7172_v28, %v10477_v51  ;;  %v9860_v36 = vadd.f32 %v9688_v38, %v1973_v49  ;;  %v4936_v39 = vrot.slane %v4935_v27, 4  ;;  %v4940_v1 = vrot.slane %v4938_v31, 5 }
 0x1b4   : > { %7462 = vmatprep.mubr.bf16.mxu1 %v9679_v34  ;;  %v1985_v4 = vpop.f32.mrf.mxu1  ;;  %v4950_v8 = vrot.slane %v4949_v18, 4  ;;  %v9863_v21 = vpop.f32.mrf.mxu0  ;;  %v4964_v28 = vrot.slane %v4962_v32, 5  ;;  %v5484_v34 = vsel %vm8263_vm13, %v6559_v54, %v5483_v57  ;;  %v4960_v38 = vrot.slane %v4959_v0, 4  ;;  %v10479_v18 = vld [vmem:[#allocation14_spill] sm:$0xff] }
 0x1b5   : > { %v1986_v56 = vadd.f32 %v1985_v4, %v10478_v63  ;;  %v9868_v51 = vadd.f32 %v9712_v23, %v1994_v6  ;;  %v5487_v5 = vsel %vm8263_vm13, %v5485_v35, %v5486_v61  ;;  %v4969_v31 = vrot.slane %v4967_v2, 4  ;;  %v10480_v23 = vld [vmem:[#allocation15_spill] sm:$0xff]  ;;  %v10481_v6 = vld [vmem:[#allocation16_spill] sm:$0xff] }
 0x1b6   : > { %7515 = vmatmul.mubr.bf16.gmra.mxu0 %v6589_v45  ;;  %v7173_v50 = vpop.f32.mrf.mxu1  ;;  %v4972_v27 = vrot.slane %v4970_v52, 5  ;;  %v4978_v4 = vrot.slane %v4976_v19, 5  ;;  %v4982_v32 = vrot.slane %v4980_v37, 4  ;;  %v6591_v30 = vcombine.low %v5484_v34, %v5487_v5 }
 0x1b7   : > { %7518 = vmatprep.mubr.bf16.mxu0 %v6590_v58  ;;  %v1997_v49 = vadd.f32 %v7173_v50, %v10479_v18  ;;  %v9873_v45 = vpop.f32.mrf.mxu0  ;;  %v9876_v63 = vadd.f32 %v9724_v16, %v1986_v56  ;;  %v4931_v58 = vsel %vm7794_vm2, %v4926_v17, %v9814_v62  ;;  %v4941_v16 = vsel %vm7794_vm2, %v4936_v39, %v4940_v1  ;;  %v10482_v1 = vld [vmem:[#allocation18_spill] sm:$0xff] }
 0x1b8   : > { %v1988_v57 = vpop.f32.mrf.mxu1  ;;  %v4955_v2 = vsel %vm7794_vm2, %v4950_v8, %v9835_v29  ;;  %v4965_v52 = vsel %vm7794_vm2, %v4960_v38, %v4964_v28  ;;  %v4986_v62 = vshll.u32 %v9826_v33, 16  ;;  %v4983_v37 = vor.u32 %v4982_v32, %v4978_v4  ;;  %v10483_v38 = vld [vmem:[#allocation20_spill] sm:$0xff] }
 0x1b9   : > { %v1989_v54 = vadd.f32 %v1988_v57, %v10480_v23  ;;  %v9882_v61 = vpop.f32.mrf.mxu0  ;;  %v9885_v0 = vadd.f32 %v9742_v48, %v1997_v49  ;;  %v4973_v48 = vor.u32 %v4972_v27, %v4969_v31  ;;  %v6533_v33 = vcombine.low %v4931_v58, %v4941_v16  ;;  %v10484_v49 = vld [vmem:[#allocation22_spill] sm:$0xff] }
 0x1ba   : > { %v7176_v35 = vpop.f32.mrf.mxu1  ;;  %v6534_v34 = vcombine.low %v4955_v2, %v4965_v52  ;;  %v4988_v50 = vrot.slane %v4986_v62, 5  ;;  %v4984_v31 = vrot.slane %v4983_v37, 4  ;;  %v10486_v52 = vld [vmem:[#allocation28_spill] sm:$0xff]  ;;  %v10487_v37 = vld [vmem:[#allocation29_spill] sm:$0xff] }
 0x1bb   : > { %7463 = vmatmul.mubr.bf16.gmra.mxu1 %v9726_v44  ;;  %v2010_v19 = vadd.f32 %v7176_v35, %v10481_v6  ;;  %v7233_v17 = vpop.f32.mrf.mxu0  ;;  %v9899_v44 = vadd.f32 %v9765_v55, %v1989_v54  ;;  %v4974_v5 = vrot.slane %v4973_v48, 4  ;;  %v10485_v54 = vld [vmem:[#allocation25_spill] sm:$0xff] }
 0x1bc   : > { %7466 = vmatprep.mubr.bf16.mxu1 %v9807_v3  ;;  %v2001_v39 = vpop.f32.mrf.mxu1  ;;  %v4989_v35 = vsel %vm7794_vm2, %v4984_v31, %v4988_v50  ;;  %v10489_v50 = vld [vmem:[#allocation32_spill] sm:$0xff]  ;;  %v10490_v31 = vld [vmem:[#allocation7_spill] sm:$0xff] }
 0x1bd   : > { %v2002_v56 = vadd.f32 %v2001_v39, %v10482_v1  ;;  %v2489_v29 = vpop.f32.mrf.mxu0  ;;  %v9903_v8 = vadd.f32 %v9782_v25, %v2010_v19 }
 0x1be   : > { %7519 = vmatmul.mubr.bf16.gmra.mxu0 %v6591_v30  ;;  %v7177_v28 = vpop.f32.mrf.mxu1  ;;  %v4979_v30 = vsel %vm7794_vm2, %v4974_v5, %v4978_v4 }
 0x1bf   : > { %v2013_v3 = vadd.f32 %v7177_v28, %v10483_v38  ;;  %v7300_v27 = vpop.f32.mrf.mxu0  ;;  %v9907_v55 = vadd.f32 %v9794_v20, %v2002_v56  ;;  %v6535_v48 = vcombine.low %v4979_v30, %v4989_v35  ;;  %v10488_v56 = vld [vmem:[#allocation30_spill] sm:$0xff] }
 0x1c0   : > { %v2004_v18 = vpop.f32.mrf.mxu1  ;;  %v10492_v35 = vld [vmem:[#allocation34_spill] sm:$0xff] }
 0x1c1   : > { %v2005_v32 = vadd.f32 %v2004_v18, %v10484_v49  ;;  %v3514_v57 = vpop.f32.mrf.mxu0  ;;  %v9911_v23 = vadd.f32 %v9805_v46, %v2013_v3 }
 0x1c3   : > { %v7180_v25 = vpop.f32.mrf.mxu1  ;;  %7467 = vmatmul.mubr.bf16.gmra.mxu1 %v6533_v33  ;;  %v7301_v20 = vpop.f32.mrf.mxu0  ;;  %v9919_v16 = vadd.f32 %v9820_v47, %v2005_v32 }
 0x1c4   : > { %v2026_v58 = vadd.f32 %v7180_v25, %v10485_v54  ;;  %7470 = vmatprep.mubr.bf16.mxu1 %v6534_v34  ;;  %v10491_v25 = vld [vmem:[#allocation8_spill] sm:$0xff] }
 0x1c5   : > { %v2017_v2 = vpop.f32.mrf.mxu1  ;;  %v3517_v46 = vpop.f32.mrf.mxu0 }
 0x1c6   : > { %v2018_v62 = vadd.f32 %v2017_v2, %v10486_v52  ;;  %v9923_v6 = vadd.f32 %v9838_v41, %v2026_v58 }
 0x1c7   : > { %v7181_v19 = vpop.f32.mrf.mxu1  ;;  %v7304_v1 = vpop.f32.mrf.mxu0 }
 0x1c8   : > { %v2029_v39 = vadd.f32 %v7181_v19, %v10487_v37  ;;  %v9927_v4 = vadd.f32 %v9847_v60, %v2018_v62 }
 0x1c9   : > { %v2020_v26 = vpop.f32.mrf.mxu1  ;;  %v3530_v47 = vpop.f32.mrf.mxu0 }
 0x1ca   : > { %v2021_v28 = vadd.f32 %v2020_v26, %v10488_v56  ;;  %v9931_v33 = vadd.f32 %v9857_v15, %v2029_v39 }
 0x1cb   : > { %v7184_v34 = vpop.f32.mrf.mxu1  ;;  %7471 = vmatmul.mubr.bf16.gmra.mxu1 %v6535_v48  ;;  %v7305_v38 = vpop.f32.mrf.mxu0 }
 0x1cc   : > { %v2042_v41 = vadd.f32 %v7184_v34, %v10489_v50  ;;  %v9935_v3 = vadd.f32 %v9863_v21, %v2021_v28 }
 0x1cd   : > { %v2033_v5 = vpop.f32.mrf.mxu1  ;;  %v3533_v60 = vpop.f32.mrf.mxu0 }
 0x1ce   : > { %v2034_v18 = vadd.f32 %v2033_v5, %v10490_v31  ;;  %v9939_v49 = vadd.f32 %v9873_v45, %v2042_v41 }
 0x1cf   : > { %v7185_v32 = vpop.f32.mrf.mxu1  ;;  %v7308_v15 = vpop.f32.mrf.mxu0 }
 0x1d0   : > { %v2045_v54 = vadd.f32 %v7185_v32, %v10491_v25  ;;  %v9943_v58 = vadd.f32 %v9882_v61, %v2034_v18 }
 0x1d1   : > { %v2036_v30 = vpop.f32.mrf.mxu1  ;;  %v3546_v52 = vpop.f32.mrf.mxu0 }
 0x1d2   : > { %v2037_v2 = vadd.f32 %v2036_v30, %v10492_v35  ;;  %v9946_v21 = vadd.f32 %v7233_v17, %v2045_v54 }
 0x1d3   : > { %v7252_v62 = vpop.f32.mrf.mxu1  ;;  %v7309_v48 = vpop.f32.mrf.mxu0 }
 0x1d4   : > { %v2889_v19 = vadd.f32 %v7252_v62, %v9732_v11  ;;  %v9949_v37 = vadd.f32 %v2489_v29, %v2037_v2 }
 0x1d5   : > { %v2760_v45 = vpop.f32.mrf.mxu1  ;;  %v3549_v26 = vpop.f32.mrf.mxu0 }
 0x1d6   : > { %v2887_v39 = vadd.f32 %v2760_v45, %v9735_v24  ;;  %v9952_v56 = vadd.f32 %v7300_v27, %v2889_v19 }
 0x1d7   : > { %v7253_v61 = vpop.f32.mrf.mxu1  ;;  %v7312_v34 = vpop.f32.mrf.mxu0 }
 0x1d8   : > { %v2890_v28 = vadd.f32 %v7253_v61, %v9738_v22  ;;  %v9955_v50 = vadd.f32 %v3514_v57, %v2887_v39  ;;  %v10493_v61 = vld [vmem:[#allocation9_spill] sm:$0xff] }
 0x1d9   : > { %v2763_v17 = vpop.f32.mrf.mxu1  ;;  %v3562_v5 = vpop.f32.mrf.mxu0 }
 0x1da   : > { %v2888_v41 = vadd.f32 %v2763_v17, %v9745_v40  ;;  %v9958_v11 = vadd.f32 %v7301_v20, %v2890_v28 }
 0x1db   : > { %v7256_v29 = vpop.f32.mrf.mxu1  ;;  %v7313_v18 = vpop.f32.mrf.mxu0 }
 0x1dc   : > { %v2893_v31 = vadd.f32 %v7256_v29, %v9748_v9  ;;  %v9961_v24 = vadd.f32 %v3517_v46, %v2888_v41 }
 0x1dd   : > { %v2776_v27 = vpop.f32.mrf.mxu1  ;;  %v3565_v25 = vpop.f32.mrf.mxu0 }
 0x1de   : > { %v2891_v32 = vadd.f32 %v2776_v27, %v9753_v12  ;;  %v9964_v22 = vadd.f32 %v7304_v1, %v2893_v31 }
 0x1df   : > { %v7257_v57 = vpop.f32.mrf.mxu1  ;;  %v7316_v30 = vpop.f32.mrf.mxu0 }
 0x1e0   : > { %v2894_v54 = vadd.f32 %v7257_v57, %v9756_v7  ;;  %v9967_v40 = vadd.f32 %v3530_v47, %v2891_v32 }
 0x1e1   : > { %v2779_v20 = vpop.f32.mrf.mxu1  ;;  %v3578_v2 = vpop.f32.mrf.mxu0 }
 0x1e2   : > { %v2892_v35 = vadd.f32 %v2779_v20, %v9759_v59  ;;  %v9970_v9 = vadd.f32 %v7305_v38, %v2894_v54 }
 0x1e3   : > { %v7260_v46 = vpop.f32.mrf.mxu1  ;;  %v7317_v19 = vpop.f32.mrf.mxu0 }
 0x1e4   : > { %v2897_v62 = vadd.f32 %v7260_v46, %v9769_v42  ;;  %v9973_v12 = vadd.f32 %v3533_v60, %v2892_v35 }
 0x1e5   : > { %v2792_v1 = vpop.f32.mrf.mxu1  ;;  %v3581_v39 = vpop.f32.mrf.mxu0 }
 0x1e6   : > { %v2895_v45 = vadd.f32 %v2792_v1, %v9789_v10  ;;  %v9976_v7 = vadd.f32 %v7308_v15, %v2897_v62 }
 0x1e7   : > { %v7261_v47 = vpop.f32.mrf.mxu1  ;;  %v7320_v17 = vpop.f32.mrf.mxu0 }
 0x1e8   : > { %v2898_v28 = vadd.f32 %v7261_v47, %v10493_v61  ;;  %v9979_v59 = vadd.f32 %v3546_v52, %v2895_v45 }
 0x1e9   : > { %v2795_v38 = vpop.f32.mrf.mxu1  ;;  %v3594_v29 = vpop.f32.mrf.mxu0 }
 0x1ea   : > { %v2896_v41 = vadd.f32 %v2795_v38, %v9812_v14  ;;  %v9982_v42 = vadd.f32 %v7309_v48, %v2898_v28 }
 0x1eb   : > { %v7264_v60 = vpop.f32.mrf.mxu1  ;;  %v7321_v27 = vpop.f32.mrf.mxu0 }
 0x1ec   : > { %v2901_v31 = vadd.f32 %v7264_v60, %v9829_v13  ;;  %v9985_v10 = vadd.f32 %v3549_v26, %v2896_v41 }
 0x1ed   : > { %v2808_v15 = vpop.f32.mrf.mxu1  ;;  %v3597_v57 = vpop.f32.mrf.mxu0 }
 0x1ee   : > { %v2899_v32 = vadd.f32 %v2808_v15, %v9842_v53  ;;  %v9988_v54 = vadd.f32 %v7312_v34, %v2901_v31 }
 0x1ef   : > { %v7265_v52 = vpop.f32.mrf.mxu1  ;;  %v7324_v35 = vpop.f32.mrf.mxu0 }
 0x1f0   : > { %v2902_v20 = vadd.f32 %v7265_v52, %v9851_v43  ;;  %v9991_v14 = vadd.f32 %v3562_v5, %v2899_v32 }
 0x1f1   : > { %v2811_v48 = vpop.f32.mrf.mxu1  ;;  %v3610_v62 = vpop.f32.mrf.mxu0 }
 0x1f2   : > { %v2900_v46 = vadd.f32 %v2811_v48, %v9860_v36  ;;  %v9994_v13 = vadd.f32 %v7313_v18, %v2902_v20 }
 0x1f3   : > { %v7268_v26 = vpop.f32.mrf.mxu1  ;;  %v7325_v47 = vpop.f32.mrf.mxu0 }
 0x1f4   : > { %v2905_v1 = vadd.f32 %v7268_v26, %v9868_v51  ;;  %v9997_v45 = vadd.f32 %v3565_v25, %v2900_v46 }
 0x1f5   : > { %v2824_v53 = vpop.f32.mrf.mxu1  ;;  %v3613_v38 = vpop.f32.mrf.mxu0 }
 0x1f6   : > { %v2903_v34 = vadd.f32 %v2824_v53, %v9876_v63  ;;  %v10000_v61 = vadd.f32 %v7316_v30, %v2905_v1 }
 0x1f7   : > { %v7269_v43 = vpop.f32.mrf.mxu1 }
 0x1f8   : > { %v2906_v5 = vadd.f32 %v7269_v43, %v9885_v0  ;;  %v10003_v28 = vadd.f32 %v3578_v2, %v2903_v34 }
 0x1f9   : > { %v2827_v36 = vpop.f32.mrf.mxu1 }
 0x1fa   : > { %v2904_v18 = vadd.f32 %v2827_v36, %v9899_v44  ;;  %v10006_v41 = vadd.f32 %v7317_v19, %v2906_v5 }
 0x1fb   : > { %v7272_v51 = vpop.f32.mrf.mxu1 }
 0x1fc   : > { %v2909_v25 = vadd.f32 %v7272_v51, %v9903_v8  ;;  %v10009_v60 = vadd.f32 %v3581_v39, %v2904_v18 }
 0x1fd   : > { %v2840_v63 = vpop.f32.mrf.mxu1  ;;  %v7328_v31 = vpop.f32.mrf.mxu0 }
 0x1fe   : > { %v2907_v30 = vadd.f32 %v2840_v63, %v9907_v55  ;;  %v10012_v15 = vadd.f32 %v7320_v17, %v2909_v25 }
 0x1ff   : > { %v7273_v0 = vpop.f32.mrf.mxu1  ;;  %v3626_v32 = vpop.f32.mrf.mxu0 }
 0x200   : > { %v2910_v2 = vadd.f32 %v7273_v0, %v9911_v23  ;;  %v10015_v52 = vadd.f32 %v3594_v29, %v2907_v30 }
 0x201   : > { %v2843_v44 = vpop.f32.mrf.mxu1  ;;  %v7329_v20 = vpop.f32.mrf.mxu0 }
 0x202   : > { %10494 = vst [vmem:[#allocation6_spill] sm:$0xff] %v10015_v52  ;;  %v2908_v19 = vadd.f32 %v2843_v44, %v9919_v16  ;;  %v10018_v48 = vadd.f32 %v7321_v27, %v2910_v2 }
 0x203   : > { %v7276_v8 = vpop.f32.mrf.mxu1  ;;  %v3629_v46 = vpop.f32.mrf.mxu0 }
 0x204   : > { %10495 = vst [vmem:[#allocation10_spill] sm:$0xff] %v10018_v48  ;;  %v2913_v39 = vadd.f32 %v7276_v8, %v9923_v6  ;;  %v10021_v55 = vadd.f32 %v3597_v57, %v2908_v19 }
 0x205   : > { %v2856_v17 = vpop.f32.mrf.mxu1  ;;  %v7396_v1 = vpop.f32.mrf.mxu0 }
 0x206   : > { %10496 = vst [vmem:[#allocation3_spill] sm:$0xff] %v10021_v55  ;;  %v2911_v26 = vadd.f32 %v2856_v17, %v9927_v4  ;;  %v10024_v23 = vadd.f32 %v7324_v35, %v2913_v39 }
 0x207   : > { %v7277_v29 = vpop.f32.mrf.mxu1  ;;  %v4399_v34 = vpop.f32.mrf.mxu0 }
 0x208   : > { %v2914_v53 = vadd.f32 %v7277_v29, %v9931_v33  ;;  %v10027_v16 = vadd.f32 %v3610_v62, %v2911_v26 }
 0x209   : > { %v2859_v27 = vpop.f32.mrf.mxu1  ;;  %v10030_v5 = vpop.f32.mrf.mxu0 }
 0x20a   : > { %10497 = vst [vmem:[#allocation4_spill] sm:$0xff] %v10027_v16  ;;  %v2912_v43 = vadd.f32 %v2859_v27, %v9935_v3  ;;  %v10032_v6 = vadd.f32 %v7325_v47, %v2914_v53 }
 0x20b   : > { %v7280_v57 = vpop.f32.mrf.mxu1  ;;  %v10035_v4 = vpop.f32.mrf.mxu0 }
 0x20c   : > { %10498 = vst [vmem:[#allocation11_spill] sm:$0xff] %v10032_v6  ;;  %v2917_v36 = vadd.f32 %v7280_v57, %v9939_v49  ;;  %v10037_v35 = vadd.f32 %v3613_v38, %v2912_v43 }
 0x20d   : > { %v2872_v18 = vpop.f32.mrf.mxu1  ;;  %v7400_v51 = vpop.f32.mrf.mxu0 }
 0x20e   : > { %10499 = vst [vmem:[#allocation13_spill] sm:$0xff] %v10037_v35  ;;  %v2915_v33 = vadd.f32 %v2872_v18, %v9943_v58  ;;  %v10040_v62 = vadd.f32 %v7328_v31, %v2917_v36 }
 0x20f   : > { %v7281_v25 = vpop.f32.mrf.mxu1  ;;  %v10043_v63 = vpop.f32.mrf.mxu0 }
 0x210   : > { %v2918_v3 = vadd.f32 %v7281_v25, %v9946_v21  ;;  %v10045_v47 = vadd.f32 %v3626_v32, %v2915_v33 }
 0x211   : > { %v2875_v30 = vpop.f32.mrf.mxu1  ;;  %v10048_v0 = vpop.f32.mrf.mxu0 }
 0x212   : > { %10500 = vst [vmem:[#allocation17_spill] sm:$0xff] %v10045_v47  ;;  %v2916_v49 = vadd.f32 %v2875_v30, %v9949_v37  ;;  %v10050_v38 = vadd.f32 %v7329_v20, %v2918_v3 }
 0x213   : > { %v7348_v2 = vpop.f32.mrf.mxu1  ;;  %v10053_v44 = vpop.f32.mrf.mxu0 }
 0x214   : > { %10501 = vst [vmem:[#allocation33_spill] sm:$0xff] %v10050_v38  ;;  %v4141_v58 = vadd.f32 %v7348_v2, %v9952_v56  ;;  %v10055_v31 = vadd.f32 %v3629_v46, %v2916_v49 }
 0x215   : > { %v4012_v19 = vpop.f32.mrf.mxu1  ;;  %v7404_v8 = vpop.f32.mrf.mxu0 }
 0x216   : > { %10502 = vst [vmem:[#allocation19_spill] sm:$0xff] %v10055_v31  ;;  %v4139_v21 = vadd.f32 %v4012_v19, %v9955_v50  ;;  %v10058_v32 = vadd.f32 %v7396_v1, %v4141_v58 }
 0x217   : > { %v10060_v39 = vpop.f32.mrf.mxu1  ;;  %v10062_v37 = vpop.f32.mrf.mxu0 }
 0x218   : > { %v10064_v17 = vadd.f32 %v4399_v34, %v4139_v21 }
 0x219   : > { %v10066_v20 = vpop.f32.mrf.mxu1  ;;  %v10068_v26 = vpop.f32.mrf.mxu0 }
 0x21b   : > { %v7352_v56 = vpop.f32.mrf.mxu1  ;;  %v10071_v29 = vpop.f32.mrf.mxu0 }
 0x21c   : > { %v4145_v46 = vadd.f32 %v7352_v56, %v9964_v22 }
 0x21d   : > { %v10073_v53 = vpop.f32.mrf.mxu1  ;;  %v7408_v50 = vpop.f32.mrf.mxu0 }
 0x21e   : > { %v10075_v1 = vadd.f32 %v7400_v51, %v4145_v46 }
 0x21f   : > { %v10077_v27 = vpop.f32.mrf.mxu1  ;;  %v10079_v43 = vpop.f32.mrf.mxu0 }
 0x221   : > { %v10081_v34 = vpop.f32.mrf.mxu1  ;;  %v10083_v57 = vpop.f32.mrf.mxu0 }
 0x223   : > { %v7356_v36 = vpop.f32.mrf.mxu1  ;;  %v10086_v33 = vpop.f32.mrf.mxu0 }
 0x224   : > { %v4149_v18 = vadd.f32 %v7356_v36, %v9976_v7 }
 0x225   : > { %v10088_v22 = vpop.f32.mrf.mxu1  ;;  %v7412_v25 = vpop.f32.mrf.mxu0 }
 0x226   : > { %v10090_v3 = vadd.f32 %v7404_v8, %v4149_v18 }
 0x227   : > { %v10092_v51 = vpop.f32.mrf.mxu1  ;;  %v10094_v30 = vpop.f32.mrf.mxu0 }
 0x229   : > { %v10096_v49 = vpop.f32.mrf.mxu1  ;;  %v10098_v2 = vpop.f32.mrf.mxu0 }
 0x22a   : > { %10503 = vst [vmem:[#allocation35_spill] sm:$0xff] %v10098_v2 }
 0x22b   : > { %v7360_v58 = vpop.f32.mrf.mxu1  ;;  %v10101_v21 = vpop.f32.mrf.mxu0 }
 0x22c   : > { %v4153_v19 = vadd.f32 %v7360_v58, %v9988_v54  ;;  %10504 = vst [vmem:[#allocation21_spill] sm:$0xff] %v10101_v21 }
 0x22d   : > { %v10103_v7 = vpop.f32.mrf.mxu1  ;;  %v7416_v56 = vpop.f32.mrf.mxu0 }
 0x22e   : > { %v10105_v46 = vadd.f32 %v7408_v50, %v4153_v19 }
 0x22f   : > { %v10107_v8 = vpop.f32.mrf.mxu1  ;;  %v10109_v36 = vpop.f32.mrf.mxu0 }
 0x230   : > { %10505 = vst [vmem:[#allocation36_spill] sm:$0xff] %v10109_v36 }
 0x231   : > { %v10111_v18 = vpop.f32.mrf.mxu1  ;;  %v10113_v31 = vpop.f32.mrf.mxu0 }
 0x232   : > { %10506 = vst [vmem:[#allocation31_spill] sm:$0xff] %v10113_v31 }
 0x233   : > { %v7364_v38 = vpop.f32.mrf.mxu1  ;;  %v10116_v35 = vpop.f32.mrf.mxu0 }
 0x234   : > { %v4157_v47 = vadd.f32 %v7364_v38, %v10000_v61  ;;  %10507 = vst [vmem:[#allocation23_spill] sm:$0xff] %v10116_v35 }
 0x235   : > { %v10118_v54 = vpop.f32.mrf.mxu1  ;;  %v7420_v58 = vpop.f32.mrf.mxu0 }
 0x236   : > { %v10120_v6 = vadd.f32 %v7412_v25, %v4157_v47 }
 0x237   : > { %v10122_v50 = vpop.f32.mrf.mxu1  ;;  %v10124_v19 = vpop.f32.mrf.mxu0 }
 0x238   : > { %10508 = vst [vmem:[#allocation24_spill] sm:$0xff] %v10120_v6  ;;  %10509 = vst [vmem:[#allocation26_spill] sm:$0xff] %v10124_v19 }
 0x239   : > { %v10126_v16 = vpop.f32.mrf.mxu1  ;;  %v10128_v36 = vpop.f32.mrf.mxu0 }
 0x23a   : > { %10510 = vst [vmem:[#allocation27_spill] sm:$0xff] %v10128_v36 }
 0x23b   : > { %v7368_v55 = vpop.f32.mrf.mxu1  ;;  %v10131_v21 = vpop.f32.mrf.mxu0 }
 0x23c   : > { %v4161_v31 = vadd.f32 %v7368_v55, %v10012_v15  ;;  %10511 = vst [vmem:[#allocation5_spill] sm:$0xff] %v10131_v21 }
 0x23d   : > { %v10133_v61 = vpop.f32.mrf.mxu1  ;;  %v7424_v38 = vpop.f32.mrf.mxu0 }
 0x23e   : > { %10512 = vst [vmem:[#allocation12_spill] sm:$0xff] %v10133_v61  ;;  %v10135_v35 = vadd.f32 %v7416_v56, %v4161_v31 }
 0x23f   : > { %v10137_v47 = vpop.f32.mrf.mxu1  ;;  %v10139_v25 = vpop.f32.mrf.mxu0 }
 0x240   : > { %10513 = vst [vmem:[#allocation14_spill] sm:$0xff] %v10135_v35  ;;  %10514 = vst [vmem:[#allocation15_spill] sm:$0xff] %v10137_v47 }
 0x241   : > { %10515 = vst [vmem:[#allocation16_spill] sm:$0xff] %v10139_v25  ;;  %v10141_v48 = vpop.f32.mrf.mxu1  ;;  %v10143_v19 = vpop.f32.mrf.mxu0 }
 0x242   : > { %10516 = vst [vmem:[#allocation18_spill] sm:$0xff] %v10141_v48  ;;  %10517 = vst [vmem:[#allocation20_spill] sm:$0xff] %v10143_v19 }
 0x243   : > { %v7372_v52 = vpop.f32.mrf.mxu1  ;;  %v10146_v6 = vpop.f32.mrf.mxu0 }
 0x244   : > { %v4165_v36 = vadd.f32 %v7372_v52, %v10024_v23  ;;  %10518 = vst [vmem:[#allocation22_spill] sm:$0xff] %v10146_v6 }
 0x245   : > { %v10148_v15 = vpop.f32.mrf.mxu1  ;;  %v7492_v55 = vpop.f32.mrf.mxu0 }
 0x246   : > { %10519 = vst [vmem:[#allocation25_spill] sm:$0xff] %v10148_v15  ;;  %v10150_v21 = vadd.f32 %v7420_v58, %v4165_v36  ;;  %v4142_v58 = vadd.f32 %v10060_v39, %v9958_v11 }
 0x247   : > { %v10152_v31 = vpop.f32.mrf.mxu1  ;;  %v5651_v56 = vpop.f32.mrf.mxu0 }
 0x248   : > { %10520 = vst [vmem:[#allocation28_spill] sm:$0xff] %v10150_v21  ;;  %10521 = vst [vmem:[#allocation29_spill] sm:$0xff] %v10152_v31  ;;  %v4140_v31 = vadd.f32 %v10066_v20, %v9961_v24  ;;  %v4143_v24 = vadd.f32 %v10073_v53, %v9967_v40  ;;  %v4146_v20 = vadd.f32 %v10077_v27, %v9970_v9 }
 0x249   : > { %v10154_v35 = vpop.f32.mrf.mxu1  ;;  %v7493_v25 = vpop.f32.mrf.mxu0 }
 0x24a   : > { %10522 = vst [vmem:[#allocation30_spill] sm:$0xff] %v10154_v35  ;;  %v4527_v11 = vadd.f32 %v10035_v4, %v4140_v31  ;;  %v4530_v27 = vadd.f32 %v10043_v63, %v4143_v24  ;;  %v4150_v24 = vadd.f32 %v10092_v51, %v9982_v42 }
 0x24b   : > { %v7376_v47 = vpop.f32.mrf.mxu1  ;;  %v5654_v19 = vpop.f32.mrf.mxu0 }
 0x24c   : > { %v4169_v48 = vadd.f32 %v7376_v47, %v10040_v62 }
 0x24d   : > { %v10157_v61 = vpop.f32.mrf.mxu1  ;;  %v7496_v52 = vpop.f32.mrf.mxu0 }
 0x24e   : > { %10523 = vst [vmem:[#allocation32_spill] sm:$0xff] %v10157_v61  ;;  %v10159_v23 = vadd.f32 %v7424_v38, %v4169_v48  ;;  %v4529_v38 = vadd.f32 %v10030_v5, %v4142_v58 }
 0x24f   : > { %v10161_v6 = vpop.f32.mrf.mxu1  ;;  %v5667_v15 = vpop.f32.mrf.mxu0 }
 0x250   : > { %10524 = vst [vmem:[#allocation7_spill] sm:$0xff] %v10159_v23  ;;  %10525 = vst [vmem:[#allocation8_spill] sm:$0xff] %v10161_v6 }
 0x251   : > { %v10163_v36 = vpop.f32.mrf.mxu1  ;;  %v7497_v21 = vpop.f32.mrf.mxu0 }
 0x252   : > { %10526 = vst [vmem:[#allocation34_spill] sm:$0xff] %v10163_v36 }
 0x253   : > { %v7444_v35 = vpop.f32.mrf.mxu1  ;;  %v5670_v62 = vpop.f32.mrf.mxu0 }
 0x254   : > { %v5282_v61 = vadd.f32 %v7444_v35, %v10058_v32 }
 0x255   : > { %v5153_v47 = vpop.f32.mrf.mxu1  ;;  %v10172_v23 = vpop.f32.mrf.mxu0 }
 0x256   : > { %v5280_v48 = vadd.f32 %v5153_v47, %v10064_v17  ;;  %v5780_v32 = vadd.f32 %v7492_v55, %v5282_v61 }
 0x257   : > { %v7445_v36 = vpop.f32.mrf.mxu1  ;;  %v10175_v39 = vpop.f32.mrf.mxu0 }
 0x258   : > { %v5283_v6 = vadd.f32 %v7445_v36, %v4529_v38  ;;  %v5778_v17 = vadd.f32 %v5651_v56, %v5280_v48  ;;  %v4144_v36 = vadd.f32 %v10081_v34, %v9973_v12  ;;  %v4533_v12 = vadd.f32 %v10048_v0, %v4146_v20 }
 0x259   : > { %v5156_v35 = vpop.f32.mrf.mxu1  ;;  %v10181_v5 = vpop.f32.mrf.mxu0 }
 0x25a   : > { %v5781_v47 = vadd.f32 %v7493_v25, %v5283_v6  ;;  %v5281_v2 = vadd.f32 %v5156_v35, %v4527_v11  ;;  %v6008_v34 = vmul.f32 %v5778_v17, %v5778_v17  ;;  %v4531_v48 = vadd.f32 %v10053_v44, %v4144_v36 }
 0x25b   : > { %v7448_v40 = vpop.f32.mrf.mxu1  ;;  %v10192_v53 = vpop.f32.mrf.mxu0 }
 0x25c   : > { %v6772_v4 = vpack.c.bf16 %v5781_v47, %v5780_v32  ;;  %v5779_v9 = vadd.f32 %v5654_v19, %v5281_v2  ;;  %v5286_v6 = vadd.f32 %v7448_v40, %v10075_v1  ;;  %v4147_v2 = vadd.f32 %v10088_v22, %v9979_v59 }
 0x25d   : > { %v5169_v61 = vpop.f32.mrf.mxu1  ;;  %v6010_v1 = vmul.f32 %v5780_v32, %v5780_v32  ;;  %v6011_v20 = vmul.f32 %v5781_v47, %v5781_v47 }
 0x25e   : > { %6859 = vst [vmem:[%s10190_s11 + $0x8] sm:$0xff] %v6772_v4   ;;  %v6767_v25 = vpack.c.bf16 %v5779_v9, %v5778_v17  ;;  %v5970_v55 = vadd.f32 %v5779_v9, %v5778_v17  ;;  %v6009_v31 = vmul.f32 %v5779_v9, %v5779_v9  ;;  %v10198_v56 = vpop.f32.mrf.mxu0  ;;  %v5284_v19 = vadd.f32 %v5169_v61, %v4530_v27 }
 0x25f   : > { %v7449_v58 = vpop.f32.mrf.mxu1  ;;  %v5784_v35 = vadd.f32 %v7496_v52, %v5286_v6  ;;  %v4534_v27 = vadd.f32 %v10062_v37, %v4147_v2  ;;  %v4151_v2 = vadd.f32 %v10103_v7, %v9991_v14 }
 0x260   : > { %6768 = vst [vmem:[%s10190_s11] sm:$0xff] %v6767_v25   ;;  %v5971_v63 = vadd.f32 %v5970_v55, %v5780_v32  ;;  %v6040_v38 = vadd.f32 %v6009_v31, %v6008_v34  ;;  %v5287_v11 = vadd.f32 %v7449_v58, %v4533_v12  ;;  %v10204_v0 = vpop.f32.mrf.mxu0  ;;  %v5782_v17 = vadd.f32 %v5667_v15, %v5284_v19 }
 0x261   : > { %v5172_v40 = vpop.f32.mrf.mxu1  ;;  %v4148_v32 = vadd.f32 %v10096_v49, %v9985_v10  ;;  %v4537_v25 = vadd.f32 %v10068_v26, %v4150_v24 }
 0x262   : > { %v6041_v4 = vadd.f32 %v6040_v38, %v6010_v1  ;;  %v5972_v59 = vadd.f32 %v5971_v63, %v5781_v47  ;;  %v5785_v22 = vadd.f32 %v7497_v21, %v5287_v11  ;;  %v5285_v9 = vadd.f32 %v5172_v40, %v4531_v48  ;;  %v10208_v44 = vpop.f32.mrf.mxu0 }
 0x263   : > { %v7452_v36 = vpop.f32.mrf.mxu1  ;;  %v6012_v12 = vmul.f32 %v5782_v17, %v5782_v17  ;;  %v4535_v58 = vadd.f32 %v10071_v29, %v4148_v32 }
 0x264   : > { %v5973_v61 = vadd.f32 %v5972_v59, %v5782_v17  ;;  %v6042_v42 = vadd.f32 %v6041_v4, %v6011_v20  ;;  %v6782_v51 = vpack.c.bf16 %v5785_v22, %v5784_v35  ;;  %v10213_v52 = vpop.f32.mrf.mxu0  ;;  %v5783_v15 = vadd.f32 %v5670_v62, %v5285_v9 }
 0x265   : > { %v5185_v6 = vpop.f32.mrf.mxu1  ;;  %v5290_v21 = vadd.f32 %v7452_v36, %v10090_v3  ;;  %v4154_v62 = vadd.f32 %v10107_v8, %v9994_v13  ;;  %v6014_v3 = vmul.f32 %v5784_v35, %v5784_v35  ;;  %v6015_v13 = vmul.f32 %v5785_v22, %v5785_v22 }
 0x266   : > { %v6043_v34 = vadd.f32 %v6042_v42, %v6012_v12  ;;  %6861 = vst [vmem:[%s10190_s11 + $0x18] sm:$0xff] %v6782_v51   ;;  %v5288_v47 = vadd.f32 %v5185_v6, %v4534_v27  ;;  %v10218_v10 = vpop.f32.mrf.mxu0  ;;  %v6777_v49 = vpack.c.bf16 %v5783_v15, %v5782_v17  ;;  %v5974_v37 = vadd.f32 %v5973_v61, %v5783_v15 }
 0x267   : > { %v6013_v55 = vmul.f32 %v5783_v15, %v5783_v15  ;;  %v7453_v31 = vpop.f32.mrf.mxu1  ;;  %v5788_v11 = vadd.f32 %v10172_v23, %v5290_v21  ;;  %v4152_v17 = vadd.f32 %v10111_v18, %v9997_v45  ;;  %v4541_v32 = vadd.f32 %v10083_v57, %v4154_v62 }
 0x268   : > { %v5291_v19 = vadd.f32 %v7453_v31, %v4537_v25  ;;  %v10225_v48 = vpop.f32.mrf.mxu0  ;;  %6860 = vst [vmem:[%s10190_s11 + $0x10] sm:$0xff] %v6777_v49   ;;  %v5975_v26 = vadd.f32 %v5974_v37, %v5784_v35  ;;  %v5786_v63 = vadd.f32 %v10175_v39, %v5288_v47  ;;  %v4538_v39 = vadd.f32 %v10079_v43, %v4151_v2 }
 0x269   : > { %v6044_v1 = vadd.f32 %v6043_v34, %v6013_v55  ;;  %v5188_v38 = vpop.f32.mrf.mxu1  ;;  %v4155_v12 = vadd.f32 %v10118_v54, %v10003_v28  ;;  %v4158_v42 = vadd.f32 %v10122_v50, %v10006_v41  ;;  %v4539_v57 = vadd.f32 %v10086_v33, %v4152_v17 }
 0x26a   : > { %v5789_v24 = vadd.f32 %v10181_v5, %v5291_v19  ;;  %v5289_v14 = vadd.f32 %v5188_v38, %v4535_v58  ;;  %v10231_v7 = vpop.f32.mrf.mxu0  ;;  %v5976_v29 = vadd.f32 %v5975_v26, %v5785_v22  ;;  %v6016_v5 = vmul.f32 %v5786_v63, %v5786_v63  ;;  %v10528_v38 = vld [vmem:[#allocation24_spill] sm:$0xff] }
 0x26b   : > { %v6045_v8 = vadd.f32 %v6044_v1, %v6014_v3  ;;  %v7456_v20 = vpop.f32.mrf.mxu1  ;;  %v6018_v6 = vmul.f32 %v5788_v11, %v5788_v11  ;;  %v4156_v55 = vadd.f32 %v10126_v16, %v10009_v60  ;;  %v10527_v3 = vld [vmem:[#allocation35_spill] sm:$0xff] }
 0x26c   : > { %v6792_v35 = vpack.c.bf16 %v5789_v24, %v5788_v11  ;;  %v5787_v40 = vadd.f32 %v10192_v53, %v5289_v14  ;;  %v10237_v4 = vpop.f32.mrf.mxu0  ;;  %v5977_v23 = vadd.f32 %v5976_v29, %v5786_v63  ;;  %v5294_v27 = vadd.f32 %v7456_v20, %v10105_v46  ;;  %v10531_v29 = vld [vmem:[#allocation10_spill] sm:$0xff]  ;;  %v10532_v20 = vld [vmem:[#allocation15_spill] sm:$0xff] }
 0x26d   : > { %v6046_v59 = vadd.f32 %v6045_v8, %v6015_v13  ;;  %v5201_v9 = vpop.f32.mrf.mxu1  ;;  %v6019_v41 = vmul.f32 %v5789_v24, %v5789_v24  ;;  %v4545_v26 = vadd.f32 %v10527_v3, %v4158_v42  ;;  %v10530_v13 = vld [vmem:[#allocation12_spill] sm:$0xff]  ;;  %v4162_v17 = vadd.f32 %v10532_v20, %v10531_v29  ;;  %v10534_v42 = vld [vmem:[#allocation3_spill] sm:$0xff] }
 0x26e   : > { %6863 = vst [vmem:[%s10190_s11 + $0x28] sm:$0xff] %v6792_v35   ;;  %v6787_v22 = vpack.c.bf16 %v5787_v40, %v5786_v63  ;;  %v6017_v36 = vmul.f32 %v5787_v40, %v5787_v40  ;;  %v5292_v45 = vadd.f32 %v5201_v9, %v4538_v39  ;;  %v10242_v18 = vpop.f32.mrf.mxu0  ;;  %v5978_v61 = vadd.f32 %v5977_v23, %v5787_v40  ;;  %v10533_v40 = vld [vmem:[#allocation21_spill] sm:$0xff] }
 0x26f   : > { %v6047_v53 = vadd.f32 %v6046_v59, %v6016_v5  ;;  %v7457_v43 = vpop.f32.mrf.mxu1  ;;  %v5792_v25 = vadd.f32 %v10198_v56, %v5294_v27  ;;  %v4543_v39 = vadd.f32 %v10533_v40, %v4156_v55  ;;  %v10544_v40 = vld [vmem:[#allocation13_spill] sm:$0xff] }
 0x270   : > { %6862 = vst [vmem:[%s10190_s11 + $0x20] sm:$0xff] %v6787_v22   ;;  %v5295_v51 = vadd.f32 %v7457_v43, %v4541_v32  ;;  %v10250_v15 = vpop.f32.mrf.mxu0  ;;  %v5979_v46 = vadd.f32 %v5978_v61, %v5788_v11  ;;  %v5790_v21 = vadd.f32 %v10204_v0, %v5292_v45  ;;  %v4542_v0 = vadd.f32 %v10094_v30, %v4155_v12  ;;  %v10529_v30 = vld [vmem:[#allocation6_spill] sm:$0xff] }
 0x271   : > { %v6048_v34 = vadd.f32 %v6047_v53, %v6017_v36  ;;  %v5204_v47 = vpop.f32.mrf.mxu1  ;;  %v4159_v8 = vadd.f32 %v10530_v13, %v10529_v30  ;;  %v6022_v23 = vmul.f32 %v5792_v25, %v5792_v25 }
 0x272   : > { %v5793_v49 = vadd.f32 %v10208_v44, %v5295_v51  ;;  %v5293_v28 = vadd.f32 %v5204_v47, %v4539_v57  ;;  %v10255_v54 = vpop.f32.mrf.mxu0  ;;  %v5980_v37 = vadd.f32 %v5979_v46, %v5789_v24  ;;  %v6020_v44 = vmul.f32 %v5790_v21, %v5790_v21  ;;  %v10535_v51 = vld [vmem:[#allocation18_spill] sm:$0xff] }
 0x273   : > { %v6049_v50 = vadd.f32 %v6048_v34, %v6018_v6  ;;  %v7460_v33 = vpop.f32.mrf.mxu1  ;;  %v4160_v57 = vadd.f32 %v10535_v51, %v10534_v42 }
 0x274   : > { %v6802_v31 = vpack.c.bf16 %v5793_v49, %v5792_v25  ;;  %v5791_v2 = vadd.f32 %v10213_v52, %v5293_v28  ;;  %v10261_v62 = vpop.f32.mrf.mxu0  ;;  %v5981_v56 = vadd.f32 %v5980_v37, %v5790_v21  ;;  %v5298_v11 = vadd.f32 %v7460_v33, %v10528_v38 }
 0x275   : > { %v6050_v19 = vadd.f32 %v6049_v50, %v6019_v41  ;;  %v5217_v58 = vpop.f32.mrf.mxu1  ;;  %v6023_v45 = vmul.f32 %v5793_v49, %v5793_v49  ;;  %v10538_v50 = vld [vmem:[#allocation14_spill] sm:$0xff] }
 0x276   : > { %6865 = vst [vmem:[%s10190_s11 + $0x38] sm:$0xff] %v6802_v31   ;;  %v6797_v1 = vpack.c.bf16 %v5791_v2, %v5790_v21  ;;  %v6021_v63 = vmul.f32 %v5791_v2, %v5791_v2  ;;  %v5296_v60 = vadd.f32 %v5217_v58, %v4542_v0  ;;  %v5982_v24 = vadd.f32 %v5981_v56, %v5791_v2  ;;  %v10266_v14 = vpop.f32.mrf.mxu0  ;;  %v10540_v56 = vld [vmem:[#allocation25_spill] sm:$0xff] }
 0x277   : > { %v6051_v16 = vadd.f32 %v6050_v19, %v6020_v44  ;;  %v7461_v52 = vpop.f32.mrf.mxu1  ;;  %v5796_v22 = vadd.f32 %v10218_v10, %v5298_v11  ;;  %v10541_v19 = vld [vmem:[#allocation11_spill] sm:$0xff]  ;;  %v10542_v58 = vld [vmem:[#allocation29_spill] sm:$0xff] }
 0x278   : > { %6864 = vst [vmem:[%s10190_s11 + $0x30] sm:$0xff] %v6797_v1   ;;  %v5299_v35 = vadd.f32 %v7461_v52, %v4545_v26  ;;  %v5983_v5 = vadd.f32 %v5982_v24, %v5792_v25  ;;  %v5794_v9 = vadd.f32 %v10225_v48, %v5296_v60  ;;  %v10277_v12 = vpop.f32.mrf.mxu0  ;;  %v10536_v48 = vld [vmem:[#allocation36_spill] sm:$0xff]  ;;  %v10537_v25 = vld [vmem:[#allocation31_spill] sm:$0xff]  ;;  %v4166_v3 = vadd.f32 %v10542_v58, %v10541_v19 }
 0x279   : > { %v6052_v59 = vadd.f32 %v6051_v16, %v6021_v63  ;;  %v5220_v32 = vpop.f32.mrf.mxu1  ;;  %v4546_v34 = vadd.f32 %v10536_v48, %v4159_v8  ;;  %v4549_v28 = vadd.f32 %v10537_v25, %v4162_v17  ;;  %v10543_v1 = vld [vmem:[#allocation23_spill] sm:$0xff]  ;;  %v6026_v38 = vmul.f32 %v5796_v22, %v5796_v22  ;;  %v10550_v48 = vld [vmem:[#allocation32_spill] sm:$0xff]  ;;  %v10553_v25 = vld [vmem:[#allocation5_spill] sm:$0xff] }
 0x27a   : > { %v5797_v36 = vadd.f32 %v10231_v7, %v5299_v35  ;;  %v5297_v27 = vadd.f32 %v5220_v32, %v4543_v39  ;;  %v5984_v61 = vadd.f32 %v5983_v5, %v5793_v49  ;;  %v6024_v10 = vmul.f32 %v5794_v9, %v5794_v9  ;;  %v7517_v0 = vpop.f32.mrf.mxu0  ;;  %v10545_v39 = vld [vmem:[#allocation30_spill] sm:$0xff] }
 0x27b   : > { %v6053_v53 = vadd.f32 %v6052_v59, %v6022_v23  ;;  %v7464_v43 = vpop.f32.mrf.mxu1  ;;  %v4547_v63 = vadd.f32 %v10543_v1, %v4160_v57  ;;  %v4164_v23 = vadd.f32 %v10545_v39, %v10544_v40 }
 0x27c   : > { %v6812_v6 = vpack.c.bf16 %v5797_v36, %v5796_v22  ;;  %v5795_v46 = vadd.f32 %v10237_v4, %v5297_v27  ;;  %v5985_v21 = vadd.f32 %v5984_v61, %v5794_v9  ;;  %v5302_v37 = vadd.f32 %v7464_v43, %v10538_v50  ;;  %v10539_v4 = vld [vmem:[#allocation4_spill] sm:$0xff]  ;;  %v5750_v35 = vpop.f32.mrf.mxu0  ;;  %v10547_v27 = vld [vmem:[#allocation27_spill] sm:$0xff] }
 0x27d   : > { %v6054_v7 = vadd.f32 %v6053_v53, %v6023_v45  ;;  %v5233_v47 = vpop.f32.mrf.mxu1  ;;  %v4163_v44 = vadd.f32 %v10540_v56, %v10539_v4  ;;  %v6027_v8 = vmul.f32 %v5797_v36, %v5797_v36  ;;  %v4553_v45 = vadd.f32 %v10547_v27, %v4166_v3  ;;  %v10548_v61 = vld [vmem:[#allocation28_spill] sm:$0xff]  ;;  %v10554_v3 = vld [vmem:[#allocation19_spill] sm:$0xff] }
 0x27e   : > { %6867 = vst [vmem:[%s10190_s11 + $0x48] sm:$0xff] %v6812_v6   ;;  %v6807_v49 = vpack.c.bf16 %v5795_v46, %v5794_v9  ;;  %v6025_v41 = vmul.f32 %v5795_v46, %v5795_v46  ;;  %v5300_v33 = vadd.f32 %v5233_v47, %v4546_v34  ;;  %v5986_v31 = vadd.f32 %v5985_v21, %v5795_v46  ;;  %v10546_v9 = vld [vmem:[#allocation26_spill] sm:$0xff]  ;;  %v7520_v46 = vpop.f32.mrf.mxu0  ;;  %v10551_v21 = vld [vmem:[#allocation33_spill] sm:$0xff] }
 0x27f   : > { %v6055_v55 = vadd.f32 %v6054_v7, %v6024_v10  ;;  %v7465_v2 = vpop.f32.mrf.mxu1  ;;  %v5800_v52 = vadd.f32 %v10242_v18, %v5302_v37  ;;  %v10552_v10 = vld [vmem:[#allocation8_spill] sm:$0xff] }
 0x280   : > { %6866 = vst [vmem:[%s10190_s11 + $0x40] sm:$0xff] %v6807_v49   ;;  %v5303_v26 = vadd.f32 %v7465_v2, %v4549_v28  ;;  %v5987_v11 = vadd.f32 %v5986_v31, %v5796_v22  ;;  %v5798_v16 = vadd.f32 %v10250_v15, %v5300_v33  ;;  %v4550_v15 = vadd.f32 %v10546_v9, %v4163_v44  ;;  %v5763_v58 = vpop.f32.mrf.mxu0 }
 0x281   : > { %v6056_v60 = vadd.f32 %v6055_v55, %v6025_v41  ;;  %v5236_v24 = vpop.f32.mrf.mxu1  ;;  %v4170_v7 = vadd.f32 %v10552_v10, %v10551_v21  ;;  %v4551_v28 = vadd.f32 %v10553_v25, %v4164_v23  ;;  %v6030_v49 = vmul.f32 %v5800_v52, %v5800_v52 }
 0x282   : > { %v5801_v30 = vadd.f32 %v10255_v54, %v5303_v26  ;;  %v5301_v13 = vadd.f32 %v5236_v24, %v4547_v63  ;;  %v5988_v20 = vadd.f32 %v5987_v11, %v5797_v36  ;;  %v6028_v18 = vmul.f32 %v5798_v16, %v5798_v16  ;;  %v10555_v26 = vld [vmem:[#allocation34_spill] sm:$0xff]  ;;  %v10556_v11 = vld [vmem:[#allocation16_spill] sm:$0xff]  ;;  %v7521_v39 = vpop.f32.mrf.mxu0 }
 0x283   : > { %v6057_v29 = vadd.f32 %v6056_v60, %v6026_v38  ;;  %v7468_v17 = vpop.f32.mrf.mxu1  ;;  %v4168_v1 = vadd.f32 %v10555_v26, %v10554_v3 }
 0x284   : > { %v6822_v5 = vpack.c.bf16 %v5801_v30, %v5800_v52  ;;  %v5799_v59 = vadd.f32 %v10261_v62, %v5301_v13  ;;  %v5989_v32 = vadd.f32 %v5988_v20, %v5798_v16  ;;  %v5306_v43 = vadd.f32 %v7468_v17, %v10548_v61  ;;  %v10549_v62 = vld [vmem:[#allocation17_spill] sm:$0xff] }
 0x285   : > { %v6058_v22 = vadd.f32 %v6057_v29, %v6027_v8  ;;  %v5249_v54 = vpop.f32.mrf.mxu1  ;;  %v4167_v34 = vadd.f32 %v10550_v48, %v10549_v62  ;;  %v6031_v4 = vmul.f32 %v5801_v30, %v5801_v30 }
 0x286   : > { %6869 = vst [vmem:[%s10190_s11 + $0x58] sm:$0xff] %v6822_v5   ;;  %v6817_v53 = vpack.c.bf16 %v5799_v59, %v5798_v16  ;;  %v6029_v36 = vmul.f32 %v5799_v59, %v5799_v59  ;;  %v5304_v42 = vadd.f32 %v5249_v54, %v4550_v15  ;;  %v5990_v57 = vadd.f32 %v5989_v32, %v5799_v59  ;;  %v10559_v5 = vld [vmem:[#allocation22_spill] sm:$0xff] }
 0x287   : > { %v6059_v51 = vadd.f32 %v6058_v22, %v6028_v18  ;;  %v7469_v6 = vpop.f32.mrf.mxu1  ;;  %v5804_v55 = vadd.f32 %v10266_v14, %v5306_v43  ;;  %v4554_v60 = vadd.f32 %v10556_v11, %v4167_v34  ;;  %v4555_v59 = vadd.f32 %v10559_v5, %v4168_v1  ;;  %v5766_v43 = vpop.f32.mrf.mxu0 }
 0x288   : > { %6868 = vst [vmem:[%s10190_s11 + $0x50] sm:$0xff] %v6817_v53   ;;  %v5307_v47 = vadd.f32 %v7469_v6, %v4553_v45  ;;  %v5991_v41 = vadd.f32 %v5990_v57, %v5800_v52  ;;  %v5802_v37 = vadd.f32 %v10277_v12, %v5304_v42 }
 0x289   : > { %v6060_v50 = vadd.f32 %v6059_v51, %v6029_v36  ;;  %v5252_v33 = vpop.f32.mrf.mxu1  ;;  %v6034_v9 = vmul.f32 %v5804_v55, %v5804_v55 }
 0x28a   : > { %v5805_v31 = vadd.f32 %v7517_v0, %v5307_v47  ;;  %v5305_v2 = vadd.f32 %v5252_v33, %v4551_v28  ;;  %v5992_v44 = vadd.f32 %v5991_v41, %v5801_v30  ;;  %v6032_v16 = vmul.f32 %v5802_v37, %v5802_v37  ;;  %v10557_v0 = vld [vmem:[#allocation20_spill] sm:$0xff]  ;;  %v10558_v30 = vld [vmem:[#allocation7_spill] sm:$0xff] }
 0x28b   : > { %v6061_v56 = vadd.f32 %v6060_v50, %v6030_v49  ;;  %v7472_v19 = vpop.f32.mrf.mxu1  ;;  %v4557_v52 = vadd.f32 %v10557_v0, %v4170_v7 }
 0x28c   : > { %v6832_v63 = vpack.c.bf16 %v5805_v31, %v5804_v55  ;;  %v5803_v38 = vadd.f32 %v5750_v35, %v5305_v2  ;;  %v5993_v12 = vadd.f32 %v5992_v44, %v5802_v37  ;;  %v5310_v29 = vadd.f32 %v7472_v19, %v10558_v30 }
 0x28d   : > { %v6062_v24 = vadd.f32 %v6061_v56, %v6031_v4  ;;  %v5265_v14 = vpop.f32.mrf.mxu1  ;;  %v6035_v53 = vmul.f32 %v5805_v31, %v5805_v31 }
 0x28e   : > { %6871 = vst [vmem:[%s10190_s11 + $0x68] sm:$0xff] %v6832_v63   ;;  %v6827_v13 = vpack.c.bf16 %v5803_v38, %v5802_v37  ;;  %v6033_v8 = vmul.f32 %v5803_v38, %v5803_v38  ;;  %v5308_v20 = vadd.f32 %v5265_v14, %v4554_v60  ;;  %v5994_v40 = vadd.f32 %v5993_v12, %v5803_v38 }
 0x28f   : > { %v6063_v17 = vadd.f32 %v6062_v24, %v6032_v16  ;;  %v7473_v23 = vpop.f32.mrf.mxu1  ;;  %v5808_v54 = vadd.f32 %v7520_v46, %v5310_v29 }
 0x290   : > { %6870 = vst [vmem:[%s10190_s11 + $0x60] sm:$0xff] %v6827_v13   ;;  %v5311_v35 = vadd.f32 %v7473_v23, %v4557_v52  ;;  %v5995_v15 = vadd.f32 %v5994_v40, %v5804_v55  ;;  %v5806_v18 = vadd.f32 %v5763_v58, %v5308_v20 }
 0x291   : > { %v6064_v32 = vadd.f32 %v6063_v17, %v6033_v8  ;;  %v5268_v22 = vpop.f32.mrf.mxu1  ;;  %v6038_v46 = vmul.f32 %v5808_v54, %v5808_v54 }
 0x292   : > { %v5809_v27 = vadd.f32 %v7521_v39, %v5311_v35  ;;  %v5309_v45 = vadd.f32 %v5268_v22, %v4555_v59  ;;  %v5996_v61 = vadd.f32 %v5995_v15, %v5805_v31  ;;  %v6036_v6 = vmul.f32 %v5806_v18, %v5806_v18 }
 0x293   : > { %v6065_v36 = vadd.f32 %v6064_v32, %v6034_v9 }
 0x294   : > { %v6842_v42 = vpack.c.bf16 %v5809_v27, %v5808_v54  ;;  %v5807_v51 = vadd.f32 %v5766_v43, %v5309_v45  ;;  %v5997_v57 = vadd.f32 %v5996_v61, %v5806_v18  ;;  %v6039_v25 = vmul.f32 %v5809_v27, %v5809_v27 }
 0x295   : > { %v6066_v62 = vadd.f32 %v6065_v36, %v6035_v53 }
 0x296   : > { %6873 = vst [vmem:[%s10190_s11 + $0x78] sm:$0xff] %v6842_v42   ;;  %v6837_v48 = vpack.c.bf16 %v5807_v51, %v5806_v18  ;;  %v6037_v34 = vmul.f32 %v5807_v51, %v5807_v51  ;;  %v5998_v10 = vadd.f32 %v5997_v57, %v5807_v51 }
 0x297   : > { %v6067_v21 = vadd.f32 %v6066_v62, %v6036_v6 }
 0x298   : > { %6872 = vst [vmem:[%s10190_s11 + $0x70] sm:$0xff] %v6837_v48   ;;  %v5999_v7 = vadd.f32 %v5998_v10, %v5808_v54 }
 0x299   : > { %v6068_v47 = vadd.f32 %v6067_v21, %v6037_v34 }
 0x29a   : > { %v6000_v28 = vadd.f32 %v5999_v7, %v5809_v27 }
 0x29b   : > { %v6069_v49 = vadd.f32 %v6068_v47, %v6038_v46 }
 0x29c   : > { %v6001_v41 = vrot.slane %v6000_v28, 4 }
 0x29d   : > { %v6070_v50 = vadd.f32 %v6069_v49, %v6039_v25 }
 0x29e   : > { %v6002_v37 = vadd.f32 %v6001_v41, %v6000_v28 }
 0x29f   : > { %v6071_v33 = vrot.slane %v6070_v50, 4 }
 0x2a0   : > { %v6003_v55 = vrot.slane %v6002_v37, 2 }
 0x2a1   : > { %v6072_v31 = vadd.f32 %v6071_v33, %v6070_v50 }
 0x2a2   : > { %v6004_v2 = vadd.f32 %v6003_v55, %v6002_v37 }
 0x2a3   : > { %v6073_v4 = vrot.slane %v6072_v31, 2 }
 0x2a4   : > { %v6005_v56 = vrot.slane %v6004_v2, 1 }
 0x2a5   : > { %v6074_v44 = vadd.f32 %v6073_v4, %v6072_v31 }
 0x2a6   : > { %v6006_v19 = vadd.f32 %v6005_v56, %v6004_v2 }
 0x2a7   : > { %v6075_v58 = vrot.slane %v6074_v44, 1 }
 0x2a8   : > { %6007 = vst [vmem:[%s235_s14] sm:$0x1] %v6006_v19 }
 0x2a9   : > { %v6076_v3 = vadd.f32 %v6075_v58, %v6074_v44 }
 0x2ab   : > { %6077 = vst [vmem:[%s235_s14 + $0x1] sm:$0x1] %v6076_v3 }
 0x2ac PF: > { %s16_s18 = sadd.s32 1, %s7701_s18  }
 0x2ad   : > { %p13_p4 = scmp.ge.s32.totalorder %s16_s18, 4  }
 0x2af   :  { %15 = sbr.rel (!%p13_p4) target bundleno = 1 (0x1), region = 88 }

</bundles_post_ra>
